<compile_context>
chip_gen: v7x
topology: tpu7x:2x2x1
jax: 0.10.0
libtpu: 0.0.40
codegen_flags: <defaults>
</compile_context>

<pallas_src>
import numpy as np
import jax
import jax.numpy as jnp
from jax.experimental import pallas as pl
from jax.experimental.pallas import tpu as pltpu


# ----------------------------------------------------------------------------
# Kernel 1: conv3x3 (im2col matmul) fused with BN + ReLU + MaxPool + avg-pool
# ----------------------------------------------------------------------------
def conv_bn_relu_pool(A, Wk, N, OH, OW, *, eps=1e-5, tn=1024, tk=2048):
    """A: (M, K) im2col patches with M = N*OH*OW.  Wk: (K, Cout).
    Returns xs: (N, Cout) = avg-pooled MaxPool(ReLU(BN(conv(x)))) features."""
    M, K = A.shape
    _, Cout = Wk.shape
    assert M == N * OH * OW
    assert K % tk == 0 and Cout % tn == 0
    nk = K // tk
    PH = (OH + 2 - 3) // 2 + 1          # MaxPool2d(kernel=3, stride=2, padding=1)
    PW = (OW + 2 - 3) // 2 + 1
    inv_pool = 1.0 / float(PH * PW)

    def kernel(a_ref, w_ref, o_ref, acc_ref):
        k = pl.program_id(1)

        @pl.when(k == 0)
        def _():
            acc_ref[...] = jnp.zeros_like(acc_ref)

        # A is fully VMEM-resident; slice the k-th K-chunk in place.
        a_blk = a_ref[:, pl.ds(pl.multiple_of(k * tk, tk), tk)]
        acc_ref[...] += jnp.dot(a_blk, w_ref[...],
                                preferred_element_type=jnp.float32)

        @pl.when(k == nk - 1)
        def _():
            y = acc_ref[...]                                      # (M, tn)
            mu = jnp.mean(y, axis=0, keepdims=True)
            var = jnp.mean((y - mu) ** 2, axis=0, keepdims=True)  # biased var (training BN)
            yr = jnp.maximum((y - mu) * jax.lax.rsqrt(var + eps), 0.0)
            # MaxPool(3,2,1) windows (clipped, matches PyTorch -inf padding for max)
            # followed by the mean over pooled positions (adaptive_avg_pool (1,1)).
            for n in range(N):
                acc = None
                for pi in range(PH):
                    r0, r1 = max(0, 2 * pi - 1), min(OH, 2 * pi + 2)
                    for pj in range(PW):
                        c0, c1 = max(0, 2 * pj - 1), min(OW, 2 * pj + 2)
                        mx = None
                        for r in range(r0, r1):
                            base = n * OH * OW + r * OW
                            blk = yr[base + c0:base + c1, :]      # contiguous multi-row slab
                            m_r = jnp.max(blk, axis=0, keepdims=True)
                            mx = m_r if mx is None else jnp.maximum(mx, m_r)
                        acc = mx if acc is None else acc + mx
                o_ref[n:n + 1, :] = acc * inv_pool

    return pl.pallas_call(
        kernel,
        out_shape=jax.ShapeDtypeStruct((N, Cout), jnp.float32),
        grid_spec=pltpu.PrefetchScalarGridSpec(
            num_scalar_prefetch=0,
            grid=(Cout // tn, nk),
            in_specs=[pl.BlockSpec((M, K), lambda j, k: (0, 0)),    # A resident (2.25 MiB)
                      pl.BlockSpec((tk, tn), lambda j, k: (k, j))], # weight stream
            out_specs=pl.BlockSpec((N, tn), lambda j, k: (0, j)),
            scratch_shapes=[pltpu.VMEM((M, tn), jnp.float32)]),
        compiler_params=pltpu.CompilerParams(
            dimension_semantics=("parallel", "arbitrary"),
            # 48 MiB: safe on v7x (64 MiB physical VMEM/TC) with ample headroom;
            # on v5e/v6e one can grow tn to 2048 and the limit to ~96 MiB.
            vmem_limit_bytes=48 * 1024 * 1024),
    )(A, Wk)
    # TODO(synk): optional bf16 cast of Wk (+A) would halve the dominant 288 MiB
    # weight stream (~2x end-to-end) at a small precision cost vs the f32 reference.


# ----------------------------------------------------------------------------
# Kernel 2: fc_loc = Linear(4096,512) -> ReLU -> Linear(512,36), fused
# ----------------------------------------------------------------------------
def fc_loc(xs, w1, b1, w2, b2):
    N, D = xs.shape
    H1 = w1.shape[1]
    D2 = w2.shape[1]

    def kernel(x_ref, w1_ref, b1_ref, w2_ref, b2_ref, o_ref):
        h = jnp.dot(x_ref[...], w1_ref[...],
                    preferred_element_type=jnp.float32) + b1_ref[...]
        h = jnp.maximum(h, 0.0)
        o_ref[...] = jnp.dot(h, w2_ref[...],
                             preferred_element_type=jnp.float32) + b2_ref[...]

    return pl.pallas_call(
        kernel,
        out_shape=jax.ShapeDtypeStruct((N, D2), jnp.float32),
        grid=(1,),
        in_specs=[pl.BlockSpec((N, D), lambda i: (0, 0)),
                  pl.BlockSpec((D, H1), lambda i: (0, 0)),
                  pl.BlockSpec((1, H1), lambda i: (0, 0)),
                  pl.BlockSpec((H1, D2), lambda i: (0, 0)),
                  pl.BlockSpec((1, D2), lambda i: (0, 0))],
        out_specs=pl.BlockSpec((N, D2), lambda i: (0, 0)),
        compiler_params=pltpu.CompilerParams(vmem_limit_bytes=32 * 1024 * 1024),
    )(xs, w1, b1.reshape(1, H1), w2, b2.reshape(1, D2))


# ----------------------------------------------------------------------------
# Kernel 3: grid_sample for all 6 stripes as one matmul per image,
#           channels on lanes (lane-dense output stores)
# ----------------------------------------------------------------------------
def grid_sample_matmul(S_all, x_t):
    # S_all: (N, R, Q) with R = 6*H*W stacked stripe sampling matrices
    # x_t:   (N, Q, C) channels-last flattened input
    N, R, Q = S_all.shape
    _, _, C = x_t.shape

    def kernel(s_ref, x_ref, o_ref):
        o_ref[0] = jnp.dot(s_ref[0], x_ref[0],
                           preferred_element_type=jnp.float32)

    return pl.pallas_call(
        kernel,
        out_shape=jax.ShapeDtypeStruct((N, R, C), jnp.float32),
        grid_spec=pltpu.PrefetchScalarGridSpec(
            num_scalar_prefetch=0,
            grid=(N,),
            in_specs=[pl.BlockSpec((1, R, Q), lambda n: (n, 0, 0)),
                      pl.BlockSpec((1, Q, C), lambda n: (n, 0, 0))],
            out_specs=pl.BlockSpec((1, R, C), lambda n: (n, 0, 0))),
        compiler_params=pltpu.CompilerParams(
            dimension_semantics=("parallel",),
            vmem_limit_bytes=32 * 1024 * 1024),
    )(S_all, x_t)


# ----------------------------------------------------------------------------
# JAX glue: im2col, affine_grid, bilinear sampling-matrix construction
# ----------------------------------------------------------------------------
def im2col(x, KH=3, KW=3):
    N, C, H, W = x.shape
    OH, OW = H - KH + 1, W - KW + 1
    patches = jnp.stack(
        [x[:, :, kh:kh + OH, kw:kw + OW] for kh in range(KH) for kw in range(KW)],
        axis=2)                                   # (N, C, KH*KW, OH, OW)
    patches = patches.transpose(0, 3, 4, 1, 2)    # (N, OH, OW, C, KH*KW)
    return patches.reshape(N * OH * OW, C * KH * KW), OH, OW


def affine_grid(theta, H, W):
    # theta: (N, 2, 3); align_corners=False (PyTorch default)
    xs = (2.0 * jnp.arange(W, dtype=jnp.float32) + 1.0) / W - 1.0
    ys = (2.0 * jnp.arange(H, dtype=jnp.float32) + 1.0) / H - 1.0
    bx = jnp.broadcast_to(xs[None, :], (H, W))
    by = jnp.broadcast_to(ys[:, None], (H, W))
    base = jnp.stack([bx, by, jnp.ones((H, W), jnp.float32)], axis=-1)  # (H,W,3)
    return jnp.einsum('hwk,nrk->nhwr', base, theta)                     # (N,H,W,2)


def build_sampling_matrix(grid, H_in, W_in):
    # grid: (N, H, W, 2) -> S: (N, P, Q) bilinear, zeros padding, align_corners=False
    N = grid.shape[0]
    gx = grid[..., 0].reshape(N, -1)
    gy = grid[..., 1].reshape(N, -1)
    ix = ((gx + 1.0) * W_in - 1.0) / 2.0
    iy = ((gy + 1.0) * H_in - 1.0) / 2.0
    ix0 = jnp.floor(ix); iy0 = jnp.floor(iy)
    ix1 = ix0 + 1.0;     iy1 = iy0 + 1.0
    wx1 = ix - ix0; wx0 = 1.0 - wx1
    wy1 = iy - iy0; wy0 = 1.0 - wy1
    S = jnp.zeros((N, gx.shape[1], H_in * W_in), jnp.float32)
    for cx, wx in ((ix0, wx0), (ix1, wx1)):
        for cy, wy in ((iy0, wy0), (iy1, wy1)):
            valid = (cx >= 0) & (cx <= W_in - 1) & (cy >= 0) & (cy <= H_in - 1)
            w = jnp.where(valid, wx * wy, 0.0)
            q = (jnp.clip(cy, 0, H_in - 1) * W_in +
                 jnp.clip(cx, 0, W_in - 1)).astype(jnp.int32)
            S = S + w[..., None] * jax.nn.one_hot(q, H_in * W_in, dtype=jnp.float32)
    return S


# ----------------------------------------------------------------------------
# Full forward
# ----------------------------------------------------------------------------
def patch_generator_forward(x, params):
    N, C_in, H, W = x.shape
    # (1) conv3x3 + BN(train) + ReLU + MaxPool(3,2,1) + adaptive_avg_pool, fused
    A, OH, OW = im2col(x)
    Wk = params['conv_w'].reshape(params['conv_w'].shape[0], -1).T   # (C_in*9, C_out)
    xs = conv_bn_relu_pool(A, Wk, N, OH, OW)                         # (N, C_out)
    # (2) fc_loc -> theta
    theta = fc_loc(xs, params['w1'], params['b1'], params['w2'], params['b2'])
    theta = theta.reshape(N, 6, 2, 3)
    # (3) affine_grid + grid_sample for all 6 stripes, one matmul per image
    S_all = jnp.concatenate(
        [build_sampling_matrix(affine_grid(theta[:, i], H, W), H, W)
         for i in range(6)], axis=1)                                  # (N, 6*H*W, H*W)
    x_t = x.transpose(0, 2, 3, 1).reshape(N, H * W, C_in)             # channels on lanes
    out_all = grid_sample_matmul(S_all, x_t)                          # (N, 6*H*W, C_in)
    out_all = out_all.reshape(N, 6, H * W, C_in)
    return [out_all[:, i].transpose(0, 2, 1).reshape(N, C_in, H, W) for i in range(6)]


# ----------------------------------------------------------------------------
# Deterministic parameter init (shapes from the module's __init__)
# ----------------------------------------------------------------------------
def init_params(key, C_in=2048, C_out=4096, hid=512):
    k1, k2, k3, k4 = jax.random.split(key, 4)
    fan_out = C_out * 9
    fan_in = C_in * 9
    conv_w = jax.random.normal(k1, (C_out, C_in, 3, 3), jnp.float32) * np.sqrt(2.0 / fan_out)
    # conv_b exists in the module but is a no-op under training-mode BatchNorm
    # (BN subtracts the batch mean), so the kernel intentionally skips it.
    conv_b = jax.random.uniform(k2, (C_out,), jnp.float32,
                                -1.0 / np.sqrt(fan_in), 1.0 / np.sqrt(fan_in))
    lim = 1.0 / np.sqrt(C_out)
    w1 = jax.random.uniform(k3, (C_out, hid), jnp.float32, -lim, lim)
    b1 = jax.random.uniform(k4, (hid,), jnp.float32, -lim, lim)
    path_position = jnp.array(
        [1, 0, 0, 0, 1 / 6, -5 / 6, 1, 0, 0, 0, 1 / 6, -3 / 6,
         1, 0, 0, 0, 1 / 6, -1 / 6, 1, 0, 0, 0, 1 / 6, 1 / 6,
         1, 0, 0, 0, 1 / 6, 3 / 6, 1, 0, 0, 0, 1 / 6, 5 / 6], jnp.float32)
    w2 = jnp.zeros((hid, 36), jnp.float32)      # fc_loc[2].weight.zero_()
    b2 = path_position                          # fc_loc[2].bias = path_position
    return dict(conv_w=conv_w, conv_b=conv_b, w1=w1, b1=b1, w2=w2, b2=b2)


if __name__ == "__main__":
    key = jax.random.PRNGKey(0)
    kp, kx = jax.random.split(key)
    params = init_params(kp)
    # Channel counts (2048 -> 4096) are fixed by the module; spatial kept small.
    x = jax.random.normal(kx, (2, 2048, 6, 6), jnp.float32)

    outs = patch_generator_forward(x, params)
    outs = [jax.block_until_ready(o) for o in outs]

    assert len(outs) == 6
    for o in outs:
        assert o.shape == x.shape and o.dtype == jnp.float32
        assert bool(jnp.all(jnp.isfinite(o)))
    print("KERNEL_OK")
</pallas_src>

<mosaic_0001>
module attributes {stable_mosaic.version = 11 : i64} {
  func.func @kernel(%arg0: i32, %arg1: i32, %arg2: memref<32x18432xf32, #tpu.memory_space<vmem>>, %arg3: memref<2048x1024xf32, #tpu.memory_space<vmem>>, %arg4: memref<2x1024xf32, #tpu.memory_space<vmem>>, %arg5: memref<32x1024xf32, #tpu.memory_space<vmem>>) attributes {dimension_semantics = [#tpu.dimension_semantics<parallel>, #tpu.dimension_semantics<arbitrary>], iteration_bounds = array<i64: 4, 9>, scalar_prefetch = 0 : i64, scratch_operands = 1 : i64, tpu.core_type = #tpu.core_type<tc>, window_params = [{pipeline_mode = #tpu.pipeline_mode<synchronous>, transform_indices = @transform_0, window_bounds = array<i64: 32, 18432>}, {transform_indices = @transform_1, window_bounds = array<i64: 2048, 1024>}, {transform_indices = @transform_2, window_bounds = array<i64: 2, 1024>}]} {
    %c0_i32 = arith.constant 0 : i32
    %0 = arith.cmpi eq, %arg1, %c0_i32 : i32
    %1 = arith.extui %0 : i1 to i32
    %c0_i32_0 = arith.constant 0 : i32
    %2 = arith.cmpi ne, %1, %c0_i32_0 : i32
    scf.if %2 {
      %cst_8 = arith.constant 0.000000e+00 : f32
      %15 = vector.broadcast %cst_8 : f32 to vector<32x1024xf32>
      %c0_9 = arith.constant 0 : index
      %c0_10 = arith.constant 0 : index
      %16 = vector.load %arg5[%c0_9, %c0_10] : memref<32x1024xf32, #tpu.memory_space<vmem>>, vector<32x1024xf32>
      tpu.vector_store %arg5[%c0_9, %c0_10], %15 {strides = array<i32>} : memref<32x1024xf32, #tpu.memory_space<vmem>>, vector<32x1024xf32>,
    } else {
    }
    %c2048_i32 = arith.constant 2048 : i32
    %3 = arith.muli %arg1, %c2048_i32 : i32
    %4 = tpu.assume_multiple %3, 2048 : i32
    %c0 = arith.constant 0 : index
    %5 = arith.index_cast %4 : i32 to index
    %6 = vector.load %arg2[%c0, %5] : memref<32x18432xf32, #tpu.memory_space<vmem>>, vector<32x2048xf32>
    %c0_1 = arith.constant 0 : index
    %c0_2 = arith.constant 0 : index
    %7 = vector.load %arg5[%c0_1, %c0_2] : memref<32x1024xf32, #tpu.memory_space<vmem>>, vector<32x1024xf32>
    %c0_3 = arith.constant 0 : index
    %c0_4 = arith.constant 0 : index
    %8 = vector.load %arg3[%c0_3, %c0_4] : memref<2048x1024xf32, #tpu.memory_space<vmem>>, vector<2048x1024xf32>
    %cst = arith.constant dense<0.000000e+00> : vector<32x1024xf32>
    %9 = tpu.matmul %6, %8, %cst {dimension_numbers = #tpu.dot_dimension_numbers<[1], [0], [0], [1], [0, 0, 1, 1], [], []>} : vector<32x2048xf32>, vector<2048x1024xf32>, vector<32x1024xf32> -> vector<32x1024xf32>
    %10 = arith.addf %7, %9 : vector<32x1024xf32>
    %c0_5 = arith.constant 0 : index
    %c0_6 = arith.constant 0 : index
    %11 = vector.load %arg5[%c0_5, %c0_6] : memref<32x1024xf32, #tpu.memory_space<vmem>>, vector<32x1024xf32>
    tpu.vector_store %arg5[%c0_5, %c0_6], %10 {strides = array<i32>} : memref<32x1024xf32, #tpu.memory_space<vmem>>, vector<32x1024xf32>,
    %c8_i32 = arith.constant 8 : i32
    %12 = arith.cmpi eq, %arg1, %c8_i32 : i32
    %13 = arith.extui %12 : i1 to i32
    %c0_i32_7 = arith.constant 0 : i32
    %14 = arith.cmpi ne, %13, %c0_i32_7 : i32
    scf.if %14 {
      %c0_8 = arith.constant 0 : index
      %c0_9 = arith.constant 0 : index
      %15 = vector.load %arg5[%c0_8, %c0_9] : memref<32x1024xf32, #tpu.memory_space<vmem>>, vector<32x1024xf32>
      %cst_10 = arith.constant dense<0.000000e+00> : vector<1024xf32>
      %16 = vector.multi_reduction <add>, %15, %cst_10 [0] : vector<32x1024xf32> to vector<1024xf32>
      %17 = vector.shape_cast %16 : vector<1024xf32> to vector<1x1024xf32>
      %cst_11 = arith.constant 3.200000e+01 : f32
      %18 = vector.broadcast %cst_11 : f32 to vector<1x1024xf32>
      %19 = arith.divf %17, %18 : vector<1x1024xf32>
      %20 = vector.broadcast %19 : vector<1x1024xf32> to vector<32x1024xf32>
      %21 = arith.subf %15, %20 : vector<32x1024xf32>
      %22 = arith.mulf %21, %21 : vector<32x1024xf32>
      %cst_12 = arith.constant dense<0.000000e+00> : vector<1024xf32>
      %23 = vector.multi_reduction <add>, %22, %cst_12 [0] : vector<32x1024xf32> to vector<1024xf32>
      %24 = vector.shape_cast %23 : vector<1024xf32> to vector<1x1024xf32>
      %cst_13 = arith.constant 3.200000e+01 : f32
      %25 = vector.broadcast %cst_13 : f32 to vector<1x1024xf32>
      %26 = arith.divf %24, %25 : vector<1x1024xf32>
      %27 = vector.broadcast %19 : vector<1x1024xf32> to vector<32x1024xf32>
      %28 = arith.subf %15, %27 : vector<32x1024xf32>
      %cst_14 = arith.constant 9.99999974E-6 : f32
      %29 = vector.broadcast %cst_14 : f32 to vector<1x1024xf32>
      %30 = arith.addf %26, %29 : vector<1x1024xf32>
      %31 = math.rsqrt %30 : vector<1x1024xf32>
      %32 = vector.broadcast %31 : vector<1x1024xf32> to vector<32x1024xf32>
      %33 = arith.mulf %28, %32 : vector<32x1024xf32>
      %cst_15 = arith.constant 0.000000e+00 : f32
      %34 = vector.broadcast %cst_15 : f32 to vector<32x1024xf32>
      %35 = arith.maximumf %33, %34 : vector<32x1024xf32>
      %36 = vector.extract_strided_slice %35 {offsets = [0, 0], sizes = [2, 1024], strides = [1, 1]} : vector<32x1024xf32> to vector<2x1024xf32>
      %cst_16 = arith.constant dense<0xFF800000> : vector<1024xf32>
      %37 = vector.multi_reduction <maximumf>, %36, %cst_16 [0] : vector<2x1024xf32> to vector<1024xf32>
      %38 = vector.shape_cast %37 : vector<1024xf32> to vector<1x1024xf32>
      %39 = vector.extract_strided_slice %35 {offsets = [4, 0], sizes = [2, 1024], strides = [1, 1]} : vector<32x1024xf32> to vector<2x1024xf32>
      %cst_17 = arith.constant dense<0xFF800000> : vector<1024xf32>
      %40 = vector.multi_reduction <maximumf>, %39, %cst_17 [0] : vector<2x1024xf32> to vector<1024xf32>
      %41 = vector.shape_cast %40 : vector<1024xf32> to vector<1x1024xf32>
      %42 = arith.maximumf %38, %41 : vector<1x1024xf32>
      %43 = vector.extract_strided_slice %35 {offsets = [1, 0], sizes = [3, 1024], strides = [1, 1]} : vector<32x1024xf32> to vector<3x1024xf32>
      %cst_18 = arith.constant dense<0xFF800000> : vector<1024xf32>
      %44 = vector.multi_reduction <maximumf>, %43, %cst_18 [0] : vector<3x1024xf32> to vector<1024xf32>
      %45 = vector.shape_cast %44 : vector<1024xf32> to vector<1x1024xf32>
      %46 = vector.extract_strided_slice %35 {offsets = [5, 0], sizes = [3, 1024], strides = [1, 1]} : vector<32x1024xf32> to vector<3x1024xf32>
      %cst_19 = arith.constant dense<0xFF800000> : vector<1024xf32>
      %47 = vector.multi_reduction <maximumf>, %46, %cst_19 [0] : vector<3x1024xf32> to vector<1024xf32>
      %48 = vector.shape_cast %47 : vector<1024xf32> to vector<1x1024xf32>
      %49 = arith.maximumf %45, %48 : vector<1x1024xf32>
      %50 = arith.addf %42, %49 : vector<1x1024xf32>
      %51 = vector.extract_strided_slice %35 {offsets = [4, 0], sizes = [2, 1024], strides = [1, 1]} : vector<32x1024xf32> to vector<2x1024xf32>
      %cst_20 = arith.constant dense<0xFF800000> : vector<1024xf32>
      %52 = vector.multi_reduction <maximumf>, %51, %cst_20 [0] : vector<2x1024xf32> to vector<1024xf32>
      %53 = vector.shape_cast %52 : vector<1024xf32> to vector<1x1024xf32>
      %54 = vector.extract_strided_slice %35 {offsets = [8, 0], sizes = [2, 1024], strides = [1, 1]} : vector<32x1024xf32> to vector<2x1024xf32>
      %cst_21 = arith.constant dense<0xFF800000> : vector<1024xf32>
      %55 = vector.multi_reduction <maximumf>, %54, %cst_21 [0] : vector<2x1024xf32> to vector<1024xf32>
      %56 = vector.shape_cast %55 : vector<1024xf32> to vector<1x1024xf32>
      %57 = arith.maximumf %53, %56 : vector<1x1024xf32>
      %58 = vector.extract_strided_slice %35 {offsets = [12, 0], sizes = [2, 1024], strides = [1, 1]} : vector<32x1024xf32> to vector<2x1024xf32>
      %cst_22 = arith.constant dense<0xFF800000> : vector<1024xf32>
      %59 = vector.multi_reduction <maximumf>, %58, %cst_22 [0] : vector<2x1024xf32> to vector<1024xf32>
      %60 = vector.shape_cast %59 : vector<1024xf32> to vector<1x1024xf32>
      %61 = arith.maximumf %57, %60 : vector<1x1024xf32>
      %62 = arith.addf %50, %61 : vector<1x1024xf32>
      %63 = vector.extract_strided_slice %35 {offsets = [5, 0], sizes = [3, 1024], strides = [1, 1]} : vector<32x1024xf32> to vector<3x1024xf32>
      %cst_23 = arith.constant dense<0xFF800000> : vector<1024xf32>
      %64 = vector.multi_reduction <maximumf>, %63, %cst_23 [0] : vector<3x1024xf32> to vector<1024xf32>
      %65 = vector.shape_cast %64 : vector<1024xf32> to vector<1x1024xf32>
      %66 = vector.extract_strided_slice %35 {offsets = [9, 0], sizes = [3, 1024], strides = [1, 1]} : vector<32x1024xf32> to vector<3x1024xf32>
      %cst_24 = arith.constant dense<0xFF800000> : vector<1024xf32>
      %67 = vector.multi_reduction <maximumf>, %66, %cst_24 [0] : vector<3x1024xf32> to vector<1024xf32>
      %68 = vector.shape_cast %67 : vector<1024xf32> to vector<1x1024xf32>
      %69 = arith.maximumf %65, %68 : vector<1x1024xf32>
      %70 = vector.extract_strided_slice %35 {offsets = [13, 0], sizes = [3, 1024], strides = [1, 1]} : vector<32x1024xf32> to vector<3x1024xf32>
      %cst_25 = arith.constant dense<0xFF800000> : vector<1024xf32>
      %71 = vector.multi_reduction <maximumf>, %70, %cst_25 [0] : vector<3x1024xf32> to vector<1024xf32>
      %72 = vector.shape_cast %71 : vector<1024xf32> to vector<1x1024xf32>
      %73 = arith.maximumf %69, %72 : vector<1x1024xf32>
      %74 = arith.addf %62, %73 : vector<1x1024xf32>
      %cst_26 = arith.constant 2.500000e-01 : f32
      %75 = vector.broadcast %cst_26 : f32 to vector<1x1024xf32>
      %76 = arith.mulf %74, %75 : vector<1x1024xf32>
      %c0_27 = arith.constant 0 : index
      %c0_28 = arith.constant 0 : index
      %77 = vector.load %arg4[%c0_27, %c0_28] : memref<2x1024xf32, #tpu.memory_space<vmem>>, vector<1x1024xf32>
      tpu.vector_store %arg4[%c0_27, %c0_28], %76 {strides = array<i32>} : memref<2x1024xf32, #tpu.memory_space<vmem>>, vector<1x1024xf32>,
      %78 = vector.extract_strided_slice %35 {offsets = [16, 0], sizes = [2, 1024], strides = [1, 1]} : vector<32x1024xf32> to vector<2x1024xf32>
      %cst_29 = arith.constant dense<0xFF800000> : vector<1024xf32>
      %79 = vector.multi_reduction <maximumf>, %78, %cst_29 [0] : vector<2x1024xf32> to vector<1024xf32>
      %80 = vector.shape_cast %79 : vector<1024xf32> to vector<1x1024xf32>
      %81 = vector.extract_strided_slice %35 {offsets = [20, 0], sizes = [2, 1024], strides = [1, 1]} : vector<32x1024xf32> to vector<2x1024xf32>
      %cst_30 = arith.constant dense<0xFF800000> : vector<1024xf32>
      %82 = vector.multi_reduction <maximumf>, %81, %cst_30 [0] : vector<2x1024xf32> to vector<1024xf32>
      %83 = vector.shape_cast %82 : vector<1024xf32> to vector<1x1024xf32>
      %84 = arith.maximumf %80, %83 : vector<1x1024xf32>
      %85 = vector.extract_strided_slice %35 {offsets = [17, 0], sizes = [3, 1024], strides = [1, 1]} : vector<32x1024xf32> to vector<3x1024xf32>
      %cst_31 = arith.constant dense<0xFF800000> : vector<1024xf32>
      %86 = vector.multi_reduction <maximumf>, %85, %cst_31 [0] : vector<3x1024xf32> to vector<1024xf32>
      %87 = vector.shape_cast %86 : vector<1024xf32> to vector<1x1024xf32>
      %88 = vector.extract_strided_slice %35 {offsets = [21, 0], sizes = [3, 1024], strides = [1, 1]} : vector<32x1024xf32> to vector<3x1024xf32>
      %cst_32 = arith.constant dense<0xFF800000> : vector<1024xf32>
      %89 = vector.multi_reduction <maximumf>, %88, %cst_32 [0] : vector<3x1024xf32> to vector<1024xf32>
      %90 = vector.shape_cast %89 : vector<1024xf32> to vector<1x1024xf32>
      %91 = arith.maximumf %87, %90 : vector<1x1024xf32>
      %92 = arith.addf %84, %91 : vector<1x1024xf32>
      %93 = vector.extract_strided_slice %35 {offsets = [20, 0], sizes = [2, 1024], strides = [1, 1]} : vector<32x1024xf32> to vector<2x1024xf32>
      %cst_33 = arith.constant dense<0xFF800000> : vector<1024xf32>
      %94 = vector.multi_reduction <maximumf>, %93, %cst_33 [0] : vector<2x1024xf32> to vector<1024xf32>
      %95 = vector.shape_cast %94 : vector<1024xf32> to vector<1x1024xf32>
      %96 = vector.extract_strided_slice %35 {offsets = [24, 0], sizes = [2, 1024], strides = [1, 1]} : vector<32x1024xf32> to vector<2x1024xf32>
      %cst_34 = arith.constant dense<0xFF800000> : vector<1024xf32>
      %97 = vector.multi_reduction <maximumf>, %96, %cst_34 [0] : vector<2x1024xf32> to vector<1024xf32>
      %98 = vector.shape_cast %97 : vector<1024xf32> to vector<1x1024xf32>
      %99 = arith.maximumf %95, %98 : vector<1x1024xf32>
      %100 = vector.extract_strided_slice %35 {offsets = [28, 0], sizes = [2, 1024], strides = [1, 1]} : vector<32x1024xf32> to vector<2x1024xf32>
      %cst_35 = arith.constant dense<0xFF800000> : vector<1024xf32>
      %101 = vector.multi_reduction <maximumf>, %100, %cst_35 [0] : vector<2x1024xf32> to vector<1024xf32>
      %102 = vector.shape_cast %101 : vector<1024xf32> to vector<1x1024xf32>
      %103 = arith.maximumf %99, %102 : vector<1x1024xf32>
      %104 = arith.addf %92, %103 : vector<1x1024xf32>
      %105 = vector.extract_strided_slice %35 {offsets = [21, 0], sizes = [3, 1024], strides = [1, 1]} : vector<32x1024xf32> to vector<3x1024xf32>
      %cst_36 = arith.constant dense<0xFF800000> : vector<1024xf32>
      %106 = vector.multi_reduction <maximumf>, %105, %cst_36 [0] : vector<3x1024xf32> to vector<1024xf32>
      %107 = vector.shape_cast %106 : vector<1024xf32> to vector<1x1024xf32>
      %108 = vector.extract_strided_slice %35 {offsets = [25, 0], sizes = [3, 1024], strides = [1, 1]} : vector<32x1024xf32> to vector<3x1024xf32>
      %cst_37 = arith.constant dense<0xFF800000> : vector<1024xf32>
      %109 = vector.multi_reduction <maximumf>, %108, %cst_37 [0] : vector<3x1024xf32> to vector<1024xf32>
      %110 = vector.shape_cast %109 : vector<1024xf32> to vector<1x1024xf32>
      %111 = arith.maximumf %107, %110 : vector<1x1024xf32>
      %112 = vector.extract_strided_slice %35 {offsets = [29, 0], sizes = [3, 1024], strides = [1, 1]} : vector<32x1024xf32> to vector<3x1024xf32>
      %cst_38 = arith.constant dense<0xFF800000> : vector<1024xf32>
      %113 = vector.multi_reduction <maximumf>, %112, %cst_38 [0] : vector<3x1024xf32> to vector<1024xf32>
      %114 = vector.shape_cast %113 : vector<1024xf32> to vector<1x1024xf32>
      %115 = arith.maximumf %111, %114 : vector<1x1024xf32>
      %116 = arith.addf %104, %115 : vector<1x1024xf32>
      %cst_39 = arith.constant 2.500000e-01 : f32
      %117 = vector.broadcast %cst_39 : f32 to vector<1x1024xf32>
      %118 = arith.mulf %116, %117 : vector<1x1024xf32>
      %c1 = arith.constant 1 : index
      %c0_40 = arith.constant 0 : index
      %119 = vector.load %arg4[%c1, %c0_40] : memref<2x1024xf32, #tpu.memory_space<vmem>>, vector<1x1024xf32>
      tpu.vector_store %arg4[%c1, %c0_40], %118 {strides = array<i32>} : memref<2x1024xf32, #tpu.memory_space<vmem>>, vector<1x1024xf32>,
    } else {
    }
    return
  }
  func.func @transform_0(%arg0: i32, %arg1: i32) -> (i32, i32) {
    %c0_i32 = arith.constant 0 : i32
    %c0_i32_0 = arith.constant 0 : i32
    %c0_i32_1 = arith.constant 0 : i32
    return %c0_i32, %c0_i32_0 : i32, i32
  }
  func.func @transform_1(%arg0: i32, %arg1: i32) -> (i32, i32) {
    %c0_i32 = arith.constant 0 : i32
    return %arg1, %arg0 : i32, i32
  }
  func.func @transform_2(%arg0: i32, %arg1: i32) -> (i32, i32) {
    %c0_i32 = arith.constant 0 : i32
    %c0_i32_0 = arith.constant 0 : i32
    return %c0_i32, %arg0 : i32, i32
  }
}

</mosaic_0001>

<bundles_post_ra>
// kernel: tpu_custom_call.1
= control target key start
LH: loop header
LB: loop body
LE: loop exit
PB: predicated region body
PF: predicated region fallthrough
CT: control target
= control target key end

     0   :  { %s13259_s0 = inlined_call_operand.hbm [shape: f32[32,18432], index: 0, kind: input, shape index: {}]   ;;  %s13260_s1 = inlined_call_operand.hbm [shape: f32[18432,4096], index: 1, kind: input, shape index: {}]   ;;  %s13261_s2 = inlined_call_operand.hbm [shape: f32[2,4096], index: 2, kind: output, shape index: {}]  }
   0x1   :  { %13343 = sst [smem:[#allocation44_spill]] %s13259_s0 }
   0x2   :  { %7 = vsyncpa [#allocation4], 0 }
   0x3   :  { %8 = vsyncpa [#allocation7], 0 }
   0x4   :  { %10 = vsyncpa [#allocation7 + $0x1], 0 }
   0x5   :  { %11 = vsyncpa [#allocation5], 0 }
   0x6   :  { %13 = vsyncpa [#allocation5 + $0x1], 0  ;;  %s9636_s9 = smov 0   ;;  %s9638_s10 = smov 0  }
   0x7   :  { %s9640_s11 = smov 0   ;;  %s9642_s12 = smov 0  }
   0x8   :  { %s9644_s13 = smov 0   ;;  %s9646_s14 = smov 0  }
   0x9   :  { %s9648_s15 = smov 0   ;;  %s9650_s16 = smov 0  }
   0xa   :  { %s9652_s17 = smov 0   ;;  %s9654_s18 = smov 0  }
   0xb   :  { %s9656_s19 = smov 0  }
   0xc LB: > { %13344 = sst [smem:[#allocation12_spill]] %s9569_s9  ;;  %s6927_s20 = sadd.s32 4294967295, %s9609_s19   ;;  %s9609_s19 = sphi %s9656_s19, %s19_s19   ;;  %s9605_s18 = sphi %s9654_s18, %s13521_s18   ;;  %s9601_s17 = sphi %s9652_s17, %s13520_s17   ;;  %s9597_s16 = sphi %s9650_s16, %s13519_s16   ;;  %s9593_s15 = sphi %s9648_s15, %s13518_s15   ;;  %s9589_s14 = sphi %s9646_s14, %s13517_s14   ;;  %s9585_s13 = sphi %s9644_s13, %s13516_s13   ;;  %s9581_s12 = sphi %s9642_s12, %s13515_s12   ;;  %s9577_s11 = sphi %s9640_s11, %s13514_s11   ;;  %s9573_s10 = sphi %s9638_s10, %s13513_s10   ;;  %s9569_s9 = sphi %s9636_s9, %s13512_s9  }
   0xd   : > { %s6928_s21 = sadd.s32 4294967294, %s9609_s19   ;;  %p68_p0 = scmp.ne.s32.totalorder %s9589_s14, %s9585_s13 }
   0xe   : > { %p69_p1 = scmp.eq.s32.totalorder %s9609_s19, 0  ;;  %p74_p2 = scmp.ne.s32.totalorder %s9585_s13, %s9581_s12 }
   0xf   : > { %p9696_p3 = scmp.eq.s32.totalorder %s6927_s20, 0  ;;  %p97_p5 = scmp.ne.s32.totalorder %s9577_s11, %s9573_s10 }
  0x10   : > { %p9701_p4 = por %p69_p1, %p68_p0  ;;  %p98_p7 = scmp.eq.s32.totalorder %s6927_s20, 35 }
  0x11   : > { %s13345_s23 = scalar_select %p9696_p3, 1, 0 }
  0x12   : > { %p9709_p6 = por %p9696_p3, %p74_p2  ;;  %p103_p8 = scmp.ne.s32.totalorder %s9573_s10, %s9569_s9 }
  0x13   : > { %p104_p9 = scmp.eq.s32.totalorder %s6928_s21, 35  ;;  %p9715_p10 = por %p98_p7, %p97_p5 }
  0x14   : > { %s13347_s26 = scalar_select %p9709_p6, 1, 0 }
  0x15   : > { %s13348_s27 = scalar_select %p9715_p10, 1, 0 }
  0x16   : > { %p6929_p11 = scmp.ge.s32.totalorder %s9609_s19, 1  ;;  %p9720_p12 = por %p104_p9, %p103_p8 }
  0x17   : > { %p111_p13 = scmp.lt.s32.totalorder %s9609_s19, 37  ;;  %s9611_s30 = smov [#allocation3]  }
  0x18   : > { %s13349_s28 = scalar_select %p9720_p12, 1, 0 }
  0x19   : > { %p9725_p0 = pnand %p6929_p11, %p111_p13  ;;  %s123_s3 = sshll.u32 %s9611_s30, 4  ;;  %s124_s3 = int_to_ptr.vmem [resolvable:$true] %s123_s3 }
  0x1a   : > { %13350 = sst [smem:[#allocation13_spill]] %s13349_s28  ;;  %p9246_p2 = scmp.lt.s32.totalorder %s9609_s19, 36 }
  0x1b   : > { %s13351_s29 = scalar_select %p9725_p0, 1, 0 }
  0x1c   : > { %p9233_p1 = pneg %p9725_p0  ;;  %p9740_p7 = pnand %p9246_p2, %p9701_p4 }
  0x1d   : > { %s13354_s0 = sld [smem:[#allocation44_spill]] }
  0x1e   : > { %p9734_p5 = pnand %p9233_p1, %p9696_p3 }
  0x1f   : > { %s13353_s5 = scalar_select %p9740_p7, 1, 0 }
  0x20   : > { %p9427_p9 = pneg %p9734_p5 }
  0x23   : > { %s9425_s8 = scalar_lea.hbm %s13354_s0, 73728 }
  0x24   : > { %p9426_p8 = scmp.ne.s32.totalorder %s13354_s0, %s9425_s8  ;;  %p9432_p1 = scmp.lt.u32.totalorder %s9425_s8, %s13354_s0 }
  0x26   : > { %p9428_p11 = pnand %p9427_p9, %p9426_p8 }
  0x28   : > { %p9429_p13 = pneg %p9428_p11 }
  0x2a   : > { %p9434_p4 = pnand %p9432_p1, %p9429_p13 }
  0x2c   : > { %9437 = shalt.err (!%p9434_p4)
}
  0x2d   : > { %s9438_s25 = scalar_lea.vmem %s124_s3, 73728  ;;  %p9446_p6 = scmp.lt.s32.totalorder %s124_s3, %s124_s3 }
  0x2e   : > { %p9439_p2 = scmp.ne.s32.totalorder %s124_s3, %s9438_s25  ;;  %p9447_p3 = scmp.lt.s32.totalorder %s9438_s25, %s9438_s25 }
  0x30   : > { %p9441_p12 = pnand %p9439_p2, %p9427_p9  ;;  %p9448_p0 = por %p9447_p3, %p9446_p6 }
  0x32   : > { %p9442_p10 = pneg %p9441_p12 }
  0x34   : > { %p9449_p7 = pnand %p9448_p0, %p9442_p10 }
  0x36   : > { %9452 = shalt.err (!%p9449_p7)
}
  0x37   : > { %s9612_s6 = smov 18432   ;;  %s9613_s7 = smov 1152  }
  0x38   : > { %9236 = dma.hbm_to_vmem [thread:$0]  (!%p9734_p5), %s13354_s0, 73728, %s124_s3, [#allocation4], %s9612_s6, %s9612_s6, %s9613_s7  }
  0x39   : > { %s28_s20 = sadd.s32 1, %s9601_s17  ;;  %s31_s21 = sadd.s32 1, %s9605_s18 }
  0x3a   : > { %p29_p3 = scmp.ge.s32.totalorder %s28_s20, 9  ;;  %s137_s30 = sand.u32 1, %s9589_s14  }
  0x3b   : > { %s6932_s25 = sshll.u32 %s137_s30, 14  ;;  %s6934_s4 = sshll.u32 %s9605_s18, 3 }
  0x3c   : > { %s13523_s20 = smov (%p29_p3, %s28_s20), 0  ;;  %s13525_s21 = smov (!%p29_p3, %s31_s21), %s9605_s18 }
  0x3d   : > { %13355 = sst [smem:[#allocation14_spill]] %s13523_s20  ;;  %s56_s22 = ssub.s32 %s9601_s17, %s13523_s20 }
  0x3e   : > { %p33_p6 = scmp.ge.s32.totalorder %s13525_s21, 4  ;;  %s6951_s24 = sshll.u32 %s9601_s17, 13 }
  0x3f   : > { %s141_s8 = scalar_lea.vmem [#allocation6], %s6932_s25  ;;  %s148_s6 = sadd.s32 %s6951_s24, %s6934_s4 }
  0x40   : > { %s151_s3 = sshll.u32 %s141_s8, 4  ;;  %s13527_s21 = smov (%p33_p6, %s13525_s21), 0  ;;  %s9772_s3 = int_to_ptr.vmem [resolvable:$true] %s151_s3 }
  0x41   : > { %13356 = sst [smem:[#allocation15_spill]] %s13527_s21  ;;  %s57_s7 = ssub.s32 %s9605_s18, %s13527_s21 }
  0x42   : > { %s6936_s12 = sshll.u32 %s148_s6, 7  ;;  %s58_s0 = sor.u32 %s57_s7, %s56_s22 }
  0x43   : > { %p85_p10 = scmp.eq.s32.totalorder %s57_s7, 0  ;;  %p59_p12 = scmp.eq.s32.totalorder %s58_s0, 0 }
  0x44   : > { %s9779_s9 = scalar_lea.hbm %s13260_s1, %s6936_s12  ;;  %s13357_s25 = sadd.s32 1, %s9577_s11 }
  0x45   : > { %s9784_s8 = scalar_select %p85_p10, %s9577_s11, %s13357_s25  }
  0x46   : > { %s13358_s24 = sadd.s32 1, %s9589_s14  ;;  %s9791_s21 = scalar_lea.sflag [#allocation7], %s137_s30 }
  0x47   : > { %s9789_s4 = scalar_select %p59_p12, %s9589_s14, %s13358_s24  }
  0x48   : > { %s9453_s22 = scalar_lea.hbm %s9779_s9, 262144  ;;  %p13359_p5 = scmp.ne.s32.totalorder %s13353_s5, 0 }
  0x49   : > { %p9454_p0 = scmp.ne.s32.totalorder %s9779_s9, %s9453_s22  ;;  %s9458_s20 = scalar_lea.hbm %s13260_s1, 9437184 }
  0x4a   : > { %p9455_p7 = pneg %p13359_p5  ;;  %p9459_p11 = scmp.lt.u32.totalorder %s9779_s9, %s13260_s1 }
  0x4b   : > { %p9460_p13 = scmp.lt.u32.totalorder %s9458_s20, %s9453_s22  ;;  %p9462_p4 = scmp.lt.u32.totalorder %s9453_s22, %s9779_s9 }
  0x4c   : > { %p9456_p8 = pnand %p9455_p7, %p9454_p0 }
  0x4d   : > { %p9461_p1 = por %p9460_p13, %p9459_p11 }
  0x4e   : > { %p9457_p9 = pneg %p9456_p8 }
  0x4f   : > { %p9463_p2 = por %p9462_p4, %p9461_p1 }
  0x51   : > { %p9464_p3 = pnand %p9463_p2, %p9457_p9 }
  0x53   : > { %9467 = shalt.err (!%p9464_p3)
}
  0x54   : > { %s9468_s30 = scalar_lea.vmem %s9772_s3, 262144  ;;  %s9614_s12 = smov [#allocation6]  }
  0x55   : > { %p9469_p6 = scmp.ne.s32.totalorder %s9772_s3, %s9468_s30  ;;  %s9473_s25 = sshll.u32 %s9614_s12, 4  ;;  %s9474_s25 = int_to_ptr.vmem [resolvable:$false] %s9473_s25 }
  0x56   : > { %s9475_s24 = scalar_lea.vmem %s9474_s25, 524288  ;;  %p9476_p0 = scmp.lt.s32.totalorder %s9772_s3, %s9474_s25 }
  0x57   : > { %p9471_p10 = pnand %p9469_p6, %p9455_p7  ;;  %p9477_p8 = scmp.lt.s32.totalorder %s9475_s24, %s9468_s30 }
  0x59   : > { %p9472_p12 = pneg %p9471_p10  ;;  %p9478_p11 = por %p9477_p8, %p9476_p0 }
  0x5b   : > { %p9479_p13 = pnand %p9478_p11, %p9472_p12 }
  0x5d   : > { %9482 = shalt.err (!%p9479_p13)
}
  0x5e   : > { %s9615_s22 = smov 4096   ;;  %s9616_s0 = smov 1024  }
  0x5f   : > { %s9617_s28 = smov 64   ;;  %p13360_p7 = scmp.ne.s32.totalorder %s13351_s29, 0 }
  0x60   : > { %9240 = dma.hbm_to_vmem [thread:$0]  (!%p13359_p5), %s9779_s9, 262144, %s9772_s3, %s9791_s21, %s9615_s22, %s9616_s0, %s9617_s28  }
  0x61   : > { %163 = sbr.rel (%p13360_p7) target bundleno = 1789 (0x6fd), region = 28  ;;  %p13361_p9 = scmp.ne.s32.totalorder (!%p13360_p7), %s13345_s23, 0 }
  0x68   : > { %9556 = dma.done.wait (%p13361_p9), [#allocation4], 73728  }
  0x69   : > { %9558 = vsyncadd (%p13361_p9), [#allocation4], 4294893568  ;;  %s169_s20 = sand.u32 1, %s9585_s13   ;;  %p13362_p1 = scmp.ne.s32.totalorder %s13347_s26, 0 }
  0x6a   : > { %s6939_s6 = sshll.u32 %s169_s20, 14  ;;  %s170_s7 = scalar_lea.sflag [#allocation7], %s169_s20 }
  0x6b   : > { %s9826_s30 = scalar_lea.vmem [#allocation6], %s6939_s6 }
  0x6c   : > { %9560 = dma.done.wait (%p13362_p1), %s170_s7, 262144  }
  0x6d   : > { %9562 = vsyncadd (%p13362_p1), %s170_s7, 4294705152  ;;  %s191_s9 = sand.u32 1, %s9573_s10   ;;  %p6941_p5 = scmp.ne.s32.totalorder %s9593_s15, 0 }
  0x6e   : > { %s6940_s29 = sshll.u32 %s191_s9, 4  ;;  %v9618_v0 = vmov (!%p6941_p5), 0.0  }
  0x6f   : > { %s9835_s5 = scalar_lea.vmem [#allocation8], %s6940_s29  ;;  %200 = sbr.rel (%p6941_p5) target bundleno = 127 (0x7f), region = 40  ;;  %201 = vst [vmem:[#allocation2] sm:$0xff] (!%p6941_p5), %v9618_v0  ;;  %202 = vst [vmem:[#allocation2 + $0x8] sm:$0xff] (!%p6941_p5), %v9618_v0 }
  0x70   : > { %203 = vst [vmem:[#allocation2 + $0x10] sm:$0xff] (!%p6941_p5), %v9618_v0  ;;  %204 = vst [vmem:[#allocation2 + $0x18] sm:$0xff] (!%p6941_p5), %v9618_v0 }
  0x71   : > { %205 = vst [vmem:[#allocation2 + $0x20] sm:$0xff] (!%p6941_p5), %v9618_v0  ;;  %206 = vst [vmem:[#allocation2 + $0x28] sm:$0xff] (!%p6941_p5), %v9618_v0 }
  0x72   : > { %207 = vst [vmem:[#allocation2 + $0x30] sm:$0xff] (!%p6941_p5), %v9618_v0  ;;  %208 = vst [vmem:[#allocation2 + $0x38] sm:$0xff] (!%p6941_p5), %v9618_v0 }
  0x73   : > { %209 = vst [vmem:[#allocation2 + $0x40] sm:$0xff] (!%p6941_p5), %v9618_v0  ;;  %210 = vst [vmem:[#allocation2 + $0x48] sm:$0xff] (!%p6941_p5), %v9618_v0 }
  0x74   : > { %211 = vst [vmem:[#allocation2 + $0x50] sm:$0xff] (!%p6941_p5), %v9618_v0  ;;  %212 = vst [vmem:[#allocation2 + $0x58] sm:$0xff] (!%p6941_p5), %v9618_v0 }
  0x75   : > { %213 = vst [vmem:[#allocation2 + $0x60] sm:$0xff] (!%p6941_p5), %v9618_v0  ;;  %214 = vst [vmem:[#allocation2 + $0x68] sm:$0xff] (!%p6941_p5), %v9618_v0 }
  0x76   : > { %215 = vst [vmem:[#allocation2 + $0x70] sm:$0xff] %v9618_v0  ;;  %216 = vst [vmem:[#allocation2 + $0x78] sm:$0xff] %v9618_v0 }
  0x77   : > { %217 = vst [vmem:[#allocation2 + $0x80] sm:$0xff] %v9618_v0  ;;  %218 = vst [vmem:[#allocation2 + $0x88] sm:$0xff] %v9618_v0 }
  0x78   : > { %219 = vst [vmem:[#allocation2 + $0x90] sm:$0xff] %v9618_v0  ;;  %220 = vst [vmem:[#allocation2 + $0x98] sm:$0xff] %v9618_v0 }
  0x79   : > { %221 = vst [vmem:[#allocation2 + $0xa0] sm:$0xff] %v9618_v0  ;;  %222 = vst [vmem:[#allocation2 + $0xa8] sm:$0xff] %v9618_v0 }
  0x7a   : > { %223 = vst [vmem:[#allocation2 + $0xb0] sm:$0xff] %v9618_v0  ;;  %224 = vst [vmem:[#allocation2 + $0xb8] sm:$0xff] %v9618_v0 }
  0x7b   : > { %225 = vst [vmem:[#allocation2 + $0xc0] sm:$0xff] %v9618_v0  ;;  %226 = vst [vmem:[#allocation2 + $0xc8] sm:$0xff] %v9618_v0 }
  0x7c   : > { %227 = vst [vmem:[#allocation2 + $0xd0] sm:$0xff] %v9618_v0  ;;  %228 = vst [vmem:[#allocation2 + $0xd8] sm:$0xff] %v9618_v0 }
  0x7d   : > { %229 = vst [vmem:[#allocation2 + $0xe0] sm:$0xff] %v9618_v0  ;;  %230 = vst [vmem:[#allocation2 + $0xe8] sm:$0xff] %v9618_v0 }
  0x7e   : > { %231 = vst [vmem:[#allocation2 + $0xf0] sm:$0xff] %v9618_v0  ;;  %232 = vst [vmem:[#allocation2 + $0xf8] sm:$0xff] %v9618_v0 }
  0x7f PF: > { %v335_v1 = vld [vmem:[%s9826_s30 + $0x8] sm:$0xff]  ;;  %v337_v3 = vld [vmem:[%s9826_s30 + $0x18] sm:$0xff]  ;;  %v334_v6 = vld [vmem:[%s9826_s30] sm:$0xff]  ;;  %s6942_s23 = sshll.u32 %s9593_s15, 11  ;;  %p6944_p4 = scmp.ne.s32.totalorder %s9593_s15, 8 }
  0x80   : > { %v343_v2 = vld [vmem:[%s9826_s30 + $0x48] sm:$0xff]  ;;  %v345_v5 = vld [vmem:[%s9826_s30 + $0x58] sm:$0xff]  ;;  %v342_v7 = vld [vmem:[%s9826_s30 + $0x40] sm:$0xff]  ;;  %s9918_s26 = sshra.s32 %s6942_s23, 7 }
  0x81   : > { %v6953_v4 = vpack.c.bf16 %v343_v2, %v335_v1  ;;  %v7465_v8 = vpack.c.bf16 %v345_v5, %v337_v3  ;;  %v6955_v9 = vpack.c.bf16 %v342_v7, %v334_v6  ;;  %v336_v10 = vld [vmem:[%s9826_s30 + $0x10] sm:$0xff]  ;;  %v351_v12 = vld [vmem:[%s9826_s30 + $0x88] sm:$0xff]  ;;  %v353_v15 = vld [vmem:[%s9826_s30 + $0x98] sm:$0xff]  ;;  %s6943_s21 = sshll.u32 %s9918_s26, 3 }
  0x82   : > { %v344_v11 = vld [vmem:[%s9826_s30 + $0x50] sm:$0xff]  ;;  %v359_v14 = vld [vmem:[%s9826_s30 + $0xc8] sm:$0xff]  ;;  %v361_v16 = vld [vmem:[%s9826_s30 + $0xd8] sm:$0xff]  ;;  %s9940_s3 = scalar_lea.vmem [#allocation3], %s6943_s21 }
  0x83   : > { %6954 = vmatprep.subr.bf16.mxu0 %v6953_v4  ;;  %v7467_v13 = vpack.c.bf16 %v344_v11, %v336_v10  ;;  %7466 = vmatprep.subr.bf16.mxu1 %v7465_v8  ;;  %v6957_v17 = vpack.c.bf16 %v359_v14, %v351_v12  ;;  %v7469_v18 = vpack.c.bf16 %v361_v16, %v353_v15  ;;  %v350_v19 = vld [vmem:[%s9826_s30 + $0x80] sm:$0xff]  ;;  %v352_v21 = vld [vmem:[%s9826_s30 + $0x90] sm:$0xff]  ;;  %v367_v24 = vld [vmem:[%s9826_s30 + $0x108] sm:$0xff] }
  0x84   : > { %6956 = vmatpush1.bf16.msra.mxu0 %v6955_v9  ;;  %v358_v20 = vld [vmem:[%s9826_s30 + $0xc0] sm:$0xff]  ;;  %v360_v23 = vld [vmem:[%s9826_s30 + $0xd0] sm:$0xff]  ;;  %v375_v25 = vld [vmem:[%s9826_s30 + $0x148] sm:$0xff] }
  0x85   : > { %7468 = vmatpush1.bf16.msra.mxu1 %v7467_v13  ;;  %v6959_v22 = vpack.c.bf16 %v358_v20, %v350_v19  ;;  %6958 = vmatprep.subr.bf16.mxu0 %v6957_v17  ;;  %v7471_v26 = vpack.c.bf16 %v360_v23, %v352_v21  ;;  %v6961_v27 = vpack.c.bf16 %v375_v25, %v367_v24  ;;  %v369_v28 = vld [vmem:[%s9826_s30 + $0x118] sm:$0xff]  ;;  %v366_v30 = vld [vmem:[%s9826_s30 + $0x100] sm:$0xff]  ;;  %v368_v33 = vld [vmem:[%s9826_s30 + $0x110] sm:$0xff] }
  0x86   : > { %7470 = vmatprep.subr.bf16.mxu1 %v7469_v18  ;;  %v377_v29 = vld [vmem:[%s9826_s30 + $0x158] sm:$0xff]  ;;  %v374_v32 = vld [vmem:[%s9826_s30 + $0x140] sm:$0xff]  ;;  %v376_v34 = vld [vmem:[%s9826_s30 + $0x150] sm:$0xff] }
  0x87   : > { %v7473_v31 = vpack.c.bf16 %v377_v29, %v369_v28  ;;  %v6963_v35 = vpack.c.bf16 %v374_v32, %v366_v30  ;;  %v383_v36 = vld [vmem:[%s9826_s30 + $0x188] sm:$0xff]  ;;  %v385_v38 = vld [vmem:[%s9826_s30 + $0x198] sm:$0xff]  ;;  %v7475_v39 = vpack.c.bf16 %v376_v34, %v368_v33  ;;  %v382_v42 = vld [vmem:[%s9826_s30 + $0x180] sm:$0xff] }
  0x88   : > { %6960 = vmatpush1.bf16.msra.mxu0 %v6959_v22  ;;  %v391_v37 = vld [vmem:[%s9826_s30 + $0x1c8] sm:$0xff]  ;;  %v393_v41 = vld [vmem:[%s9826_s30 + $0x1d8] sm:$0xff]  ;;  %v390_v43 = vld [vmem:[%s9826_s30 + $0x1c0] sm:$0xff] }
  0x89   : > { %7472 = vmatpush1.bf16.msra.mxu1 %v7471_v26  ;;  %6962 = vmatprep.subr.bf16.mxu0 %v6961_v27  ;;  %v6965_v40 = vpack.c.bf16 %v391_v37, %v383_v36  ;;  %v7477_v44 = vpack.c.bf16 %v393_v41, %v385_v38  ;;  %v384_v45 = vld [vmem:[%s9826_s30 + $0x190] sm:$0xff]  ;;  %v399_v47 = vld [vmem:[%s9826_s30 + $0x208] sm:$0xff]  ;;  %v401_v49 = vld [vmem:[%s9826_s30 + $0x218] sm:$0xff]  ;;  %v6967_v51 = vpack.c.bf16 %v390_v43, %v382_v42 }
  0x8a   : > { %7474 = vmatprep.subr.bf16.mxu1 %v7473_v31  ;;  %v392_v46 = vld [vmem:[%s9826_s30 + $0x1d0] sm:$0xff]  ;;  %v407_v48 = vld [vmem:[%s9826_s30 + $0x248] sm:$0xff]  ;;  %v409_v50 = vld [vmem:[%s9826_s30 + $0x258] sm:$0xff] }
  0x8b   : > { %v7479_v52 = vpack.c.bf16 %v392_v46, %v384_v45  ;;  %v6969_v53 = vpack.c.bf16 %v407_v48, %v399_v47  ;;  %v398_v54 = vld [vmem:[%s9826_s30 + $0x200] sm:$0xff]  ;;  %v400_v56 = vld [vmem:[%s9826_s30 + $0x210] sm:$0xff]  ;;  %v7481_v57 = vpack.c.bf16 %v409_v50, %v401_v49  ;;  %v415_v59 = vld [vmem:[%s9826_s30 + $0x288] sm:$0xff] }
  0x8c   : > { %6964 = vmatpush1.bf16.msra.mxu0 %v6963_v35  ;;  %v406_v55 = vld [vmem:[%s9826_s30 + $0x240] sm:$0xff]  ;;  %v408_v58 = vld [vmem:[%s9826_s30 + $0x250] sm:$0xff]  ;;  %v423_v60 = vld [vmem:[%s9826_s30 + $0x2c8] sm:$0xff] }
  0x8d   : > { %7476 = vmatpush1.bf16.msra.mxu1 %v7475_v39  ;;  %6966 = vmatprep.subr.bf16.mxu0 %v6965_v40  ;;  %v417_v61 = vld [vmem:[%s9826_s30 + $0x298] sm:$0xff]  ;;  %v6971_v63 = vpack.c.bf16 %v406_v55, %v398_v54  ;;  %v7483_v0 = vpack.c.bf16 %v408_v58, %v400_v56  ;;  %v6973_v1 = vpack.c.bf16 %v423_v60, %v415_v59  ;;  %v414_v2 = vld [vmem:[%s9826_s30 + $0x280] sm:$0xff]  ;;  %v416_v4 = vld [vmem:[%s9826_s30 + $0x290] sm:$0xff] }
  0x8e   : > { %7478 = vmatprep.subr.bf16.mxu1 %v7477_v44  ;;  %v425_v62 = vld [vmem:[%s9826_s30 + $0x2d8] sm:$0xff]  ;;  %v422_v3 = vld [vmem:[%s9826_s30 + $0x2c0] sm:$0xff]  ;;  %v424_v6 = vld [vmem:[%s9826_s30 + $0x2d0] sm:$0xff] }
  0x8f   : > { %v7485_v5 = vpack.c.bf16 %v425_v62, %v417_v61  ;;  %v431_v7 = vld [vmem:[%s9826_s30 + $0x308] sm:$0xff]  ;;  %v433_v9 = vld [vmem:[%s9826_s30 + $0x318] sm:$0xff]  ;;  %v6975_v11 = vpack.c.bf16 %v422_v3, %v414_v2  ;;  %v7487_v12 = vpack.c.bf16 %v424_v6, %v416_v4  ;;  %v430_v14 = vld [vmem:[%s9826_s30 + $0x300] sm:$0xff] }
  0x90   : > { %6968 = vmatpush1.bf16.msra.mxu0 %v6967_v51  ;;  %v439_v8 = vld [vmem:[%s9826_s30 + $0x348] sm:$0xff]  ;;  %v441_v10 = vld [vmem:[%s9826_s30 + $0x358] sm:$0xff]  ;;  %v438_v15 = vld [vmem:[%s9826_s30 + $0x340] sm:$0xff] }
  0x91   : > { %7480 = vmatpush1.bf16.msra.mxu1 %v7479_v52  ;;  %6970 = vmatprep.subr.bf16.mxu0 %v6969_v53  ;;  %v6977_v13 = vpack.c.bf16 %v439_v8, %v431_v7  ;;  %v432_v16 = vld [vmem:[%s9826_s30 + $0x310] sm:$0xff]  ;;  %v7489_v17 = vpack.c.bf16 %v441_v10, %v433_v9  ;;  %v447_v19 = vld [vmem:[%s9826_s30 + $0x388] sm:$0xff]  ;;  %v449_v21 = vld [vmem:[%s9826_s30 + $0x398] sm:$0xff]  ;;  %v6979_v23 = vpack.c.bf16 %v438_v15, %v430_v14 }
  0x92   : > { %7482 = vmatprep.subr.bf16.mxu1 %v7481_v57  ;;  %v440_v18 = vld [vmem:[%s9826_s30 + $0x350] sm:$0xff]  ;;  %v455_v20 = vld [vmem:[%s9826_s30 + $0x3c8] sm:$0xff]  ;;  %v457_v22 = vld [vmem:[%s9826_s30 + $0x3d8] sm:$0xff] }
  0x93   : > { %v7491_v24 = vpack.c.bf16 %v440_v18, %v432_v16  ;;  %v6981_v25 = vpack.c.bf16 %v455_v20, %v447_v19  ;;  %v446_v26 = vld [vmem:[%s9826_s30 + $0x380] sm:$0xff]  ;;  %v448_v28 = vld [vmem:[%s9826_s30 + $0x390] sm:$0xff]  ;;  %v7493_v29 = vpack.c.bf16 %v457_v22, %v449_v21  ;;  %v463_v31 = vld [vmem:[%s9826_s30 + $0x408] sm:$0xff] }
  0x94   : > { %6972 = vmatpush1.bf16.msra.mxu0 %v6971_v63  ;;  %v454_v27 = vld [vmem:[%s9826_s30 + $0x3c0] sm:$0xff]  ;;  %v456_v30 = vld [vmem:[%s9826_s30 + $0x3d0] sm:$0xff]  ;;  %v471_v32 = vld [vmem:[%s9826_s30 + $0x448] sm:$0xff] }
  0x95   : > { %7484 = vmatpush1.bf16.msra.mxu1 %v7483_v0  ;;  %6974 = vmatprep.subr.bf16.mxu0 %v6973_v1  ;;  %v465_v33 = vld [vmem:[%s9826_s30 + $0x418] sm:$0xff]  ;;  %v6983_v35 = vpack.c.bf16 %v454_v27, %v446_v26  ;;  %v7495_v36 = vpack.c.bf16 %v456_v30, %v448_v28  ;;  %v6985_v37 = vpack.c.bf16 %v471_v32, %v463_v31  ;;  %v462_v38 = vld [vmem:[%s9826_s30 + $0x400] sm:$0xff]  ;;  %v464_v40 = vld [vmem:[%s9826_s30 + $0x410] sm:$0xff] }
  0x96   : > { %7486 = vmatprep.subr.bf16.mxu1 %v7485_v5  ;;  %v473_v34 = vld [vmem:[%s9826_s30 + $0x458] sm:$0xff]  ;;  %v470_v39 = vld [vmem:[%s9826_s30 + $0x440] sm:$0xff]  ;;  %v472_v42 = vld [vmem:[%s9826_s30 + $0x450] sm:$0xff] }
  0x97   : > { %v7497_v41 = vpack.c.bf16 %v473_v34, %v465_v33  ;;  %v479_v43 = vld [vmem:[%s9826_s30 + $0x488] sm:$0xff]  ;;  %v481_v45 = vld [vmem:[%s9826_s30 + $0x498] sm:$0xff]  ;;  %v6987_v47 = vpack.c.bf16 %v470_v39, %v462_v38  ;;  %v7499_v48 = vpack.c.bf16 %v472_v42, %v464_v40  ;;  %v478_v50 = vld [vmem:[%s9826_s30 + $0x480] sm:$0xff] }
  0x98   : > { %6976 = vmatpush1.bf16.msra.mxu0 %v6975_v11  ;;  %v487_v44 = vld [vmem:[%s9826_s30 + $0x4c8] sm:$0xff]  ;;  %v489_v46 = vld [vmem:[%s9826_s30 + $0x4d8] sm:$0xff]  ;;  %v486_v51 = vld [vmem:[%s9826_s30 + $0x4c0] sm:$0xff] }
  0x99   : > { %7488 = vmatpush1.bf16.msra.mxu1 %v7487_v12  ;;  %6978 = vmatprep.subr.bf16.mxu0 %v6977_v13  ;;  %v6989_v49 = vpack.c.bf16 %v487_v44, %v479_v43  ;;  %v480_v52 = vld [vmem:[%s9826_s30 + $0x490] sm:$0xff]  ;;  %v7501_v53 = vpack.c.bf16 %v489_v46, %v481_v45  ;;  %v495_v55 = vld [vmem:[%s9826_s30 + $0x508] sm:$0xff]  ;;  %v497_v57 = vld [vmem:[%s9826_s30 + $0x518] sm:$0xff]  ;;  %v6991_v59 = vpack.c.bf16 %v486_v51, %v478_v50 }
  0x9a   : > { %7490 = vmatprep.subr.bf16.mxu1 %v7489_v17  ;;  %v488_v54 = vld [vmem:[%s9826_s30 + $0x4d0] sm:$0xff]  ;;  %v503_v56 = vld [vmem:[%s9826_s30 + $0x548] sm:$0xff]  ;;  %v505_v58 = vld [vmem:[%s9826_s30 + $0x558] sm:$0xff] }
  0x9b   : > { %v7503_v60 = vpack.c.bf16 %v488_v54, %v480_v52  ;;  %v6993_v61 = vpack.c.bf16 %v503_v56, %v495_v55  ;;  %v494_v62 = vld [vmem:[%s9826_s30 + $0x500] sm:$0xff]  ;;  %v496_v0 = vld [vmem:[%s9826_s30 + $0x510] sm:$0xff]  ;;  %v7505_v1 = vpack.c.bf16 %v505_v58, %v497_v57  ;;  %v511_v3 = vld [vmem:[%s9826_s30 + $0x588] sm:$0xff] }
  0x9c   : > { %6980 = vmatpush1.bf16.msra.mxu0 %v6979_v23  ;;  %v502_v63 = vld [vmem:[%s9826_s30 + $0x540] sm:$0xff]  ;;  %v504_v2 = vld [vmem:[%s9826_s30 + $0x550] sm:$0xff]  ;;  %v519_v4 = vld [vmem:[%s9826_s30 + $0x5c8] sm:$0xff] }
  0x9d   : > { %7492 = vmatpush1.bf16.msra.mxu1 %v7491_v24  ;;  %6982 = vmatprep.subr.bf16.mxu0 %v6981_v25  ;;  %v513_v5 = vld [vmem:[%s9826_s30 + $0x598] sm:$0xff]  ;;  %v6995_v7 = vpack.c.bf16 %v502_v63, %v494_v62  ;;  %v510_v8 = vld [vmem:[%s9826_s30 + $0x580] sm:$0xff]  ;;  %v7507_v9 = vpack.c.bf16 %v504_v2, %v496_v0  ;;  %v6997_v10 = vpack.c.bf16 %v519_v4, %v511_v3  ;;  %v512_v12 = vld [vmem:[%s9826_s30 + $0x590] sm:$0xff] }
  0x9e   : > { %7494 = vmatprep.subr.bf16.mxu1 %v7493_v29  ;;  %v521_v6 = vld [vmem:[%s9826_s30 + $0x5d8] sm:$0xff]  ;;  %v518_v11 = vld [vmem:[%s9826_s30 + $0x5c0] sm:$0xff]  ;;  %v520_v13 = vld [vmem:[%s9826_s30 + $0x5d0] sm:$0xff] }
  0x9f   : > { %v7509_v14 = vpack.c.bf16 %v521_v6, %v513_v5  ;;  %v527_v15 = vld [vmem:[%s9826_s30 + $0x608] sm:$0xff]  ;;  %v529_v18 = vld [vmem:[%s9826_s30 + $0x618] sm:$0xff]  ;;  %v6999_v20 = vpack.c.bf16 %v518_v11, %v510_v8  ;;  %v7511_v21 = vpack.c.bf16 %v520_v13, %v512_v12  ;;  %v526_v23 = vld [vmem:[%s9826_s30 + $0x600] sm:$0xff] }
  0xa0   : > { %6984 = vmatpush1.bf16.msra.mxu0 %v6983_v35  ;;  %v535_v16 = vld [vmem:[%s9826_s30 + $0x648] sm:$0xff]  ;;  %v537_v19 = vld [vmem:[%s9826_s30 + $0x658] sm:$0xff]  ;;  %v534_v24 = vld [vmem:[%s9826_s30 + $0x640] sm:$0xff] }
  0xa1   : > { %7496 = vmatpush1.bf16.msra.mxu1 %v7495_v36  ;;  %6986 = vmatprep.subr.bf16.mxu0 %v6985_v37  ;;  %v239_v17 = vld [vmem:[%s9940_s3 + $0x8] sm:$0xff]  ;;  %v7001_v22 = vpack.c.bf16 %v535_v16, %v527_v15  ;;  %v528_v25 = vld [vmem:[%s9826_s30 + $0x610] sm:$0xff]  ;;  %v7513_v26 = vpack.c.bf16 %v537_v19, %v529_v18  ;;  %v545_v30 = vld [vmem:[%s9826_s30 + $0x698] sm:$0xff]  ;;  %v7003_v32 = vpack.c.bf16 %v534_v24, %v526_v23 }
  0xa2   : > { %7498 = vmatprep.subr.bf16.mxu1 %v7497_v41  ;;  %2446 = vmatprep.mubr.f32.mxu0 %v239_v17  ;;  %v536_v27 = vld [vmem:[%s9826_s30 + $0x650] sm:$0xff]  ;;  %v543_v28 = vld [vmem:[%s9826_s30 + $0x688] sm:$0xff]  ;;  %v553_v31 = vld [vmem:[%s9826_s30 + $0x6d8] sm:$0xff] }
  0xa3   : > { %3158 = vmatprep.mubr.f32.mxu1 %v239_v17  ;;  %v551_v29 = vld [vmem:[%s9826_s30 + $0x6c8] sm:$0xff]  ;;  %v7515_v33 = vpack.c.bf16 %v536_v27, %v528_v25  ;;  %v542_v35 = vld [vmem:[%s9826_s30 + $0x680] sm:$0xff]  ;;  %v544_v37 = vld [vmem:[%s9826_s30 + $0x690] sm:$0xff]  ;;  %v7517_v38 = vpack.c.bf16 %v553_v31, %v545_v30 }
  0xa4   : > { %6988 = vmatpush1.bf16.msra.mxu0 %v6987_v47  ;;  %v7005_v34 = vpack.c.bf16 %v551_v29, %v543_v28  ;;  %v550_v36 = vld [vmem:[%s9826_s30 + $0x6c0] sm:$0xff]  ;;  %v552_v39 = vld [vmem:[%s9826_s30 + $0x6d0] sm:$0xff]  ;;  %v559_v40 = vld [vmem:[%s9826_s30 + $0x708] sm:$0xff] }
  0xa5   : > { %7500 = vmatpush1.bf16.msra.mxu1 %v7499_v48  ;;  %6990 = vmatprep.subr.bf16.mxu0 %v6989_v49  ;;  %v567_v41 = vld [vmem:[%s9826_s30 + $0x748] sm:$0xff]  ;;  %v561_v42 = vld [vmem:[%s9826_s30 + $0x718] sm:$0xff]  ;;  %v7007_v44 = vpack.c.bf16 %v550_v36, %v542_v35  ;;  %v7519_v45 = vpack.c.bf16 %v552_v39, %v544_v37  ;;  %v558_v47 = vld [vmem:[%s9826_s30 + $0x700] sm:$0xff] }
  0xa6   : > { %7502 = vmatprep.subr.bf16.mxu1 %v7501_v53  ;;  %v569_v43 = vld [vmem:[%s9826_s30 + $0x758] sm:$0xff]  ;;  %v7009_v46 = vpack.c.bf16 %v567_v41, %v559_v40  ;;  %v566_v48 = vld [vmem:[%s9826_s30 + $0x740] sm:$0xff]  ;;  %v560_v49 = vld [vmem:[%s9826_s30 + $0x710] sm:$0xff] }
  0xa7   : > { %v7521_v50 = vpack.c.bf16 %v569_v43, %v561_v42  ;;  %v568_v51 = vld [vmem:[%s9826_s30 + $0x750] sm:$0xff]  ;;  %v575_v52 = vld [vmem:[%s9826_s30 + $0x788] sm:$0xff]  ;;  %v577_v54 = vld [vmem:[%s9826_s30 + $0x798] sm:$0xff]  ;;  %v7011_v56 = vpack.c.bf16 %v566_v48, %v558_v47 }
  0xa8   : > { %6992 = vmatpush1.bf16.msra.mxu0 %v6991_v59  ;;  %v583_v53 = vld [vmem:[%s9826_s30 + $0x7c8] sm:$0xff]  ;;  %v585_v55 = vld [vmem:[%s9826_s30 + $0x7d8] sm:$0xff]  ;;  %v7523_v57 = vpack.c.bf16 %v568_v51, %v560_v49  ;;  %v574_v59 = vld [vmem:[%s9826_s30 + $0x780] sm:$0xff] }
  0xa9   : > { %7504 = vmatpush1.bf16.msra.mxu1 %v7503_v60  ;;  %6994 = vmatprep.subr.bf16.mxu0 %v6993_v61  ;;  %v7013_v58 = vpack.c.bf16 %v583_v53, %v575_v52  ;;  %v582_v60 = vld [vmem:[%s9826_s30 + $0x7c0] sm:$0xff]  ;;  %v576_v61 = vld [vmem:[%s9826_s30 + $0x790] sm:$0xff]  ;;  %v7525_v62 = vpack.c.bf16 %v585_v55, %v577_v54  ;;  %v591_v0 = vld [vmem:[%s9826_s30 + $0x808] sm:$0xff] }
  0xaa   : > { %7506 = vmatprep.subr.bf16.mxu1 %v7505_v1  ;;  %v584_v63 = vld [vmem:[%s9826_s30 + $0x7d0] sm:$0xff]  ;;  %v599_v1 = vld [vmem:[%s9826_s30 + $0x848] sm:$0xff]  ;;  %v593_v2 = vld [vmem:[%s9826_s30 + $0x818] sm:$0xff]  ;;  %v7015_v4 = vpack.c.bf16 %v582_v60, %v574_v59 }
  0xab   : > { %v601_v3 = vld [vmem:[%s9826_s30 + $0x858] sm:$0xff]  ;;  %v7527_v5 = vpack.c.bf16 %v584_v63, %v576_v61  ;;  %v7017_v6 = vpack.c.bf16 %v599_v1, %v591_v0  ;;  %v598_v8 = vld [vmem:[%s9826_s30 + $0x840] sm:$0xff]  ;;  %v600_v11 = vld [vmem:[%s9826_s30 + $0x850] sm:$0xff] }
  0xac   : > { %6996 = vmatpush1.bf16.msra.mxu0 %v6995_v7  ;;  %v590_v7 = vld [vmem:[%s9826_s30 + $0x800] sm:$0xff]  ;;  %v607_v12 = vld [vmem:[%s9826_s30 + $0x888] sm:$0xff]  ;;  %v617_v15 = vld [vmem:[%s9826_s30 + $0x8d8] sm:$0xff] }
  0xad   : > { %7508 = vmatpush1.bf16.msra.mxu1 %v7507_v9  ;;  %6998 = vmatprep.subr.bf16.mxu0 %v6997_v10  ;;  %v592_v9 = vld [vmem:[%s9826_s30 + $0x810] sm:$0xff]  ;;  %v7529_v10 = vpack.c.bf16 %v601_v3, %v593_v2  ;;  %v615_v13 = vld [vmem:[%s9826_s30 + $0x8c8] sm:$0xff]  ;;  %v238_v16 = vld [vmem:[%s9940_s3] sm:$0xff]  ;;  %v7019_v17 = vpack.c.bf16 %v598_v8, %v590_v7 }
  0xae   : > { %7510 = vmatprep.subr.bf16.mxu1 %v7509_v14  ;;  %v609_v14 = vld [vmem:[%s9826_s30 + $0x898] sm:$0xff]  ;;  %v7531_v18 = vpack.c.bf16 %v600_v11, %v592_v9  ;;  %v7021_v19 = vpack.c.bf16 %v615_v13, %v607_v12  ;;  %v616_v24 = vld [vmem:[%s9826_s30 + $0x8d0] sm:$0xff]  ;;  %v623_v25 = vld [vmem:[%s9826_s30 + $0x908] sm:$0xff] }
  0xaf   : > { %v7533_v23 = vpack.c.bf16 %v617_v15, %v609_v14  ;;  %v625_v27 = vld [vmem:[%s9826_s30 + $0x918] sm:$0xff]  ;;  %v632_v36 = vld [vmem:[%s9826_s30 + $0x950] sm:$0xff]  ;;  %v639_v37 = vld [vmem:[%s9826_s30 + $0x988] sm:$0xff] }
  0xb0   : > { %7000 = vmatpush1.bf16.msra.mxu0 %v6999_v20  ;;  %v606_v20 = vld [vmem:[%s9826_s30 + $0x880] sm:$0xff]  ;;  %v633_v28 = vld [vmem:[%s9826_s30 + $0x958] sm:$0xff]  ;;  %v648_v48 = vld [vmem:[%s9826_s30 + $0x9d0] sm:$0xff] }
  0xb1   : > { %7512 = vmatpush1.bf16.msra.mxu1 %v7511_v21  ;;  %7002 = vmatprep.subr.bf16.mxu0 %v7001_v22  ;;  %v614_v21 = vld [vmem:[%s9826_s30 + $0x8c0] sm:$0xff]  ;;  %v608_v22 = vld [vmem:[%s9826_s30 + $0x890] sm:$0xff]  ;;  %v7537_v35 = vpack.c.bf16 %v633_v28, %v625_v27  ;;  %v641_v39 = vld [vmem:[%s9826_s30 + $0x998] sm:$0xff] }
  0xb2   : > { %7514 = vmatprep.subr.bf16.mxu1 %v7513_v26  ;;  %v631_v26 = vld [vmem:[%s9826_s30 + $0x948] sm:$0xff]  ;;  %v7023_v29 = vpack.c.bf16 %v614_v21, %v606_v20  ;;  %v7535_v30 = vpack.c.bf16 %v616_v24, %v608_v22  ;;  %v649_v40 = vld [vmem:[%s9826_s30 + $0x9d8] sm:$0xff]  ;;  %v654_v54 = vld [vmem:[%s9826_s30 + $0xa00] sm:$0xff] }
  0xb3   : > { %v7025_v31 = vpack.c.bf16 %v631_v26, %v623_v25  ;;  %v7541_v47 = vpack.c.bf16 %v649_v40, %v641_v39  ;;  %v655_v49 = vld [vmem:[%s9826_s30 + $0xa08] sm:$0xff]  ;;  %v657_v51 = vld [vmem:[%s9826_s30 + $0xa18] sm:$0xff]  ;;  %v664_v59 = vld [vmem:[%s9826_s30 + $0xa50] sm:$0xff] }
  0xb4   : > { %7004 = vmatpush1.bf16.msra.mxu0 %v7003_v32  ;;  %v622_v32 = vld [vmem:[%s9826_s30 + $0x900] sm:$0xff]  ;;  %v665_v52 = vld [vmem:[%s9826_s30 + $0xa58] sm:$0xff]  ;;  %v671_v61 = vld [vmem:[%s9826_s30 + $0xa88] sm:$0xff] }
  0xb5   : > { %7516 = vmatpush1.bf16.msra.mxu1 %v7515_v33  ;;  %7006 = vmatprep.subr.bf16.mxu0 %v7005_v34  ;;  %v630_v33 = vld [vmem:[%s9826_s30 + $0x940] sm:$0xff]  ;;  %v624_v34 = vld [vmem:[%s9826_s30 + $0x910] sm:$0xff]  ;;  %v7545_v60 = vpack.c.bf16 %v665_v52, %v657_v51  ;;  %v255_v63 = vld [vmem:[%s9940_s3 + $0x488] sm:$0xff] }
  0xb6   : > { %7518 = vmatprep.subr.bf16.mxu1 %v7517_v38  ;;  %v647_v38 = vld [vmem:[%s9826_s30 + $0x9c8] sm:$0xff]  ;;  %v7027_v41 = vpack.c.bf16 %v630_v33, %v622_v32  ;;  %v7539_v42 = vpack.c.bf16 %v632_v36, %v624_v34  ;;  %v673_v0 = vld [vmem:[%s9826_s30 + $0xa98] sm:$0xff]  ;;  %v254_v2 = vld [vmem:[%s9940_s3 + $0x480] sm:$0xff] }
  0xb7   : > { %v7029_v43 = vpack.c.bf16 %v647_v38, %v639_v37  ;;  %v681_v1 = vld [vmem:[%s9826_s30 + $0xad8] sm:$0xff]  ;;  %v678_v7 = vld [vmem:[%s9826_s30 + $0xac0] sm:$0xff]  ;;  %v672_v8 = vld [vmem:[%s9826_s30 + $0xa90] sm:$0xff] }
  0xb8   : > { %7008 = vmatpush1.bf16.msra.mxu0 %v7007_v44  ;;  %v638_v44 = vld [vmem:[%s9826_s30 + $0x980] sm:$0xff]  ;;  %v271_v9 = vld [vmem:[%s9940_s3 + $0x908] sm:$0xff]  ;;  %v680_v11 = vld [vmem:[%s9826_s30 + $0xad0] sm:$0xff] }
  0xb9   : > { %7520 = vmatpush1.bf16.msra.mxu1 %v7519_v45  ;;  %7010 = vmatprep.subr.bf16.mxu0 %v7009_v46  ;;  %v646_v45 = vld [vmem:[%s9826_s30 + $0x9c0] sm:$0xff]  ;;  %v640_v46 = vld [vmem:[%s9826_s30 + $0x990] sm:$0xff]  ;;  %v687_v12 = vld [vmem:[%s9826_s30 + $0xb08] sm:$0xff]  ;;  %v7551_v20 = vpack.c.bf16 %v680_v11, %v672_v8 }
  0xba   : > { %7522 = vmatprep.subr.bf16.mxu1 %v7521_v50  ;;  %v663_v50 = vld [vmem:[%s9826_s30 + $0xa48] sm:$0xff]  ;;  %v7031_v53 = vpack.c.bf16 %v646_v45, %v638_v44  ;;  %v7543_v55 = vpack.c.bf16 %v648_v48, %v640_v46  ;;  %v689_v14 = vld [vmem:[%s9826_s30 + $0xb18] sm:$0xff]  ;;  %v694_v22 = vld [vmem:[%s9826_s30 + $0xb40] sm:$0xff] }
  0xbb   : > { %v695_v13 = vld [vmem:[%s9826_s30 + $0xb48] sm:$0xff]  ;;  %v697_v15 = vld [vmem:[%s9826_s30 + $0xb58] sm:$0xff]  ;;  %v696_v24 = vld [vmem:[%s9826_s30 + $0xb50] sm:$0xff] }
  0xbc   : > { %7012 = vmatpush1.bf16.msra.mxu0 %v7011_v56  ;;  %v7033_v56 = vpack.c.bf16 %v663_v50, %v655_v49  ;;  %v7041_v21 = vpack.c.bf16 %v695_v13, %v687_v12  ;;  %v7553_v25 = vpack.c.bf16 %v697_v15, %v689_v14  ;;  %v703_v26 = vld [vmem:[%s9826_s30 + $0xb88] sm:$0xff]  ;;  %v286_v28 = vld [vmem:[%s9940_s3 + $0xd80] sm:$0xff]  ;;  %v241_v32 = vld [vmem:[%s9940_s3 + $0x18] sm:$0xff] }
  0xbd   : > { %7524 = vmatpush1.bf16.msra.mxu1 %v7523_v57  ;;  %7014 = vmatprep.subr.bf16.mxu0 %v7013_v58  ;;  %v662_v57 = vld [vmem:[%s9826_s30 + $0xa40] sm:$0xff]  ;;  %v656_v58 = vld [vmem:[%s9826_s30 + $0xa10] sm:$0xff]  ;;  %v711_v27 = vld [vmem:[%s9826_s30 + $0xbc8] sm:$0xff] }
  0xbe   : > { %7526 = vmatprep.subr.bf16.mxu1 %v7525_v62  ;;  %v679_v62 = vld [vmem:[%s9826_s30 + $0xac8] sm:$0xff]  ;;  %v7035_v3 = vpack.c.bf16 %v662_v57, %v654_v54  ;;  %v7045_v34 = vpack.c.bf16 %v711_v27, %v703_v26  ;;  %v710_v36 = vld [vmem:[%s9826_s30 + $0xbc0] sm:$0xff]  ;;  %v704_v37 = vld [vmem:[%s9826_s30 + $0xb90] sm:$0xff] }
  0xbf   : > { %v712_v39 = vld [vmem:[%s9826_s30 + $0xbd0] sm:$0xff]  ;;  %v719_v40 = vld [vmem:[%s9826_s30 + $0xc08] sm:$0xff]  ;;  %v726_v48 = vld [vmem:[%s9826_s30 + $0xc40] sm:$0xff] }
  0xc0   : > { %7016 = vmatpush1.bf16.msra.mxu0 %v7015_v4  ;;  %v670_v4 = vld [vmem:[%s9826_s30 + $0xa80] sm:$0xff]  ;;  %v7559_v45 = vpack.c.bf16 %v712_v39, %v704_v37  ;;  %v720_v49 = vld [vmem:[%s9826_s30 + $0xc10] sm:$0xff]  ;;  %v735_v52 = vld [vmem:[%s9826_s30 + $0xc88] sm:$0xff] }
  0xc1   : > { %7528 = vmatpush1.bf16.msra.mxu1 %v7527_v5  ;;  %7018 = vmatprep.subr.bf16.mxu0 %v7017_v6  ;;  %v7547_v5 = vpack.c.bf16 %v664_v59, %v656_v58  ;;  %v7037_v6 = vpack.c.bf16 %v679_v62, %v671_v61  ;;  %v728_v51 = vld [vmem:[%s9826_s30 + $0xc50] sm:$0xff]  ;;  %v737_v54 = vld [vmem:[%s9826_s30 + $0xc98] sm:$0xff]  ;;  %v734_v59 = vld [vmem:[%s9826_s30 + $0xc80] sm:$0xff] }
  0xc2   : > { %7530 = vmatprep.subr.bf16.mxu1 %v7529_v10  ;;  %v7549_v10 = vpack.c.bf16 %v681_v1, %v673_v0  ;;  %v7563_v57 = vpack.c.bf16 %v728_v51, %v720_v49  ;;  %v736_v61 = vld [vmem:[%s9826_s30 + $0xc90] sm:$0xff]  ;;  %v751_v0 = vld [vmem:[%s9826_s30 + $0xd08] sm:$0xff]  ;;  %v758_v8 = vld [vmem:[%s9826_s30 + $0xd40] sm:$0xff] }
  0xc3   : > { %2447 = vmatmul.mubr.f32.vlgmr.msra.gmra.mrb[0].mxu0 %v238_v16  ;;  %v759_v1 = vld [vmem:[%s9826_s30 + $0xd48] sm:$0xff]  ;;  %v760_v11 = vld [vmem:[%s9826_s30 + $0xd50] sm:$0xff]  ;;  %v769_v14 = vld [vmem:[%s9826_s30 + $0xd98] sm:$0xff] }
  0xc4   : > { %7020 = vmatpush1.bf16.msra.mxu0 %v7019_v17  ;;  %3159 = vmatmul.mubr.f32.vlgmr.msra.gmra.mrb[0].mxu1 %v238_v16  ;;  %v270_v16 = vld [vmem:[%s9940_s3 + $0x900] sm:$0xff]  ;;  %v7039_v17 = vpack.c.bf16 %v678_v7, %v670_v4  ;;  %v767_v12 = vld [vmem:[%s9826_s30 + $0xd88] sm:$0xff]  ;;  %v777_v15 = vld [vmem:[%s9826_s30 + $0xdd8] sm:$0xff] }
  0xc5   : > { %7532 = vmatpush1.bf16.msra.mxu1 %v7531_v18  ;;  %7022 = vmatprep.subr.bf16.mxu0 %v7021_v19  ;;  %v686_v18 = vld [vmem:[%s9826_s30 + $0xb00] sm:$0xff]  ;;  %v287_v19 = vld [vmem:[%s9940_s3 + $0xd88] sm:$0xff]  ;;  %v785_v26 = vld [vmem:[%s9826_s30 + $0xe18] sm:$0xff] }
  0xc6   : > { %7534 = vmatprep.subr.bf16.mxu1 %v7533_v23  ;;  %2452 = vmatprep.mubr.f32.mxu0 %v255_v63  ;;  %v688_v23 = vld [vmem:[%s9826_s30 + $0xb10] sm:$0xff]  ;;  %v750_v7 = vld [vmem:[%s9826_s30 + $0xd00] sm:$0xff]  ;;  %v775_v13 = vld [vmem:[%s9826_s30 + $0xdc8] sm:$0xff] }
  0xc7   : > { %3164 = vmatprep.mubr.f32.mxu1 %v255_v63  ;;  %2453 = vmatmul.mubr.f32.gmra.mrb[2].mxu0 %v254_v2  ;;  %v7555_v33 = vpack.c.bf16 %v696_v24, %v688_v23  ;;  %v744_v63 = vld [vmem:[%s9826_s30 + $0xcd0] sm:$0xff]  ;;  %v783_v24 = vld [vmem:[%s9826_s30 + $0xe08] sm:$0xff]  ;;  %v793_v27 = vld [vmem:[%s9826_s30 + $0xe58] sm:$0xff] }
  0xc8   : > { %7024 = vmatpush1.bf16.msra.mxu0 %v7023_v29  ;;  %3165 = vmatmul.mubr.f32.gmra.mrb[2].mxu1 %v254_v2  ;;  %v705_v29 = vld [vmem:[%s9826_s30 + $0xb98] sm:$0xff]  ;;  %v776_v23 = vld [vmem:[%s9826_s30 + $0xdd0] sm:$0xff]  ;;  %v807_v37 = vld [vmem:[%s9826_s30 + $0xec8] sm:$0xff] }
  0xc9   : > { %7536 = vmatpush1.bf16.msra.mxu1 %v7535_v30  ;;  %7026 = vmatprep.subr.bf16.mxu0 %v7025_v31  ;;  %v713_v30 = vld [vmem:[%s9826_s30 + $0xbd8] sm:$0xff]  ;;  %v7043_v31 = vpack.c.bf16 %v694_v22, %v686_v18  ;;  %v7061_v18 = vpack.c.bf16 %v775_v13, %v767_v12  ;;  %v7573_v22 = vpack.c.bf16 %v777_v15, %v769_v14  ;;  %v823_v49 = vld [vmem:[%s9826_s30 + $0xf48] sm:$0xff]  ;;  %v846_v15 = vld [vmem:[%s9826_s30 + $0x1000] sm:$0xff] }
  0xca   : > { %7538 = vmatprep.subr.bf16.mxu1 %v7537_v35  ;;  %2458 = vmatprep.mubr.f32.mxu0 %v271_v9  ;;  %v702_v35 = vld [vmem:[%s9826_s30 + $0xb80] sm:$0xff]  ;;  %v7557_v38 = vpack.c.bf16 %v713_v30, %v705_v29  ;;  %v753_v2 = vld [vmem:[%s9826_s30 + $0xd18] sm:$0xff] }
  0xcb   : > { %3170 = vmatprep.mubr.f32.mxu1 %v271_v9  ;;  %2459 = vmatmul.mubr.f32.gmra.mrb[4].mxu0 %v270_v16  ;;  %v7047_v44 = vpack.c.bf16 %v710_v36, %v702_v35  ;;  %v752_v9 = vld [vmem:[%s9826_s30 + $0xd10] sm:$0xff]  ;;  %v799_v36 = vld [vmem:[%s9826_s30 + $0xe88] sm:$0xff]  ;;  %v809_v39 = vld [vmem:[%s9826_s30 + $0xed8] sm:$0xff] }
  0xcc   : > { %7028 = vmatpush1.bf16.msra.mxu0 %v7027_v41  ;;  %3171 = vmatmul.mubr.f32.gmra.mrb[4].mxu1 %v270_v16  ;;  %v727_v41 = vld [vmem:[%s9826_s30 + $0xc48] sm:$0xff]  ;;  %v7059_v16 = vpack.c.bf16 %v758_v8, %v750_v7  ;;  %v792_v35 = vld [vmem:[%s9826_s30 + $0xe50] sm:$0xff]  ;;  %v825_v51 = vld [vmem:[%s9826_s30 + $0xf58] sm:$0xff] }
  0xcd   : > { %7540 = vmatpush1.bf16.msra.mxu1 %v7539_v42  ;;  %7030 = vmatprep.subr.bf16.mxu0 %v7029_v43  ;;  %v721_v42 = vld [vmem:[%s9826_s30 + $0xc18] sm:$0xff]  ;;  %v7049_v46 = vpack.c.bf16 %v727_v41, %v719_v40  ;;  %v840_v7 = vld [vmem:[%s9826_s30 + $0xfd0] sm:$0xff]  ;;  %v847_v8 = vld [vmem:[%s9826_s30 + $0x1008] sm:$0xff] }
  0xce   : > { %7542 = vmatprep.subr.bf16.mxu1 %v7541_v47  ;;  %2464 = vmatprep.mubr.f32.mxu0 %v287_v19  ;;  %v729_v43 = vld [vmem:[%s9826_s30 + $0xc58] sm:$0xff]  ;;  %v718_v47 = vld [vmem:[%s9826_s30 + $0xc00] sm:$0xff] }
  0xcf   : > { %3176 = vmatprep.mubr.f32.mxu1 %v287_v19  ;;  %2465 = vmatmul.mubr.f32.gmra.mrb[6].mxu0 %v286_v28  ;;  %v7561_v50 = vpack.c.bf16 %v729_v43, %v721_v42  ;;  %v766_v19 = vld [vmem:[%s9826_s30 + $0xd80] sm:$0xff]  ;;  %v7069_v42 = vpack.c.bf16 %v807_v37, %v799_v36  ;;  %v889_v36 = vld [vmem:[%s9826_s30 + $0x1158] sm:$0xff] }
  0xd0   : > { %7032 = vmatpush1.bf16.msra.mxu0 %v7031_v53  ;;  %3177 = vmatmul.mubr.f32.gmra.mrb[6].mxu1 %v286_v28  ;;  %v743_v53 = vld [vmem:[%s9826_s30 + $0xcc8] sm:$0xff]  ;;  %v798_v43 = vld [vmem:[%s9826_s30 + $0xe80] sm:$0xff]  ;;  %v257_v37 = vld [vmem:[%s9940_s3 + $0x498] sm:$0xff] }
  0xd1   : > { %7544 = vmatpush1.bf16.msra.mxu1 %v7543_v55  ;;  %7034 = vmatprep.subr.bf16.mxu0 %v7033_v56  ;;  %v745_v55 = vld [vmem:[%s9826_s30 + $0xcd8] sm:$0xff]  ;;  %v7051_v56 = vpack.c.bf16 %v726_v48, %v718_v47  ;;  %v7053_v58 = vpack.c.bf16 %v743_v53, %v735_v52  ;;  %v808_v47 = vld [vmem:[%s9826_s30 + $0xed0] sm:$0xff]  ;;  %v815_v48 = vld [vmem:[%s9826_s30 + $0xf08] sm:$0xff] }
  0xd2   : > { %7546 = vmatprep.subr.bf16.mxu1 %v7545_v60  ;;  %2535 = vmatprep.mubr.f32.mxu0 %v241_v32  ;;  %v742_v60 = vld [vmem:[%s9826_s30 + $0xcc0] sm:$0xff]  ;;  %v7565_v62 = vpack.c.bf16 %v745_v55, %v737_v54  ;;  %v7073_v54 = vpack.c.bf16 %v823_v49, %v815_v48  ;;  %v903_v48 = vld [vmem:[%s9826_s30 + $0x11c8] sm:$0xff]  ;;  %v897_v49 = vld [vmem:[%s9826_s30 + $0x1198] sm:$0xff] }
  0xd3   : > { %3247 = vmatprep.mubr.f32.mxu1 %v241_v32  ;;  %v7055_v4 = vpack.c.bf16 %v742_v60, %v734_v59  ;;  %v790_v32 = vld [vmem:[%s9826_s30 + $0xe40] sm:$0xff]  ;;  %v824_v59 = vld [vmem:[%s9826_s30 + $0xf50] sm:$0xff]  ;;  %v831_v60 = vld [vmem:[%s9826_s30 + $0xf88] sm:$0xff] }
  0xd4   : > { %7036 = vmatpush1.bf16.msra.mxu0 %v7035_v3  ;;  %v761_v3 = vld [vmem:[%s9826_s30 + $0xd58] sm:$0xff]  ;;  %v814_v55 = vld [vmem:[%s9826_s30 + $0xf00] sm:$0xff] }
  0xd5   : > { %7548 = vmatpush1.bf16.msra.mxu1 %v7547_v5  ;;  %7038 = vmatprep.subr.bf16.mxu0 %v7037_v6  ;;  %v7567_v5 = vpack.c.bf16 %v744_v63, %v736_v61  ;;  %v7057_v6 = vpack.c.bf16 %v759_v1, %v751_v0  ;;  %v839_v61 = vld [vmem:[%s9826_s30 + $0xfc8] sm:$0xff]  ;;  %v841_v63 = vld [vmem:[%s9826_s30 + $0xfd8] sm:$0xff] }
  0xd6   : > { %7550 = vmatprep.subr.bf16.mxu1 %v7549_v10  ;;  %v7569_v10 = vpack.c.bf16 %v761_v3, %v753_v2  ;;  %v7077_v2 = vpack.c.bf16 %v839_v61, %v831_v60  ;;  %v830_v3 = vld [vmem:[%s9826_s30 + $0xf80] sm:$0xff]  ;;  %v904_v60 = vld [vmem:[%s9826_s30 + $0x11d0] sm:$0xff]  ;;  %v911_v61 = vld [vmem:[%s9826_s30 + $0x1208] sm:$0xff] }
  0xd8   : > { %7040 = vmatpush1.bf16.msra.mxu0 %v7039_v17  ;;  %v7571_v17 = vpack.c.bf16 %v760_v11, %v752_v9  ;;  %v855_v9 = vld [vmem:[%s9826_s30 + $0x1048] sm:$0xff]  ;;  %v857_v11 = vld [vmem:[%s9826_s30 + $0x1058] sm:$0xff] }
  0xd9   : > { %7552 = vmatpush1.bf16.msra.mxu1 %v7551_v20  ;;  %7042 = vmatprep.subr.bf16.mxu0 %v7041_v21  ;;  %v774_v20 = vld [vmem:[%s9826_s30 + $0xdc0] sm:$0xff]  ;;  %v768_v21 = vld [vmem:[%s9826_s30 + $0xd90] sm:$0xff]  ;;  %v7081_v14 = vpack.c.bf16 %v855_v9, %v847_v8 }
  0xda   : > { %7554 = vmatprep.subr.bf16.mxu1 %v7553_v25  ;;  %v791_v25 = vld [vmem:[%s9826_s30 + $0xe48] sm:$0xff]  ;;  %v7063_v28 = vpack.c.bf16 %v774_v20, %v766_v19  ;;  %v7575_v29 = vpack.c.bf16 %v776_v23, %v768_v21  ;;  %v856_v19 = vld [vmem:[%s9826_s30 + $0x1050] sm:$0xff]  ;;  %v873_v23 = vld [vmem:[%s9826_s30 + $0x10d8] sm:$0xff] }
  0xdb   : > { %v7065_v30 = vpack.c.bf16 %v791_v25, %v783_v24  ;;  %v863_v20 = vld [vmem:[%s9826_s30 + $0x1088] sm:$0xff]  ;;  %v240_v24 = vld [vmem:[%s9940_s3 + $0x10] sm:$0xff] }
  0xdc   : > { %7044 = vmatpush1.bf16.msra.mxu0 %v7043_v31  ;;  %v782_v31 = vld [vmem:[%s9826_s30 + $0xe00] sm:$0xff]  ;;  %v871_v21 = vld [vmem:[%s9826_s30 + $0x10c8] sm:$0xff]  ;;  %v912_v8 = vld [vmem:[%s9826_s30 + $0x1210] sm:$0xff] }
  0xdd   : > { %7556 = vmatpush1.bf16.msra.mxu1 %v7555_v33  ;;  %7046 = vmatprep.subr.bf16.mxu0 %v7045_v34  ;;  %v784_v33 = vld [vmem:[%s9826_s30 + $0xe10] sm:$0xff]  ;;  %v7577_v34 = vpack.c.bf16 %v793_v27, %v785_v26  ;;  %v7067_v40 = vpack.c.bf16 %v790_v32, %v782_v31  ;;  %v7085_v27 = vpack.c.bf16 %v871_v21, %v863_v20  ;;  %v934_v20 = vld [vmem:[%s9826_s30 + $0x12c0] sm:$0xff] }
  0xde   : > { %7558 = vmatprep.subr.bf16.mxu1 %v7557_v38  ;;  %v801_v38 = vld [vmem:[%s9826_s30 + $0xe98] sm:$0xff]  ;;  %v7579_v41 = vpack.c.bf16 %v792_v35, %v784_v33  ;;  %v872_v32 = vld [vmem:[%s9826_s30 + $0x10d0] sm:$0xff]  ;;  %v879_v33 = vld [vmem:[%s9826_s30 + $0x1108] sm:$0xff] }
  0xdf   : > { %v881_v35 = vld [vmem:[%s9826_s30 + $0x1118] sm:$0xff]  ;;  %v928_v21 = vld [vmem:[%s9826_s30 + $0x1290] sm:$0xff] }
  0xe0   : > { %7048 = vmatpush1.bf16.msra.mxu0 %v7047_v44  ;;  %v806_v44 = vld [vmem:[%s9826_s30 + $0xec0] sm:$0xff] }
  0xe1   : > { %7560 = vmatpush1.bf16.msra.mxu1 %v7559_v45  ;;  %7050 = vmatprep.subr.bf16.mxu0 %v7049_v46  ;;  %v800_v45 = vld [vmem:[%s9826_s30 + $0xe90] sm:$0xff]  ;;  %v7581_v46 = vpack.c.bf16 %v809_v39, %v801_v38  ;;  %v7071_v52 = vpack.c.bf16 %v806_v44, %v798_v43  ;;  %v886_v43 = vld [vmem:[%s9826_s30 + $0x1140] sm:$0xff] }
  0xe2   : > { %7562 = vmatprep.subr.bf16.mxu1 %v7561_v50  ;;  %v817_v50 = vld [vmem:[%s9826_s30 + $0xf18] sm:$0xff]  ;;  %v7583_v53 = vpack.c.bf16 %v808_v47, %v800_v45  ;;  %v256_v39 = vld [vmem:[%s9940_s3 + $0x490] sm:$0xff]  ;;  %v7601_v45 = vpack.c.bf16 %v889_v36, %v881_v35  ;;  %v895_v47 = vld [vmem:[%s9826_s30 + $0x1188] sm:$0xff] }
  0xe3   : > { %v880_v44 = vld [vmem:[%s9826_s30 + $0x1110] sm:$0xff]  ;;  %v959_v36 = vld [vmem:[%s9826_s30 + $0x1388] sm:$0xff] }
  0xe4   : > { %7052 = vmatpush1.bf16.msra.mxu0 %v7051_v56  ;;  %v822_v56 = vld [vmem:[%s9826_s30 + $0xf40] sm:$0xff]  ;;  %v952_v35 = vld [vmem:[%s9826_s30 + $0x1350] sm:$0xff] }
  0xe5   : > { %7564 = vmatpush1.bf16.msra.mxu1 %v7563_v57  ;;  %7054 = vmatprep.subr.bf16.mxu0 %v7053_v58  ;;  %v816_v57 = vld [vmem:[%s9826_s30 + $0xf10] sm:$0xff]  ;;  %v7585_v58 = vpack.c.bf16 %v825_v51, %v817_v50  ;;  %v7075_v0 = vpack.c.bf16 %v822_v56, %v814_v55  ;;  %v905_v50 = vld [vmem:[%s9826_s30 + $0x11d8] sm:$0xff]  ;;  %v7093_v55 = vpack.c.bf16 %v903_v48, %v895_v47  ;;  %v894_v56 = vld [vmem:[%s9826_s30 + $0x1180] sm:$0xff] }
  0xe6   : > { %7566 = vmatprep.subr.bf16.mxu1 %v7565_v62  ;;  %v833_v62 = vld [vmem:[%s9826_s30 + $0xf98] sm:$0xff]  ;;  %v7587_v1 = vpack.c.bf16 %v824_v59, %v816_v57  ;;  %v902_v57 = vld [vmem:[%s9826_s30 + $0x11c0] sm:$0xff]  ;;  %v7605_v59 = vpack.c.bf16 %v905_v50, %v897_v49  ;;  %v968_v47 = vld [vmem:[%s9826_s30 + $0x13d0] sm:$0xff] }
  0xe7   : > { %v273_v51 = vld [vmem:[%s9940_s3 + $0x918] sm:$0xff]  ;;  %v975_v48 = vld [vmem:[%s9826_s30 + $0x1408] sm:$0xff] }
  0xe8   : > { %7056 = vmatpush1.bf16.msra.mxu0 %v7055_v4  ;;  %v838_v4 = vld [vmem:[%s9826_s30 + $0xfc0] sm:$0xff]  ;;  %v983_v49 = vld [vmem:[%s9826_s30 + $0x1448] sm:$0xff]  ;;  %v977_v50 = vld [vmem:[%s9826_s30 + $0x1418] sm:$0xff] }
  0xe9   : > { %7568 = vmatpush1.bf16.msra.mxu1 %v7567_v5  ;;  %7058 = vmatprep.subr.bf16.mxu0 %v7057_v6  ;;  %v832_v5 = vld [vmem:[%s9826_s30 + $0xf90] sm:$0xff]  ;;  %v7589_v6 = vpack.c.bf16 %v841_v63, %v833_v62  ;;  %v7079_v12 = vpack.c.bf16 %v838_v4, %v830_v3  ;;  %v919_v62 = vld [vmem:[%s9826_s30 + $0x1248] sm:$0xff]  ;;  %v913_v63 = vld [vmem:[%s9826_s30 + $0x1218] sm:$0xff] }
  0xea   : > { %7570 = vmatprep.subr.bf16.mxu1 %v7569_v10  ;;  %v849_v10 = vld [vmem:[%s9826_s30 + $0x1018] sm:$0xff]  ;;  %v7591_v13 = vpack.c.bf16 %v840_v7, %v832_v5  ;;  %v288_v3 = vld [vmem:[%s9940_s3 + $0xd90] sm:$0xff]  ;;  %v7097_v5 = vpack.c.bf16 %v919_v62, %v911_v61  ;;  %v918_v7 = vld [vmem:[%s9826_s30 + $0x1240] sm:$0xff] }
  0xeb   : > { %v999_v61 = vld [vmem:[%s9826_s30 + $0x14c8] sm:$0xff]  ;;  %v993_v62 = vld [vmem:[%s9826_s30 + $0x1498] sm:$0xff] }
  0xec   : > { %7060 = vmatpush1.bf16.msra.mxu0 %v7059_v16  ;;  %v854_v16 = vld [vmem:[%s9826_s30 + $0x1040] sm:$0xff] }
  0xed   : > { %7572 = vmatpush1.bf16.msra.mxu1 %v7571_v17  ;;  %7062 = vmatprep.subr.bf16.mxu0 %v7061_v18  ;;  %v848_v17 = vld [vmem:[%s9826_s30 + $0x1010] sm:$0xff]  ;;  %v7593_v18 = vpack.c.bf16 %v857_v11, %v849_v10  ;;  %v7083_v25 = vpack.c.bf16 %v854_v16, %v846_v15  ;;  %v927_v11 = vld [vmem:[%s9826_s30 + $0x1288] sm:$0xff] }
  0xee   : > { %7574 = vmatprep.subr.bf16.mxu1 %v7573_v22  ;;  %v865_v22 = vld [vmem:[%s9826_s30 + $0x1098] sm:$0xff]  ;;  %v7595_v26 = vpack.c.bf16 %v856_v19, %v848_v17  ;;  %v920_v10 = vld [vmem:[%s9826_s30 + $0x1250] sm:$0xff]  ;;  %v243_v15 = vld [vmem:[%s9940_s3 + $0x28] sm:$0xff] }
  0xef   : > { %v7597_v31 = vpack.c.bf16 %v873_v23, %v865_v22  ;;  %v7611_v17 = vpack.c.bf16 %v920_v10, %v912_v8  ;;  %v926_v19 = vld [vmem:[%s9826_s30 + $0x1280] sm:$0xff]  ;;  %v936_v23 = vld [vmem:[%s9826_s30 + $0x12d0] sm:$0xff]  ;;  %v1007_v8 = vld [vmem:[%s9826_s30 + $0x1508] sm:$0xff] }
  0xf0   : > { %7064 = vmatpush1.bf16.msra.mxu0 %v7063_v28  ;;  %v862_v28 = vld [vmem:[%s9826_s30 + $0x1080] sm:$0xff]  ;;  %v1009_v10 = vld [vmem:[%s9826_s30 + $0x1518] sm:$0xff] }
  0xf1   : > { %7576 = vmatpush1.bf16.msra.mxu1 %v7575_v29  ;;  %7066 = vmatprep.subr.bf16.mxu0 %v7065_v30  ;;  %v870_v29 = vld [vmem:[%s9826_s30 + $0x10c0] sm:$0xff]  ;;  %v864_v30 = vld [vmem:[%s9826_s30 + $0x1090] sm:$0xff] }
  0xf2   : > { %7578 = vmatprep.subr.bf16.mxu1 %v7577_v34  ;;  %v887_v34 = vld [vmem:[%s9826_s30 + $0x1148] sm:$0xff]  ;;  %v7087_v38 = vpack.c.bf16 %v870_v29, %v862_v28  ;;  %v7103_v28 = vpack.c.bf16 %v934_v20, %v926_v19  ;;  %v7615_v29 = vpack.c.bf16 %v936_v23, %v928_v21  ;;  %v1016_v19 = vld [vmem:[%s9826_s30 + $0x1550] sm:$0xff]  ;;  %v1033_v23 = vld [vmem:[%s9826_s30 + $0x15d8] sm:$0xff] }
  0xf3   : > { %v1023_v20 = vld [vmem:[%s9826_s30 + $0x1588] sm:$0xff] }
  0xf4   : > { %7068 = vmatpush1.bf16.msra.mxu0 %v7067_v40  ;;  %v7599_v40 = vpack.c.bf16 %v872_v32, %v864_v30  ;;  %v950_v32 = vld [vmem:[%s9826_s30 + $0x1340] sm:$0xff]  ;;  %v1031_v21 = vld [vmem:[%s9826_s30 + $0x15c8] sm:$0xff] }
  0xf5   : > { %7580 = vmatpush1.bf16.msra.mxu1 %v7579_v41  ;;  %7070 = vmatprep.subr.bf16.mxu0 %v7069_v42  ;;  %v7089_v41 = vpack.c.bf16 %v887_v34, %v879_v33  ;;  %v878_v42 = vld [vmem:[%s9826_s30 + $0x1100] sm:$0xff]  ;;  %v944_v33 = vld [vmem:[%s9826_s30 + $0x1310] sm:$0xff] }
  0xf6   : > { %7582 = vmatprep.subr.bf16.mxu1 %v7581_v46  ;;  %v888_v46 = vld [vmem:[%s9826_s30 + $0x1150] sm:$0xff] }
  0xf8   : > { %7072 = vmatpush1.bf16.msra.mxu0 %v7071_v52  ;;  %v7091_v52 = vpack.c.bf16 %v886_v43, %v878_v42  ;;  %v958_v43 = vld [vmem:[%s9826_s30 + $0x1380] sm:$0xff] }
  0xf9   : > { %7584 = vmatpush1.bf16.msra.mxu1 %v7583_v53  ;;  %7074 = vmatprep.subr.bf16.mxu0 %v7073_v54  ;;  %v272_v53 = vld [vmem:[%s9940_s3 + $0x910] sm:$0xff]  ;;  %v7603_v54 = vpack.c.bf16 %v888_v46, %v880_v44  ;;  %v966_v44 = vld [vmem:[%s9826_s30 + $0x13c0] sm:$0xff] }
  0xfa   : > { %7586 = vmatprep.subr.bf16.mxu1 %v7585_v58  ;;  %v896_v58 = vld [vmem:[%s9826_s30 + $0x1190] sm:$0xff] }
  0xfb   : > { %v7607_v4 = vpack.c.bf16 %v904_v60, %v896_v58  ;;  %v991_v60 = vld [vmem:[%s9826_s30 + $0x1488] sm:$0xff] }
  0xfc   : > { %7076 = vmatpush1.bf16.msra.mxu0 %v7075_v0  ;;  %v921_v0 = vld [vmem:[%s9826_s30 + $0x1258] sm:$0xff] }
  0xfd   : > { %7588 = vmatpush1.bf16.msra.mxu1 %v7587_v1  ;;  %7078 = vmatprep.subr.bf16.mxu0 %v7077_v2  ;;  %v289_v1 = vld [vmem:[%s9940_s3 + $0xd98] sm:$0xff]  ;;  %v7095_v2 = vpack.c.bf16 %v902_v57, %v894_v56  ;;  %v7609_v9 = vpack.c.bf16 %v921_v0, %v913_v63  ;;  %v982_v56 = vld [vmem:[%s9826_s30 + $0x1440] sm:$0xff]  ;;  %v976_v57 = vld [vmem:[%s9826_s30 + $0x1410] sm:$0xff] }
  0xfe   : > { %7590 = vmatprep.subr.bf16.mxu1 %v7589_v6  ;;  %v910_v6 = vld [vmem:[%s9826_s30 + $0x1200] sm:$0xff]  ;;  %v1001_v63 = vld [vmem:[%s9826_s30 + $0x14d8] sm:$0xff] }
  0xff   : > { %v7099_v16 = vpack.c.bf16 %v918_v7, %v910_v6  ;;  %v7629_v6 = vpack.c.bf16 %v1001_v63, %v993_v62  ;;  %v1000_v7 = vld [vmem:[%s9826_s30 + $0x14d0] sm:$0xff]  ;;  %v1070_v63 = vld [vmem:[%s9826_s30 + $0x1700] sm:$0xff] }
 0x100   : > { %7080 = vmatpush1.bf16.msra.mxu0 %v7079_v12  ;;  %v935_v12 = vld [vmem:[%s9826_s30 + $0x12c8] sm:$0xff] }
 0x101   : > { %7592 = vmatpush1.bf16.msra.mxu1 %v7591_v13  ;;  %7082 = vmatprep.subr.bf16.mxu0 %v7081_v14  ;;  %v929_v13 = vld [vmem:[%s9826_s30 + $0x1298] sm:$0xff] }
 0x102   : > { %7594 = vmatprep.subr.bf16.mxu1 %v7593_v18  ;;  %v937_v14 = vld [vmem:[%s9826_s30 + $0x12d8] sm:$0xff]  ;;  %v7101_v18 = vpack.c.bf16 %v935_v12, %v927_v11 }
 0x103   : > { %2536 = vmatmul.mubr.f32.vlgmr.msra.gmra.mrb[0].mxu0 %v240_v24  ;;  %v7613_v22 = vpack.c.bf16 %v937_v14, %v929_v13  ;;  %v1017_v11 = vld [vmem:[%s9826_s30 + $0x1558] sm:$0xff] }
 0x104   : > { %7084 = vmatpush1.bf16.msra.mxu0 %v7083_v25  ;;  %3248 = vmatmul.mubr.f32.vlgmr.msra.gmra.mrb[0].mxu1 %v240_v24  ;;  %v943_v24 = vld [vmem:[%s9826_s30 + $0x1308] sm:$0xff] }
 0x105   : > { %7596 = vmatpush1.bf16.msra.mxu1 %v7595_v26  ;;  %7086 = vmatprep.subr.bf16.mxu0 %v7085_v27  ;;  %v951_v25 = vld [vmem:[%s9826_s30 + $0x1348] sm:$0xff]  ;;  %v945_v26 = vld [vmem:[%s9826_s30 + $0x1318] sm:$0xff] }
 0x106   : > { %7598 = vmatprep.subr.bf16.mxu1 %v7597_v31  ;;  %2541 = vmatprep.mubr.f32.mxu0 %v257_v37  ;;  %v953_v27 = vld [vmem:[%s9826_s30 + $0x1358] sm:$0xff]  ;;  %v7105_v30 = vpack.c.bf16 %v951_v25, %v943_v24  ;;  %v942_v31 = vld [vmem:[%s9826_s30 + $0x1300] sm:$0xff] }
 0x107   : > { %3253 = vmatprep.mubr.f32.mxu1 %v257_v37  ;;  %2542 = vmatmul.mubr.f32.gmra.mrb[2].mxu0 %v256_v39  ;;  %v7617_v34 = vpack.c.bf16 %v953_v27, %v945_v26  ;;  %v967_v37 = vld [vmem:[%s9826_s30 + $0x13c8] sm:$0xff]  ;;  %v7125_v26 = vpack.c.bf16 %v1031_v21, %v1023_v20  ;;  %v1022_v27 = vld [vmem:[%s9826_s30 + $0x1580] sm:$0xff] }
 0x108   : > { %7088 = vmatpush1.bf16.msra.mxu0 %v7087_v38  ;;  %3254 = vmatmul.mubr.f32.gmra.mrb[2].mxu1 %v256_v39  ;;  %v961_v38 = vld [vmem:[%s9826_s30 + $0x1398] sm:$0xff]  ;;  %v7109_v42 = vpack.c.bf16 %v967_v37, %v959_v36 }
 0x109   : > { %7600 = vmatpush1.bf16.msra.mxu1 %v7599_v40  ;;  %7090 = vmatprep.subr.bf16.mxu0 %v7089_v41  ;;  %v969_v39 = vld [vmem:[%s9826_s30 + $0x13d8] sm:$0xff]  ;;  %v7107_v40 = vpack.c.bf16 %v950_v32, %v942_v31  ;;  %v7619_v41 = vpack.c.bf16 %v952_v35, %v944_v33  ;;  %v1032_v31 = vld [vmem:[%s9826_s30 + $0x15d0] sm:$0xff]  ;;  %v1039_v32 = vld [vmem:[%s9826_s30 + $0x1608] sm:$0xff] }
 0x10a   : > { %7602 = vmatprep.subr.bf16.mxu1 %v7601_v45  ;;  %2547 = vmatprep.mubr.f32.mxu0 %v273_v51  ;;  %v960_v45 = vld [vmem:[%s9826_s30 + $0x1390] sm:$0xff]  ;;  %v7621_v46 = vpack.c.bf16 %v969_v39, %v961_v38  ;;  %v1047_v33 = vld [vmem:[%s9826_s30 + $0x1648] sm:$0xff]  ;;  %v1049_v35 = vld [vmem:[%s9826_s30 + $0x1658] sm:$0xff] }
 0x10b   : > { %3259 = vmatprep.mubr.f32.mxu1 %v273_v51  ;;  %2548 = vmatmul.mubr.f32.gmra.mrb[4].mxu0 %v272_v53  ;;  %v985_v51 = vld [vmem:[%s9826_s30 + $0x1458] sm:$0xff]  ;;  %v7129_v38 = vpack.c.bf16 %v1047_v33, %v1039_v32  ;;  %v1038_v39 = vld [vmem:[%s9826_s30 + $0x1600] sm:$0xff] }
 0x10c   : > { %7092 = vmatpush1.bf16.msra.mxu0 %v7091_v52  ;;  %3260 = vmatmul.mubr.f32.gmra.mrb[4].mxu1 %v272_v53  ;;  %v7111_v52 = vpack.c.bf16 %v966_v44, %v958_v43  ;;  %v7623_v53 = vpack.c.bf16 %v968_v47, %v960_v45  ;;  %v7625_v58 = vpack.c.bf16 %v985_v51, %v977_v50  ;;  %v1048_v43 = vld [vmem:[%s9826_s30 + $0x1650] sm:$0xff]  ;;  %v1055_v44 = vld [vmem:[%s9826_s30 + $0x1688] sm:$0xff]  ;;  %v1065_v47 = vld [vmem:[%s9826_s30 + $0x16d8] sm:$0xff] }
 0x10d   : > { %7604 = vmatpush1.bf16.msra.mxu1 %v7603_v54  ;;  %7094 = vmatprep.subr.bf16.mxu0 %v7093_v55  ;;  %v7113_v54 = vpack.c.bf16 %v983_v49, %v975_v48  ;;  %v974_v55 = vld [vmem:[%s9826_s30 + $0x1400] sm:$0xff]  ;;  %v1063_v45 = vld [vmem:[%s9826_s30 + $0x16c8] sm:$0xff] }
 0x10e   : > { %7606 = vmatprep.subr.bf16.mxu1 %v7605_v59  ;;  %2553 = vmatprep.mubr.f32.mxu0 %v289_v1  ;;  %v984_v59 = vld [vmem:[%s9826_s30 + $0x1450] sm:$0xff]  ;;  %v7115_v0 = vpack.c.bf16 %v982_v56, %v974_v55  ;;  %v7133_v50 = vpack.c.bf16 %v1063_v45, %v1055_v44  ;;  %v1054_v51 = vld [vmem:[%s9826_s30 + $0x1680] sm:$0xff]  ;;  %v1071_v56 = vld [vmem:[%s9826_s30 + $0x1708] sm:$0xff] }
 0x10f   : > { %3265 = vmatprep.mubr.f32.mxu1 %v289_v1  ;;  %2554 = vmatmul.mubr.f32.gmra.mrb[6].mxu0 %v288_v3  ;;  %v7627_v1 = vpack.c.bf16 %v984_v59, %v976_v57  ;;  %v1064_v55 = vld [vmem:[%s9826_s30 + $0x16d0] sm:$0xff]  ;;  %v1079_v57 = vld [vmem:[%s9826_s30 + $0x1748] sm:$0xff]  ;;  %v1081_v59 = vld [vmem:[%s9826_s30 + $0x1758] sm:$0xff] }
 0x110   : > { %7096 = vmatpush1.bf16.msra.mxu0 %v7095_v2  ;;  %3266 = vmatmul.mubr.f32.gmra.mrb[6].mxu1 %v288_v3  ;;  %v7117_v2 = vpack.c.bf16 %v999_v61, %v991_v60  ;;  %v990_v3 = vld [vmem:[%s9826_s30 + $0x1480] sm:$0xff]  ;;  %v7137_v62 = vpack.c.bf16 %v1079_v57, %v1071_v56  ;;  %v1145_v44 = vld [vmem:[%s9826_s30 + $0x1958] sm:$0xff]  ;;  %v259_v45 = vld [vmem:[%s9940_s3 + $0x4a8] sm:$0xff] }
 0x111   : > { %7608 = vmatpush1.bf16.msra.mxu1 %v7607_v4  ;;  %7098 = vmatprep.subr.bf16.mxu0 %v7097_v5  ;;  %v998_v4 = vld [vmem:[%s9826_s30 + $0x14c0] sm:$0xff]  ;;  %v992_v5 = vld [vmem:[%s9826_s30 + $0x1490] sm:$0xff]  ;;  %v1159_v56 = vld [vmem:[%s9826_s30 + $0x19c8] sm:$0xff] }
 0x112   : > { %7610 = vmatprep.subr.bf16.mxu1 %v7609_v9  ;;  %2624 = vmatprep.mubr.f32.mxu0 %v243_v15  ;;  %v1015_v9 = vld [vmem:[%s9826_s30 + $0x1548] sm:$0xff]  ;;  %v7119_v12 = vpack.c.bf16 %v998_v4, %v990_v3  ;;  %v7631_v13 = vpack.c.bf16 %v1000_v7, %v992_v5  ;;  %v1080_v3 = vld [vmem:[%s9826_s30 + $0x1750] sm:$0xff]  ;;  %v1097_v7 = vld [vmem:[%s9826_s30 + $0x17d8] sm:$0xff] }
 0x113   : > { %3336 = vmatprep.mubr.f32.mxu1 %v243_v15  ;;  %v7121_v14 = vpack.c.bf16 %v1015_v9, %v1007_v8  ;;  %v1006_v15 = vld [vmem:[%s9826_s30 + $0x1500] sm:$0xff]  ;;  %v1087_v4 = vld [vmem:[%s9826_s30 + $0x1788] sm:$0xff]  ;;  %v1153_v57 = vld [vmem:[%s9826_s30 + $0x1998] sm:$0xff] }
 0x114   : > { %7100 = vmatpush1.bf16.msra.mxu0 %v7099_v16  ;;  %v1014_v16 = vld [vmem:[%s9826_s30 + $0x1540] sm:$0xff]  ;;  %v1095_v5 = vld [vmem:[%s9826_s30 + $0x17c8] sm:$0xff] }
 0x115   : > { %7612 = vmatpush1.bf16.msra.mxu1 %v7611_v17  ;;  %7102 = vmatprep.subr.bf16.mxu0 %v7101_v18  ;;  %v1008_v17 = vld [vmem:[%s9826_s30 + $0x1510] sm:$0xff]  ;;  %v7633_v18 = vpack.c.bf16 %v1017_v11, %v1009_v10  ;;  %v7123_v24 = vpack.c.bf16 %v1014_v16, %v1006_v15  ;;  %v7141_v10 = vpack.c.bf16 %v1095_v5, %v1087_v4  ;;  %v1086_v11 = vld [vmem:[%s9826_s30 + $0x1780] sm:$0xff]  ;;  %v1103_v16 = vld [vmem:[%s9826_s30 + $0x1808] sm:$0xff] }
 0x116   : > { %7614 = vmatprep.subr.bf16.mxu1 %v7613_v22  ;;  %v1025_v22 = vld [vmem:[%s9826_s30 + $0x1598] sm:$0xff]  ;;  %v7635_v25 = vpack.c.bf16 %v1016_v19, %v1008_v17  ;;  %v1096_v15 = vld [vmem:[%s9826_s30 + $0x17d0] sm:$0xff]  ;;  %v1111_v17 = vld [vmem:[%s9826_s30 + $0x1848] sm:$0xff] }
 0x117   : > { %v1113_v19 = vld [vmem:[%s9826_s30 + $0x1858] sm:$0xff]  ;;  %v242_v32 = vld [vmem:[%s9940_s3 + $0x20] sm:$0xff]  ;;  %v1160_v4 = vld [vmem:[%s9826_s30 + $0x19d0] sm:$0xff] }
 0x118   : > { %7104 = vmatpush1.bf16.msra.mxu0 %v7103_v28  ;;  %v1030_v28 = vld [vmem:[%s9826_s30 + $0x15c0] sm:$0xff]  ;;  %v1167_v5 = vld [vmem:[%s9826_s30 + $0x1a08] sm:$0xff] }
 0x119   : > { %7616 = vmatpush1.bf16.msra.mxu1 %v7615_v29  ;;  %7106 = vmatprep.subr.bf16.mxu0 %v7105_v30  ;;  %v1024_v29 = vld [vmem:[%s9826_s30 + $0x1590] sm:$0xff]  ;;  %v7637_v30 = vpack.c.bf16 %v1033_v23, %v1025_v22  ;;  %v7127_v36 = vpack.c.bf16 %v1030_v28, %v1022_v27  ;;  %v7145_v22 = vpack.c.bf16 %v1111_v17, %v1103_v16  ;;  %v1102_v23 = vld [vmem:[%s9826_s30 + $0x1800] sm:$0xff]  ;;  %v1119_v28 = vld [vmem:[%s9826_s30 + $0x1888] sm:$0xff] }
 0x11a   : > { %7618 = vmatprep.subr.bf16.mxu1 %v7617_v34  ;;  %v1041_v34 = vld [vmem:[%s9826_s30 + $0x1618] sm:$0xff]  ;;  %v7639_v37 = vpack.c.bf16 %v1032_v31, %v1024_v29  ;;  %v1112_v27 = vld [vmem:[%s9826_s30 + $0x1850] sm:$0xff]  ;;  %v1127_v29 = vld [vmem:[%s9826_s30 + $0x18c8] sm:$0xff] }
 0x11b   : > { %v1129_v31 = vld [vmem:[%s9826_s30 + $0x18d8] sm:$0xff]  ;;  %v1168_v16 = vld [vmem:[%s9826_s30 + $0x1a10] sm:$0xff] }
 0x11c   : > { %7108 = vmatpush1.bf16.msra.mxu0 %v7107_v40  ;;  %v1046_v40 = vld [vmem:[%s9826_s30 + $0x1640] sm:$0xff] }
 0x11d   : > { %7620 = vmatpush1.bf16.msra.mxu1 %v7619_v41  ;;  %7110 = vmatprep.subr.bf16.mxu0 %v7109_v42  ;;  %v1040_v41 = vld [vmem:[%s9826_s30 + $0x1610] sm:$0xff]  ;;  %v7641_v42 = vpack.c.bf16 %v1049_v35, %v1041_v34  ;;  %v7131_v48 = vpack.c.bf16 %v1046_v40, %v1038_v39  ;;  %v7149_v35 = vpack.c.bf16 %v1127_v29, %v1119_v28  ;;  %v1190_v28 = vld [vmem:[%s9826_s30 + $0x1ac0] sm:$0xff] }
 0x11e   : > { %7622 = vmatprep.subr.bf16.mxu1 %v7621_v46  ;;  %v1057_v46 = vld [vmem:[%s9826_s30 + $0x1698] sm:$0xff]  ;;  %v7643_v49 = vpack.c.bf16 %v1048_v43, %v1040_v41  ;;  %v1128_v40 = vld [vmem:[%s9826_s30 + $0x18d0] sm:$0xff]  ;;  %v1135_v41 = vld [vmem:[%s9826_s30 + $0x1908] sm:$0xff] }
 0x11f   : > { %v1137_v43 = vld [vmem:[%s9826_s30 + $0x1918] sm:$0xff]  ;;  %v1184_v29 = vld [vmem:[%s9826_s30 + $0x1a90] sm:$0xff] }
 0x120   : > { %7112 = vmatpush1.bf16.msra.mxu0 %v7111_v52  ;;  %v1062_v52 = vld [vmem:[%s9826_s30 + $0x16c0] sm:$0xff] }
 0x121   : > { %7624 = vmatpush1.bf16.msra.mxu1 %v7623_v53  ;;  %7114 = vmatprep.subr.bf16.mxu0 %v7113_v54  ;;  %v1056_v53 = vld [vmem:[%s9826_s30 + $0x1690] sm:$0xff]  ;;  %v7645_v54 = vpack.c.bf16 %v1065_v47, %v1057_v46  ;;  %v7135_v60 = vpack.c.bf16 %v1062_v52, %v1054_v51  ;;  %v258_v47 = vld [vmem:[%s9940_s3 + $0x4a0] sm:$0xff] }
 0x122   : > { %7626 = vmatprep.subr.bf16.mxu1 %v7625_v58  ;;  %v1073_v58 = vld [vmem:[%s9826_s30 + $0x1718] sm:$0xff]  ;;  %v7647_v61 = vpack.c.bf16 %v1064_v55, %v1056_v53  ;;  %v1142_v51 = vld [vmem:[%s9826_s30 + $0x1940] sm:$0xff]  ;;  %v1136_v52 = vld [vmem:[%s9826_s30 + $0x1910] sm:$0xff]  ;;  %v7665_v53 = vpack.c.bf16 %v1145_v44, %v1137_v43 }
 0x123   : > { %v1151_v55 = vld [vmem:[%s9826_s30 + $0x1988] sm:$0xff]  ;;  %v1208_v43 = vld [vmem:[%s9826_s30 + $0x1b50] sm:$0xff] }
 0x124   : > { %7116 = vmatpush1.bf16.msra.mxu0 %v7115_v0  ;;  %v1078_v0 = vld [vmem:[%s9826_s30 + $0x1740] sm:$0xff]  ;;  %v1215_v44 = vld [vmem:[%s9826_s30 + $0x1b88] sm:$0xff] }
 0x125   : > { %7628 = vmatpush1.bf16.msra.mxu1 %v7627_v1  ;;  %7118 = vmatprep.subr.bf16.mxu0 %v7117_v2  ;;  %v1072_v1 = vld [vmem:[%s9826_s30 + $0x1710] sm:$0xff]  ;;  %v7649_v2 = vpack.c.bf16 %v1081_v59, %v1073_v58  ;;  %v7139_v8 = vpack.c.bf16 %v1078_v0, %v1070_v63  ;;  %v1161_v58 = vld [vmem:[%s9826_s30 + $0x19d8] sm:$0xff]  ;;  %v275_v59 = vld [vmem:[%s9940_s3 + $0x928] sm:$0xff]  ;;  %v7157_v63 = vpack.c.bf16 %v1159_v56, %v1151_v55 }
 0x126   : > { %7630 = vmatprep.subr.bf16.mxu1 %v7629_v6  ;;  %v1089_v6 = vld [vmem:[%s9826_s30 + $0x1798] sm:$0xff]  ;;  %v7651_v9 = vpack.c.bf16 %v1080_v3, %v1072_v1  ;;  %v1150_v0 = vld [vmem:[%s9826_s30 + $0x1980] sm:$0xff]  ;;  %v7669_v3 = vpack.c.bf16 %v1161_v58, %v1153_v57  ;;  %v1224_v55 = vld [vmem:[%s9826_s30 + $0x1bd0] sm:$0xff] }
 0x127   : > { %v1158_v1 = vld [vmem:[%s9826_s30 + $0x19c0] sm:$0xff]  ;;  %v1231_v56 = vld [vmem:[%s9826_s30 + $0x1c08] sm:$0xff]  ;;  %v1233_v58 = vld [vmem:[%s9826_s30 + $0x1c18] sm:$0xff] }
 0x128   : > { %7120 = vmatpush1.bf16.msra.mxu0 %v7119_v12  ;;  %v1094_v12 = vld [vmem:[%s9826_s30 + $0x17c0] sm:$0xff]  ;;  %v1239_v57 = vld [vmem:[%s9826_s30 + $0x1c48] sm:$0xff] }
 0x129   : > { %7632 = vmatpush1.bf16.msra.mxu1 %v7631_v13  ;;  %7122 = vmatprep.subr.bf16.mxu0 %v7121_v14  ;;  %v1088_v13 = vld [vmem:[%s9826_s30 + $0x1790] sm:$0xff]  ;;  %v7653_v14 = vpack.c.bf16 %v1097_v7, %v1089_v6  ;;  %v7143_v20 = vpack.c.bf16 %v1094_v12, %v1086_v11  ;;  %v1175_v6 = vld [vmem:[%s9826_s30 + $0x1a48] sm:$0xff]  ;;  %v1169_v7 = vld [vmem:[%s9826_s30 + $0x1a18] sm:$0xff] }
 0x12a   : > { %7634 = vmatprep.subr.bf16.mxu1 %v7633_v18  ;;  %v1105_v18 = vld [vmem:[%s9826_s30 + $0x1818] sm:$0xff]  ;;  %v7655_v21 = vpack.c.bf16 %v1096_v15, %v1088_v13  ;;  %v290_v11 = vld [vmem:[%s9940_s3 + $0xda0] sm:$0xff]  ;;  %v7161_v13 = vpack.c.bf16 %v1175_v6, %v1167_v5  ;;  %v1255_v5 = vld [vmem:[%s9826_s30 + $0x1cc8] sm:$0xff] }
 0x12b   : > { %v1174_v15 = vld [vmem:[%s9826_s30 + $0x1a40] sm:$0xff]  ;;  %v1249_v6 = vld [vmem:[%s9826_s30 + $0x1c98] sm:$0xff] }
 0x12c   : > { %7124 = vmatpush1.bf16.msra.mxu0 %v7123_v24  ;;  %v1110_v24 = vld [vmem:[%s9826_s30 + $0x1840] sm:$0xff] }
 0x12d   : > { %7636 = vmatpush1.bf16.msra.mxu1 %v7635_v25  ;;  %7126 = vmatprep.subr.bf16.mxu0 %v7125_v26  ;;  %v1104_v25 = vld [vmem:[%s9826_s30 + $0x1810] sm:$0xff]  ;;  %v7657_v26 = vpack.c.bf16 %v1113_v19, %v1105_v18  ;;  %v7147_v33 = vpack.c.bf16 %v1110_v24, %v1102_v23  ;;  %v1183_v19 = vld [vmem:[%s9826_s30 + $0x1a88] sm:$0xff]  ;;  %v245_v23 = vld [vmem:[%s9940_s3 + $0x38] sm:$0xff] }
 0x12e   : > { %7638 = vmatprep.subr.bf16.mxu1 %v7637_v30  ;;  %v1121_v30 = vld [vmem:[%s9826_s30 + $0x1898] sm:$0xff]  ;;  %v7659_v34 = vpack.c.bf16 %v1112_v27, %v1104_v25  ;;  %v1176_v18 = vld [vmem:[%s9826_s30 + $0x1a50] sm:$0xff]  ;;  %v1182_v27 = vld [vmem:[%s9826_s30 + $0x1a80] sm:$0xff] }
 0x12f   : > { %v7661_v39 = vpack.c.bf16 %v1129_v31, %v1121_v30  ;;  %v7675_v25 = vpack.c.bf16 %v1176_v18, %v1168_v16  ;;  %v1192_v31 = vld [vmem:[%s9826_s30 + $0x1ad0] sm:$0xff]  ;;  %v1263_v16 = vld [vmem:[%s9826_s30 + $0x1d08] sm:$0xff]  ;;  %v1265_v18 = vld [vmem:[%s9826_s30 + $0x1d18] sm:$0xff] }
 0x130   : > { %7128 = vmatpush1.bf16.msra.mxu0 %v7127_v36  ;;  %v1118_v36 = vld [vmem:[%s9826_s30 + $0x1880] sm:$0xff] }
 0x131   : > { %7640 = vmatpush1.bf16.msra.mxu1 %v7639_v37  ;;  %7130 = vmatprep.subr.bf16.mxu0 %v7129_v38  ;;  %v1126_v37 = vld [vmem:[%s9826_s30 + $0x18c0] sm:$0xff]  ;;  %v1120_v38 = vld [vmem:[%s9826_s30 + $0x1890] sm:$0xff] }
 0x132   : > { %7642 = vmatprep.subr.bf16.mxu1 %v7641_v42  ;;  %v1143_v42 = vld [vmem:[%s9826_s30 + $0x1948] sm:$0xff]  ;;  %v7151_v46 = vpack.c.bf16 %v1126_v37, %v1118_v36  ;;  %v7167_v36 = vpack.c.bf16 %v1190_v28, %v1182_v27  ;;  %v7679_v37 = vpack.c.bf16 %v1192_v31, %v1184_v29  ;;  %v1272_v27 = vld [vmem:[%s9826_s30 + $0x1d50] sm:$0xff]  ;;  %v1289_v31 = vld [vmem:[%s9826_s30 + $0x1dd8] sm:$0xff] }
 0x133   : > { %v1279_v28 = vld [vmem:[%s9826_s30 + $0x1d88] sm:$0xff] }
 0x134   : > { %7132 = vmatpush1.bf16.msra.mxu0 %v7131_v48  ;;  %v7663_v48 = vpack.c.bf16 %v1128_v40, %v1120_v38  ;;  %v1206_v40 = vld [vmem:[%s9826_s30 + $0x1b40] sm:$0xff]  ;;  %v1287_v29 = vld [vmem:[%s9826_s30 + $0x1dc8] sm:$0xff] }
 0x135   : > { %7644 = vmatpush1.bf16.msra.mxu1 %v7643_v49  ;;  %7134 = vmatprep.subr.bf16.mxu0 %v7133_v50  ;;  %v7153_v49 = vpack.c.bf16 %v1143_v42, %v1135_v41  ;;  %v1134_v50 = vld [vmem:[%s9826_s30 + $0x1900] sm:$0xff]  ;;  %v1200_v41 = vld [vmem:[%s9826_s30 + $0x1b10] sm:$0xff] }
 0x136   : > { %7646 = vmatprep.subr.bf16.mxu1 %v7645_v54  ;;  %v1144_v54 = vld [vmem:[%s9826_s30 + $0x1950] sm:$0xff] }
 0x138   : > { %7136 = vmatpush1.bf16.msra.mxu0 %v7135_v60  ;;  %v7155_v60 = vpack.c.bf16 %v1142_v51, %v1134_v50  ;;  %v1214_v51 = vld [vmem:[%s9826_s30 + $0x1b80] sm:$0xff] }
 0x139   : > { %7648 = vmatpush1.bf16.msra.mxu1 %v7647_v61  ;;  %7138 = vmatprep.subr.bf16.mxu0 %v7137_v62  ;;  %v274_v61 = vld [vmem:[%s9940_s3 + $0x920] sm:$0xff]  ;;  %v7667_v62 = vpack.c.bf16 %v1144_v54, %v1136_v52 }
 0x13a   : > { %7650 = vmatprep.subr.bf16.mxu1 %v7649_v2  ;;  %v1152_v2 = vld [vmem:[%s9826_s30 + $0x1990] sm:$0xff]  ;;  %v1222_v52 = vld [vmem:[%s9826_s30 + $0x1bc0] sm:$0xff] }
 0x13b   : > { %v7671_v12 = vpack.c.bf16 %v1160_v4, %v1152_v2  ;;  %v1247_v4 = vld [vmem:[%s9826_s30 + $0x1c88] sm:$0xff] }
 0x13c   : > { %7140 = vmatpush1.bf16.msra.mxu0 %v7139_v8  ;;  %v1177_v8 = vld [vmem:[%s9826_s30 + $0x1a58] sm:$0xff] }
 0x13d   : > { %7652 = vmatpush1.bf16.msra.mxu1 %v7651_v9  ;;  %7142 = vmatprep.subr.bf16.mxu0 %v7141_v10  ;;  %v291_v9 = vld [vmem:[%s9940_s3 + $0xda8] sm:$0xff]  ;;  %v7159_v10 = vpack.c.bf16 %v1158_v1, %v1150_v0  ;;  %v7673_v17 = vpack.c.bf16 %v1177_v8, %v1169_v7  ;;  %v1238_v0 = vld [vmem:[%s9826_s30 + $0x1c40] sm:$0xff]  ;;  %v1232_v1 = vld [vmem:[%s9826_s30 + $0x1c10] sm:$0xff] }
 0x13e   : > { %7654 = vmatprep.subr.bf16.mxu1 %v7653_v14  ;;  %v1166_v14 = vld [vmem:[%s9826_s30 + $0x1a00] sm:$0xff]  ;;  %v1257_v7 = vld [vmem:[%s9826_s30 + $0x1cd8] sm:$0xff] }
 0x13f   : > { %v7163_v24 = vpack.c.bf16 %v1174_v15, %v1166_v14  ;;  %v7693_v14 = vpack.c.bf16 %v1257_v7, %v1249_v6  ;;  %v1256_v15 = vld [vmem:[%s9826_s30 + $0x1cd0] sm:$0xff]  ;;  %v1326_v7 = vld [vmem:[%s9826_s30 + $0x1f00] sm:$0xff] }
 0x140   : > { %7144 = vmatpush1.bf16.msra.mxu0 %v7143_v20  ;;  %v1191_v20 = vld [vmem:[%s9826_s30 + $0x1ac8] sm:$0xff] }
 0x141   : > { %7656 = vmatpush1.bf16.msra.mxu1 %v7655_v21  ;;  %7146 = vmatprep.subr.bf16.mxu0 %v7145_v22  ;;  %v1185_v21 = vld [vmem:[%s9826_s30 + $0x1a98] sm:$0xff] }
 0x142   : > { %7658 = vmatprep.subr.bf16.mxu1 %v7657_v26  ;;  %v1193_v22 = vld [vmem:[%s9826_s30 + $0x1ad8] sm:$0xff]  ;;  %v7165_v26 = vpack.c.bf16 %v1191_v20, %v1183_v19 }
 0x143   : > { %2625 = vmatmul.mubr.f32.vlgmr.msra.gmra.mrb[0].mxu0 %v242_v32  ;;  %v7677_v30 = vpack.c.bf16 %v1193_v22, %v1185_v21  ;;  %v1273_v19 = vld [vmem:[%s9826_s30 + $0x1d58] sm:$0xff] }
 0x144   : > { %7148 = vmatpush1.bf16.msra.mxu0 %v7147_v33  ;;  %3337 = vmatmul.mubr.f32.vlgmr.msra.gmra.mrb[0].mxu1 %v242_v32  ;;  %v1199_v32 = vld [vmem:[%s9826_s30 + $0x1b08] sm:$0xff] }
 0x145   : > { %7660 = vmatpush1.bf16.msra.mxu1 %v7659_v34  ;;  %7150 = vmatprep.subr.bf16.mxu0 %v7149_v35  ;;  %v1207_v33 = vld [vmem:[%s9826_s30 + $0x1b48] sm:$0xff]  ;;  %v1201_v34 = vld [vmem:[%s9826_s30 + $0x1b18] sm:$0xff] }
 0x146   : > { %7662 = vmatprep.subr.bf16.mxu1 %v7661_v39  ;;  %2630 = vmatprep.mubr.f32.mxu0 %v259_v45  ;;  %v1209_v35 = vld [vmem:[%s9826_s30 + $0x1b58] sm:$0xff]  ;;  %v7169_v38 = vpack.c.bf16 %v1207_v33, %v1199_v32  ;;  %v1198_v39 = vld [vmem:[%s9826_s30 + $0x1b00] sm:$0xff] }
 0x147   : > { %3342 = vmatprep.mubr.f32.mxu1 %v259_v45  ;;  %2631 = vmatmul.mubr.f32.gmra.mrb[2].mxu0 %v258_v47  ;;  %v7681_v42 = vpack.c.bf16 %v1209_v35, %v1201_v34  ;;  %v1223_v45 = vld [vmem:[%s9826_s30 + $0x1bc8] sm:$0xff]  ;;  %v7189_v34 = vpack.c.bf16 %v1287_v29, %v1279_v28  ;;  %v1278_v35 = vld [vmem:[%s9826_s30 + $0x1d80] sm:$0xff] }
 0x148   : > { %7152 = vmatpush1.bf16.msra.mxu0 %v7151_v46  ;;  %3343 = vmatmul.mubr.f32.gmra.mrb[2].mxu1 %v258_v47  ;;  %v1217_v46 = vld [vmem:[%s9826_s30 + $0x1b98] sm:$0xff]  ;;  %v7173_v50 = vpack.c.bf16 %v1223_v45, %v1215_v44 }
 0x149   : > { %7664 = vmatpush1.bf16.msra.mxu1 %v7663_v48  ;;  %7154 = vmatprep.subr.bf16.mxu0 %v7153_v49  ;;  %v1225_v47 = vld [vmem:[%s9826_s30 + $0x1bd8] sm:$0xff]  ;;  %v7171_v48 = vpack.c.bf16 %v1206_v40, %v1198_v39  ;;  %v7683_v49 = vpack.c.bf16 %v1208_v43, %v1200_v41  ;;  %v1288_v39 = vld [vmem:[%s9826_s30 + $0x1dd0] sm:$0xff]  ;;  %v1295_v40 = vld [vmem:[%s9826_s30 + $0x1e08] sm:$0xff] }
 0x14a   : > { %7666 = vmatprep.subr.bf16.mxu1 %v7665_v53  ;;  %2636 = vmatprep.mubr.f32.mxu0 %v275_v59  ;;  %v1216_v53 = vld [vmem:[%s9826_s30 + $0x1b90] sm:$0xff]  ;;  %v7685_v54 = vpack.c.bf16 %v1225_v47, %v1217_v46  ;;  %v1303_v41 = vld [vmem:[%s9826_s30 + $0x1e48] sm:$0xff]  ;;  %v1305_v43 = vld [vmem:[%s9826_s30 + $0x1e58] sm:$0xff] }
 0x14b   : > { %3348 = vmatprep.mubr.f32.mxu1 %v275_v59  ;;  %2637 = vmatmul.mubr.f32.gmra.mrb[4].mxu0 %v274_v61  ;;  %v1241_v59 = vld [vmem:[%s9826_s30 + $0x1c58] sm:$0xff]  ;;  %v7193_v46 = vpack.c.bf16 %v1303_v41, %v1295_v40  ;;  %v1294_v47 = vld [vmem:[%s9826_s30 + $0x1e00] sm:$0xff]  ;;  %v244_v40 = vld [vmem:[%s9940_s3 + $0x30] sm:$0xff] }
 0x14c   : > { %7156 = vmatpush1.bf16.msra.mxu0 %v7155_v60  ;;  %3349 = vmatmul.mubr.f32.gmra.mrb[4].mxu1 %v274_v61  ;;  %v7175_v60 = vpack.c.bf16 %v1222_v52, %v1214_v51  ;;  %v7687_v61 = vpack.c.bf16 %v1224_v55, %v1216_v53  ;;  %v7689_v2 = vpack.c.bf16 %v1241_v59, %v1233_v58  ;;  %v1304_v51 = vld [vmem:[%s9826_s30 + $0x1e50] sm:$0xff]  ;;  %v1311_v52 = vld [vmem:[%s9826_s30 + $0x1e88] sm:$0xff]  ;;  %v1321_v55 = vld [vmem:[%s9826_s30 + $0x1ed8] sm:$0xff] }
 0x14d   : > { %7668 = vmatpush1.bf16.msra.mxu1 %v7667_v62  ;;  %7158 = vmatprep.subr.bf16.mxu0 %v7157_v63  ;;  %v7177_v62 = vpack.c.bf16 %v1239_v57, %v1231_v56  ;;  %v1230_v63 = vld [vmem:[%s9826_s30 + $0x1c00] sm:$0xff]  ;;  %v1319_v53 = vld [vmem:[%s9826_s30 + $0x1ec8] sm:$0xff] }
 0x14e   : > { %7670 = vmatprep.subr.bf16.mxu1 %v7669_v3  ;;  %2642 = vmatprep.mubr.f32.mxu0 %v291_v9  ;;  %v1240_v3 = vld [vmem:[%s9826_s30 + $0x1c50] sm:$0xff]  ;;  %v7179_v8 = vpack.c.bf16 %v1238_v0, %v1230_v63  ;;  %v7197_v58 = vpack.c.bf16 %v1319_v53, %v1311_v52  ;;  %v1310_v59 = vld [vmem:[%s9826_s30 + $0x1e80] sm:$0xff]  ;;  %v1327_v0 = vld [vmem:[%s9826_s30 + $0x1f08] sm:$0xff] }
 0x14f   : > { %3354 = vmatprep.mubr.f32.mxu1 %v291_v9  ;;  %2643 = vmatmul.mubr.f32.gmra.mrb[6].mxu0 %v290_v11  ;;  %v7691_v9 = vpack.c.bf16 %v1240_v3, %v1232_v1  ;;  %v1320_v63 = vld [vmem:[%s9826_s30 + $0x1ed0] sm:$0xff]  ;;  %v1335_v1 = vld [vmem:[%s9826_s30 + $0x1f48] sm:$0xff]  ;;  %v1337_v3 = vld [vmem:[%s9826_s30 + $0x1f58] sm:$0xff] }
 0x150   : > { %7160 = vmatpush1.bf16.msra.mxu0 %v7159_v10  ;;  %3355 = vmatmul.mubr.f32.gmra.mrb[6].mxu1 %v290_v11  ;;  %v7181_v10 = vpack.c.bf16 %v1255_v5, %v1247_v4  ;;  %v1246_v11 = vld [vmem:[%s9826_s30 + $0x1c80] sm:$0xff]  ;;  %v7201_v6 = vpack.c.bf16 %v1335_v1, %v1327_v0  ;;  %v1401_v52 = vld [vmem:[%s9826_s30 + $0x2158] sm:$0xff]  ;;  %v1415_v0 = vld [vmem:[%s9826_s30 + $0x21c8] sm:$0xff] }
 0x151   : > { %7672 = vmatpush1.bf16.msra.mxu1 %v7671_v12  ;;  %7162 = vmatprep.subr.bf16.mxu0 %v7161_v13  ;;  %v1254_v12 = vld [vmem:[%s9826_s30 + $0x1cc0] sm:$0xff]  ;;  %v1248_v13 = vld [vmem:[%s9826_s30 + $0x1c90] sm:$0xff]  ;;  %v261_v53 = vld [vmem:[%s9940_s3 + $0x4b8] sm:$0xff] }
 0x152   : > { %7674 = vmatprep.subr.bf16.mxu1 %v7673_v17  ;;  %2713 = vmatprep.mubr.f32.mxu0 %v245_v23  ;;  %v1271_v17 = vld [vmem:[%s9826_s30 + $0x1d48] sm:$0xff]  ;;  %v7183_v20 = vpack.c.bf16 %v1254_v12, %v1246_v11  ;;  %v7695_v21 = vpack.c.bf16 %v1256_v15, %v1248_v13  ;;  %v1336_v11 = vld [vmem:[%s9826_s30 + $0x1f50] sm:$0xff]  ;;  %v1353_v15 = vld [vmem:[%s9826_s30 + $0x1fd8] sm:$0xff] }
 0x153   : > { %3425 = vmatprep.mubr.f32.mxu1 %v245_v23  ;;  %v7185_v22 = vpack.c.bf16 %v1271_v17, %v1263_v16  ;;  %v1262_v23 = vld [vmem:[%s9826_s30 + $0x1d00] sm:$0xff]  ;;  %v1343_v12 = vld [vmem:[%s9826_s30 + $0x1f88] sm:$0xff]  ;;  %v1409_v1 = vld [vmem:[%s9826_s30 + $0x2198] sm:$0xff] }
 0x154   : > { %7164 = vmatpush1.bf16.msra.mxu0 %v7163_v24  ;;  %v1270_v24 = vld [vmem:[%s9826_s30 + $0x1d40] sm:$0xff]  ;;  %v1351_v13 = vld [vmem:[%s9826_s30 + $0x1fc8] sm:$0xff] }
 0x155   : > { %7676 = vmatpush1.bf16.msra.mxu1 %v7675_v25  ;;  %7166 = vmatprep.subr.bf16.mxu0 %v7165_v26  ;;  %v1264_v25 = vld [vmem:[%s9826_s30 + $0x1d10] sm:$0xff]  ;;  %v7697_v26 = vpack.c.bf16 %v1273_v19, %v1265_v18  ;;  %v7187_v32 = vpack.c.bf16 %v1270_v24, %v1262_v23  ;;  %v7205_v18 = vpack.c.bf16 %v1351_v13, %v1343_v12  ;;  %v1342_v19 = vld [vmem:[%s9826_s30 + $0x1f80] sm:$0xff]  ;;  %v1359_v24 = vld [vmem:[%s9826_s30 + $0x2008] sm:$0xff] }
 0x156   : > { %7678 = vmatprep.subr.bf16.mxu1 %v7677_v30  ;;  %v1281_v30 = vld [vmem:[%s9826_s30 + $0x1d98] sm:$0xff]  ;;  %v7699_v33 = vpack.c.bf16 %v1272_v27, %v1264_v25  ;;  %v1352_v23 = vld [vmem:[%s9826_s30 + $0x1fd0] sm:$0xff]  ;;  %v1367_v25 = vld [vmem:[%s9826_s30 + $0x2048] sm:$0xff] }
 0x157   : > { %v1369_v27 = vld [vmem:[%s9826_s30 + $0x2058] sm:$0xff]  ;;  %v1416_v12 = vld [vmem:[%s9826_s30 + $0x21d0] sm:$0xff]  ;;  %v1423_v13 = vld [vmem:[%s9826_s30 + $0x2208] sm:$0xff] }
 0x158   : > { %7168 = vmatpush1.bf16.msra.mxu0 %v7167_v36  ;;  %v1286_v36 = vld [vmem:[%s9826_s30 + $0x1dc0] sm:$0xff] }
 0x159   : > { %7680 = vmatpush1.bf16.msra.mxu1 %v7679_v37  ;;  %7170 = vmatprep.subr.bf16.mxu0 %v7169_v38  ;;  %v1280_v37 = vld [vmem:[%s9826_s30 + $0x1d90] sm:$0xff]  ;;  %v7701_v38 = vpack.c.bf16 %v1289_v31, %v1281_v30  ;;  %v7191_v44 = vpack.c.bf16 %v1286_v36, %v1278_v35  ;;  %v7209_v30 = vpack.c.bf16 %v1367_v25, %v1359_v24  ;;  %v1358_v31 = vld [vmem:[%s9826_s30 + $0x2000] sm:$0xff]  ;;  %v1375_v36 = vld [vmem:[%s9826_s30 + $0x2088] sm:$0xff] }
 0x15a   : > { %7682 = vmatprep.subr.bf16.mxu1 %v7681_v42  ;;  %v1297_v42 = vld [vmem:[%s9826_s30 + $0x1e18] sm:$0xff]  ;;  %v7703_v45 = vpack.c.bf16 %v1288_v39, %v1280_v37  ;;  %v1368_v35 = vld [vmem:[%s9826_s30 + $0x2050] sm:$0xff]  ;;  %v1383_v37 = vld [vmem:[%s9826_s30 + $0x20c8] sm:$0xff] }
 0x15b   : > { %v1385_v39 = vld [vmem:[%s9826_s30 + $0x20d8] sm:$0xff]  ;;  %v1424_v24 = vld [vmem:[%s9826_s30 + $0x2210] sm:$0xff] }
 0x15c   : > { %7172 = vmatpush1.bf16.msra.mxu0 %v7171_v48  ;;  %v1302_v48 = vld [vmem:[%s9826_s30 + $0x1e40] sm:$0xff] }
 0x15d   : > { %7684 = vmatpush1.bf16.msra.mxu1 %v7683_v49  ;;  %7174 = vmatprep.subr.bf16.mxu0 %v7173_v50  ;;  %v1296_v49 = vld [vmem:[%s9826_s30 + $0x1e10] sm:$0xff]  ;;  %v7705_v50 = vpack.c.bf16 %v1305_v43, %v1297_v42  ;;  %v7195_v56 = vpack.c.bf16 %v1302_v48, %v1294_v47  ;;  %v7213_v43 = vpack.c.bf16 %v1383_v37, %v1375_v36  ;;  %v1446_v36 = vld [vmem:[%s9826_s30 + $0x22c0] sm:$0xff] }
 0x15e   : > { %7686 = vmatprep.subr.bf16.mxu1 %v7685_v54  ;;  %v1313_v54 = vld [vmem:[%s9826_s30 + $0x1e98] sm:$0xff]  ;;  %v7707_v57 = vpack.c.bf16 %v1304_v51, %v1296_v49  ;;  %v1384_v48 = vld [vmem:[%s9826_s30 + $0x20d0] sm:$0xff]  ;;  %v1391_v49 = vld [vmem:[%s9826_s30 + $0x2108] sm:$0xff] }
 0x15f   : > { %v1393_v51 = vld [vmem:[%s9826_s30 + $0x2118] sm:$0xff]  ;;  %v1440_v37 = vld [vmem:[%s9826_s30 + $0x2290] sm:$0xff] }
 0x160   : > { %7176 = vmatpush1.bf16.msra.mxu0 %v7175_v60  ;;  %v1318_v60 = vld [vmem:[%s9826_s30 + $0x1ec0] sm:$0xff] }
 0x161   : > { %7688 = vmatpush1.bf16.msra.mxu1 %v7687_v61  ;;  %7178 = vmatprep.subr.bf16.mxu0 %v7177_v62  ;;  %v1312_v61 = vld [vmem:[%s9826_s30 + $0x1e90] sm:$0xff]  ;;  %v7709_v62 = vpack.c.bf16 %v1321_v55, %v1313_v54  ;;  %v7199_v4 = vpack.c.bf16 %v1318_v60, %v1310_v59  ;;  %v1398_v59 = vld [vmem:[%s9826_s30 + $0x2140] sm:$0xff] }
 0x162   : > { %7690 = vmatprep.subr.bf16.mxu1 %v7689_v2  ;;  %v1329_v2 = vld [vmem:[%s9826_s30 + $0x1f18] sm:$0xff]  ;;  %v7711_v5 = vpack.c.bf16 %v1320_v63, %v1312_v61  ;;  %v260_v55 = vld [vmem:[%s9940_s3 + $0x4b0] sm:$0xff]  ;;  %v7729_v61 = vpack.c.bf16 %v1401_v52, %v1393_v51  ;;  %v1407_v63 = vld [vmem:[%s9826_s30 + $0x2188] sm:$0xff] }
 0x163   : > { %v1392_v60 = vld [vmem:[%s9826_s30 + $0x2110] sm:$0xff]  ;;  %v1471_v52 = vld [vmem:[%s9826_s30 + $0x2388] sm:$0xff] }
 0x164   : > { %7180 = vmatpush1.bf16.msra.mxu0 %v7179_v8  ;;  %v1334_v8 = vld [vmem:[%s9826_s30 + $0x1f40] sm:$0xff]  ;;  %v1464_v51 = vld [vmem:[%s9826_s30 + $0x2350] sm:$0xff] }
 0x165   : > { %7692 = vmatpush1.bf16.msra.mxu1 %v7691_v9  ;;  %7182 = vmatprep.subr.bf16.mxu0 %v7181_v10  ;;  %v1328_v9 = vld [vmem:[%s9826_s30 + $0x1f10] sm:$0xff]  ;;  %v7713_v10 = vpack.c.bf16 %v1337_v3, %v1329_v2  ;;  %v7203_v16 = vpack.c.bf16 %v1334_v8, %v1326_v7  ;;  %v1417_v2 = vld [vmem:[%s9826_s30 + $0x21d8] sm:$0xff]  ;;  %v7221_v7 = vpack.c.bf16 %v1415_v0, %v1407_v63  ;;  %v1406_v8 = vld [vmem:[%s9826_s30 + $0x2180] sm:$0xff] }
 0x166   : > { %7694 = vmatprep.subr.bf16.mxu1 %v7693_v14  ;;  %v1345_v14 = vld [vmem:[%s9826_s30 + $0x1f98] sm:$0xff]  ;;  %v7715_v17 = vpack.c.bf16 %v1336_v11, %v1328_v9  ;;  %v1414_v9 = vld [vmem:[%s9826_s30 + $0x21c0] sm:$0xff]  ;;  %v7733_v11 = vpack.c.bf16 %v1417_v2, %v1409_v1  ;;  %v1480_v63 = vld [vmem:[%s9826_s30 + $0x23d0] sm:$0xff] }
 0x167   : > { %v277_v3 = vld [vmem:[%s9940_s3 + $0x938] sm:$0xff]  ;;  %v1487_v0 = vld [vmem:[%s9826_s30 + $0x2408] sm:$0xff] }
 0x168   : > { %7184 = vmatpush1.bf16.msra.mxu0 %v7183_v20  ;;  %v1350_v20 = vld [vmem:[%s9826_s30 + $0x1fc0] sm:$0xff]  ;;  %v1495_v1 = vld [vmem:[%s9826_s30 + $0x2448] sm:$0xff]  ;;  %v1489_v2 = vld [vmem:[%s9826_s30 + $0x2418] sm:$0xff] }
 0x169   : > { %7696 = vmatpush1.bf16.msra.mxu1 %v7695_v21  ;;  %7186 = vmatprep.subr.bf16.mxu0 %v7185_v22  ;;  %v1344_v21 = vld [vmem:[%s9826_s30 + $0x1f90] sm:$0xff]  ;;  %v7717_v22 = vpack.c.bf16 %v1353_v15, %v1345_v14  ;;  %v7207_v28 = vpack.c.bf16 %v1350_v20, %v1342_v19  ;;  %v1431_v14 = vld [vmem:[%s9826_s30 + $0x2248] sm:$0xff]  ;;  %v1425_v15 = vld [vmem:[%s9826_s30 + $0x2218] sm:$0xff] }
 0x16a   : > { %7698 = vmatprep.subr.bf16.mxu1 %v7697_v26  ;;  %v1361_v26 = vld [vmem:[%s9826_s30 + $0x2018] sm:$0xff]  ;;  %v7719_v29 = vpack.c.bf16 %v1352_v23, %v1344_v21  ;;  %v292_v19 = vld [vmem:[%s9940_s3 + $0xdb0] sm:$0xff]  ;;  %v7225_v21 = vpack.c.bf16 %v1431_v14, %v1423_v13  ;;  %v1430_v23 = vld [vmem:[%s9826_s30 + $0x2240] sm:$0xff] }
 0x16b   : > { %v1511_v13 = vld [vmem:[%s9826_s30 + $0x24c8] sm:$0xff]  ;;  %v1505_v14 = vld [vmem:[%s9826_s30 + $0x2498] sm:$0xff] }
 0x16c   : > { %7188 = vmatpush1.bf16.msra.mxu0 %v7187_v32  ;;  %v1366_v32 = vld [vmem:[%s9826_s30 + $0x2040] sm:$0xff] }
 0x16d   : > { %7700 = vmatpush1.bf16.msra.mxu1 %v7699_v33  ;;  %7190 = vmatprep.subr.bf16.mxu0 %v7189_v34  ;;  %v1360_v33 = vld [vmem:[%s9826_s30 + $0x2010] sm:$0xff]  ;;  %v7721_v34 = vpack.c.bf16 %v1369_v27, %v1361_v26  ;;  %v7211_v41 = vpack.c.bf16 %v1366_v32, %v1358_v31  ;;  %v1439_v27 = vld [vmem:[%s9826_s30 + $0x2288] sm:$0xff] }
 0x16e   : > { %7702 = vmatprep.subr.bf16.mxu1 %v7701_v38  ;;  %v1377_v38 = vld [vmem:[%s9826_s30 + $0x2098] sm:$0xff]  ;;  %v7723_v42 = vpack.c.bf16 %v1368_v35, %v1360_v33  ;;  %v1432_v26 = vld [vmem:[%s9826_s30 + $0x2250] sm:$0xff]  ;;  %v247_v31 = vld [vmem:[%s9940_s3 + $0x48] sm:$0xff] }
 0x16f   : > { %v7725_v47 = vpack.c.bf16 %v1385_v39, %v1377_v38  ;;  %v7739_v33 = vpack.c.bf16 %v1432_v26, %v1424_v24  ;;  %v1438_v35 = vld [vmem:[%s9826_s30 + $0x2280] sm:$0xff]  ;;  %v1448_v39 = vld [vmem:[%s9826_s30 + $0x22d0] sm:$0xff]  ;;  %v1519_v24 = vld [vmem:[%s9826_s30 + $0x2508] sm:$0xff] }
 0x170   : > { %7192 = vmatpush1.bf16.msra.mxu0 %v7191_v44  ;;  %v1374_v44 = vld [vmem:[%s9826_s30 + $0x2080] sm:$0xff]  ;;  %v1521_v26 = vld [vmem:[%s9826_s30 + $0x2518] sm:$0xff] }
 0x171   : > { %7704 = vmatpush1.bf16.msra.mxu1 %v7703_v45  ;;  %7194 = vmatprep.subr.bf16.mxu0 %v7193_v46  ;;  %v1382_v45 = vld [vmem:[%s9826_s30 + $0x20c0] sm:$0xff]  ;;  %v1376_v46 = vld [vmem:[%s9826_s30 + $0x2090] sm:$0xff] }
 0x172   : > { %7706 = vmatprep.subr.bf16.mxu1 %v7705_v50  ;;  %v1399_v50 = vld [vmem:[%s9826_s30 + $0x2148] sm:$0xff]  ;;  %v7215_v54 = vpack.c.bf16 %v1382_v45, %v1374_v44  ;;  %v7231_v44 = vpack.c.bf16 %v1446_v36, %v1438_v35  ;;  %v7743_v45 = vpack.c.bf16 %v1448_v39, %v1440_v37  ;;  %v1528_v35 = vld [vmem:[%s9826_s30 + $0x2550] sm:$0xff]  ;;  %v1545_v39 = vld [vmem:[%s9826_s30 + $0x25d8] sm:$0xff] }
 0x173   : > { %v1535_v36 = vld [vmem:[%s9826_s30 + $0x2588] sm:$0xff] }
 0x174   : > { %7196 = vmatpush1.bf16.msra.mxu0 %v7195_v56  ;;  %v7727_v56 = vpack.c.bf16 %v1384_v48, %v1376_v46  ;;  %v1462_v48 = vld [vmem:[%s9826_s30 + $0x2340] sm:$0xff]  ;;  %v1543_v37 = vld [vmem:[%s9826_s30 + $0x25c8] sm:$0xff] }
 0x175   : > { %7708 = vmatpush1.bf16.msra.mxu1 %v7707_v57  ;;  %7198 = vmatprep.subr.bf16.mxu0 %v7197_v58  ;;  %v7217_v57 = vpack.c.bf16 %v1399_v50, %v1391_v49  ;;  %v1390_v58 = vld [vmem:[%s9826_s30 + $0x2100] sm:$0xff]  ;;  %v1456_v49 = vld [vmem:[%s9826_s30 + $0x2310] sm:$0xff] }
 0x176   : > { %7710 = vmatprep.subr.bf16.mxu1 %v7709_v62  ;;  %v1400_v62 = vld [vmem:[%s9826_s30 + $0x2150] sm:$0xff] }
 0x178   : > { %7200 = vmatpush1.bf16.msra.mxu0 %v7199_v4  ;;  %v7219_v4 = vpack.c.bf16 %v1398_v59, %v1390_v58  ;;  %v1470_v59 = vld [vmem:[%s9826_s30 + $0x2380] sm:$0xff] }
 0x179   : > { %7712 = vmatpush1.bf16.msra.mxu1 %v7711_v5  ;;  %7202 = vmatprep.subr.bf16.mxu0 %v7201_v6  ;;  %v276_v5 = vld [vmem:[%s9940_s3 + $0x930] sm:$0xff]  ;;  %v7731_v6 = vpack.c.bf16 %v1400_v62, %v1392_v60  ;;  %v1478_v60 = vld [vmem:[%s9826_s30 + $0x23c0] sm:$0xff] }
 0x17a   : > { %7714 = vmatprep.subr.bf16.mxu1 %v7713_v10  ;;  %v1408_v10 = vld [vmem:[%s9826_s30 + $0x2190] sm:$0xff] }
 0x17b   : > { %v7735_v20 = vpack.c.bf16 %v1416_v12, %v1408_v10  ;;  %v1503_v12 = vld [vmem:[%s9826_s30 + $0x2488] sm:$0xff] }
 0x17c   : > { %7204 = vmatpush1.bf16.msra.mxu0 %v7203_v16  ;;  %v1433_v16 = vld [vmem:[%s9826_s30 + $0x2258] sm:$0xff] }
 0x17d   : > { %7716 = vmatpush1.bf16.msra.mxu1 %v7715_v17  ;;  %7206 = vmatprep.subr.bf16.mxu0 %v7205_v18  ;;  %v293_v17 = vld [vmem:[%s9940_s3 + $0xdb8] sm:$0xff]  ;;  %v7223_v18 = vpack.c.bf16 %v1414_v9, %v1406_v8  ;;  %v7737_v25 = vpack.c.bf16 %v1433_v16, %v1425_v15  ;;  %v1494_v8 = vld [vmem:[%s9826_s30 + $0x2440] sm:$0xff]  ;;  %v1488_v9 = vld [vmem:[%s9826_s30 + $0x2410] sm:$0xff] }
 0x17e   : > { %7718 = vmatprep.subr.bf16.mxu1 %v7717_v22  ;;  %v1422_v22 = vld [vmem:[%s9826_s30 + $0x2200] sm:$0xff]  ;;  %v1513_v15 = vld [vmem:[%s9826_s30 + $0x24d8] sm:$0xff] }
 0x17f   : > { %v7227_v32 = vpack.c.bf16 %v1430_v23, %v1422_v22  ;;  %v7757_v22 = vpack.c.bf16 %v1513_v15, %v1505_v14  ;;  %v1512_v23 = vld [vmem:[%s9826_s30 + $0x24d0] sm:$0xff]  ;;  %v1582_v15 = vld [vmem:[%s9826_s30 + $0x2700] sm:$0xff] }
 0x180   : > { %7208 = vmatpush1.bf16.msra.mxu0 %v7207_v28  ;;  %v1447_v28 = vld [vmem:[%s9826_s30 + $0x22c8] sm:$0xff] }
 0x181   : > { %7720 = vmatpush1.bf16.msra.mxu1 %v7719_v29  ;;  %7210 = vmatprep.subr.bf16.mxu0 %v7209_v30  ;;  %v1441_v29 = vld [vmem:[%s9826_s30 + $0x2298] sm:$0xff] }
 0x182   : > { %7722 = vmatprep.subr.bf16.mxu1 %v7721_v34  ;;  %v1449_v30 = vld [vmem:[%s9826_s30 + $0x22d8] sm:$0xff]  ;;  %v7229_v34 = vpack.c.bf16 %v1447_v28, %v1439_v27 }
 0x183   : > { %2714 = vmatmul.mubr.f32.vlgmr.msra.gmra.mrb[0].mxu0 %v244_v40  ;;  %v7741_v38 = vpack.c.bf16 %v1449_v30, %v1441_v29  ;;  %v1529_v27 = vld [vmem:[%s9826_s30 + $0x2558] sm:$0xff] }
 0x184   : > { %7212 = vmatpush1.bf16.msra.mxu0 %v7211_v41  ;;  %3426 = vmatmul.mubr.f32.vlgmr.msra.gmra.mrb[0].mxu1 %v244_v40  ;;  %v1455_v40 = vld [vmem:[%s9826_s30 + $0x2308] sm:$0xff] }
 0x185   : > { %7724 = vmatpush1.bf16.msra.mxu1 %v7723_v42  ;;  %7214 = vmatprep.subr.bf16.mxu0 %v7213_v43  ;;  %v1463_v41 = vld [vmem:[%s9826_s30 + $0x2348] sm:$0xff]  ;;  %v1457_v42 = vld [vmem:[%s9826_s30 + $0x2318] sm:$0xff] }
 0x186   : > { %7726 = vmatprep.subr.bf16.mxu1 %v7725_v47  ;;  %2719 = vmatprep.mubr.f32.mxu0 %v261_v53  ;;  %v1465_v43 = vld [vmem:[%s9826_s30 + $0x2358] sm:$0xff]  ;;  %v7233_v46 = vpack.c.bf16 %v1463_v41, %v1455_v40  ;;  %v1454_v47 = vld [vmem:[%s9826_s30 + $0x2300] sm:$0xff] }
 0x187   : > { %3431 = vmatprep.mubr.f32.mxu1 %v261_v53  ;;  %2720 = vmatmul.mubr.f32.gmra.mrb[2].mxu0 %v260_v55  ;;  %v7745_v50 = vpack.c.bf16 %v1465_v43, %v1457_v42  ;;  %v1479_v53 = vld [vmem:[%s9826_s30 + $0x23c8] sm:$0xff]  ;;  %v7253_v42 = vpack.c.bf16 %v1543_v37, %v1535_v36  ;;  %v1534_v43 = vld [vmem:[%s9826_s30 + $0x2580] sm:$0xff] }
 0x188   : > { %7216 = vmatpush1.bf16.msra.mxu0 %v7215_v54  ;;  %3432 = vmatmul.mubr.f32.gmra.mrb[2].mxu1 %v260_v55  ;;  %v1473_v54 = vld [vmem:[%s9826_s30 + $0x2398] sm:$0xff]  ;;  %v7237_v58 = vpack.c.bf16 %v1479_v53, %v1471_v52 }
 0x189   : > { %7728 = vmatpush1.bf16.msra.mxu1 %v7727_v56  ;;  %7218 = vmatprep.subr.bf16.mxu0 %v7217_v57  ;;  %v1481_v55 = vld [vmem:[%s9826_s30 + $0x23d8] sm:$0xff]  ;;  %v7235_v56 = vpack.c.bf16 %v1462_v48, %v1454_v47  ;;  %v7747_v57 = vpack.c.bf16 %v1464_v51, %v1456_v49  ;;  %v1544_v47 = vld [vmem:[%s9826_s30 + $0x25d0] sm:$0xff]  ;;  %v1551_v48 = vld [vmem:[%s9826_s30 + $0x2608] sm:$0xff] }
 0x18a   : > { %7730 = vmatprep.subr.bf16.mxu1 %v7729_v61  ;;  %2725 = vmatprep.mubr.f32.mxu0 %v277_v3  ;;  %v1472_v61 = vld [vmem:[%s9826_s30 + $0x2390] sm:$0xff]  ;;  %v7749_v62 = vpack.c.bf16 %v1481_v55, %v1473_v54  ;;  %v1559_v49 = vld [vmem:[%s9826_s30 + $0x2648] sm:$0xff]  ;;  %v1561_v51 = vld [vmem:[%s9826_s30 + $0x2658] sm:$0xff] }
 0x18b   : > { %3437 = vmatprep.mubr.f32.mxu1 %v277_v3  ;;  %2726 = vmatmul.mubr.f32.gmra.mrb[4].mxu0 %v276_v5  ;;  %v1497_v3 = vld [vmem:[%s9826_s30 + $0x2458] sm:$0xff]  ;;  %v7257_v54 = vpack.c.bf16 %v1559_v49, %v1551_v48  ;;  %v1550_v55 = vld [vmem:[%s9826_s30 + $0x2600] sm:$0xff] }
 0x18c   : > { %7220 = vmatpush1.bf16.msra.mxu0 %v7219_v4  ;;  %3438 = vmatmul.mubr.f32.gmra.mrb[4].mxu1 %v276_v5  ;;  %v7239_v4 = vpack.c.bf16 %v1478_v60, %v1470_v59  ;;  %v7751_v5 = vpack.c.bf16 %v1480_v63, %v1472_v61  ;;  %v7753_v10 = vpack.c.bf16 %v1497_v3, %v1489_v2  ;;  %v1560_v59 = vld [vmem:[%s9826_s30 + $0x2650] sm:$0xff]  ;;  %v1567_v60 = vld [vmem:[%s9826_s30 + $0x2688] sm:$0xff]  ;;  %v1577_v63 = vld [vmem:[%s9826_s30 + $0x26d8] sm:$0xff] }
 0x18d   : > { %7732 = vmatpush1.bf16.msra.mxu1 %v7731_v6  ;;  %7222 = vmatprep.subr.bf16.mxu0 %v7221_v7  ;;  %v7241_v6 = vpack.c.bf16 %v1495_v1, %v1487_v0  ;;  %v1486_v7 = vld [vmem:[%s9826_s30 + $0x2400] sm:$0xff]  ;;  %v1575_v61 = vld [vmem:[%s9826_s30 + $0x26c8] sm:$0xff] }
 0x18e   : > { %7734 = vmatprep.subr.bf16.mxu1 %v7733_v11  ;;  %2731 = vmatprep.mubr.f32.mxu0 %v293_v17  ;;  %v1496_v11 = vld [vmem:[%s9826_s30 + $0x2450] sm:$0xff]  ;;  %v7243_v16 = vpack.c.bf16 %v1494_v8, %v1486_v7  ;;  %v7261_v2 = vpack.c.bf16 %v1575_v61, %v1567_v60  ;;  %v1566_v3 = vld [vmem:[%s9826_s30 + $0x2680] sm:$0xff]  ;;  %v1583_v8 = vld [vmem:[%s9826_s30 + $0x2708] sm:$0xff] }
 0x18f   : > { %3443 = vmatprep.mubr.f32.mxu1 %v293_v17  ;;  %2732 = vmatmul.mubr.f32.gmra.mrb[6].mxu0 %v292_v19  ;;  %v7755_v17 = vpack.c.bf16 %v1496_v11, %v1488_v9  ;;  %v1576_v7 = vld [vmem:[%s9826_s30 + $0x26d0] sm:$0xff]  ;;  %v1591_v9 = vld [vmem:[%s9826_s30 + $0x2748] sm:$0xff]  ;;  %v1593_v11 = vld [vmem:[%s9826_s30 + $0x2758] sm:$0xff] }
 0x190   : > { %7224 = vmatpush1.bf16.msra.mxu0 %v7223_v18  ;;  %3444 = vmatmul.mubr.f32.gmra.mrb[6].mxu1 %v292_v19  ;;  %v7245_v18 = vpack.c.bf16 %v1511_v13, %v1503_v12  ;;  %v1502_v19 = vld [vmem:[%s9826_s30 + $0x2480] sm:$0xff]  ;;  %v7265_v14 = vpack.c.bf16 %v1591_v9, %v1583_v8  ;;  %v1657_v60 = vld [vmem:[%s9826_s30 + $0x2958] sm:$0xff]  ;;  %v263_v61 = vld [vmem:[%s9940_s3 + $0x4c8] sm:$0xff] }
 0x191   : > { %7736 = vmatpush1.bf16.msra.mxu1 %v7735_v20  ;;  %7226 = vmatprep.subr.bf16.mxu0 %v7225_v21  ;;  %v1510_v20 = vld [vmem:[%s9826_s30 + $0x24c0] sm:$0xff]  ;;  %v1504_v21 = vld [vmem:[%s9826_s30 + $0x2490] sm:$0xff]  ;;  %v1671_v8 = vld [vmem:[%s9826_s30 + $0x29c8] sm:$0xff] }
 0x192   : > { %7738 = vmatprep.subr.bf16.mxu1 %v7737_v25  ;;  %2802 = vmatprep.mubr.f32.mxu0 %v247_v31  ;;  %v1527_v25 = vld [vmem:[%s9826_s30 + $0x2548] sm:$0xff]  ;;  %v7247_v28 = vpack.c.bf16 %v1510_v20, %v1502_v19  ;;  %v7759_v29 = vpack.c.bf16 %v1512_v23, %v1504_v21  ;;  %v1592_v19 = vld [vmem:[%s9826_s30 + $0x2750] sm:$0xff]  ;;  %v1609_v23 = vld [vmem:[%s9826_s30 + $0x27d8] sm:$0xff] }
 0x193   : > { %3514 = vmatprep.mubr.f32.mxu1 %v247_v31  ;;  %v7249_v30 = vpack.c.bf16 %v1527_v25, %v1519_v24  ;;  %v1518_v31 = vld [vmem:[%s9826_s30 + $0x2500] sm:$0xff]  ;;  %v1599_v20 = vld [vmem:[%s9826_s30 + $0x2788] sm:$0xff]  ;;  %v1665_v9 = vld [vmem:[%s9826_s30 + $0x2998] sm:$0xff] }
 0x194   : > { %7228 = vmatpush1.bf16.msra.mxu0 %v7227_v32  ;;  %v1526_v32 = vld [vmem:[%s9826_s30 + $0x2540] sm:$0xff]  ;;  %v1607_v21 = vld [vmem:[%s9826_s30 + $0x27c8] sm:$0xff] }
 0x195   : > { %7740 = vmatpush1.bf16.msra.mxu1 %v7739_v33  ;;  %7230 = vmatprep.subr.bf16.mxu0 %v7229_v34  ;;  %v1520_v33 = vld [vmem:[%s9826_s30 + $0x2510] sm:$0xff]  ;;  %v7761_v34 = vpack.c.bf16 %v1529_v27, %v1521_v26  ;;  %v7251_v40 = vpack.c.bf16 %v1526_v32, %v1518_v31  ;;  %v7269_v26 = vpack.c.bf16 %v1607_v21, %v1599_v20  ;;  %v1598_v27 = vld [vmem:[%s9826_s30 + $0x2780] sm:$0xff]  ;;  %v1615_v32 = vld [vmem:[%s9826_s30 + $0x2808] sm:$0xff] }
 0x196   : > { %7742 = vmatprep.subr.bf16.mxu1 %v7741_v38  ;;  %v1537_v38 = vld [vmem:[%s9826_s30 + $0x2598] sm:$0xff]  ;;  %v7763_v41 = vpack.c.bf16 %v1528_v35, %v1520_v33  ;;  %v1608_v31 = vld [vmem:[%s9826_s30 + $0x27d0] sm:$0xff]  ;;  %v1623_v33 = vld [vmem:[%s9826_s30 + $0x2848] sm:$0xff] }
 0x197   : > { %v1625_v35 = vld [vmem:[%s9826_s30 + $0x2858] sm:$0xff]  ;;  %v246_v48 = vld [vmem:[%s9940_s3 + $0x40] sm:$0xff]  ;;  %v1672_v20 = vld [vmem:[%s9826_s30 + $0x29d0] sm:$0xff] }
 0x198   : > { %7232 = vmatpush1.bf16.msra.mxu0 %v7231_v44  ;;  %v1542_v44 = vld [vmem:[%s9826_s30 + $0x25c0] sm:$0xff]  ;;  %v1679_v21 = vld [vmem:[%s9826_s30 + $0x2a08] sm:$0xff] }
 0x199   : > { %7744 = vmatpush1.bf16.msra.mxu1 %v7743_v45  ;;  %7234 = vmatprep.subr.bf16.mxu0 %v7233_v46  ;;  %v1536_v45 = vld [vmem:[%s9826_s30 + $0x2590] sm:$0xff]  ;;  %v7765_v46 = vpack.c.bf16 %v1545_v39, %v1537_v38  ;;  %v7255_v52 = vpack.c.bf16 %v1542_v44, %v1534_v43  ;;  %v7273_v38 = vpack.c.bf16 %v1623_v33, %v1615_v32  ;;  %v1614_v39 = vld [vmem:[%s9826_s30 + $0x2800] sm:$0xff]  ;;  %v1631_v44 = vld [vmem:[%s9826_s30 + $0x2888] sm:$0xff] }
 0x19a   : > { %7746 = vmatprep.subr.bf16.mxu1 %v7745_v50  ;;  %v1553_v50 = vld [vmem:[%s9826_s30 + $0x2618] sm:$0xff]  ;;  %v7767_v53 = vpack.c.bf16 %v1544_v47, %v1536_v45  ;;  %v1624_v43 = vld [vmem:[%s9826_s30 + $0x2850] sm:$0xff]  ;;  %v1639_v45 = vld [vmem:[%s9826_s30 + $0x28c8] sm:$0xff] }
 0x19b   : > { %v1641_v47 = vld [vmem:[%s9826_s30 + $0x28d8] sm:$0xff]  ;;  %v1680_v32 = vld [vmem:[%s9826_s30 + $0x2a10] sm:$0xff] }
 0x19c   : > { %7236 = vmatpush1.bf16.msra.mxu0 %v7235_v56  ;;  %v1558_v56 = vld [vmem:[%s9826_s30 + $0x2640] sm:$0xff] }
 0x19d   : > { %7748 = vmatpush1.bf16.msra.mxu1 %v7747_v57  ;;  %7238 = vmatprep.subr.bf16.mxu0 %v7237_v58  ;;  %v1552_v57 = vld [vmem:[%s9826_s30 + $0x2610] sm:$0xff]  ;;  %v7769_v58 = vpack.c.bf16 %v1561_v51, %v1553_v50  ;;  %v7259_v0 = vpack.c.bf16 %v1558_v56, %v1550_v55  ;;  %v7277_v51 = vpack.c.bf16 %v1639_v45, %v1631_v44  ;;  %v1702_v44 = vld [vmem:[%s9826_s30 + $0x2ac0] sm:$0xff] }
 0x19e   : > { %7750 = vmatprep.subr.bf16.mxu1 %v7749_v62  ;;  %v1569_v62 = vld [vmem:[%s9826_s30 + $0x2698] sm:$0xff]  ;;  %v7771_v1 = vpack.c.bf16 %v1560_v59, %v1552_v57  ;;  %v1640_v56 = vld [vmem:[%s9826_s30 + $0x28d0] sm:$0xff]  ;;  %v1647_v57 = vld [vmem:[%s9826_s30 + $0x2908] sm:$0xff] }
 0x19f   : > { %v1649_v59 = vld [vmem:[%s9826_s30 + $0x2918] sm:$0xff]  ;;  %v1696_v45 = vld [vmem:[%s9826_s30 + $0x2a90] sm:$0xff] }
 0x1a0   : > { %7240 = vmatpush1.bf16.msra.mxu0 %v7239_v4  ;;  %v1574_v4 = vld [vmem:[%s9826_s30 + $0x26c0] sm:$0xff] }
 0x1a1   : > { %7752 = vmatpush1.bf16.msra.mxu1 %v7751_v5  ;;  %7242 = vmatprep.subr.bf16.mxu0 %v7241_v6  ;;  %v1568_v5 = vld [vmem:[%s9826_s30 + $0x2690] sm:$0xff]  ;;  %v7773_v6 = vpack.c.bf16 %v1577_v63, %v1569_v62  ;;  %v7263_v12 = vpack.c.bf16 %v1574_v4, %v1566_v3  ;;  %v262_v63 = vld [vmem:[%s9940_s3 + $0x4c0] sm:$0xff] }
 0x1a2   : > { %7754 = vmatprep.subr.bf16.mxu1 %v7753_v10  ;;  %v1585_v10 = vld [vmem:[%s9826_s30 + $0x2718] sm:$0xff]  ;;  %v7775_v13 = vpack.c.bf16 %v1576_v7, %v1568_v5  ;;  %v1654_v3 = vld [vmem:[%s9826_s30 + $0x2940] sm:$0xff]  ;;  %v1648_v4 = vld [vmem:[%s9826_s30 + $0x2910] sm:$0xff]  ;;  %v7793_v5 = vpack.c.bf16 %v1657_v60, %v1649_v59 }
 0x1a3   : > { %v1663_v7 = vld [vmem:[%s9826_s30 + $0x2988] sm:$0xff]  ;;  %v1720_v59 = vld [vmem:[%s9826_s30 + $0x2b50] sm:$0xff] }
 0x1a4   : > { %7244 = vmatpush1.bf16.msra.mxu0 %v7243_v16  ;;  %v1590_v16 = vld [vmem:[%s9826_s30 + $0x2740] sm:$0xff]  ;;  %v1727_v60 = vld [vmem:[%s9826_s30 + $0x2b88] sm:$0xff] }
 0x1a5   : > { %7756 = vmatpush1.bf16.msra.mxu1 %v7755_v17  ;;  %7246 = vmatprep.subr.bf16.mxu0 %v7245_v18  ;;  %v1584_v17 = vld [vmem:[%s9826_s30 + $0x2710] sm:$0xff]  ;;  %v7777_v18 = vpack.c.bf16 %v1593_v11, %v1585_v10  ;;  %v7267_v24 = vpack.c.bf16 %v1590_v16, %v1582_v15  ;;  %v1673_v10 = vld [vmem:[%s9826_s30 + $0x29d8] sm:$0xff]  ;;  %v279_v11 = vld [vmem:[%s9940_s3 + $0x948] sm:$0xff]  ;;  %v7285_v15 = vpack.c.bf16 %v1671_v8, %v1663_v7 }
 0x1a6   : > { %7758 = vmatprep.subr.bf16.mxu1 %v7757_v22  ;;  %v1601_v22 = vld [vmem:[%s9826_s30 + $0x2798] sm:$0xff]  ;;  %v7779_v25 = vpack.c.bf16 %v1592_v19, %v1584_v17  ;;  %v1662_v16 = vld [vmem:[%s9826_s30 + $0x2980] sm:$0xff]  ;;  %v7797_v19 = vpack.c.bf16 %v1673_v10, %v1665_v9  ;;  %v1736_v7 = vld [vmem:[%s9826_s30 + $0x2bd0] sm:$0xff] }
 0x1a7   : > { %v1670_v17 = vld [vmem:[%s9826_s30 + $0x29c0] sm:$0xff]  ;;  %v1743_v8 = vld [vmem:[%s9826_s30 + $0x2c08] sm:$0xff]  ;;  %v1745_v10 = vld [vmem:[%s9826_s30 + $0x2c18] sm:$0xff] }
 0x1a8   : > { %7248 = vmatpush1.bf16.msra.mxu0 %v7247_v28  ;;  %v1606_v28 = vld [vmem:[%s9826_s30 + $0x27c0] sm:$0xff]  ;;  %v1751_v9 = vld [vmem:[%s9826_s30 + $0x2c48] sm:$0xff] }
 0x1a9   : > { %7760 = vmatpush1.bf16.msra.mxu1 %v7759_v29  ;;  %7250 = vmatprep.subr.bf16.mxu0 %v7249_v30  ;;  %v1600_v29 = vld [vmem:[%s9826_s30 + $0x2790] sm:$0xff]  ;;  %v7781_v30 = vpack.c.bf16 %v1609_v23, %v1601_v22  ;;  %v7271_v36 = vpack.c.bf16 %v1606_v28, %v1598_v27  ;;  %v1687_v22 = vld [vmem:[%s9826_s30 + $0x2a48] sm:$0xff]  ;;  %v1681_v23 = vld [vmem:[%s9826_s30 + $0x2a18] sm:$0xff] }
 0x1aa   : > { %7762 = vmatprep.subr.bf16.mxu1 %v7761_v34  ;;  %v1617_v34 = vld [vmem:[%s9826_s30 + $0x2818] sm:$0xff]  ;;  %v7783_v37 = vpack.c.bf16 %v1608_v31, %v1600_v29  ;;  %v294_v27 = vld [vmem:[%s9940_s3 + $0xdc0] sm:$0xff]  ;;  %v7289_v29 = vpack.c.bf16 %v1687_v22, %v1679_v21  ;;  %v1767_v21 = vld [vmem:[%s9826_s30 + $0x2cc8] sm:$0xff] }
 0x1ab   : > { %v1686_v31 = vld [vmem:[%s9826_s30 + $0x2a40] sm:$0xff]  ;;  %v1761_v22 = vld [vmem:[%s9826_s30 + $0x2c98] sm:$0xff] }
 0x1ac   : > { %7252 = vmatpush1.bf16.msra.mxu0 %v7251_v40  ;;  %v1622_v40 = vld [vmem:[%s9826_s30 + $0x2840] sm:$0xff] }
 0x1ad   : > { %7764 = vmatpush1.bf16.msra.mxu1 %v7763_v41  ;;  %7254 = vmatprep.subr.bf16.mxu0 %v7253_v42  ;;  %v1616_v41 = vld [vmem:[%s9826_s30 + $0x2810] sm:$0xff]  ;;  %v7785_v42 = vpack.c.bf16 %v1625_v35, %v1617_v34  ;;  %v7275_v49 = vpack.c.bf16 %v1622_v40, %v1614_v39  ;;  %v1695_v35 = vld [vmem:[%s9826_s30 + $0x2a88] sm:$0xff]  ;;  %v249_v39 = vld [vmem:[%s9940_s3 + $0x58] sm:$0xff] }
 0x1ae   : > { %7766 = vmatprep.subr.bf16.mxu1 %v7765_v46  ;;  %v1633_v46 = vld [vmem:[%s9826_s30 + $0x2898] sm:$0xff]  ;;  %v7787_v50 = vpack.c.bf16 %v1624_v43, %v1616_v41  ;;  %v1688_v34 = vld [vmem:[%s9826_s30 + $0x2a50] sm:$0xff]  ;;  %v1694_v43 = vld [vmem:[%s9826_s30 + $0x2a80] sm:$0xff] }
 0x1af   : > { %v7789_v55 = vpack.c.bf16 %v1641_v47, %v1633_v46  ;;  %v7803_v41 = vpack.c.bf16 %v1688_v34, %v1680_v32  ;;  %v1704_v47 = vld [vmem:[%s9826_s30 + $0x2ad0] sm:$0xff]  ;;  %v1775_v32 = vld [vmem:[%s9826_s30 + $0x2d08] sm:$0xff]  ;;  %v1777_v34 = vld [vmem:[%s9826_s30 + $0x2d18] sm:$0xff] }
 0x1b0   : > { %7256 = vmatpush1.bf16.msra.mxu0 %v7255_v52  ;;  %v1630_v52 = vld [vmem:[%s9826_s30 + $0x2880] sm:$0xff] }
 0x1b1   : > { %7768 = vmatpush1.bf16.msra.mxu1 %v7767_v53  ;;  %7258 = vmatprep.subr.bf16.mxu0 %v7257_v54  ;;  %v1638_v53 = vld [vmem:[%s9826_s30 + $0x28c0] sm:$0xff]  ;;  %v1632_v54 = vld [vmem:[%s9826_s30 + $0x2890] sm:$0xff] }
 0x1b2   : > { %7770 = vmatprep.subr.bf16.mxu1 %v7769_v58  ;;  %v1655_v58 = vld [vmem:[%s9826_s30 + $0x2948] sm:$0xff]  ;;  %v7279_v62 = vpack.c.bf16 %v1638_v53, %v1630_v52  ;;  %v7295_v52 = vpack.c.bf16 %v1702_v44, %v1694_v43  ;;  %v7807_v53 = vpack.c.bf16 %v1704_v47, %v1696_v45  ;;  %v1784_v43 = vld [vmem:[%s9826_s30 + $0x2d50] sm:$0xff]  ;;  %v1801_v47 = vld [vmem:[%s9826_s30 + $0x2dd8] sm:$0xff] }
 0x1b3   : > { %v1791_v44 = vld [vmem:[%s9826_s30 + $0x2d88] sm:$0xff] }
 0x1b4   : > { %7260 = vmatpush1.bf16.msra.mxu0 %v7259_v0  ;;  %v7791_v0 = vpack.c.bf16 %v1640_v56, %v1632_v54  ;;  %v1718_v56 = vld [vmem:[%s9826_s30 + $0x2b40] sm:$0xff]  ;;  %v1799_v45 = vld [vmem:[%s9826_s30 + $0x2dc8] sm:$0xff] }
 0x1b5   : > { %7772 = vmatpush1.bf16.msra.mxu1 %v7771_v1  ;;  %7262 = vmatprep.subr.bf16.mxu0 %v7261_v2  ;;  %v7281_v1 = vpack.c.bf16 %v1655_v58, %v1647_v57  ;;  %v1646_v2 = vld [vmem:[%s9826_s30 + $0x2900] sm:$0xff]  ;;  %v1712_v57 = vld [vmem:[%s9826_s30 + $0x2b10] sm:$0xff] }
 0x1b6   : > { %7774 = vmatprep.subr.bf16.mxu1 %v7773_v6  ;;  %v1656_v6 = vld [vmem:[%s9826_s30 + $0x2950] sm:$0xff] }
 0x1b8   : > { %7264 = vmatpush1.bf16.msra.mxu0 %v7263_v12  ;;  %v7283_v12 = vpack.c.bf16 %v1654_v3, %v1646_v2  ;;  %v1726_v3 = vld [vmem:[%s9826_s30 + $0x2b80] sm:$0xff] }
 0x1b9   : > { %7776 = vmatpush1.bf16.msra.mxu1 %v7775_v13  ;;  %7266 = vmatprep.subr.bf16.mxu0 %v7265_v14  ;;  %v278_v13 = vld [vmem:[%s9940_s3 + $0x940] sm:$0xff]  ;;  %v7795_v14 = vpack.c.bf16 %v1656_v6, %v1648_v4 }
 0x1ba   : > { %7778 = vmatprep.subr.bf16.mxu1 %v7777_v18  ;;  %v1664_v18 = vld [vmem:[%s9826_s30 + $0x2990] sm:$0xff]  ;;  %v1734_v4 = vld [vmem:[%s9826_s30 + $0x2bc0] sm:$0xff] }
 0x1bb   : > { %v7799_v28 = vpack.c.bf16 %v1672_v20, %v1664_v18  ;;  %v1759_v20 = vld [vmem:[%s9826_s30 + $0x2c88] sm:$0xff] }
 0x1bc   : > { %7268 = vmatpush1.bf16.msra.mxu0 %v7267_v24  ;;  %v1689_v24 = vld [vmem:[%s9826_s30 + $0x2a58] sm:$0xff] }
 0x1bd   : > { %7780 = vmatpush1.bf16.msra.mxu1 %v7779_v25  ;;  %7270 = vmatprep.subr.bf16.mxu0 %v7269_v26  ;;  %v295_v25 = vld [vmem:[%s9940_s3 + $0xdc8] sm:$0xff]  ;;  %v7287_v26 = vpack.c.bf16 %v1670_v17, %v1662_v16  ;;  %v7801_v33 = vpack.c.bf16 %v1689_v24, %v1681_v23  ;;  %v1750_v16 = vld [vmem:[%s9826_s30 + $0x2c40] sm:$0xff]  ;;  %v1744_v17 = vld [vmem:[%s9826_s30 + $0x2c10] sm:$0xff] }
 0x1be   : > { %7782 = vmatprep.subr.bf16.mxu1 %v7781_v30  ;;  %v1678_v30 = vld [vmem:[%s9826_s30 + $0x2a00] sm:$0xff]  ;;  %v1769_v23 = vld [vmem:[%s9826_s30 + $0x2cd8] sm:$0xff] }
 0x1bf   : > { %v7291_v40 = vpack.c.bf16 %v1686_v31, %v1678_v30  ;;  %v7821_v30 = vpack.c.bf16 %v1769_v23, %v1761_v22  ;;  %v1768_v31 = vld [vmem:[%s9826_s30 + $0x2cd0] sm:$0xff]  ;;  %v1838_v23 = vld [vmem:[%s9826_s30 + $0x2f00] sm:$0xff] }
 0x1c0   : > { %7272 = vmatpush1.bf16.msra.mxu0 %v7271_v36  ;;  %v1703_v36 = vld [vmem:[%s9826_s30 + $0x2ac8] sm:$0xff] }
 0x1c1   : > { %7784 = vmatpush1.bf16.msra.mxu1 %v7783_v37  ;;  %7274 = vmatprep.subr.bf16.mxu0 %v7273_v38  ;;  %v1697_v37 = vld [vmem:[%s9826_s30 + $0x2a98] sm:$0xff] }
 0x1c2   : > { %7786 = vmatprep.subr.bf16.mxu1 %v7785_v42  ;;  %v1705_v38 = vld [vmem:[%s9826_s30 + $0x2ad8] sm:$0xff]  ;;  %v7293_v42 = vpack.c.bf16 %v1703_v36, %v1695_v35 }
 0x1c3   : > { %2803 = vmatmul.mubr.f32.vlgmr.msra.gmra.mrb[0].mxu0 %v246_v48  ;;  %v7805_v46 = vpack.c.bf16 %v1705_v38, %v1697_v37  ;;  %v1785_v35 = vld [vmem:[%s9826_s30 + $0x2d58] sm:$0xff] }
 0x1c4   : > { %7276 = vmatpush1.bf16.msra.mxu0 %v7275_v49  ;;  %3515 = vmatmul.mubr.f32.vlgmr.msra.gmra.mrb[0].mxu1 %v246_v48  ;;  %v1711_v48 = vld [vmem:[%s9826_s30 + $0x2b08] sm:$0xff] }
 0x1c5   : > { %7788 = vmatpush1.bf16.msra.mxu1 %v7787_v50  ;;  %7278 = vmatprep.subr.bf16.mxu0 %v7277_v51  ;;  %v1719_v49 = vld [vmem:[%s9826_s30 + $0x2b48] sm:$0xff]  ;;  %v1713_v50 = vld [vmem:[%s9826_s30 + $0x2b18] sm:$0xff] }
 0x1c6   : > { %7790 = vmatprep.subr.bf16.mxu1 %v7789_v55  ;;  %2808 = vmatprep.mubr.f32.mxu0 %v263_v61  ;;  %v1721_v51 = vld [vmem:[%s9826_s30 + $0x2b58] sm:$0xff]  ;;  %v7297_v54 = vpack.c.bf16 %v1719_v49, %v1711_v48  ;;  %v1710_v55 = vld [vmem:[%s9826_s30 + $0x2b00] sm:$0xff] }
 0x1c7   : > { %3520 = vmatprep.mubr.f32.mxu1 %v263_v61  ;;  %2809 = vmatmul.mubr.f32.gmra.mrb[2].mxu0 %v262_v63  ;;  %v7809_v58 = vpack.c.bf16 %v1721_v51, %v1713_v50  ;;  %v1735_v61 = vld [vmem:[%s9826_s30 + $0x2bc8] sm:$0xff]  ;;  %v7317_v50 = vpack.c.bf16 %v1799_v45, %v1791_v44  ;;  %v1790_v51 = vld [vmem:[%s9826_s30 + $0x2d80] sm:$0xff] }
 0x1c8   : > { %7280 = vmatpush1.bf16.msra.mxu0 %v7279_v62  ;;  %3521 = vmatmul.mubr.f32.gmra.mrb[2].mxu1 %v262_v63  ;;  %v1729_v62 = vld [vmem:[%s9826_s30 + $0x2b98] sm:$0xff]  ;;  %v7301_v2 = vpack.c.bf16 %v1735_v61, %v1727_v60 }
 0x1c9   : > { %7792 = vmatpush1.bf16.msra.mxu1 %v7791_v0  ;;  %7282 = vmatprep.subr.bf16.mxu0 %v7281_v1  ;;  %v1737_v63 = vld [vmem:[%s9826_s30 + $0x2bd8] sm:$0xff]  ;;  %v7299_v0 = vpack.c.bf16 %v1718_v56, %v1710_v55  ;;  %v7811_v1 = vpack.c.bf16 %v1720_v59, %v1712_v57  ;;  %v1800_v55 = vld [vmem:[%s9826_s30 + $0x2dd0] sm:$0xff]  ;;  %v1807_v56 = vld [vmem:[%s9826_s30 + $0x2e08] sm:$0xff] }
 0x1ca   : > { %7794 = vmatprep.subr.bf16.mxu1 %v7793_v5  ;;  %2814 = vmatprep.mubr.f32.mxu0 %v279_v11  ;;  %v1728_v5 = vld [vmem:[%s9826_s30 + $0x2b90] sm:$0xff]  ;;  %v7813_v6 = vpack.c.bf16 %v1737_v63, %v1729_v62  ;;  %v1815_v57 = vld [vmem:[%s9826_s30 + $0x2e48] sm:$0xff]  ;;  %v1817_v59 = vld [vmem:[%s9826_s30 + $0x2e58] sm:$0xff] }
 0x1cb   : > { %3526 = vmatprep.mubr.f32.mxu1 %v279_v11  ;;  %2815 = vmatmul.mubr.f32.gmra.mrb[4].mxu0 %v278_v13  ;;  %v1753_v11 = vld [vmem:[%s9826_s30 + $0x2c58] sm:$0xff]  ;;  %v7321_v62 = vpack.c.bf16 %v1815_v57, %v1807_v56  ;;  %v1806_v63 = vld [vmem:[%s9826_s30 + $0x2e00] sm:$0xff]  ;;  %v248_v56 = vld [vmem:[%s9940_s3 + $0x50] sm:$0xff] }
 0x1cc   : > { %7284 = vmatpush1.bf16.msra.mxu0 %v7283_v12  ;;  %3527 = vmatmul.mubr.f32.gmra.mrb[4].mxu1 %v278_v13  ;;  %v7303_v12 = vpack.c.bf16 %v1734_v4, %v1726_v3  ;;  %v7815_v13 = vpack.c.bf16 %v1736_v7, %v1728_v5  ;;  %v7817_v18 = vpack.c.bf16 %v1753_v11, %v1745_v10  ;;  %v1816_v3 = vld [vmem:[%s9826_s30 + $0x2e50] sm:$0xff]  ;;  %v1823_v4 = vld [vmem:[%s9826_s30 + $0x2e88] sm:$0xff]  ;;  %v1833_v7 = vld [vmem:[%s9826_s30 + $0x2ed8] sm:$0xff] }
 0x1cd   : > { %7796 = vmatpush1.bf16.msra.mxu1 %v7795_v14  ;;  %7286 = vmatprep.subr.bf16.mxu0 %v7285_v15  ;;  %v7305_v14 = vpack.c.bf16 %v1751_v9, %v1743_v8  ;;  %v1742_v15 = vld [vmem:[%s9826_s30 + $0x2c00] sm:$0xff]  ;;  %v1831_v5 = vld [vmem:[%s9826_s30 + $0x2ec8] sm:$0xff] }
 0x1ce   : > { %7798 = vmatprep.subr.bf16.mxu1 %v7797_v19  ;;  %2820 = vmatprep.mubr.f32.mxu0 %v295_v25  ;;  %v1752_v19 = vld [vmem:[%s9826_s30 + $0x2c50] sm:$0xff]  ;;  %v7307_v24 = vpack.c.bf16 %v1750_v16, %v1742_v15  ;;  %v7325_v10 = vpack.c.bf16 %v1831_v5, %v1823_v4  ;;  %v1822_v11 = vld [vmem:[%s9826_s30 + $0x2e80] sm:$0xff]  ;;  %v1839_v16 = vld [vmem:[%s9826_s30 + $0x2f08] sm:$0xff] }
 0x1cf   : > { %3532 = vmatprep.mubr.f32.mxu1 %v295_v25  ;;  %2821 = vmatmul.mubr.f32.gmra.mrb[6].mxu0 %v294_v27  ;;  %v7819_v25 = vpack.c.bf16 %v1752_v19, %v1744_v17  ;;  %v1832_v15 = vld [vmem:[%s9826_s30 + $0x2ed0] sm:$0xff]  ;;  %v1847_v17 = vld [vmem:[%s9826_s30 + $0x2f48] sm:$0xff]  ;;  %v1849_v19 = vld [vmem:[%s9826_s30 + $0x2f58] sm:$0xff] }
 0x1d0   : > { %7288 = vmatpush1.bf16.msra.mxu0 %v7287_v26  ;;  %3533 = vmatmul.mubr.f32.gmra.mrb[6].mxu1 %v294_v27  ;;  %v7309_v26 = vpack.c.bf16 %v1767_v21, %v1759_v20  ;;  %v1758_v27 = vld [vmem:[%s9826_s30 + $0x2c80] sm:$0xff]  ;;  %v7329_v22 = vpack.c.bf16 %v1847_v17, %v1839_v16  ;;  %v1913_v4 = vld [vmem:[%s9826_s30 + $0x3158] sm:$0xff]  ;;  %v1927_v16 = vld [vmem:[%s9826_s30 + $0x31c8] sm:$0xff] }
 0x1d1   : > { %7800 = vmatpush1.bf16.msra.mxu1 %v7799_v28  ;;  %7290 = vmatprep.subr.bf16.mxu0 %v7289_v29  ;;  %v1766_v28 = vld [vmem:[%s9826_s30 + $0x2cc0] sm:$0xff]  ;;  %v1760_v29 = vld [vmem:[%s9826_s30 + $0x2c90] sm:$0xff]  ;;  %v265_v5 = vld [vmem:[%s9940_s3 + $0x4d8] sm:$0xff] }
 0x1d2   : > { %7802 = vmatprep.subr.bf16.mxu1 %v7801_v33  ;;  %2891 = vmatprep.mubr.f32.mxu0 %v249_v39  ;;  %v1783_v33 = vld [vmem:[%s9826_s30 + $0x2d48] sm:$0xff]  ;;  %v7311_v36 = vpack.c.bf16 %v1766_v28, %v1758_v27  ;;  %v7823_v37 = vpack.c.bf16 %v1768_v31, %v1760_v29  ;;  %v1848_v27 = vld [vmem:[%s9826_s30 + $0x2f50] sm:$0xff]  ;;  %v1865_v31 = vld [vmem:[%s9826_s30 + $0x2fd8] sm:$0xff] }
 0x1d3   : > { %3603 = vmatprep.mubr.f32.mxu1 %v249_v39  ;;  %v7313_v38 = vpack.c.bf16 %v1783_v33, %v1775_v32  ;;  %v1774_v39 = vld [vmem:[%s9826_s30 + $0x2d00] sm:$0xff]  ;;  %v1855_v28 = vld [vmem:[%s9826_s30 + $0x2f88] sm:$0xff]  ;;  %v1921_v17 = vld [vmem:[%s9826_s30 + $0x3198] sm:$0xff] }
 0x1d4   : > { %7292 = vmatpush1.bf16.msra.mxu0 %v7291_v40  ;;  %v1782_v40 = vld [vmem:[%s9826_s30 + $0x2d40] sm:$0xff]  ;;  %v1863_v29 = vld [vmem:[%s9826_s30 + $0x2fc8] sm:$0xff] }
 0x1d5   : > { %7804 = vmatpush1.bf16.msra.mxu1 %v7803_v41  ;;  %7294 = vmatprep.subr.bf16.mxu0 %v7293_v42  ;;  %v1776_v41 = vld [vmem:[%s9826_s30 + $0x2d10] sm:$0xff]  ;;  %v7825_v42 = vpack.c.bf16 %v1785_v35, %v1777_v34  ;;  %v7315_v48 = vpack.c.bf16 %v1782_v40, %v1774_v39  ;;  %v7333_v34 = vpack.c.bf16 %v1863_v29, %v1855_v28  ;;  %v1854_v35 = vld [vmem:[%s9826_s30 + $0x2f80] sm:$0xff]  ;;  %v1871_v40 = vld [vmem:[%s9826_s30 + $0x3008] sm:$0xff] }
 0x1d6   : > { %7806 = vmatprep.subr.bf16.mxu1 %v7805_v46  ;;  %v1793_v46 = vld [vmem:[%s9826_s30 + $0x2d98] sm:$0xff]  ;;  %v7827_v49 = vpack.c.bf16 %v1784_v43, %v1776_v41  ;;  %v1864_v39 = vld [vmem:[%s9826_s30 + $0x2fd0] sm:$0xff]  ;;  %v1879_v41 = vld [vmem:[%s9826_s30 + $0x3048] sm:$0xff] }
 0x1d7   : > { %v1881_v43 = vld [vmem:[%s9826_s30 + $0x3058] sm:$0xff]  ;;  %v1928_v28 = vld [vmem:[%s9826_s30 + $0x31d0] sm:$0xff]  ;;  %v1935_v29 = vld [vmem:[%s9826_s30 + $0x3208] sm:$0xff] }
 0x1d8   : > { %7296 = vmatpush1.bf16.msra.mxu0 %v7295_v52  ;;  %v1798_v52 = vld [vmem:[%s9826_s30 + $0x2dc0] sm:$0xff] }
 0x1d9   : > { %7808 = vmatpush1.bf16.msra.mxu1 %v7807_v53  ;;  %7298 = vmatprep.subr.bf16.mxu0 %v7297_v54  ;;  %v1792_v53 = vld [vmem:[%s9826_s30 + $0x2d90] sm:$0xff]  ;;  %v7829_v54 = vpack.c.bf16 %v1801_v47, %v1793_v46  ;;  %v7319_v60 = vpack.c.bf16 %v1798_v52, %v1790_v51  ;;  %v7337_v46 = vpack.c.bf16 %v1879_v41, %v1871_v40  ;;  %v1870_v47 = vld [vmem:[%s9826_s30 + $0x3000] sm:$0xff]  ;;  %v1887_v52 = vld [vmem:[%s9826_s30 + $0x3088] sm:$0xff] }
 0x1da   : > { %7810 = vmatprep.subr.bf16.mxu1 %v7809_v58  ;;  %v1809_v58 = vld [vmem:[%s9826_s30 + $0x2e18] sm:$0xff]  ;;  %v7831_v61 = vpack.c.bf16 %v1800_v55, %v1792_v53  ;;  %v1880_v51 = vld [vmem:[%s9826_s30 + $0x3050] sm:$0xff]  ;;  %v1895_v53 = vld [vmem:[%s9826_s30 + $0x30c8] sm:$0xff] }
 0x1db   : > { %v1897_v55 = vld [vmem:[%s9826_s30 + $0x30d8] sm:$0xff]  ;;  %v1936_v40 = vld [vmem:[%s9826_s30 + $0x3210] sm:$0xff] }
 0x1dc   : > { %7300 = vmatpush1.bf16.msra.mxu0 %v7299_v0  ;;  %v1814_v0 = vld [vmem:[%s9826_s30 + $0x2e40] sm:$0xff] }
 0x1dd   : > { %7812 = vmatpush1.bf16.msra.mxu1 %v7811_v1  ;;  %7302 = vmatprep.subr.bf16.mxu0 %v7301_v2  ;;  %v1808_v1 = vld [vmem:[%s9826_s30 + $0x2e10] sm:$0xff]  ;;  %v7833_v2 = vpack.c.bf16 %v1817_v59, %v1809_v58  ;;  %v7323_v8 = vpack.c.bf16 %v1814_v0, %v1806_v63  ;;  %v7341_v59 = vpack.c.bf16 %v1895_v53, %v1887_v52  ;;  %v1958_v52 = vld [vmem:[%s9826_s30 + $0x32c0] sm:$0xff] }
 0x1de   : > { %7814 = vmatprep.subr.bf16.mxu1 %v7813_v6  ;;  %v1825_v6 = vld [vmem:[%s9826_s30 + $0x2e98] sm:$0xff]  ;;  %v7835_v9 = vpack.c.bf16 %v1816_v3, %v1808_v1  ;;  %v1896_v0 = vld [vmem:[%s9826_s30 + $0x30d0] sm:$0xff]  ;;  %v1903_v1 = vld [vmem:[%s9826_s30 + $0x3108] sm:$0xff] }
 0x1df   : > { %v1905_v3 = vld [vmem:[%s9826_s30 + $0x3118] sm:$0xff]  ;;  %v1952_v53 = vld [vmem:[%s9826_s30 + $0x3290] sm:$0xff] }
 0x1e0   : > { %7304 = vmatpush1.bf16.msra.mxu0 %v7303_v12  ;;  %v1830_v12 = vld [vmem:[%s9826_s30 + $0x2ec0] sm:$0xff] }
 0x1e1   : > { %7816 = vmatpush1.bf16.msra.mxu1 %v7815_v13  ;;  %7306 = vmatprep.subr.bf16.mxu0 %v7305_v14  ;;  %v1824_v13 = vld [vmem:[%s9826_s30 + $0x2e90] sm:$0xff]  ;;  %v7837_v14 = vpack.c.bf16 %v1833_v7, %v1825_v6  ;;  %v7327_v20 = vpack.c.bf16 %v1830_v12, %v1822_v11  ;;  %v1910_v11 = vld [vmem:[%s9826_s30 + $0x3140] sm:$0xff] }
 0x1e2   : > { %7818 = vmatprep.subr.bf16.mxu1 %v7817_v18  ;;  %v1841_v18 = vld [vmem:[%s9826_s30 + $0x2f18] sm:$0xff]  ;;  %v7839_v21 = vpack.c.bf16 %v1832_v15, %v1824_v13  ;;  %v264_v7 = vld [vmem:[%s9940_s3 + $0x4d0] sm:$0xff]  ;;  %v7857_v13 = vpack.c.bf16 %v1913_v4, %v1905_v3  ;;  %v1919_v15 = vld [vmem:[%s9826_s30 + $0x3188] sm:$0xff] }
 0x1e3   : > { %v1904_v12 = vld [vmem:[%s9826_s30 + $0x3110] sm:$0xff]  ;;  %v1983_v4 = vld [vmem:[%s9826_s30 + $0x3388] sm:$0xff] }
 0x1e4   : > { %7308 = vmatpush1.bf16.msra.mxu0 %v7307_v24  ;;  %v1846_v24 = vld [vmem:[%s9826_s30 + $0x2f40] sm:$0xff]  ;;  %v1976_v3 = vld [vmem:[%s9826_s30 + $0x3350] sm:$0xff] }
 0x1e5   : > { %7820 = vmatpush1.bf16.msra.mxu1 %v7819_v25  ;;  %7310 = vmatprep.subr.bf16.mxu0 %v7309_v26  ;;  %v1840_v25 = vld [vmem:[%s9826_s30 + $0x2f10] sm:$0xff]  ;;  %v7841_v26 = vpack.c.bf16 %v1849_v19, %v1841_v18  ;;  %v7331_v32 = vpack.c.bf16 %v1846_v24, %v1838_v23  ;;  %v1929_v18 = vld [vmem:[%s9826_s30 + $0x31d8] sm:$0xff]  ;;  %v7349_v23 = vpack.c.bf16 %v1927_v16, %v1919_v15  ;;  %v1918_v24 = vld [vmem:[%s9826_s30 + $0x3180] sm:$0xff] }
 0x1e6   : > { %7822 = vmatprep.subr.bf16.mxu1 %v7821_v30  ;;  %v1857_v30 = vld [vmem:[%s9826_s30 + $0x2f98] sm:$0xff]  ;;  %v7843_v33 = vpack.c.bf16 %v1848_v27, %v1840_v25  ;;  %v1926_v25 = vld [vmem:[%s9826_s30 + $0x31c0] sm:$0xff]  ;;  %v7861_v27 = vpack.c.bf16 %v1929_v18, %v1921_v17  ;;  %v1992_v15 = vld [vmem:[%s9826_s30 + $0x33d0] sm:$0xff] }
 0x1e7   : > { %v281_v19 = vld [vmem:[%s9940_s3 + $0x958] sm:$0xff]  ;;  %v1999_v16 = vld [vmem:[%s9826_s30 + $0x3408] sm:$0xff] }
 0x1e8   : > { %7312 = vmatpush1.bf16.msra.mxu0 %v7311_v36  ;;  %v1862_v36 = vld [vmem:[%s9826_s30 + $0x2fc0] sm:$0xff]  ;;  %v2007_v17 = vld [vmem:[%s9826_s30 + $0x3448] sm:$0xff]  ;;  %v2001_v18 = vld [vmem:[%s9826_s30 + $0x3418] sm:$0xff] }
 0x1e9   : > { %7824 = vmatpush1.bf16.msra.mxu1 %v7823_v37  ;;  %7314 = vmatprep.subr.bf16.mxu0 %v7313_v38  ;;  %v1856_v37 = vld [vmem:[%s9826_s30 + $0x2f90] sm:$0xff]  ;;  %v7845_v38 = vpack.c.bf16 %v1865_v31, %v1857_v30  ;;  %v7335_v44 = vpack.c.bf16 %v1862_v36, %v1854_v35  ;;  %v1943_v30 = vld [vmem:[%s9826_s30 + $0x3248] sm:$0xff]  ;;  %v1937_v31 = vld [vmem:[%s9826_s30 + $0x3218] sm:$0xff] }
 0x1ea   : > { %7826 = vmatprep.subr.bf16.mxu1 %v7825_v42  ;;  %v1873_v42 = vld [vmem:[%s9826_s30 + $0x3018] sm:$0xff]  ;;  %v7847_v45 = vpack.c.bf16 %v1864_v39, %v1856_v37  ;;  %v296_v35 = vld [vmem:[%s9940_s3 + $0xdd0] sm:$0xff]  ;;  %v7353_v37 = vpack.c.bf16 %v1943_v30, %v1935_v29  ;;  %v1942_v39 = vld [vmem:[%s9826_s30 + $0x3240] sm:$0xff] }
 0x1eb   : > { %v2023_v29 = vld [vmem:[%s9826_s30 + $0x34c8] sm:$0xff]  ;;  %v2017_v30 = vld [vmem:[%s9826_s30 + $0x3498] sm:$0xff] }
 0x1ec   : > { %7316 = vmatpush1.bf16.msra.mxu0 %v7315_v48  ;;  %v1878_v48 = vld [vmem:[%s9826_s30 + $0x3040] sm:$0xff] }
 0x1ed   : > { %7828 = vmatpush1.bf16.msra.mxu1 %v7827_v49  ;;  %7318 = vmatprep.subr.bf16.mxu0 %v7317_v50  ;;  %v1872_v49 = vld [vmem:[%s9826_s30 + $0x3010] sm:$0xff]  ;;  %v7849_v50 = vpack.c.bf16 %v1881_v43, %v1873_v42  ;;  %v7339_v57 = vpack.c.bf16 %v1878_v48, %v1870_v47  ;;  %v1951_v43 = vld [vmem:[%s9826_s30 + $0x3288] sm:$0xff] }
 0x1ee   : > { %7830 = vmatprep.subr.bf16.mxu1 %v7829_v54  ;;  %v1889_v54 = vld [vmem:[%s9826_s30 + $0x3098] sm:$0xff]  ;;  %v7851_v58 = vpack.c.bf16 %v1880_v51, %v1872_v49  ;;  %v1944_v42 = vld [vmem:[%s9826_s30 + $0x3250] sm:$0xff]  ;;  %v251_v47 = vld [vmem:[%s9940_s3 + $0x68] sm:$0xff] }
 0x1ef   : > { %v7853_v63 = vpack.c.bf16 %v1897_v55, %v1889_v54  ;;  %v7867_v49 = vpack.c.bf16 %v1944_v42, %v1936_v40  ;;  %v1950_v51 = vld [vmem:[%s9826_s30 + $0x3280] sm:$0xff]  ;;  %v1960_v55 = vld [vmem:[%s9826_s30 + $0x32d0] sm:$0xff]  ;;  %v2031_v40 = vld [vmem:[%s9826_s30 + $0x3508] sm:$0xff] }
 0x1f0   : > { %7320 = vmatpush1.bf16.msra.mxu0 %v7319_v60  ;;  %v1886_v60 = vld [vmem:[%s9826_s30 + $0x3080] sm:$0xff]  ;;  %v2033_v42 = vld [vmem:[%s9826_s30 + $0x3518] sm:$0xff] }
 0x1f1   : > { %7832 = vmatpush1.bf16.msra.mxu1 %v7831_v61  ;;  %7322 = vmatprep.subr.bf16.mxu0 %v7321_v62  ;;  %v1894_v61 = vld [vmem:[%s9826_s30 + $0x30c0] sm:$0xff]  ;;  %v1888_v62 = vld [vmem:[%s9826_s30 + $0x3090] sm:$0xff] }
 0x1f2   : > { %7834 = vmatprep.subr.bf16.mxu1 %v7833_v2  ;;  %v1911_v2 = vld [vmem:[%s9826_s30 + $0x3148] sm:$0xff]  ;;  %v7343_v6 = vpack.c.bf16 %v1894_v61, %v1886_v60  ;;  %v7359_v60 = vpack.c.bf16 %v1958_v52, %v1950_v51  ;;  %v7871_v61 = vpack.c.bf16 %v1960_v55, %v1952_v53  ;;  %v2040_v51 = vld [vmem:[%s9826_s30 + $0x3550] sm:$0xff]  ;;  %v2057_v55 = vld [vmem:[%s9826_s30 + $0x35d8] sm:$0xff] }
 0x1f3   : > { %v2047_v52 = vld [vmem:[%s9826_s30 + $0x3588] sm:$0xff] }
 0x1f4   : > { %7324 = vmatpush1.bf16.msra.mxu0 %v7323_v8  ;;  %v7855_v8 = vpack.c.bf16 %v1896_v0, %v1888_v62  ;;  %v1974_v0 = vld [vmem:[%s9826_s30 + $0x3340] sm:$0xff]  ;;  %v2055_v53 = vld [vmem:[%s9826_s30 + $0x35c8] sm:$0xff] }
 0x1f5   : > { %7836 = vmatpush1.bf16.msra.mxu1 %v7835_v9  ;;  %7326 = vmatprep.subr.bf16.mxu0 %v7325_v10  ;;  %v7345_v9 = vpack.c.bf16 %v1911_v2, %v1903_v1  ;;  %v1902_v10 = vld [vmem:[%s9826_s30 + $0x3100] sm:$0xff]  ;;  %v1968_v1 = vld [vmem:[%s9826_s30 + $0x3310] sm:$0xff] }
 0x1f6   : > { %7838 = vmatprep.subr.bf16.mxu1 %v7837_v14  ;;  %v1912_v14 = vld [vmem:[%s9826_s30 + $0x3150] sm:$0xff] }
 0x1f8   : > { %7328 = vmatpush1.bf16.msra.mxu0 %v7327_v20  ;;  %v7347_v20 = vpack.c.bf16 %v1910_v11, %v1902_v10  ;;  %v1982_v11 = vld [vmem:[%s9826_s30 + $0x3380] sm:$0xff] }
 0x1f9   : > { %7840 = vmatpush1.bf16.msra.mxu1 %v7839_v21  ;;  %7330 = vmatprep.subr.bf16.mxu0 %v7329_v22  ;;  %v280_v21 = vld [vmem:[%s9940_s3 + $0x950] sm:$0xff]  ;;  %v7859_v22 = vpack.c.bf16 %v1912_v14, %v1904_v12  ;;  %v1990_v12 = vld [vmem:[%s9826_s30 + $0x33c0] sm:$0xff] }
 0x1fa   : > { %7842 = vmatprep.subr.bf16.mxu1 %v7841_v26  ;;  %v1920_v26 = vld [vmem:[%s9826_s30 + $0x3190] sm:$0xff] }
 0x1fb   : > { %v7863_v36 = vpack.c.bf16 %v1928_v28, %v1920_v26  ;;  %v2015_v28 = vld [vmem:[%s9826_s30 + $0x3488] sm:$0xff] }
 0x1fc   : > { %7332 = vmatpush1.bf16.msra.mxu0 %v7331_v32  ;;  %v1945_v32 = vld [vmem:[%s9826_s30 + $0x3258] sm:$0xff] }
 0x1fd   : > { %7844 = vmatpush1.bf16.msra.mxu1 %v7843_v33  ;;  %7334 = vmatprep.subr.bf16.mxu0 %v7333_v34  ;;  %v297_v33 = vld [vmem:[%s9940_s3 + $0xdd8] sm:$0xff]  ;;  %v7351_v34 = vpack.c.bf16 %v1926_v25, %v1918_v24  ;;  %v7865_v41 = vpack.c.bf16 %v1945_v32, %v1937_v31  ;;  %v2006_v24 = vld [vmem:[%s9826_s30 + $0x3440] sm:$0xff]  ;;  %v2000_v25 = vld [vmem:[%s9826_s30 + $0x3410] sm:$0xff] }
 0x1fe   : > { %7846 = vmatprep.subr.bf16.mxu1 %v7845_v38  ;;  %v1934_v38 = vld [vmem:[%s9826_s30 + $0x3200] sm:$0xff]  ;;  %v2025_v31 = vld [vmem:[%s9826_s30 + $0x34d8] sm:$0xff] }
 0x1ff   : > { %v7355_v48 = vpack.c.bf16 %v1942_v39, %v1934_v38  ;;  %v7885_v38 = vpack.c.bf16 %v2025_v31, %v2017_v30  ;;  %v2024_v39 = vld [vmem:[%s9826_s30 + $0x34d0] sm:$0xff]  ;;  %v2094_v31 = vld [vmem:[%s9826_s30 + $0x3700] sm:$0xff] }
 0x200   : > { %7336 = vmatpush1.bf16.msra.mxu0 %v7335_v44  ;;  %v1959_v44 = vld [vmem:[%s9826_s30 + $0x32c8] sm:$0xff] }
 0x201   : > { %7848 = vmatpush1.bf16.msra.mxu1 %v7847_v45  ;;  %7338 = vmatprep.subr.bf16.mxu0 %v7337_v46  ;;  %v1953_v45 = vld [vmem:[%s9826_s30 + $0x3298] sm:$0xff] }
 0x202   : > { %7850 = vmatprep.subr.bf16.mxu1 %v7849_v50  ;;  %v1961_v46 = vld [vmem:[%s9826_s30 + $0x32d8] sm:$0xff]  ;;  %v7357_v50 = vpack.c.bf16 %v1959_v44, %v1951_v43 }
 0x203   : > { %2892 = vmatmul.mubr.f32.vlgmr.msra.gmra.mrb[0].mxu0 %v248_v56  ;;  %v7869_v54 = vpack.c.bf16 %v1961_v46, %v1953_v45  ;;  %v2041_v43 = vld [vmem:[%s9826_s30 + $0x3558] sm:$0xff] }
 0x204   : > { %7340 = vmatpush1.bf16.msra.mxu0 %v7339_v57  ;;  %3604 = vmatmul.mubr.f32.vlgmr.msra.gmra.mrb[0].mxu1 %v248_v56  ;;  %v1967_v56 = vld [vmem:[%s9826_s30 + $0x3308] sm:$0xff] }
 0x205   : > { %7852 = vmatpush1.bf16.msra.mxu1 %v7851_v58  ;;  %7342 = vmatprep.subr.bf16.mxu0 %v7341_v59  ;;  %v1975_v57 = vld [vmem:[%s9826_s30 + $0x3348] sm:$0xff]  ;;  %v1969_v58 = vld [vmem:[%s9826_s30 + $0x3318] sm:$0xff] }
 0x206   : > { %7854 = vmatprep.subr.bf16.mxu1 %v7853_v63  ;;  %2897 = vmatprep.mubr.f32.mxu0 %v265_v5  ;;  %v1977_v59 = vld [vmem:[%s9826_s30 + $0x3358] sm:$0xff]  ;;  %v7361_v62 = vpack.c.bf16 %v1975_v57, %v1967_v56  ;;  %v1966_v63 = vld [vmem:[%s9826_s30 + $0x3300] sm:$0xff] }
 0x207   : > { %3609 = vmatprep.mubr.f32.mxu1 %v265_v5  ;;  %2898 = vmatmul.mubr.f32.gmra.mrb[2].mxu0 %v264_v7  ;;  %v7873_v2 = vpack.c.bf16 %v1977_v59, %v1969_v58  ;;  %v1991_v5 = vld [vmem:[%s9826_s30 + $0x33c8] sm:$0xff]  ;;  %v7381_v58 = vpack.c.bf16 %v2055_v53, %v2047_v52  ;;  %v2046_v59 = vld [vmem:[%s9826_s30 + $0x3580] sm:$0xff] }
 0x208   : > { %7344 = vmatpush1.bf16.msra.mxu0 %v7343_v6  ;;  %3610 = vmatmul.mubr.f32.gmra.mrb[2].mxu1 %v264_v7  ;;  %v1985_v6 = vld [vmem:[%s9826_s30 + $0x3398] sm:$0xff]  ;;  %v7365_v10 = vpack.c.bf16 %v1991_v5, %v1983_v4 }
 0x209   : > { %7856 = vmatpush1.bf16.msra.mxu1 %v7855_v8  ;;  %7346 = vmatprep.subr.bf16.mxu0 %v7345_v9  ;;  %v1993_v7 = vld [vmem:[%s9826_s30 + $0x33d8] sm:$0xff]  ;;  %v7363_v8 = vpack.c.bf16 %v1974_v0, %v1966_v63  ;;  %v7875_v9 = vpack.c.bf16 %v1976_v3, %v1968_v1  ;;  %v2056_v63 = vld [vmem:[%s9826_s30 + $0x35d0] sm:$0xff]  ;;  %v2063_v0 = vld [vmem:[%s9826_s30 + $0x3608] sm:$0xff] }
 0x20a   : > { %7858 = vmatprep.subr.bf16.mxu1 %v7857_v13  ;;  %2903 = vmatprep.mubr.f32.mxu0 %v281_v19  ;;  %v1984_v13 = vld [vmem:[%s9826_s30 + $0x3390] sm:$0xff]  ;;  %v7877_v14 = vpack.c.bf16 %v1993_v7, %v1985_v6  ;;  %v2071_v1 = vld [vmem:[%s9826_s30 + $0x3648] sm:$0xff]  ;;  %v2073_v3 = vld [vmem:[%s9826_s30 + $0x3658] sm:$0xff] }
 0x20b   : > { %3615 = vmatprep.mubr.f32.mxu1 %v281_v19  ;;  %2904 = vmatmul.mubr.f32.gmra.mrb[4].mxu0 %v280_v21  ;;  %v2009_v19 = vld [vmem:[%s9826_s30 + $0x3458] sm:$0xff]  ;;  %v7385_v6 = vpack.c.bf16 %v2071_v1, %v2063_v0  ;;  %v2062_v7 = vld [vmem:[%s9826_s30 + $0x3600] sm:$0xff] }
 0x20c   : > { %7348 = vmatpush1.bf16.msra.mxu0 %v7347_v20  ;;  %3616 = vmatmul.mubr.f32.gmra.mrb[4].mxu1 %v280_v21  ;;  %v7367_v20 = vpack.c.bf16 %v1990_v12, %v1982_v11  ;;  %v7879_v21 = vpack.c.bf16 %v1992_v15, %v1984_v13  ;;  %v7881_v26 = vpack.c.bf16 %v2009_v19, %v2001_v18  ;;  %v2072_v11 = vld [vmem:[%s9826_s30 + $0x3650] sm:$0xff]  ;;  %v2079_v12 = vld [vmem:[%s9826_s30 + $0x3688] sm:$0xff]  ;;  %v2089_v15 = vld [vmem:[%s9826_s30 + $0x36d8] sm:$0xff] }
 0x20d   : > { %7860 = vmatpush1.bf16.msra.mxu1 %v7859_v22  ;;  %7350 = vmatprep.subr.bf16.mxu0 %v7349_v23  ;;  %v7369_v22 = vpack.c.bf16 %v2007_v17, %v1999_v16  ;;  %v1998_v23 = vld [vmem:[%s9826_s30 + $0x3400] sm:$0xff]  ;;  %v2087_v13 = vld [vmem:[%s9826_s30 + $0x36c8] sm:$0xff] }
 0x20e   : > { %7862 = vmatprep.subr.bf16.mxu1 %v7861_v27  ;;  %2909 = vmatprep.mubr.f32.mxu0 %v297_v33  ;;  %v2008_v27 = vld [vmem:[%s9826_s30 + $0x3450] sm:$0xff]  ;;  %v7371_v32 = vpack.c.bf16 %v2006_v24, %v1998_v23  ;;  %v7389_v18 = vpack.c.bf16 %v2087_v13, %v2079_v12  ;;  %v2078_v19 = vld [vmem:[%s9826_s30 + $0x3680] sm:$0xff]  ;;  %v2095_v24 = vld [vmem:[%s9826_s30 + $0x3708] sm:$0xff] }
 0x20f   : > { %3621 = vmatprep.mubr.f32.mxu1 %v297_v33  ;;  %2910 = vmatmul.mubr.f32.gmra.mrb[6].mxu0 %v296_v35  ;;  %v7883_v33 = vpack.c.bf16 %v2008_v27, %v2000_v25  ;;  %v2088_v23 = vld [vmem:[%s9826_s30 + $0x36d0] sm:$0xff]  ;;  %v2103_v25 = vld [vmem:[%s9826_s30 + $0x3748] sm:$0xff]  ;;  %v2105_v27 = vld [vmem:[%s9826_s30 + $0x3758] sm:$0xff] }
 0x210   : > { %7352 = vmatpush1.bf16.msra.mxu0 %v7351_v34  ;;  %3622 = vmatmul.mubr.f32.gmra.mrb[6].mxu1 %v296_v35  ;;  %v7373_v34 = vpack.c.bf16 %v2023_v29, %v2015_v28  ;;  %v2014_v35 = vld [vmem:[%s9826_s30 + $0x3480] sm:$0xff]  ;;  %v7393_v30 = vpack.c.bf16 %v2103_v25, %v2095_v24  ;;  %v2169_v12 = vld [vmem:[%s9826_s30 + $0x3958] sm:$0xff]  ;;  %v267_v13 = vld [vmem:[%s9940_s3 + $0x4e8] sm:$0xff] }
 0x211   : > { %7864 = vmatpush1.bf16.msra.mxu1 %v7863_v36  ;;  %7354 = vmatprep.subr.bf16.mxu0 %v7353_v37  ;;  %v2022_v36 = vld [vmem:[%s9826_s30 + $0x34c0] sm:$0xff]  ;;  %v2016_v37 = vld [vmem:[%s9826_s30 + $0x3490] sm:$0xff]  ;;  %v2183_v24 = vld [vmem:[%s9826_s30 + $0x39c8] sm:$0xff] }
 0x212   : > { %7866 = vmatprep.subr.bf16.mxu1 %v7865_v41  ;;  %2980 = vmatprep.mubr.f32.mxu0 %v251_v47  ;;  %v2039_v41 = vld [vmem:[%s9826_s30 + $0x3548] sm:$0xff]  ;;  %v7375_v44 = vpack.c.bf16 %v2022_v36, %v2014_v35  ;;  %v7887_v45 = vpack.c.bf16 %v2024_v39, %v2016_v37  ;;  %v2104_v35 = vld [vmem:[%s9826_s30 + $0x3750] sm:$0xff]  ;;  %v2121_v39 = vld [vmem:[%s9826_s30 + $0x37d8] sm:$0xff] }
 0x213   : > { %3692 = vmatprep.mubr.f32.mxu1 %v251_v47  ;;  %v7377_v46 = vpack.c.bf16 %v2039_v41, %v2031_v40  ;;  %v2030_v47 = vld [vmem:[%s9826_s30 + $0x3500] sm:$0xff]  ;;  %v2111_v36 = vld [vmem:[%s9826_s30 + $0x3788] sm:$0xff]  ;;  %v2177_v25 = vld [vmem:[%s9826_s30 + $0x3998] sm:$0xff] }
 0x214   : > { %7356 = vmatpush1.bf16.msra.mxu0 %v7355_v48  ;;  %v2038_v48 = vld [vmem:[%s9826_s30 + $0x3540] sm:$0xff]  ;;  %v2119_v37 = vld [vmem:[%s9826_s30 + $0x37c8] sm:$0xff] }
 0x215   : > { %7868 = vmatpush1.bf16.msra.mxu1 %v7867_v49  ;;  %7358 = vmatprep.subr.bf16.mxu0 %v7357_v50  ;;  %v2032_v49 = vld [vmem:[%s9826_s30 + $0x3510] sm:$0xff]  ;;  %v7889_v50 = vpack.c.bf16 %v2041_v43, %v2033_v42  ;;  %v7379_v56 = vpack.c.bf16 %v2038_v48, %v2030_v47  ;;  %v7397_v42 = vpack.c.bf16 %v2119_v37, %v2111_v36  ;;  %v2110_v43 = vld [vmem:[%s9826_s30 + $0x3780] sm:$0xff]  ;;  %v2127_v48 = vld [vmem:[%s9826_s30 + $0x3808] sm:$0xff] }
 0x216   : > { %7870 = vmatprep.subr.bf16.mxu1 %v7869_v54  ;;  %v2049_v54 = vld [vmem:[%s9826_s30 + $0x3598] sm:$0xff]  ;;  %v7891_v57 = vpack.c.bf16 %v2040_v51, %v2032_v49  ;;  %v2120_v47 = vld [vmem:[%s9826_s30 + $0x37d0] sm:$0xff]  ;;  %v2135_v49 = vld [vmem:[%s9826_s30 + $0x3848] sm:$0xff] }
 0x217   : > { %v2137_v51 = vld [vmem:[%s9826_s30 + $0x3858] sm:$0xff]  ;;  %v250_v0 = vld [vmem:[%s9940_s3 + $0x60] sm:$0xff]  ;;  %v2184_v36 = vld [vmem:[%s9826_s30 + $0x39d0] sm:$0xff] }
 0x218   : > { %7360 = vmatpush1.bf16.msra.mxu0 %v7359_v60  ;;  %v2054_v60 = vld [vmem:[%s9826_s30 + $0x35c0] sm:$0xff]  ;;  %v2191_v37 = vld [vmem:[%s9826_s30 + $0x3a08] sm:$0xff] }
 0x219   : > { %7872 = vmatpush1.bf16.msra.mxu1 %v7871_v61  ;;  %7362 = vmatprep.subr.bf16.mxu0 %v7361_v62  ;;  %v2048_v61 = vld [vmem:[%s9826_s30 + $0x3590] sm:$0xff]  ;;  %v7893_v62 = vpack.c.bf16 %v2057_v55, %v2049_v54  ;;  %v7383_v4 = vpack.c.bf16 %v2054_v60, %v2046_v59  ;;  %v7401_v54 = vpack.c.bf16 %v2135_v49, %v2127_v48  ;;  %v2126_v55 = vld [vmem:[%s9826_s30 + $0x3800] sm:$0xff]  ;;  %v2143_v60 = vld [vmem:[%s9826_s30 + $0x3888] sm:$0xff] }
 0x21a   : > { %7874 = vmatprep.subr.bf16.mxu1 %v7873_v2  ;;  %v2065_v2 = vld [vmem:[%s9826_s30 + $0x3618] sm:$0xff]  ;;  %v7895_v5 = vpack.c.bf16 %v2056_v63, %v2048_v61  ;;  %v2136_v59 = vld [vmem:[%s9826_s30 + $0x3850] sm:$0xff]  ;;  %v2151_v61 = vld [vmem:[%s9826_s30 + $0x38c8] sm:$0xff] }
 0x21b   : > { %v2153_v63 = vld [vmem:[%s9826_s30 + $0x38d8] sm:$0xff]  ;;  %v2192_v48 = vld [vmem:[%s9826_s30 + $0x3a10] sm:$0xff] }
 0x21c   : > { %7364 = vmatpush1.bf16.msra.mxu0 %v7363_v8  ;;  %v2070_v8 = vld [vmem:[%s9826_s30 + $0x3640] sm:$0xff] }
 0x21d   : > { %7876 = vmatpush1.bf16.msra.mxu1 %v7875_v9  ;;  %7366 = vmatprep.subr.bf16.mxu0 %v7365_v10  ;;  %v2064_v9 = vld [vmem:[%s9826_s30 + $0x3610] sm:$0xff]  ;;  %v7897_v10 = vpack.c.bf16 %v2073_v3, %v2065_v2  ;;  %v7387_v16 = vpack.c.bf16 %v2070_v8, %v2062_v7  ;;  %v7405_v3 = vpack.c.bf16 %v2151_v61, %v2143_v60  ;;  %v2214_v60 = vld [vmem:[%s9826_s30 + $0x3ac0] sm:$0xff] }
 0x21e   : > { %7878 = vmatprep.subr.bf16.mxu1 %v7877_v14  ;;  %v2081_v14 = vld [vmem:[%s9826_s30 + $0x3698] sm:$0xff]  ;;  %v7899_v17 = vpack.c.bf16 %v2072_v11, %v2064_v9  ;;  %v2152_v8 = vld [vmem:[%s9826_s30 + $0x38d0] sm:$0xff]  ;;  %v2159_v9 = vld [vmem:[%s9826_s30 + $0x3908] sm:$0xff] }
 0x21f   : > { %v2161_v11 = vld [vmem:[%s9826_s30 + $0x3918] sm:$0xff]  ;;  %v2208_v61 = vld [vmem:[%s9826_s30 + $0x3a90] sm:$0xff] }
 0x220   : > { %7368 = vmatpush1.bf16.msra.mxu0 %v7367_v20  ;;  %v2086_v20 = vld [vmem:[%s9826_s30 + $0x36c0] sm:$0xff] }
 0x221   : > { %7880 = vmatpush1.bf16.msra.mxu1 %v7879_v21  ;;  %7370 = vmatprep.subr.bf16.mxu0 %v7369_v22  ;;  %v2080_v21 = vld [vmem:[%s9826_s30 + $0x3690] sm:$0xff]  ;;  %v7901_v22 = vpack.c.bf16 %v2089_v15, %v2081_v14  ;;  %v7391_v28 = vpack.c.bf16 %v2086_v20, %v2078_v19  ;;  %v266_v15 = vld [vmem:[%s9940_s3 + $0x4e0] sm:$0xff] }
 0x222   : > { %7882 = vmatprep.subr.bf16.mxu1 %v7881_v26  ;;  %v2097_v26 = vld [vmem:[%s9826_s30 + $0x3718] sm:$0xff]  ;;  %v7903_v29 = vpack.c.bf16 %v2088_v23, %v2080_v21  ;;  %v2166_v19 = vld [vmem:[%s9826_s30 + $0x3940] sm:$0xff]  ;;  %v2160_v20 = vld [vmem:[%s9826_s30 + $0x3910] sm:$0xff]  ;;  %v7921_v21 = vpack.c.bf16 %v2169_v12, %v2161_v11 }
 0x223   : > { %v2175_v23 = vld [vmem:[%s9826_s30 + $0x3988] sm:$0xff]  ;;  %v2232_v11 = vld [vmem:[%s9826_s30 + $0x3b50] sm:$0xff] }
 0x224   : > { %7372 = vmatpush1.bf16.msra.mxu0 %v7371_v32  ;;  %v2102_v32 = vld [vmem:[%s9826_s30 + $0x3740] sm:$0xff]  ;;  %v2239_v12 = vld [vmem:[%s9826_s30 + $0x3b88] sm:$0xff] }
 0x225   : > { %7884 = vmatpush1.bf16.msra.mxu1 %v7883_v33  ;;  %7374 = vmatprep.subr.bf16.mxu0 %v7373_v34  ;;  %v2096_v33 = vld [vmem:[%s9826_s30 + $0x3710] sm:$0xff]  ;;  %v7905_v34 = vpack.c.bf16 %v2105_v27, %v2097_v26  ;;  %v7395_v40 = vpack.c.bf16 %v2102_v32, %v2094_v31  ;;  %v2185_v26 = vld [vmem:[%s9826_s30 + $0x39d8] sm:$0xff]  ;;  %v283_v27 = vld [vmem:[%s9940_s3 + $0x968] sm:$0xff]  ;;  %v7413_v31 = vpack.c.bf16 %v2183_v24, %v2175_v23 }
 0x226   : > { %7886 = vmatprep.subr.bf16.mxu1 %v7885_v38  ;;  %v2113_v38 = vld [vmem:[%s9826_s30 + $0x3798] sm:$0xff]  ;;  %v7907_v41 = vpack.c.bf16 %v2104_v35, %v2096_v33  ;;  %v2174_v32 = vld [vmem:[%s9826_s30 + $0x3980] sm:$0xff]  ;;  %v7925_v35 = vpack.c.bf16 %v2185_v26, %v2177_v25  ;;  %v2248_v23 = vld [vmem:[%s9826_s30 + $0x3bd0] sm:$0xff] }
 0x227   : > { %v2182_v33 = vld [vmem:[%s9826_s30 + $0x39c0] sm:$0xff]  ;;  %v2255_v24 = vld [vmem:[%s9826_s30 + $0x3c08] sm:$0xff]  ;;  %v2257_v26 = vld [vmem:[%s9826_s30 + $0x3c18] sm:$0xff] }
 0x228   : > { %7376 = vmatpush1.bf16.msra.mxu0 %v7375_v44  ;;  %v2118_v44 = vld [vmem:[%s9826_s30 + $0x37c0] sm:$0xff]  ;;  %v2263_v25 = vld [vmem:[%s9826_s30 + $0x3c48] sm:$0xff] }
 0x229   : > { %7888 = vmatpush1.bf16.msra.mxu1 %v7887_v45  ;;  %7378 = vmatprep.subr.bf16.mxu0 %v7377_v46  ;;  %v2112_v45 = vld [vmem:[%s9826_s30 + $0x3790] sm:$0xff]  ;;  %v7909_v46 = vpack.c.bf16 %v2121_v39, %v2113_v38  ;;  %v7399_v52 = vpack.c.bf16 %v2118_v44, %v2110_v43  ;;  %v2199_v38 = vld [vmem:[%s9826_s30 + $0x3a48] sm:$0xff]  ;;  %v2193_v39 = vld [vmem:[%s9826_s30 + $0x3a18] sm:$0xff] }
 0x22a   : > { %7890 = vmatprep.subr.bf16.mxu1 %v7889_v50  ;;  %v2129_v50 = vld [vmem:[%s9826_s30 + $0x3818] sm:$0xff]  ;;  %v7911_v53 = vpack.c.bf16 %v2120_v47, %v2112_v45  ;;  %v298_v43 = vld [vmem:[%s9940_s3 + $0xde0] sm:$0xff]  ;;  %v7417_v45 = vpack.c.bf16 %v2199_v38, %v2191_v37  ;;  %v2279_v37 = vld [vmem:[%s9826_s30 + $0x3cc8] sm:$0xff] }
 0x22b   : > { %v2198_v47 = vld [vmem:[%s9826_s30 + $0x3a40] sm:$0xff]  ;;  %v2273_v38 = vld [vmem:[%s9826_s30 + $0x3c98] sm:$0xff] }
 0x22c   : > { %7380 = vmatpush1.bf16.msra.mxu0 %v7379_v56  ;;  %v2134_v56 = vld [vmem:[%s9826_s30 + $0x3840] sm:$0xff] }
 0x22d   : > { %7892 = vmatpush1.bf16.msra.mxu1 %v7891_v57  ;;  %7382 = vmatprep.subr.bf16.mxu0 %v7381_v58  ;;  %v2128_v57 = vld [vmem:[%s9826_s30 + $0x3810] sm:$0xff]  ;;  %v7913_v58 = vpack.c.bf16 %v2137_v51, %v2129_v50  ;;  %v7403_v1 = vpack.c.bf16 %v2134_v56, %v2126_v55  ;;  %v2207_v51 = vld [vmem:[%s9826_s30 + $0x3a88] sm:$0xff]  ;;  %v253_v55 = vld [vmem:[%s9940_s3 + $0x78] sm:$0xff] }
 0x22e   : > { %7894 = vmatprep.subr.bf16.mxu1 %v7893_v62  ;;  %v2145_v62 = vld [vmem:[%s9826_s30 + $0x3898] sm:$0xff]  ;;  %v7915_v2 = vpack.c.bf16 %v2136_v59, %v2128_v57  ;;  %v2200_v50 = vld [vmem:[%s9826_s30 + $0x3a50] sm:$0xff]  ;;  %v2206_v59 = vld [vmem:[%s9826_s30 + $0x3a80] sm:$0xff] }
 0x22f   : > { %v7917_v7 = vpack.c.bf16 %v2153_v63, %v2145_v62  ;;  %v7931_v57 = vpack.c.bf16 %v2200_v50, %v2192_v48  ;;  %v2216_v63 = vld [vmem:[%s9826_s30 + $0x3ad0] sm:$0xff]  ;;  %v2287_v48 = vld [vmem:[%s9826_s30 + $0x3d08] sm:$0xff]  ;;  %v2289_v50 = vld [vmem:[%s9826_s30 + $0x3d18] sm:$0xff] }
 0x230   : > { %7384 = vmatpush1.bf16.msra.mxu0 %v7383_v4  ;;  %v2142_v4 = vld [vmem:[%s9826_s30 + $0x3880] sm:$0xff] }
 0x231   : > { %7896 = vmatpush1.bf16.msra.mxu1 %v7895_v5  ;;  %7386 = vmatprep.subr.bf16.mxu0 %v7385_v6  ;;  %v2150_v5 = vld [vmem:[%s9826_s30 + $0x38c0] sm:$0xff]  ;;  %v2144_v6 = vld [vmem:[%s9826_s30 + $0x3890] sm:$0xff] }
 0x232   : > { %7898 = vmatprep.subr.bf16.mxu1 %v7897_v10  ;;  %v2167_v10 = vld [vmem:[%s9826_s30 + $0x3948] sm:$0xff]  ;;  %v7407_v14 = vpack.c.bf16 %v2150_v5, %v2142_v4  ;;  %v7423_v4 = vpack.c.bf16 %v2214_v60, %v2206_v59  ;;  %v7935_v5 = vpack.c.bf16 %v2216_v63, %v2208_v61  ;;  %v2296_v59 = vld [vmem:[%s9826_s30 + $0x3d50] sm:$0xff]  ;;  %v2313_v63 = vld [vmem:[%s9826_s30 + $0x3dd8] sm:$0xff] }
 0x233   : > { %v2303_v60 = vld [vmem:[%s9826_s30 + $0x3d88] sm:$0xff] }
 0x234   : > { %7388 = vmatpush1.bf16.msra.mxu0 %v7387_v16  ;;  %v7919_v16 = vpack.c.bf16 %v2152_v8, %v2144_v6  ;;  %v2230_v8 = vld [vmem:[%s9826_s30 + $0x3b40] sm:$0xff]  ;;  %v2311_v61 = vld [vmem:[%s9826_s30 + $0x3dc8] sm:$0xff] }
 0x235   : > { %7900 = vmatpush1.bf16.msra.mxu1 %v7899_v17  ;;  %7390 = vmatprep.subr.bf16.mxu0 %v7389_v18  ;;  %v7409_v17 = vpack.c.bf16 %v2167_v10, %v2159_v9  ;;  %v2158_v18 = vld [vmem:[%s9826_s30 + $0x3900] sm:$0xff]  ;;  %v2224_v9 = vld [vmem:[%s9826_s30 + $0x3b10] sm:$0xff] }
 0x236   : > { %7902 = vmatprep.subr.bf16.mxu1 %v7901_v22  ;;  %v2168_v22 = vld [vmem:[%s9826_s30 + $0x3950] sm:$0xff] }
 0x238   : > { %7392 = vmatpush1.bf16.msra.mxu0 %v7391_v28  ;;  %v7411_v28 = vpack.c.bf16 %v2166_v19, %v2158_v18  ;;  %v2238_v19 = vld [vmem:[%s9826_s30 + $0x3b80] sm:$0xff] }
 0x239   : > { %7904 = vmatpush1.bf16.msra.mxu1 %v7903_v29  ;;  %7394 = vmatprep.subr.bf16.mxu0 %v7393_v30  ;;  %v282_v29 = vld [vmem:[%s9940_s3 + $0x960] sm:$0xff]  ;;  %v7923_v30 = vpack.c.bf16 %v2168_v22, %v2160_v20 }
 0x23a   : > { %7906 = vmatprep.subr.bf16.mxu1 %v7905_v34  ;;  %v2176_v34 = vld [vmem:[%s9826_s30 + $0x3990] sm:$0xff]  ;;  %v2246_v20 = vld [vmem:[%s9826_s30 + $0x3bc0] sm:$0xff] }
 0x23b   : > { %v7927_v44 = vpack.c.bf16 %v2184_v36, %v2176_v34  ;;  %v2271_v36 = vld [vmem:[%s9826_s30 + $0x3c88] sm:$0xff] }
 0x23c   : > { %7396 = vmatpush1.bf16.msra.mxu0 %v7395_v40  ;;  %v2201_v40 = vld [vmem:[%s9826_s30 + $0x3a58] sm:$0xff] }
 0x23d   : > { %7908 = vmatpush1.bf16.msra.mxu1 %v7907_v41  ;;  %7398 = vmatprep.subr.bf16.mxu0 %v7397_v42  ;;  %v299_v41 = vld [vmem:[%s9940_s3 + $0xde8] sm:$0xff]  ;;  %v7415_v42 = vpack.c.bf16 %v2182_v33, %v2174_v32  ;;  %v7929_v49 = vpack.c.bf16 %v2201_v40, %v2193_v39  ;;  %v2262_v32 = vld [vmem:[%s9826_s30 + $0x3c40] sm:$0xff]  ;;  %v2256_v33 = vld [vmem:[%s9826_s30 + $0x3c10] sm:$0xff] }
 0x23e   : > { %7910 = vmatprep.subr.bf16.mxu1 %v7909_v46  ;;  %v2190_v46 = vld [vmem:[%s9826_s30 + $0x3a00] sm:$0xff]  ;;  %v2281_v39 = vld [vmem:[%s9826_s30 + $0x3cd8] sm:$0xff] }
 0x23f   : > { %v7419_v56 = vpack.c.bf16 %v2198_v47, %v2190_v46  ;;  %v7949_v46 = vpack.c.bf16 %v2281_v39, %v2273_v38  ;;  %v2280_v47 = vld [vmem:[%s9826_s30 + $0x3cd0] sm:$0xff]  ;;  %v2350_v39 = vld [vmem:[%s9826_s30 + $0x3f00] sm:$0xff] }
 0x240   : > { %7400 = vmatpush1.bf16.msra.mxu0 %v7399_v52  ;;  %v2215_v52 = vld [vmem:[%s9826_s30 + $0x3ac8] sm:$0xff] }
 0x241   : > { %7912 = vmatpush1.bf16.msra.mxu1 %v7911_v53  ;;  %7402 = vmatprep.subr.bf16.mxu0 %v7401_v54  ;;  %v2209_v53 = vld [vmem:[%s9826_s30 + $0x3a98] sm:$0xff] }
 0x242   : > { %7914 = vmatprep.subr.bf16.mxu1 %v7913_v58  ;;  %v2217_v54 = vld [vmem:[%s9826_s30 + $0x3ad8] sm:$0xff]  ;;  %v7421_v58 = vpack.c.bf16 %v2215_v52, %v2207_v51 }
 0x243   : > { %2981 = vmatmul.mubr.f32.vlgmr.msra.gmra.mrb[0].mxu0 %v250_v0  ;;  %v7933_v62 = vpack.c.bf16 %v2217_v54, %v2209_v53  ;;  %v2297_v51 = vld [vmem:[%s9826_s30 + $0x3d58] sm:$0xff] }
 0x244   : > { %7404 = vmatpush1.bf16.msra.mxu0 %v7403_v1  ;;  %3693 = vmatmul.mubr.f32.vlgmr.msra.gmra.mrb[0].mxu1 %v250_v0  ;;  %v2223_v0 = vld [vmem:[%s9826_s30 + $0x3b08] sm:$0xff] }
 0x245   : > { %7916 = vmatpush1.bf16.msra.mxu1 %v7915_v2  ;;  %7406 = vmatprep.subr.bf16.mxu0 %v7405_v3  ;;  %v2231_v1 = vld [vmem:[%s9826_s30 + $0x3b48] sm:$0xff]  ;;  %v2225_v2 = vld [vmem:[%s9826_s30 + $0x3b18] sm:$0xff] }
 0x246   : > { %7918 = vmatprep.subr.bf16.mxu1 %v7917_v7  ;;  %2986 = vmatprep.mubr.f32.mxu0 %v267_v13  ;;  %v2233_v3 = vld [vmem:[%s9826_s30 + $0x3b58] sm:$0xff]  ;;  %v7425_v6 = vpack.c.bf16 %v2231_v1, %v2223_v0  ;;  %v2222_v7 = vld [vmem:[%s9826_s30 + $0x3b00] sm:$0xff] }
 0x247   : > { %3698 = vmatprep.mubr.f32.mxu1 %v267_v13  ;;  %2987 = vmatmul.mubr.f32.gmra.mrb[2].mxu0 %v266_v15  ;;  %v7937_v10 = vpack.c.bf16 %v2233_v3, %v2225_v2  ;;  %v2247_v13 = vld [vmem:[%s9826_s30 + $0x3bc8] sm:$0xff]  ;;  %v7445_v2 = vpack.c.bf16 %v2311_v61, %v2303_v60  ;;  %v2302_v3 = vld [vmem:[%s9826_s30 + $0x3d80] sm:$0xff] }
 0x248   : > { %7408 = vmatpush1.bf16.msra.mxu0 %v7407_v14  ;;  %3699 = vmatmul.mubr.f32.gmra.mrb[2].mxu1 %v266_v15  ;;  %v2241_v14 = vld [vmem:[%s9826_s30 + $0x3b98] sm:$0xff]  ;;  %v7429_v18 = vpack.c.bf16 %v2247_v13, %v2239_v12 }
 0x249   : > { %7920 = vmatpush1.bf16.msra.mxu1 %v7919_v16  ;;  %7410 = vmatprep.subr.bf16.mxu0 %v7409_v17  ;;  %v2249_v15 = vld [vmem:[%s9826_s30 + $0x3bd8] sm:$0xff]  ;;  %v7427_v16 = vpack.c.bf16 %v2230_v8, %v2222_v7  ;;  %v7939_v17 = vpack.c.bf16 %v2232_v11, %v2224_v9  ;;  %v2312_v7 = vld [vmem:[%s9826_s30 + $0x3dd0] sm:$0xff]  ;;  %v2319_v8 = vld [vmem:[%s9826_s30 + $0x3e08] sm:$0xff] }
 0x24a   : > { %7922 = vmatprep.subr.bf16.mxu1 %v7921_v21  ;;  %2992 = vmatprep.mubr.f32.mxu0 %v283_v27  ;;  %v2240_v21 = vld [vmem:[%s9826_s30 + $0x3b90] sm:$0xff]  ;;  %v7941_v22 = vpack.c.bf16 %v2249_v15, %v2241_v14  ;;  %v2327_v9 = vld [vmem:[%s9826_s30 + $0x3e48] sm:$0xff]  ;;  %v2329_v11 = vld [vmem:[%s9826_s30 + $0x3e58] sm:$0xff] }
 0x24b   : > { %3704 = vmatprep.mubr.f32.mxu1 %v283_v27  ;;  %2993 = vmatmul.mubr.f32.gmra.mrb[4].mxu0 %v282_v29  ;;  %v2265_v27 = vld [vmem:[%s9826_s30 + $0x3c58] sm:$0xff]  ;;  %v7449_v14 = vpack.c.bf16 %v2327_v9, %v2319_v8  ;;  %v2318_v15 = vld [vmem:[%s9826_s30 + $0x3e00] sm:$0xff] }
 0x24c   : > { %7412 = vmatpush1.bf16.msra.mxu0 %v7411_v28  ;;  %3705 = vmatmul.mubr.f32.gmra.mrb[4].mxu1 %v282_v29  ;;  %v7431_v28 = vpack.c.bf16 %v2246_v20, %v2238_v19  ;;  %v7943_v29 = vpack.c.bf16 %v2248_v23, %v2240_v21  ;;  %v7945_v34 = vpack.c.bf16 %v2265_v27, %v2257_v26  ;;  %v2328_v19 = vld [vmem:[%s9826_s30 + $0x3e50] sm:$0xff]  ;;  %v2335_v20 = vld [vmem:[%s9826_s30 + $0x3e88] sm:$0xff]  ;;  %v2345_v23 = vld [vmem:[%s9826_s30 + $0x3ed8] sm:$0xff] }
 0x24d   : > { %7924 = vmatpush1.bf16.msra.mxu1 %v7923_v30  ;;  %7414 = vmatprep.subr.bf16.mxu0 %v7413_v31  ;;  %v7433_v30 = vpack.c.bf16 %v2263_v25, %v2255_v24  ;;  %v2254_v31 = vld [vmem:[%s9826_s30 + $0x3c00] sm:$0xff]  ;;  %v2343_v21 = vld [vmem:[%s9826_s30 + $0x3ec8] sm:$0xff]  ;;  %v357_v8 = vld [vmem:[%s9826_s30 + $0xb8] sm:$0xff] }
 0x24e   : > { %7926 = vmatprep.subr.bf16.mxu1 %v7925_v35  ;;  %2998 = vmatprep.mubr.f32.mxu0 %v299_v41  ;;  %v2264_v35 = vld [vmem:[%s9826_s30 + $0x3c50] sm:$0xff]  ;;  %v7435_v40 = vpack.c.bf16 %v2262_v32, %v2254_v31  ;;  %v7453_v26 = vpack.c.bf16 %v2343_v21, %v2335_v20  ;;  %v2334_v27 = vld [vmem:[%s9826_s30 + $0x3e80] sm:$0xff]  ;;  %v2351_v32 = vld [vmem:[%s9826_s30 + $0x3f08] sm:$0xff] }
 0x24f   : > { %3710 = vmatprep.mubr.f32.mxu1 %v299_v41  ;;  %2999 = vmatmul.mubr.f32.gmra.mrb[6].mxu0 %v298_v43  ;;  %v7947_v41 = vpack.c.bf16 %v2264_v35, %v2256_v33  ;;  %v2344_v31 = vld [vmem:[%s9826_s30 + $0x3ed0] sm:$0xff]  ;;  %v2359_v33 = vld [vmem:[%s9826_s30 + $0x3f48] sm:$0xff]  ;;  %v2361_v35 = vld [vmem:[%s9826_s30 + $0x3f58] sm:$0xff] }
 0x250   : > { %7416 = vmatpush1.bf16.msra.mxu0 %v7415_v42  ;;  %3711 = vmatmul.mubr.f32.gmra.mrb[6].mxu1 %v298_v43  ;;  %v7437_v42 = vpack.c.bf16 %v2279_v37, %v2271_v36  ;;  %v2270_v43 = vld [vmem:[%s9826_s30 + $0x3c80] sm:$0xff]  ;;  %v7457_v38 = vpack.c.bf16 %v2359_v33, %v2351_v32  ;;  %v365_v9 = vld [vmem:[%s9826_s30 + $0xf8] sm:$0xff]  ;;  %v268_v20 = vld [vmem:[%s9940_s3 + $0x4f0] sm:$0xff] }
 0x251   : > { %7928 = vmatpush1.bf16.msra.mxu1 %v7927_v44  ;;  %7418 = vmatprep.subr.bf16.mxu0 %v7417_v45  ;;  %v2278_v44 = vld [vmem:[%s9826_s30 + $0x3cc0] sm:$0xff]  ;;  %v2272_v45 = vld [vmem:[%s9826_s30 + $0x3c90] sm:$0xff]  ;;  %v387_v33 = vld [vmem:[%s9826_s30 + $0x1a8] sm:$0xff] }
 0x252   : > { %7930 = vmatprep.subr.bf16.mxu1 %v7929_v49  ;;  %3069 = vmatprep.mubr.f32.mxu0 %v253_v55  ;;  %v2295_v49 = vld [vmem:[%s9826_s30 + $0x3d48] sm:$0xff]  ;;  %v7439_v52 = vpack.c.bf16 %v2278_v44, %v2270_v43  ;;  %v7951_v53 = vpack.c.bf16 %v2280_v47, %v2272_v45  ;;  %v2360_v43 = vld [vmem:[%s9826_s30 + $0x3f50] sm:$0xff]  ;;  %v2377_v47 = vld [vmem:[%s9826_s30 + $0x3fd8] sm:$0xff] }
 0x253   : > { %3781 = vmatprep.mubr.f32.mxu1 %v253_v55  ;;  %v7441_v54 = vpack.c.bf16 %v2295_v49, %v2287_v48  ;;  %v2286_v55 = vld [vmem:[%s9826_s30 + $0x3d00] sm:$0xff]  ;;  %v2367_v44 = vld [vmem:[%s9826_s30 + $0x3f88] sm:$0xff] }
 0x254   : > { %7420 = vmatpush1.bf16.msra.mxu0 %v7419_v56  ;;  %v2294_v56 = vld [vmem:[%s9826_s30 + $0x3d40] sm:$0xff]  ;;  %v2375_v45 = vld [vmem:[%s9826_s30 + $0x3fc8] sm:$0xff] }
 0x255   : > { %7932 = vmatpush1.bf16.msra.mxu1 %v7931_v57  ;;  %7422 = vmatprep.subr.bf16.mxu0 %v7421_v58  ;;  %v2288_v57 = vld [vmem:[%s9826_s30 + $0x3d10] sm:$0xff]  ;;  %v7953_v58 = vpack.c.bf16 %v2297_v51, %v2289_v50  ;;  %v7443_v0 = vpack.c.bf16 %v2294_v56, %v2286_v55  ;;  %v7461_v50 = vpack.c.bf16 %v2375_v45, %v2367_v44  ;;  %v2366_v51 = vld [vmem:[%s9826_s30 + $0x3f80] sm:$0xff]  ;;  %v339_v56 = vld [vmem:[%s9826_s30 + $0x28] sm:$0xff] }
 0x256   : > { %7934 = vmatprep.subr.bf16.mxu1 %v7933_v62  ;;  %v2305_v62 = vld [vmem:[%s9826_s30 + $0x3d98] sm:$0xff]  ;;  %v7955_v1 = vpack.c.bf16 %v2296_v59, %v2288_v57  ;;  %v2376_v55 = vld [vmem:[%s9826_s30 + $0x3fd0] sm:$0xff]  ;;  %v347_v57 = vld [vmem:[%s9826_s30 + $0x68] sm:$0xff] }
 0x257   : > { %v349_v59 = vld [vmem:[%s9826_s30 + $0x78] sm:$0xff]  ;;  %v396_v44 = vld [vmem:[%s9826_s30 + $0x1f0] sm:$0xff]  ;;  %v403_v45 = vld [vmem:[%s9826_s30 + $0x228] sm:$0xff] }
 0x258   : > { %7424 = vmatpush1.bf16.msra.mxu0 %v7423_v4  ;;  %v2310_v4 = vld [vmem:[%s9826_s30 + $0x3dc0] sm:$0xff] }
 0x259   : > { %7936 = vmatpush1.bf16.msra.mxu1 %v7935_v5  ;;  %7426 = vmatprep.subr.bf16.mxu0 %v7425_v6  ;;  %v2304_v5 = vld [vmem:[%s9826_s30 + $0x3d90] sm:$0xff]  ;;  %v7957_v6 = vpack.c.bf16 %v2313_v63, %v2305_v62  ;;  %v7447_v12 = vpack.c.bf16 %v2310_v4, %v2302_v3  ;;  %v7977_v62 = vpack.c.bf16 %v347_v57, %v339_v56  ;;  %v338_v63 = vld [vmem:[%s9826_s30 + $0x20] sm:$0xff]  ;;  %v355_v4 = vld [vmem:[%s9826_s30 + $0xa8] sm:$0xff] }
 0x25a   : > { %7938 = vmatprep.subr.bf16.mxu1 %v7937_v10  ;;  %v2321_v10 = vld [vmem:[%s9826_s30 + $0x3e18] sm:$0xff]  ;;  %v7959_v13 = vpack.c.bf16 %v2312_v7, %v2304_v5  ;;  %v348_v3 = vld [vmem:[%s9826_s30 + $0x70] sm:$0xff]  ;;  %v363_v5 = vld [vmem:[%s9826_s30 + $0xe8] sm:$0xff] }
 0x25b   : > { %v404_v56 = vld [vmem:[%s9826_s30 + $0x230] sm:$0xff] }
 0x25c   : > { %7428 = vmatpush1.bf16.msra.mxu0 %v7427_v16  ;;  %v2326_v16 = vld [vmem:[%s9826_s30 + $0x3e40] sm:$0xff] }
 0x25d   : > { %7940 = vmatpush1.bf16.msra.mxu1 %v7939_v17  ;;  %7430 = vmatprep.subr.bf16.mxu0 %v7429_v18  ;;  %v2320_v17 = vld [vmem:[%s9826_s30 + $0x3e10] sm:$0xff]  ;;  %v7961_v18 = vpack.c.bf16 %v2329_v11, %v2321_v10  ;;  %v7451_v24 = vpack.c.bf16 %v2326_v16, %v2318_v15  ;;  %v354_v11 = vld [vmem:[%s9826_s30 + $0xa0] sm:$0xff] }
 0x25e   : > { %7942 = vmatprep.subr.bf16.mxu1 %v7941_v22  ;;  %v2337_v22 = vld [vmem:[%s9826_s30 + $0x3e98] sm:$0xff]  ;;  %v7963_v25 = vpack.c.bf16 %v2328_v19, %v2320_v17  ;;  %v356_v15 = vld [vmem:[%s9826_s30 + $0xb0] sm:$0xff]  ;;  %v8493_v17 = vpack.c.bf16 %v365_v9, %v357_v8  ;;  %v379_v19 = vld [vmem:[%s9826_s30 + $0x168] sm:$0xff] }
 0x25f   : > { %v364_v16 = vld [vmem:[%s9826_s30 + $0xf0] sm:$0xff]  ;;  %v443_v8 = vld [vmem:[%s9826_s30 + $0x368] sm:$0xff] }
 0x260   : > { %7432 = vmatpush1.bf16.msra.mxu0 %v7431_v28  ;;  %v2342_v28 = vld [vmem:[%s9826_s30 + $0x3ec0] sm:$0xff]  ;;  %v9345_v9 = vld [vmem:[%s9940_s3 + $0x8] sm:$0xff] }
 0x261   : > { %7944 = vmatpush1.bf16.msra.mxu1 %v7943_v29  ;;  %7434 = vmatprep.subr.bf16.mxu0 %v7433_v30  ;;  %v2336_v29 = vld [vmem:[%s9826_s30 + $0x3e90] sm:$0xff]  ;;  %v7965_v30 = vpack.c.bf16 %v2345_v23, %v2337_v22  ;;  %v7455_v36 = vpack.c.bf16 %v2342_v28, %v2334_v27  ;;  %v373_v22 = vld [vmem:[%s9826_s30 + $0x138] sm:$0xff] }
 0x262   : > { %7946 = vmatprep.subr.bf16.mxu1 %v7945_v34  ;;  %v2353_v34 = vld [vmem:[%s9826_s30 + $0x3f18] sm:$0xff]  ;;  %v7967_v37 = vpack.c.bf16 %v2344_v31, %v2336_v29  ;;  %v372_v29 = vld [vmem:[%s9826_s30 + $0x130] sm:$0xff] }
 0x263   : > { %v381_v23 = vld [vmem:[%s9826_s30 + $0x178] sm:$0xff]  ;;  %v284_v31 = vld [vmem:[%s9940_s3 + $0x970] sm:$0xff] }
 0x264   : > { %7436 = vmatpush1.bf16.msra.mxu0 %v7435_v40  ;;  %v2358_v40 = vld [vmem:[%s9826_s30 + $0x3f40] sm:$0xff]  ;;  %v285_v27 = vld [vmem:[%s9940_s3 + $0x978] sm:$0xff]  ;;  %v8497_v32 = vpack.c.bf16 %v381_v23, %v373_v22 }
 0x265   : > { %7948 = vmatpush1.bf16.msra.mxu1 %v7947_v41  ;;  %7438 = vmatprep.subr.bf16.mxu0 %v7437_v42  ;;  %v2352_v41 = vld [vmem:[%s9826_s30 + $0x3f10] sm:$0xff]  ;;  %v7969_v42 = vpack.c.bf16 %v2361_v35, %v2353_v34  ;;  %v7459_v48 = vpack.c.bf16 %v2358_v40, %v2350_v39  ;;  %v395_v34 = vld [vmem:[%s9826_s30 + $0x1e8] sm:$0xff]  ;;  %v386_v40 = vld [vmem:[%s9826_s30 + $0x1a0] sm:$0xff] }
 0x266   : > { %7950 = vmatprep.subr.bf16.mxu1 %v7949_v46  ;;  %v2369_v46 = vld [vmem:[%s9826_s30 + $0x3f98] sm:$0xff]  ;;  %v7971_v49 = vpack.c.bf16 %v2360_v43, %v2352_v41  ;;  %v394_v41 = vld [vmem:[%s9826_s30 + $0x1e0] sm:$0xff]  ;;  %v7989_v43 = vpack.c.bf16 %v395_v34, %v387_v33  ;;  %v475_v33 = vld [vmem:[%s9826_s30 + $0x468] sm:$0xff] }
 0x267   : > { %v453_v22 = vld [vmem:[%s9826_s30 + $0x3b8] sm:$0xff] }
 0x268   : > { %7440 = vmatpush1.bf16.msra.mxu0 %v7439_v52  ;;  %v2374_v52 = vld [vmem:[%s9826_s30 + $0x3fc0] sm:$0xff]  ;;  %v461_v23 = vld [vmem:[%s9826_s30 + $0x3f8] sm:$0xff] }
 0x269   : > { %7952 = vmatpush1.bf16.msra.mxu1 %v7951_v53  ;;  %7442 = vmatprep.subr.bf16.mxu0 %v7441_v54  ;;  %v2368_v53 = vld [vmem:[%s9826_s30 + $0x3f90] sm:$0xff]  ;;  %v7973_v54 = vpack.c.bf16 %v2377_v47, %v2369_v46  ;;  %v7463_v60 = vpack.c.bf16 %v2374_v52, %v2366_v51  ;;  %v411_v46 = vld [vmem:[%s9826_s30 + $0x268] sm:$0xff]  ;;  %v7991_v51 = vpack.c.bf16 %v394_v41, %v386_v40  ;;  %v469_v34 = vld [vmem:[%s9826_s30 + $0x438] sm:$0xff] }
 0x26a   : > { %7954 = vmatprep.subr.bf16.mxu1 %v7953_v58  ;;  %v341_v58 = vld [vmem:[%s9826_s30 + $0x38] sm:$0xff]  ;;  %v7975_v61 = vpack.c.bf16 %v2376_v55, %v2368_v53  ;;  %v7993_v53 = vpack.c.bf16 %v411_v46, %v403_v45  ;;  %v410_v55 = vld [vmem:[%s9826_s30 + $0x260] sm:$0xff]  ;;  %v468_v41 = vld [vmem:[%s9826_s30 + $0x430] sm:$0xff] }
 0x26b   : > { %v474_v40 = vld [vmem:[%s9826_s30 + $0x460] sm:$0xff]  ;;  %v491_v45 = vld [vmem:[%s9826_s30 + $0x4e8] sm:$0xff]  ;;  %v485_v46 = vld [vmem:[%s9826_s30 + $0x4b8] sm:$0xff] }
 0x26c   : > { %7444 = vmatpush1.bf16.msra.mxu0 %v7443_v0  ;;  %v346_v0 = vld [vmem:[%s9826_s30 + $0x60] sm:$0xff] }
 0x26d   : > { %7956 = vmatpush1.bf16.msra.mxu1 %v7955_v1  ;;  %7446 = vmatprep.subr.bf16.mxu0 %v7445_v2  ;;  %v8489_v1 = vpack.c.bf16 %v349_v59, %v341_v58  ;;  %v340_v2 = vld [vmem:[%s9826_s30 + $0x30] sm:$0xff]  ;;  %v7979_v7 = vpack.c.bf16 %v346_v0, %v338_v63  ;;  %v419_v59 = vld [vmem:[%s9826_s30 + $0x2a8] sm:$0xff] }
 0x26e   : > { %7958 = vmatprep.subr.bf16.mxu1 %v7957_v6  ;;  %v252_v6 = vld [vmem:[%s9940_s3 + $0x70] sm:$0xff]  ;;  %v8491_v10 = vpack.c.bf16 %v348_v3, %v340_v2  ;;  %v418_v2 = vld [vmem:[%s9826_s30 + $0x2a0] sm:$0xff] }
 0x26f   : > { %v412_v58 = vld [vmem:[%s9826_s30 + $0x270] sm:$0xff]  ;;  %v426_v3 = vld [vmem:[%s9826_s30 + $0x2e0] sm:$0xff] }
 0x270   : > { %7448 = vmatpush1.bf16.msra.mxu0 %v7447_v12  ;;  %v362_v12 = vld [vmem:[%s9826_s30 + $0xe0] sm:$0xff]  ;;  %v8507_v0 = vpack.c.bf16 %v412_v58, %v404_v56  ;;  %v499_v56 = vld [vmem:[%s9826_s30 + $0x528] sm:$0xff]  ;;  %v501_v58 = vld [vmem:[%s9826_s30 + $0x538] sm:$0xff] }
 0x271   : > { %7960 = vmatpush1.bf16.msra.mxu1 %v7959_v13  ;;  %7450 = vmatprep.subr.bf16.mxu0 %v7449_v14  ;;  %v269_v13 = vld [vmem:[%s9940_s3 + $0x4f8] sm:$0xff]  ;;  %v7981_v14 = vpack.c.bf16 %v363_v5, %v355_v4  ;;  %v7983_v21 = vpack.c.bf16 %v362_v12, %v354_v11  ;;  %v420_v4 = vld [vmem:[%s9826_s30 + $0x2b0] sm:$0xff]  ;;  %v7999_v12 = vpack.c.bf16 %v426_v3, %v418_v2 }
 0x272   : > { %7962 = vmatprep.subr.bf16.mxu1 %v7961_v18  ;;  %v371_v18 = vld [vmem:[%s9826_s30 + $0x128] sm:$0xff]  ;;  %v445_v11 = vld [vmem:[%s9826_s30 + $0x378] sm:$0xff]  ;;  %v508_v3 = vld [vmem:[%s9826_s30 + $0x570] sm:$0xff] }
 0x273   : > { %v7985_v28 = vpack.c.bf16 %v379_v19, %v371_v18  ;;  %v444_v19 = vld [vmem:[%s9826_s30 + $0x370] sm:$0xff] }
 0x274   : > { %7452 = vmatpush1.bf16.msra.mxu0 %v7451_v24  ;;  %v8495_v24 = vpack.c.bf16 %v364_v16, %v356_v15  ;;  %v434_v15 = vld [vmem:[%s9826_s30 + $0x320] sm:$0xff] }
 0x275   : > { %7964 = vmatpush1.bf16.msra.mxu1 %v7963_v25  ;;  %7454 = vmatprep.subr.bf16.mxu0 %v7453_v26  ;;  %v370_v25 = vld [vmem:[%s9826_s30 + $0x120] sm:$0xff] }
 0x276   : > { %7966 = vmatprep.subr.bf16.mxu1 %v7965_v30  ;;  %v378_v26 = vld [vmem:[%s9826_s30 + $0x160] sm:$0xff]  ;;  %v380_v30 = vld [vmem:[%s9826_s30 + $0x170] sm:$0xff] }
 0x277   : > { %v7987_v35 = vpack.c.bf16 %v378_v26, %v370_v25  ;;  %v8499_v39 = vpack.c.bf16 %v380_v30, %v372_v29  ;;  %v442_v16 = vld [vmem:[%s9826_s30 + $0x360] sm:$0xff]  ;;  %v452_v29 = vld [vmem:[%s9826_s30 + $0x3b0] sm:$0xff]  ;;  %v8517_v30 = vpack.c.bf16 %v461_v23, %v453_v22 }
 0x278   : > { %7456 = vmatpush1.bf16.msra.mxu0 %v7455_v36  ;;  %v301_v36 = vld [vmem:[%s9940_s3 + $0xdf8] sm:$0xff]  ;;  %v530_v23 = vld [vmem:[%s9826_s30 + $0x620] sm:$0xff] }
 0x279   : > { %7968 = vmatpush1.bf16.msra.mxu1 %v7967_v37  ;;  %7458 = vmatprep.subr.bf16.mxu0 %v7457_v38  ;;  %v389_v37 = vld [vmem:[%s9826_s30 + $0x1b8] sm:$0xff] }
 0x27a   : > { %7970 = vmatprep.subr.bf16.mxu1 %v7969_v42  ;;  %v397_v38 = vld [vmem:[%s9826_s30 + $0x1f8] sm:$0xff]  ;;  %v388_v42 = vld [vmem:[%s9826_s30 + $0x1b0] sm:$0xff] }
 0x27b   : > { %v8501_v47 = vpack.c.bf16 %v397_v38, %v389_v37  ;;  %v8503_v52 = vpack.c.bf16 %v396_v44, %v388_v42  ;;  %v483_v44 = vld [vmem:[%s9826_s30 + $0x4a8] sm:$0xff] }
 0x27c   : > { %7460 = vmatpush1.bf16.msra.mxu0 %v7459_v48  ;;  %v405_v48 = vld [vmem:[%s9826_s30 + $0x238] sm:$0xff] }
 0x27d   : > { %7972 = vmatpush1.bf16.msra.mxu1 %v7971_v49  ;;  %7462 = vmatprep.subr.bf16.mxu0 %v7461_v50  ;;  %v413_v49 = vld [vmem:[%s9826_s30 + $0x278] sm:$0xff]  ;;  %v300_v50 = vld [vmem:[%s9940_s3 + $0xdf0] sm:$0xff] }
 0x27e   : > { %7974 = vmatprep.subr.bf16.mxu1 %v7973_v54  ;;  %v402_v54 = vld [vmem:[%s9826_s30 + $0x220] sm:$0xff]  ;;  %v8505_v57 = vpack.c.bf16 %v413_v49, %v405_v48 }
 0x27f   : > { %v7995_v63 = vpack.c.bf16 %v410_v55, %v402_v54  ;;  %v492_v55 = vld [vmem:[%s9826_s30 + $0x4f0] sm:$0xff] }
 0x280   : > { %7464 = vmatpush1.bf16.msra.mxu0 %v7463_v60  ;;  %v427_v60 = vld [vmem:[%s9826_s30 + $0x2e8] sm:$0xff] }
 0x281   : > { %7976 = vmatpush1.bf16.msra.mxu1 %v7975_v61  ;;  %7978 = vmatprep.subr.bf16.mxu0 %v7977_v62  ;;  %v421_v61 = vld [vmem:[%s9826_s30 + $0x2b8] sm:$0xff] }
 0x282   : > { %8490 = vmatprep.subr.bf16.mxu1 %v8489_v1  ;;  %v429_v62 = vld [vmem:[%s9826_s30 + $0x2f8] sm:$0xff]  ;;  %v7997_v1 = vpack.c.bf16 %v427_v60, %v419_v59 }
 0x283   : > { %3070 = vmatmul.mubr.f32.vlgmr.msra.gmra.mrb[0].mxu0 %v252_v6  ;;  %v8509_v5 = vpack.c.bf16 %v429_v62, %v421_v61  ;;  %v509_v59 = vld [vmem:[%s9826_s30 + $0x578] sm:$0xff] }
 0x284   : > { %3782 = vmatmul.mubr.f32.vlgmr.msra.gmra.mrb[0].mxu1 %v252_v6  ;;  %7980 = vmatpush1.bf16.msra.mxu0 %v7979_v7  ;;  %v428_v6 = vld [vmem:[%s9826_s30 + $0x2f0] sm:$0xff]  ;;  %v435_v7 = vld [vmem:[%s9826_s30 + $0x328] sm:$0xff]  ;;  %v8529_v2 = vpack.c.bf16 %v509_v59, %v501_v58  ;;  %v578_v59 = vld [vmem:[%s9826_s30 + $0x7a0] sm:$0xff] }
 0x285   : > { %8492 = vmatpush1.bf16.msra.mxu1 %v8491_v10  ;;  %3075 = vmatprep.mubr.f32.mxu0 %v269_v13  ;;  %v437_v10 = vld [vmem:[%s9826_s30 + $0x338] sm:$0xff] }
 0x286   : > { %3787 = vmatprep.mubr.f32.mxu1 %v269_v13  ;;  %7982 = vmatprep.subr.bf16.mxu0 %v7981_v14  ;;  %v8511_v13 = vpack.c.bf16 %v428_v6, %v420_v4  ;;  %v8001_v14 = vpack.c.bf16 %v443_v8, %v435_v7  ;;  %v8513_v18 = vpack.c.bf16 %v445_v11, %v437_v10  ;;  %v515_v4 = vld [vmem:[%s9826_s30 + $0x5a8] sm:$0xff]  ;;  %v517_v6 = vld [vmem:[%s9826_s30 + $0x5b8] sm:$0xff]  ;;  %v514_v11 = vld [vmem:[%s9826_s30 + $0x5a0] sm:$0xff] }
 0x287   : > { %3076 = vmatmul.mubr.f32.gmra.mrb[2].mxu0 %v268_v20  ;;  %8494 = vmatprep.subr.bf16.mxu1 %v8493_v17  ;;  %v436_v17 = vld [vmem:[%s9826_s30 + $0x330] sm:$0xff]  ;;  %v525_v7 = vld [vmem:[%s9826_s30 + $0x5f8] sm:$0xff] }
 0x288   : > { %3788 = vmatmul.mubr.f32.gmra.mrb[2].mxu1 %v268_v20  ;;  %7984 = vmatpush1.bf16.msra.mxu0 %v7983_v21  ;;  %v451_v20 = vld [vmem:[%s9826_s30 + $0x3a8] sm:$0xff]  ;;  %v8515_v25 = vpack.c.bf16 %v444_v19, %v436_v17  ;;  %v541_v19 = vld [vmem:[%s9826_s30 + $0x678] sm:$0xff] }
 0x289   : > { %8496 = vmatpush1.bf16.msra.mxu1 %v8495_v24  ;;  %3081 = vmatprep.mubr.f32.mxu0 %v285_v27  ;;  %v459_v21 = vld [vmem:[%s9826_s30 + $0x3e8] sm:$0xff]  ;;  %v8003_v24 = vpack.c.bf16 %v442_v16, %v434_v15  ;;  %v524_v15 = vld [vmem:[%s9826_s30 + $0x5f0] sm:$0xff] }
 0x28a   : > { %3793 = vmatprep.mubr.f32.mxu1 %v285_v27  ;;  %7986 = vmatprep.subr.bf16.mxu0 %v7985_v28  ;;  %v8005_v26 = vpack.c.bf16 %v459_v21, %v451_v20  ;;  %v450_v27 = vld [vmem:[%s9826_s30 + $0x3a0] sm:$0xff]  ;;  %v531_v16 = vld [vmem:[%s9826_s30 + $0x628] sm:$0xff] }
 0x28b   : > { %3082 = vmatmul.mubr.f32.gmra.mrb[4].mxu0 %v284_v31  ;;  %8498 = vmatprep.subr.bf16.mxu1 %v8497_v32  ;;  %v458_v28 = vld [vmem:[%s9826_s30 + $0x3e0] sm:$0xff]  ;;  %v467_v32 = vld [vmem:[%s9826_s30 + $0x428] sm:$0xff] }
 0x28c   : > { %3794 = vmatmul.mubr.f32.gmra.mrb[4].mxu1 %v284_v31  ;;  %7988 = vmatpush1.bf16.msra.mxu0 %v7987_v35  ;;  %v460_v31 = vld [vmem:[%s9826_s30 + $0x3f0] sm:$0xff]  ;;  %v477_v35 = vld [vmem:[%s9826_s30 + $0x478] sm:$0xff]  ;;  %v8009_v38 = vpack.c.bf16 %v475_v33, %v467_v32  ;;  %v539_v17 = vld [vmem:[%s9826_s30 + $0x668] sm:$0xff] }
 0x28d   : > { %8500 = vmatpush1.bf16.msra.mxu1 %v8499_v39  ;;  %3087 = vmatprep.mubr.f32.mxu0 %v301_v36  ;;  %v8519_v37 = vpack.c.bf16 %v460_v31, %v452_v29  ;;  %v466_v39 = vld [vmem:[%s9826_s30 + $0x420] sm:$0xff]  ;;  %v8521_v42 = vpack.c.bf16 %v477_v35, %v469_v34  ;;  %v8025_v22 = vpack.c.bf16 %v539_v17, %v531_v16  ;;  %v555_v29 = vld [vmem:[%s9826_s30 + $0x6e8] sm:$0xff]  ;;  %v557_v31 = vld [vmem:[%s9826_s30 + $0x6f8] sm:$0xff] }
 0x28e   : > { %3799 = vmatprep.mubr.f32.mxu1 %v301_v36  ;;  %7990 = vmatprep.subr.bf16.mxu0 %v7989_v43  ;;  %v8007_v36 = vpack.c.bf16 %v458_v28, %v450_v27  ;;  %v476_v43 = vld [vmem:[%s9826_s30 + $0x470] sm:$0xff]  ;;  %v8011_v48 = vpack.c.bf16 %v474_v40, %v466_v39  ;;  %v547_v28 = vld [vmem:[%s9826_s30 + $0x6a8] sm:$0xff]  ;;  %v546_v35 = vld [vmem:[%s9826_s30 + $0x6a0] sm:$0xff] }
 0x28f   : > { %3088 = vmatmul.mubr.f32.gmra.mrb[6].mxu0 %v300_v50  ;;  %8502 = vmatprep.subr.bf16.mxu1 %v8501_v47  ;;  %v493_v47 = vld [vmem:[%s9826_s30 + $0x4f8] sm:$0xff]  ;;  %v8523_v49 = vpack.c.bf16 %v476_v43, %v468_v41  ;;  %v540_v27 = vld [vmem:[%s9826_s30 + $0x670] sm:$0xff]  ;;  %v8029_v34 = vpack.c.bf16 %v555_v29, %v547_v28  ;;  %v563_v40 = vld [vmem:[%s9826_s30 + $0x728] sm:$0xff] }
 0x290   : > { %3800 = vmatmul.mubr.f32.gmra.mrb[6].mxu1 %v300_v50  ;;  %7992 = vmatpush1.bf16.msra.mxu0 %v7991_v51  ;;  %v8013_v50 = vpack.c.bf16 %v491_v45, %v483_v44  ;;  %v482_v51 = vld [vmem:[%s9826_s30 + $0x4a0] sm:$0xff]  ;;  %v8525_v54 = vpack.c.bf16 %v493_v47, %v485_v46  ;;  %v556_v39 = vld [vmem:[%s9826_s30 + $0x6f0] sm:$0xff]  ;;  %v571_v41 = vld [vmem:[%s9826_s30 + $0x768] sm:$0xff] }
 0x291   : > { %8504 = vmatpush1.bf16.msra.mxu1 %v8503_v52  ;;  %7994 = vmatprep.subr.bf16.mxu0 %v7993_v53  ;;  %v490_v52 = vld [vmem:[%s9826_s30 + $0x4e0] sm:$0xff]  ;;  %v484_v53 = vld [vmem:[%s9826_s30 + $0x4b0] sm:$0xff]  ;;  %v573_v43 = vld [vmem:[%s9826_s30 + $0x778] sm:$0xff]  ;;  %v8033_v46 = vpack.c.bf16 %v571_v41, %v563_v40 }
 0x292   : > { %8506 = vmatprep.subr.bf16.mxu1 %v8505_v57  ;;  %3870 = vmatprep.mubr.f32.mxu0 %v9345_v9  ;;  %v507_v57 = vld [vmem:[%s9826_s30 + $0x568] sm:$0xff]  ;;  %v8015_v60 = vpack.c.bf16 %v490_v52, %v482_v51  ;;  %v8527_v61 = vpack.c.bf16 %v492_v55, %v484_v53  ;;  %v562_v47 = vld [vmem:[%s9826_s30 + $0x720] sm:$0xff]  ;;  %v572_v51 = vld [vmem:[%s9826_s30 + $0x770] sm:$0xff] }
 0x293   : > { %4582 = vmatprep.mubr.f32.mxu1 %v9345_v9  ;;  %v8017_v62 = vpack.c.bf16 %v507_v57, %v499_v56  ;;  %v579_v52 = vld [vmem:[%s9826_s30 + $0x7a8] sm:$0xff]  ;;  %v589_v55 = vld [vmem:[%s9826_s30 + $0x7f8] sm:$0xff] }
 0x294   : > { %7996 = vmatpush1.bf16.msra.mxu0 %v7995_v63  ;;  %v498_v63 = vld [vmem:[%s9826_s30 + $0x520] sm:$0xff]  ;;  %v587_v53 = vld [vmem:[%s9826_s30 + $0x7e8] sm:$0xff]  ;;  %v637_v28 = vld [vmem:[%s9826_s30 + $0x978] sm:$0xff] }
 0x295   : > { %8508 = vmatpush1.bf16.msra.mxu1 %v8507_v0  ;;  %7998 = vmatprep.subr.bf16.mxu0 %v7997_v1  ;;  %v506_v0 = vld [vmem:[%s9826_s30 + $0x560] sm:$0xff]  ;;  %v500_v1 = vld [vmem:[%s9826_s30 + $0x530] sm:$0xff]  ;;  %v8037_v58 = vpack.c.bf16 %v587_v53, %v579_v52  ;;  %v645_v40 = vld [vmem:[%s9826_s30 + $0x9b8] sm:$0xff] }
 0x296   : > { %8510 = vmatprep.subr.bf16.mxu1 %v8509_v5  ;;  %v523_v5 = vld [vmem:[%s9826_s30 + $0x5e8] sm:$0xff]  ;;  %v8019_v8 = vpack.c.bf16 %v506_v0, %v498_v63  ;;  %v8531_v9 = vpack.c.bf16 %v508_v3, %v500_v1  ;;  %v588_v63 = vld [vmem:[%s9826_s30 + $0x7f0] sm:$0xff]  ;;  %v605_v3 = vld [vmem:[%s9826_s30 + $0x878] sm:$0xff] }
 0x297   : > { %v8021_v10 = vpack.c.bf16 %v523_v5, %v515_v4  ;;  %v595_v0 = vld [vmem:[%s9826_s30 + $0x828] sm:$0xff]  ;;  %v653_v41 = vld [vmem:[%s9826_s30 + $0x9f8] sm:$0xff] }
 0x298   : > { %8000 = vmatpush1.bf16.msra.mxu0 %v7999_v12  ;;  %v522_v12 = vld [vmem:[%s9826_s30 + $0x5e0] sm:$0xff]  ;;  %v603_v1 = vld [vmem:[%s9826_s30 + $0x868] sm:$0xff] }
 0x299   : > { %8512 = vmatpush1.bf16.msra.mxu1 %v8511_v13  ;;  %8002 = vmatprep.subr.bf16.mxu0 %v8001_v14  ;;  %v516_v13 = vld [vmem:[%s9826_s30 + $0x5b0] sm:$0xff]  ;;  %v8533_v14 = vpack.c.bf16 %v525_v7, %v517_v6  ;;  %v8023_v20 = vpack.c.bf16 %v522_v12, %v514_v11  ;;  %v8041_v6 = vpack.c.bf16 %v603_v1, %v595_v0  ;;  %v594_v7 = vld [vmem:[%s9826_s30 + $0x820] sm:$0xff]  ;;  %v611_v12 = vld [vmem:[%s9826_s30 + $0x8a8] sm:$0xff] }
 0x29a   : > { %8514 = vmatprep.subr.bf16.mxu1 %v8513_v18  ;;  %v533_v18 = vld [vmem:[%s9826_s30 + $0x638] sm:$0xff]  ;;  %v8535_v21 = vpack.c.bf16 %v524_v15, %v516_v13  ;;  %v604_v11 = vld [vmem:[%s9826_s30 + $0x870] sm:$0xff]  ;;  %v619_v13 = vld [vmem:[%s9826_s30 + $0x8e8] sm:$0xff] }
 0x29b   : > { %v621_v15 = vld [vmem:[%s9826_s30 + $0x8f8] sm:$0xff]  ;;  %v667_v52 = vld [vmem:[%s9826_s30 + $0xa68] sm:$0xff]  ;;  %v668_v0 = vld [vmem:[%s9826_s30 + $0xa70] sm:$0xff] }
 0x29c   : > { %8004 = vmatpush1.bf16.msra.mxu0 %v8003_v24  ;;  %v538_v24 = vld [vmem:[%s9826_s30 + $0x660] sm:$0xff]  ;;  %v9349_v53 = vld [vmem:[%s9940_s3 + $0x908] sm:$0xff] }
 0x29d   : > { %8516 = vmatpush1.bf16.msra.mxu1 %v8515_v25  ;;  %8006 = vmatprep.subr.bf16.mxu0 %v8005_v26  ;;  %v532_v25 = vld [vmem:[%s9826_s30 + $0x630] sm:$0xff]  ;;  %v8537_v26 = vpack.c.bf16 %v541_v19, %v533_v18  ;;  %v8027_v32 = vpack.c.bf16 %v538_v24, %v530_v23  ;;  %v8045_v18 = vpack.c.bf16 %v619_v13, %v611_v12  ;;  %v610_v19 = vld [vmem:[%s9826_s30 + $0x8a0] sm:$0xff]  ;;  %v627_v24 = vld [vmem:[%s9826_s30 + $0x928] sm:$0xff] }
 0x29e   : > { %8518 = vmatprep.subr.bf16.mxu1 %v8517_v30  ;;  %v549_v30 = vld [vmem:[%s9826_s30 + $0x6b8] sm:$0xff]  ;;  %v8539_v33 = vpack.c.bf16 %v540_v27, %v532_v25  ;;  %v620_v23 = vld [vmem:[%s9826_s30 + $0x8f0] sm:$0xff]  ;;  %v635_v25 = vld [vmem:[%s9826_s30 + $0x968] sm:$0xff] }
 0x29f   : > { %v629_v27 = vld [vmem:[%s9826_s30 + $0x938] sm:$0xff]  ;;  %v675_v1 = vld [vmem:[%s9826_s30 + $0xaa8] sm:$0xff]  ;;  %v676_v12 = vld [vmem:[%s9826_s30 + $0xab0] sm:$0xff] }
 0x2a0   : > { %8008 = vmatpush1.bf16.msra.mxu0 %v8007_v36  ;;  %v554_v36 = vld [vmem:[%s9826_s30 + $0x6e0] sm:$0xff] }
 0x2a1   : > { %8520 = vmatpush1.bf16.msra.mxu1 %v8519_v37  ;;  %8010 = vmatprep.subr.bf16.mxu0 %v8009_v38  ;;  %v548_v37 = vld [vmem:[%s9826_s30 + $0x6b0] sm:$0xff]  ;;  %v8541_v38 = vpack.c.bf16 %v557_v31, %v549_v30  ;;  %v8031_v44 = vpack.c.bf16 %v554_v36, %v546_v35  ;;  %v8049_v31 = vpack.c.bf16 %v635_v25, %v627_v24  ;;  %v698_v24 = vld [vmem:[%s9826_s30 + $0xb60] sm:$0xff] }
 0x2a2   : > { %8522 = vmatprep.subr.bf16.mxu1 %v8521_v42  ;;  %v565_v42 = vld [vmem:[%s9826_s30 + $0x738] sm:$0xff]  ;;  %v8543_v45 = vpack.c.bf16 %v556_v39, %v548_v37  ;;  %v8561_v35 = vpack.c.bf16 %v637_v28, %v629_v27  ;;  %v636_v36 = vld [vmem:[%s9826_s30 + $0x970] sm:$0xff]  ;;  %v643_v37 = vld [vmem:[%s9826_s30 + $0x9a8] sm:$0xff] }
 0x2a3   : > { %v9347_v39 = vld [vmem:[%s9940_s3 + $0x488] sm:$0xff]  ;;  %v692_v25 = vld [vmem:[%s9826_s30 + $0xb30] sm:$0xff] }
 0x2a4   : > { %8012 = vmatpush1.bf16.msra.mxu0 %v8011_v48  ;;  %v570_v48 = vld [vmem:[%s9826_s30 + $0x760] sm:$0xff]  ;;  %v700_v27 = vld [vmem:[%s9826_s30 + $0xb70] sm:$0xff]  ;;  %v707_v28 = vld [vmem:[%s9826_s30 + $0xba8] sm:$0xff] }
 0x2a5   : > { %8524 = vmatpush1.bf16.msra.mxu1 %v8523_v49  ;;  %8014 = vmatprep.subr.bf16.mxu0 %v8013_v50  ;;  %v564_v49 = vld [vmem:[%s9826_s30 + $0x730] sm:$0xff]  ;;  %v8545_v50 = vpack.c.bf16 %v573_v43, %v565_v42  ;;  %v8035_v56 = vpack.c.bf16 %v570_v48, %v562_v47  ;;  %v9348_v42 = vld [vmem:[%s9940_s3 + $0x480] sm:$0xff] }
 0x2a6   : > { %8526 = vmatprep.subr.bf16.mxu1 %v8525_v54  ;;  %v581_v54 = vld [vmem:[%s9826_s30 + $0x7b8] sm:$0xff]  ;;  %v8547_v57 = vpack.c.bf16 %v572_v51, %v564_v49  ;;  %v650_v47 = vld [vmem:[%s9826_s30 + $0x9e0] sm:$0xff]  ;;  %v644_v48 = vld [vmem:[%s9826_s30 + $0x9b0] sm:$0xff]  ;;  %v8565_v49 = vpack.c.bf16 %v653_v41, %v645_v40 }
 0x2a7   : > { %v659_v51 = vld [vmem:[%s9826_s30 + $0xa28] sm:$0xff] }
 0x2a8   : > { %8016 = vmatpush1.bf16.msra.mxu0 %v8015_v60  ;;  %v586_v60 = vld [vmem:[%s9826_s30 + $0x7e0] sm:$0xff]  ;;  %v723_v40 = vld [vmem:[%s9826_s30 + $0xc28] sm:$0xff] }
 0x2a9   : > { %8528 = vmatpush1.bf16.msra.mxu1 %v8527_v61  ;;  %8018 = vmatprep.subr.bf16.mxu0 %v8017_v62  ;;  %v580_v61 = vld [vmem:[%s9826_s30 + $0x7b0] sm:$0xff]  ;;  %v8549_v62 = vpack.c.bf16 %v589_v55, %v581_v54  ;;  %v8039_v4 = vpack.c.bf16 %v586_v60, %v578_v59  ;;  %v661_v54 = vld [vmem:[%s9826_s30 + $0xa38] sm:$0xff]  ;;  %v8057_v59 = vpack.c.bf16 %v667_v52, %v659_v51  ;;  %v658_v60 = vld [vmem:[%s9826_s30 + $0xa20] sm:$0xff] }
 0x2aa   : > { %8530 = vmatprep.subr.bf16.mxu1 %v8529_v2  ;;  %v597_v2 = vld [vmem:[%s9826_s30 + $0x838] sm:$0xff]  ;;  %v8551_v5 = vpack.c.bf16 %v588_v63, %v580_v61  ;;  %v666_v61 = vld [vmem:[%s9826_s30 + $0xa60] sm:$0xff]  ;;  %v731_v41 = vld [vmem:[%s9826_s30 + $0xc68] sm:$0xff] }
 0x2ab   : > { %v669_v55 = vld [vmem:[%s9826_s30 + $0xa78] sm:$0xff]  ;;  %v732_v51 = vld [vmem:[%s9826_s30 + $0xc70] sm:$0xff]  ;;  %v739_v52 = vld [vmem:[%s9826_s30 + $0xca8] sm:$0xff] }
 0x2ac   : > { %8020 = vmatpush1.bf16.msra.mxu0 %v8019_v8  ;;  %v602_v8 = vld [vmem:[%s9826_s30 + $0x860] sm:$0xff]  ;;  %v8569_v63 = vpack.c.bf16 %v669_v55, %v661_v54  ;;  %v741_v54 = vld [vmem:[%s9826_s30 + $0xcb8] sm:$0xff] }
 0x2ad   : > { %8532 = vmatpush1.bf16.msra.mxu1 %v8531_v9  ;;  %8022 = vmatprep.subr.bf16.mxu0 %v8021_v10  ;;  %v596_v9 = vld [vmem:[%s9826_s30 + $0x830] sm:$0xff]  ;;  %v8553_v10 = vpack.c.bf16 %v605_v3, %v597_v2  ;;  %v8043_v16 = vpack.c.bf16 %v602_v8, %v594_v7  ;;  %v683_v2 = vld [vmem:[%s9826_s30 + $0xae8] sm:$0xff]  ;;  %v8059_v7 = vpack.c.bf16 %v666_v61, %v658_v60  ;;  %v749_v55 = vld [vmem:[%s9826_s30 + $0xcf8] sm:$0xff] }
 0x2ae   : > { %8534 = vmatprep.subr.bf16.mxu1 %v8533_v14  ;;  %v613_v14 = vld [vmem:[%s9826_s30 + $0x8b8] sm:$0xff]  ;;  %v8555_v17 = vpack.c.bf16 %v604_v11, %v596_v9  ;;  %v9351_v3 = vld [vmem:[%s9940_s3 + $0xd88] sm:$0xff]  ;;  %v8061_v9 = vpack.c.bf16 %v683_v2, %v675_v1  ;;  %v682_v11 = vld [vmem:[%s9826_s30 + $0xae0] sm:$0xff] }
 0x2af   : > { %v746_v60 = vld [vmem:[%s9826_s30 + $0xce0] sm:$0xff]  ;;  %v740_v61 = vld [vmem:[%s9826_s30 + $0xcb0] sm:$0xff]  ;;  %v763_v1 = vld [vmem:[%s9826_s30 + $0xd68] sm:$0xff] }
 0x2b0   : > { %8024 = vmatpush1.bf16.msra.mxu0 %v8023_v20  ;;  %v618_v20 = vld [vmem:[%s9826_s30 + $0x8e0] sm:$0xff]  ;;  %v757_v2 = vld [vmem:[%s9826_s30 + $0xd38] sm:$0xff] }
 0x2b1   : > { %8536 = vmatpush1.bf16.msra.mxu1 %v8535_v21  ;;  %8026 = vmatprep.subr.bf16.mxu0 %v8025_v22  ;;  %v612_v21 = vld [vmem:[%s9826_s30 + $0x8b0] sm:$0xff]  ;;  %v8557_v22 = vpack.c.bf16 %v621_v15, %v613_v14  ;;  %v8047_v29 = vpack.c.bf16 %v618_v20, %v610_v19  ;;  %v691_v15 = vld [vmem:[%s9826_s30 + $0xb28] sm:$0xff]  ;;  %v701_v19 = vld [vmem:[%s9826_s30 + $0xb78] sm:$0xff] }
 0x2b2   : > { %8538 = vmatprep.subr.bf16.mxu1 %v8537_v26  ;;  %v9346_v26 = vld [vmem:[%s9940_s3] sm:$0xff]  ;;  %v8559_v30 = vpack.c.bf16 %v620_v23, %v612_v21  ;;  %v684_v14 = vld [vmem:[%s9826_s30 + $0xaf0] sm:$0xff] }
 0x2b3   : > { %v8575_v21 = vpack.c.bf16 %v684_v14, %v676_v12  ;;  %v690_v23 = vld [vmem:[%s9826_s30 + $0xb20] sm:$0xff]  ;;  %v771_v12 = vld [vmem:[%s9826_s30 + $0xda8] sm:$0xff]  ;;  %v773_v14 = vld [vmem:[%s9826_s30 + $0xdb8] sm:$0xff] }
 0x2b4   : > { %8028 = vmatpush1.bf16.msra.mxu0 %v8027_v32  ;;  %v626_v32 = vld [vmem:[%s9826_s30 + $0x920] sm:$0xff] }
 0x2b5   : > { %8540 = vmatpush1.bf16.msra.mxu1 %v8539_v33  ;;  %8030 = vmatprep.subr.bf16.mxu0 %v8029_v34  ;;  %v634_v33 = vld [vmem:[%s9826_s30 + $0x960] sm:$0xff]  ;;  %v628_v34 = vld [vmem:[%s9826_s30 + $0x930] sm:$0xff] }
 0x2b6   : > { %8542 = vmatprep.subr.bf16.mxu1 %v8541_v38  ;;  %v651_v38 = vld [vmem:[%s9826_s30 + $0x9e8] sm:$0xff]  ;;  %v8051_v43 = vpack.c.bf16 %v634_v33, %v626_v32  ;;  %v8067_v32 = vpack.c.bf16 %v698_v24, %v690_v23  ;;  %v8579_v33 = vpack.c.bf16 %v700_v27, %v692_v25  ;;  %v780_v23 = vld [vmem:[%s9826_s30 + $0xdf0] sm:$0xff]  ;;  %v797_v27 = vld [vmem:[%s9826_s30 + $0xe78] sm:$0xff] }
 0x2b7   : > { %v787_v24 = vld [vmem:[%s9826_s30 + $0xe28] sm:$0xff] }
 0x2b8   : > { %8032 = vmatpush1.bf16.msra.mxu0 %v8031_v44  ;;  %v8563_v44 = vpack.c.bf16 %v636_v36, %v628_v34  ;;  %v714_v36 = vld [vmem:[%s9826_s30 + $0xbe0] sm:$0xff]  ;;  %v795_v25 = vld [vmem:[%s9826_s30 + $0xe68] sm:$0xff] }
 0x2b9   : > { %8544 = vmatpush1.bf16.msra.mxu1 %v8543_v45  ;;  %8034 = vmatprep.subr.bf16.mxu0 %v8033_v46  ;;  %v8053_v45 = vpack.c.bf16 %v651_v38, %v643_v37  ;;  %v642_v46 = vld [vmem:[%s9826_s30 + $0x9a0] sm:$0xff]  ;;  %v708_v37 = vld [vmem:[%s9826_s30 + $0xbb0] sm:$0xff] }
 0x2ba   : > { %8546 = vmatprep.subr.bf16.mxu1 %v8545_v50  ;;  %v652_v50 = vld [vmem:[%s9826_s30 + $0x9f0] sm:$0xff] }
 0x2bc   : > { %8036 = vmatpush1.bf16.msra.mxu0 %v8035_v56  ;;  %v9350_v56 = vld [vmem:[%s9940_s3 + $0x900] sm:$0xff] }
 0x2bd   : > { %8548 = vmatpush1.bf16.msra.mxu1 %v8547_v57  ;;  %8038 = vmatprep.subr.bf16.mxu0 %v8037_v58  ;;  %v8055_v57 = vpack.c.bf16 %v650_v47, %v642_v46  ;;  %v8567_v58 = vpack.c.bf16 %v652_v50, %v644_v48  ;;  %v8073_v46 = vpack.c.bf16 %v731_v41, %v723_v40  ;;  %v722_v47 = vld [vmem:[%s9826_s30 + $0xc20] sm:$0xff] }
 0x2be   : > { %8550 = vmatprep.subr.bf16.mxu1 %v8549_v62  ;;  %v660_v62 = vld [vmem:[%s9826_s30 + $0xa30] sm:$0xff]  ;;  %v730_v48 = vld [vmem:[%s9826_s30 + $0xc60] sm:$0xff] }
 0x2bf   : > { %v8571_v8 = vpack.c.bf16 %v668_v0, %v660_v62  ;;  %v8589_v62 = vpack.c.bf16 %v749_v55, %v741_v54  ;;  %v755_v0 = vld [vmem:[%s9826_s30 + $0xd28] sm:$0xff]  ;;  %v818_v55 = vld [vmem:[%s9826_s30 + $0xf20] sm:$0xff] }
 0x2c0   : > { %8040 = vmatpush1.bf16.msra.mxu0 %v8039_v4  ;;  %v677_v4 = vld [vmem:[%s9826_s30 + $0xab8] sm:$0xff] }
 0x2c1   : > { %8552 = vmatpush1.bf16.msra.mxu1 %v8551_v5  ;;  %8042 = vmatprep.subr.bf16.mxu0 %v8041_v6  ;;  %v685_v5 = vld [vmem:[%s9826_s30 + $0xaf8] sm:$0xff]  ;;  %v9352_v6 = vld [vmem:[%s9940_s3 + $0xd80] sm:$0xff] }
 0x2c2   : > { %8554 = vmatprep.subr.bf16.mxu1 %v8553_v10  ;;  %v674_v10 = vld [vmem:[%s9826_s30 + $0xaa0] sm:$0xff]  ;;  %v8573_v13 = vpack.c.bf16 %v685_v5, %v677_v4 }
 0x2c3   : > { %3871 = vmatmul.mubr.f32.vlgmr.msra.gmra.mrb[8].mxu0 %v9346_v26  ;;  %v8063_v20 = vpack.c.bf16 %v682_v11, %v674_v10  ;;  %v764_v11 = vld [vmem:[%s9826_s30 + $0xd70] sm:$0xff] }
 0x2c4   : > { %8044 = vmatpush1.bf16.msra.mxu0 %v8043_v16  ;;  %4583 = vmatmul.mubr.f32.vlgmr.msra.gmra.mrb[8].mxu1 %v9346_v26  ;;  %v699_v16 = vld [vmem:[%s9826_s30 + $0xb68] sm:$0xff] }
 0x2c5   : > { %8556 = vmatpush1.bf16.msra.mxu1 %v8555_v17  ;;  %8046 = vmatprep.subr.bf16.mxu0 %v8045_v18  ;;  %v9353_v17 = vld [vmem:[%s9940_s3 + $0x18] sm:$0xff] }
 0x2c6   : > { %8558 = vmatprep.subr.bf16.mxu1 %v8557_v22  ;;  %3876 = vmatprep.mubr.f32.mxu0 %v9347_v39  ;;  %v693_v18 = vld [vmem:[%s9826_s30 + $0xb38] sm:$0xff]  ;;  %v8065_v22 = vpack.c.bf16 %v699_v16, %v691_v15 }
 0x2c7   : > { %4588 = vmatprep.mubr.f32.mxu1 %v9347_v39  ;;  %3877 = vmatmul.mubr.f32.gmra.mrb[10].mxu0 %v9348_v42  ;;  %v8577_v26 = vpack.c.bf16 %v701_v19, %v693_v18  ;;  %v716_v39 = vld [vmem:[%s9826_s30 + $0xbf0] sm:$0xff]  ;;  %v781_v15 = vld [vmem:[%s9826_s30 + $0xdf8] sm:$0xff]  ;;  %v770_v19 = vld [vmem:[%s9826_s30 + $0xda0] sm:$0xff] }
 0x2c8   : > { %8048 = vmatpush1.bf16.msra.mxu0 %v8047_v29  ;;  %4589 = vmatmul.mubr.f32.gmra.mrb[10].mxu1 %v9348_v42  ;;  %v715_v29 = vld [vmem:[%s9826_s30 + $0xbe8] sm:$0xff]  ;;  %v725_v42 = vld [vmem:[%s9826_s30 + $0xc38] sm:$0xff] }
 0x2c9   : > { %8560 = vmatpush1.bf16.msra.mxu1 %v8559_v30  ;;  %8050 = vmatprep.subr.bf16.mxu0 %v8049_v31  ;;  %v709_v30 = vld [vmem:[%s9826_s30 + $0xbb8] sm:$0xff]  ;;  %v8069_v34 = vpack.c.bf16 %v715_v29, %v707_v28 }
 0x2ca   : > { %8562 = vmatprep.subr.bf16.mxu1 %v8561_v35  ;;  %3882 = vmatprep.mubr.f32.mxu0 %v9349_v53  ;;  %v717_v31 = vld [vmem:[%s9826_s30 + $0xbf8] sm:$0xff]  ;;  %v706_v35 = vld [vmem:[%s9826_s30 + $0xba0] sm:$0xff] }
 0x2cb   : > { %4594 = vmatprep.mubr.f32.mxu1 %v9349_v53  ;;  %3883 = vmatmul.mubr.f32.gmra.mrb[12].mxu0 %v9350_v56  ;;  %v8581_v38 = vpack.c.bf16 %v717_v31, %v709_v30  ;;  %v747_v53 = vld [vmem:[%s9826_s30 + $0xce8] sm:$0xff]  ;;  %v8089_v30 = vpack.c.bf16 %v795_v25, %v787_v24  ;;  %v786_v31 = vld [vmem:[%s9826_s30 + $0xe20] sm:$0xff] }
 0x2cc   : > { %8052 = vmatpush1.bf16.msra.mxu0 %v8051_v43  ;;  %4595 = vmatmul.mubr.f32.gmra.mrb[12].mxu1 %v9350_v56  ;;  %v733_v43 = vld [vmem:[%s9826_s30 + $0xc78] sm:$0xff]  ;;  %v8075_v56 = vpack.c.bf16 %v730_v48, %v722_v47  ;;  %v812_v47 = vld [vmem:[%s9826_s30 + $0xef0] sm:$0xff]  ;;  %v819_v48 = vld [vmem:[%s9826_s30 + $0xf28] sm:$0xff] }
 0x2cd   : > { %8564 = vmatpush1.bf16.msra.mxu1 %v8563_v44  ;;  %8054 = vmatprep.subr.bf16.mxu0 %v8053_v45  ;;  %v8071_v44 = vpack.c.bf16 %v714_v36, %v706_v35  ;;  %v8583_v45 = vpack.c.bf16 %v716_v39, %v708_v37  ;;  %v8585_v50 = vpack.c.bf16 %v733_v43, %v725_v42  ;;  %v796_v35 = vld [vmem:[%s9826_s30 + $0xe70] sm:$0xff]  ;;  %v803_v36 = vld [vmem:[%s9826_s30 + $0xea8] sm:$0xff]  ;;  %v813_v39 = vld [vmem:[%s9826_s30 + $0xef8] sm:$0xff] }
 0x2ce   : > { %8566 = vmatprep.subr.bf16.mxu1 %v8565_v49  ;;  %3888 = vmatprep.mubr.f32.mxu0 %v9351_v3  ;;  %v724_v49 = vld [vmem:[%s9826_s30 + $0xc30] sm:$0xff]  ;;  %v811_v37 = vld [vmem:[%s9826_s30 + $0xee8] sm:$0xff]  ;;  %v802_v43 = vld [vmem:[%s9826_s30 + $0xea0] sm:$0xff] }
 0x2cf   : > { %4600 = vmatprep.mubr.f32.mxu1 %v9351_v3  ;;  %3889 = vmatmul.mubr.f32.gmra.mrb[14].mxu0 %v9352_v6  ;;  %v765_v3 = vld [vmem:[%s9826_s30 + $0xd78] sm:$0xff]  ;;  %v8093_v42 = vpack.c.bf16 %v811_v37, %v803_v36 }
 0x2d0   : > { %8056 = vmatpush1.bf16.msra.mxu0 %v8055_v57  ;;  %4601 = vmatmul.mubr.f32.gmra.mrb[14].mxu1 %v9352_v6  ;;  %v8587_v57 = vpack.c.bf16 %v732_v51, %v724_v49  ;;  %v8081_v6 = vpack.c.bf16 %v763_v1, %v755_v0  ;;  %v8593_v10 = vpack.c.bf16 %v765_v3, %v757_v2  ;;  %v827_v49 = vld [vmem:[%s9826_s30 + $0xf68] sm:$0xff]  ;;  %v829_v51 = vld [vmem:[%s9826_s30 + $0xf78] sm:$0xff]  ;;  %v834_v3 = vld [vmem:[%s9826_s30 + $0xfa0] sm:$0xff] }
 0x2d1   : > { %8568 = vmatpush1.bf16.msra.mxu1 %v8567_v58  ;;  %8058 = vmatprep.subr.bf16.mxu0 %v8057_v59  ;;  %v8077_v58 = vpack.c.bf16 %v747_v53, %v739_v52  ;;  %v738_v59 = vld [vmem:[%s9826_s30 + $0xca0] sm:$0xff]  ;;  %v8097_v54 = vpack.c.bf16 %v827_v49, %v819_v48  ;;  %v893_v36 = vld [vmem:[%s9826_s30 + $0x1178] sm:$0xff] }
 0x2d2   : > { %8570 = vmatprep.subr.bf16.mxu1 %v8569_v63  ;;  %3959 = vmatprep.mubr.f32.mxu0 %v9353_v17  ;;  %v748_v63 = vld [vmem:[%s9826_s30 + $0xcf0] sm:$0xff]  ;;  %v8079_v4 = vpack.c.bf16 %v746_v60, %v738_v59  ;;  %v835_v60 = vld [vmem:[%s9826_s30 + $0xfa8] sm:$0xff]  ;;  %v901_v48 = vld [vmem:[%s9826_s30 + $0x11b8] sm:$0xff] }
 0x2d3   : > { %4671 = vmatprep.mubr.f32.mxu1 %v9353_v17  ;;  %v8591_v5 = vpack.c.bf16 %v748_v63, %v740_v61  ;;  %v828_v59 = vld [vmem:[%s9826_s30 + $0xf70] sm:$0xff]  ;;  %v843_v61 = vld [vmem:[%s9826_s30 + $0xfe8] sm:$0xff]  ;;  %v845_v63 = vld [vmem:[%s9826_s30 + $0xff8] sm:$0xff] }
 0x2d4   : > { %8060 = vmatpush1.bf16.msra.mxu0 %v8059_v7  ;;  %v754_v7 = vld [vmem:[%s9826_s30 + $0xd20] sm:$0xff]  ;;  %v8101_v2 = vpack.c.bf16 %v843_v61, %v835_v60  ;;  %v909_v49 = vld [vmem:[%s9826_s30 + $0x11f8] sm:$0xff]  ;;  %v923_v60 = vld [vmem:[%s9826_s30 + $0x1268] sm:$0xff] }
 0x2d5   : > { %8572 = vmatpush1.bf16.msra.mxu1 %v8571_v8  ;;  %8062 = vmatprep.subr.bf16.mxu0 %v8061_v9  ;;  %v762_v8 = vld [vmem:[%s9826_s30 + $0xd60] sm:$0xff]  ;;  %v756_v9 = vld [vmem:[%s9826_s30 + $0xd30] sm:$0xff]  ;;  %v9357_v61 = vld [vmem:[%s9940_s3 + $0x918] sm:$0xff] }
 0x2d6   : > { %8574 = vmatprep.subr.bf16.mxu1 %v8573_v13  ;;  %v779_v13 = vld [vmem:[%s9826_s30 + $0xde8] sm:$0xff]  ;;  %v8083_v16 = vpack.c.bf16 %v762_v8, %v754_v7  ;;  %v8595_v17 = vpack.c.bf16 %v764_v11, %v756_v9  ;;  %v844_v7 = vld [vmem:[%s9826_s30 + $0xff0] sm:$0xff]  ;;  %v861_v11 = vld [vmem:[%s9826_s30 + $0x1078] sm:$0xff] }
 0x2d7   : > { %v8085_v18 = vpack.c.bf16 %v779_v13, %v771_v12  ;;  %v851_v8 = vld [vmem:[%s9826_s30 + $0x1028] sm:$0xff] }
 0x2d8   : > { %8064 = vmatpush1.bf16.msra.mxu0 %v8063_v20  ;;  %v778_v20 = vld [vmem:[%s9826_s30 + $0xde0] sm:$0xff]  ;;  %v859_v9 = vld [vmem:[%s9826_s30 + $0x1068] sm:$0xff] }
 0x2d9   : > { %8576 = vmatpush1.bf16.msra.mxu1 %v8575_v21  ;;  %8066 = vmatprep.subr.bf16.mxu0 %v8065_v22  ;;  %v772_v21 = vld [vmem:[%s9826_s30 + $0xdb0] sm:$0xff]  ;;  %v8597_v22 = vpack.c.bf16 %v781_v15, %v773_v14  ;;  %v8087_v28 = vpack.c.bf16 %v778_v20, %v770_v19  ;;  %v8105_v14 = vpack.c.bf16 %v859_v9, %v851_v8  ;;  %v850_v15 = vld [vmem:[%s9826_s30 + $0x1020] sm:$0xff]  ;;  %v867_v20 = vld [vmem:[%s9826_s30 + $0x10a8] sm:$0xff] }
 0x2da   : > { %8578 = vmatprep.subr.bf16.mxu1 %v8577_v26  ;;  %v789_v26 = vld [vmem:[%s9826_s30 + $0xe38] sm:$0xff]  ;;  %v8599_v29 = vpack.c.bf16 %v780_v23, %v772_v21  ;;  %v860_v19 = vld [vmem:[%s9826_s30 + $0x1070] sm:$0xff]  ;;  %v875_v21 = vld [vmem:[%s9826_s30 + $0x10e8] sm:$0xff] }
 0x2db   : > { %v877_v23 = vld [vmem:[%s9826_s30 + $0x10f8] sm:$0xff]  ;;  %v924_v8 = vld [vmem:[%s9826_s30 + $0x1270] sm:$0xff]  ;;  %v931_v9 = vld [vmem:[%s9826_s30 + $0x12a8] sm:$0xff] }
 0x2dc   : > { %8068 = vmatpush1.bf16.msra.mxu0 %v8067_v32  ;;  %v794_v32 = vld [vmem:[%s9826_s30 + $0xe60] sm:$0xff] }
 0x2dd   : > { %8580 = vmatpush1.bf16.msra.mxu1 %v8579_v33  ;;  %8070 = vmatprep.subr.bf16.mxu0 %v8069_v34  ;;  %v788_v33 = vld [vmem:[%s9826_s30 + $0xe30] sm:$0xff]  ;;  %v8601_v34 = vpack.c.bf16 %v797_v27, %v789_v26  ;;  %v8091_v40 = vpack.c.bf16 %v794_v32, %v786_v31  ;;  %v8109_v26 = vpack.c.bf16 %v875_v21, %v867_v20  ;;  %v866_v27 = vld [vmem:[%s9826_s30 + $0x10a0] sm:$0xff]  ;;  %v883_v32 = vld [vmem:[%s9826_s30 + $0x1128] sm:$0xff] }
 0x2de   : > { %8582 = vmatprep.subr.bf16.mxu1 %v8581_v38  ;;  %v805_v38 = vld [vmem:[%s9826_s30 + $0xeb8] sm:$0xff]  ;;  %v8603_v41 = vpack.c.bf16 %v796_v35, %v788_v33  ;;  %v876_v31 = vld [vmem:[%s9826_s30 + $0x10f0] sm:$0xff]  ;;  %v891_v33 = vld [vmem:[%s9826_s30 + $0x1168] sm:$0xff] }
 0x2df   : > { %v885_v35 = vld [vmem:[%s9826_s30 + $0x1138] sm:$0xff]  ;;  %v932_v20 = vld [vmem:[%s9826_s30 + $0x12b0] sm:$0xff] }
 0x2e0   : > { %8072 = vmatpush1.bf16.msra.mxu0 %v8071_v44  ;;  %v810_v44 = vld [vmem:[%s9826_s30 + $0xee0] sm:$0xff] }
 0x2e1   : > { %8584 = vmatpush1.bf16.msra.mxu1 %v8583_v45  ;;  %8074 = vmatprep.subr.bf16.mxu0 %v8073_v46  ;;  %v804_v45 = vld [vmem:[%s9826_s30 + $0xeb0] sm:$0xff]  ;;  %v8605_v46 = vpack.c.bf16 %v813_v39, %v805_v38  ;;  %v8095_v52 = vpack.c.bf16 %v810_v44, %v802_v43  ;;  %v8113_v39 = vpack.c.bf16 %v891_v33, %v883_v32  ;;  %v954_v32 = vld [vmem:[%s9826_s30 + $0x1360] sm:$0xff] }
 0x2e2   : > { %8586 = vmatprep.subr.bf16.mxu1 %v8585_v50  ;;  %v821_v50 = vld [vmem:[%s9826_s30 + $0xf38] sm:$0xff]  ;;  %v8607_v53 = vpack.c.bf16 %v812_v47, %v804_v45  ;;  %v8625_v43 = vpack.c.bf16 %v893_v36, %v885_v35  ;;  %v892_v44 = vld [vmem:[%s9826_s30 + $0x1170] sm:$0xff]  ;;  %v899_v45 = vld [vmem:[%s9826_s30 + $0x11a8] sm:$0xff] }
 0x2e3   : > { %v9355_v47 = vld [vmem:[%s9940_s3 + $0x498] sm:$0xff]  ;;  %v948_v33 = vld [vmem:[%s9826_s30 + $0x1330] sm:$0xff]  ;;  %v963_v36 = vld [vmem:[%s9826_s30 + $0x13a8] sm:$0xff] }
 0x2e4   : > { %8076 = vmatpush1.bf16.msra.mxu0 %v8075_v56  ;;  %v826_v56 = vld [vmem:[%s9826_s30 + $0xf60] sm:$0xff]  ;;  %v956_v35 = vld [vmem:[%s9826_s30 + $0x1370] sm:$0xff] }
 0x2e5   : > { %8588 = vmatpush1.bf16.msra.mxu1 %v8587_v57  ;;  %8078 = vmatprep.subr.bf16.mxu0 %v8077_v58  ;;  %v820_v57 = vld [vmem:[%s9826_s30 + $0xf30] sm:$0xff]  ;;  %v8609_v58 = vpack.c.bf16 %v829_v51, %v821_v50  ;;  %v8099_v0 = vpack.c.bf16 %v826_v56, %v818_v55  ;;  %v906_v55 = vld [vmem:[%s9826_s30 + $0x11e0] sm:$0xff] }
 0x2e6   : > { %8590 = vmatprep.subr.bf16.mxu1 %v8589_v62  ;;  %v837_v62 = vld [vmem:[%s9826_s30 + $0xfb8] sm:$0xff]  ;;  %v8611_v1 = vpack.c.bf16 %v828_v59, %v820_v57  ;;  %v9356_v50 = vld [vmem:[%s9940_s3 + $0x490] sm:$0xff]  ;;  %v8629_v57 = vpack.c.bf16 %v909_v49, %v901_v48  ;;  %v915_v59 = vld [vmem:[%s9826_s30 + $0x1228] sm:$0xff] }
 0x2e7   : > { %v900_v56 = vld [vmem:[%s9826_s30 + $0x11b0] sm:$0xff]  ;;  %v979_v48 = vld [vmem:[%s9826_s30 + $0x1428] sm:$0xff] }
 0x2e8   : > { %8080 = vmatpush1.bf16.msra.mxu0 %v8079_v4  ;;  %v842_v4 = vld [vmem:[%s9826_s30 + $0xfe0] sm:$0xff]  ;;  %v987_v49 = vld [vmem:[%s9826_s30 + $0x1468] sm:$0xff] }
 0x2e9   : > { %8592 = vmatpush1.bf16.msra.mxu1 %v8591_v5  ;;  %8082 = vmatprep.subr.bf16.mxu0 %v8081_v6  ;;  %v836_v5 = vld [vmem:[%s9826_s30 + $0xfb0] sm:$0xff]  ;;  %v8613_v6 = vpack.c.bf16 %v845_v63, %v837_v62  ;;  %v8103_v12 = vpack.c.bf16 %v842_v4, %v834_v3  ;;  %v917_v62 = vld [vmem:[%s9826_s30 + $0x1238] sm:$0xff]  ;;  %v8121_v3 = vpack.c.bf16 %v923_v60, %v915_v59  ;;  %v914_v4 = vld [vmem:[%s9826_s30 + $0x1220] sm:$0xff] }
 0x2ea   : > { %8594 = vmatprep.subr.bf16.mxu1 %v8593_v10  ;;  %v853_v10 = vld [vmem:[%s9826_s30 + $0x1038] sm:$0xff]  ;;  %v8615_v13 = vpack.c.bf16 %v844_v7, %v836_v5  ;;  %v922_v5 = vld [vmem:[%s9826_s30 + $0x1260] sm:$0xff]  ;;  %v988_v59 = vld [vmem:[%s9826_s30 + $0x1470] sm:$0xff] }
 0x2eb   : > { %v925_v63 = vld [vmem:[%s9826_s30 + $0x1278] sm:$0xff]  ;;  %v995_v60 = vld [vmem:[%s9826_s30 + $0x14a8] sm:$0xff] }
 0x2ec   : > { %8084 = vmatpush1.bf16.msra.mxu0 %v8083_v16  ;;  %v858_v16 = vld [vmem:[%s9826_s30 + $0x1060] sm:$0xff]  ;;  %v8633_v7 = vpack.c.bf16 %v925_v63, %v917_v62  ;;  %v997_v62 = vld [vmem:[%s9826_s30 + $0x14b8] sm:$0xff] }
 0x2ed   : > { %8596 = vmatpush1.bf16.msra.mxu1 %v8595_v17  ;;  %8086 = vmatprep.subr.bf16.mxu0 %v8085_v18  ;;  %v852_v17 = vld [vmem:[%s9826_s30 + $0x1030] sm:$0xff]  ;;  %v8617_v18 = vpack.c.bf16 %v861_v11, %v853_v10  ;;  %v8107_v24 = vpack.c.bf16 %v858_v16, %v850_v15  ;;  %v939_v10 = vld [vmem:[%s9826_s30 + $0x12e8] sm:$0xff]  ;;  %v9359_v11 = vld [vmem:[%s9940_s3 + $0xd98] sm:$0xff]  ;;  %v8123_v15 = vpack.c.bf16 %v922_v5, %v914_v4 }
 0x2ee   : > { %8598 = vmatprep.subr.bf16.mxu1 %v8597_v22  ;;  %v869_v22 = vld [vmem:[%s9826_s30 + $0x10b8] sm:$0xff]  ;;  %v8619_v25 = vpack.c.bf16 %v860_v19, %v852_v17  ;;  %v8125_v17 = vpack.c.bf16 %v939_v10, %v931_v9  ;;  %v938_v19 = vld [vmem:[%s9826_s30 + $0x12e0] sm:$0xff]  ;;  %v996_v5 = vld [vmem:[%s9826_s30 + $0x14b0] sm:$0xff] }
 0x2ef   : > { %v1005_v63 = vld [vmem:[%s9826_s30 + $0x14f8] sm:$0xff]  ;;  %v1002_v4 = vld [vmem:[%s9826_s30 + $0x14e0] sm:$0xff]  ;;  %v1019_v9 = vld [vmem:[%s9826_s30 + $0x1568] sm:$0xff] }
 0x2f0   : > { %8088 = vmatpush1.bf16.msra.mxu0 %v8087_v28  ;;  %v874_v28 = vld [vmem:[%s9826_s30 + $0x10e0] sm:$0xff]  ;;  %v1013_v10 = vld [vmem:[%s9826_s30 + $0x1538] sm:$0xff] }
 0x2f1   : > { %8600 = vmatpush1.bf16.msra.mxu1 %v8599_v29  ;;  %8090 = vmatprep.subr.bf16.mxu0 %v8089_v30  ;;  %v868_v29 = vld [vmem:[%s9826_s30 + $0x10b0] sm:$0xff]  ;;  %v8621_v30 = vpack.c.bf16 %v877_v23, %v869_v22  ;;  %v8111_v37 = vpack.c.bf16 %v874_v28, %v866_v27  ;;  %v947_v23 = vld [vmem:[%s9826_s30 + $0x1328] sm:$0xff]  ;;  %v957_v27 = vld [vmem:[%s9826_s30 + $0x1378] sm:$0xff] }
 0x2f2   : > { %8602 = vmatprep.subr.bf16.mxu1 %v8601_v34  ;;  %v9354_v34 = vld [vmem:[%s9940_s3 + $0x10] sm:$0xff]  ;;  %v8623_v38 = vpack.c.bf16 %v876_v31, %v868_v29  ;;  %v946_v31 = vld [vmem:[%s9826_s30 + $0x1320] sm:$0xff] }
 0x2f3   : > { %v940_v22 = vld [vmem:[%s9826_s30 + $0x12f0] sm:$0xff] }
 0x2f4   : > { %8092 = vmatpush1.bf16.msra.mxu0 %v8091_v40  ;;  %v882_v40 = vld [vmem:[%s9826_s30 + $0x1120] sm:$0xff]  ;;  %v8639_v29 = vpack.c.bf16 %v940_v22, %v932_v20  ;;  %v1027_v20 = vld [vmem:[%s9826_s30 + $0x15a8] sm:$0xff]  ;;  %v1029_v22 = vld [vmem:[%s9826_s30 + $0x15b8] sm:$0xff] }
 0x2f5   : > { %8604 = vmatpush1.bf16.msra.mxu1 %v8603_v41  ;;  %8094 = vmatprep.subr.bf16.mxu0 %v8093_v42  ;;  %v890_v41 = vld [vmem:[%s9826_s30 + $0x1160] sm:$0xff]  ;;  %v884_v42 = vld [vmem:[%s9826_s30 + $0x1130] sm:$0xff] }
 0x2f6   : > { %8606 = vmatprep.subr.bf16.mxu1 %v8605_v46  ;;  %v907_v46 = vld [vmem:[%s9826_s30 + $0x11e8] sm:$0xff]  ;;  %v8115_v51 = vpack.c.bf16 %v890_v41, %v882_v40  ;;  %v8131_v40 = vpack.c.bf16 %v954_v32, %v946_v31  ;;  %v8643_v41 = vpack.c.bf16 %v956_v35, %v948_v33  ;;  %v1036_v31 = vld [vmem:[%s9826_s30 + $0x15f0] sm:$0xff]  ;;  %v1053_v35 = vld [vmem:[%s9826_s30 + $0x1678] sm:$0xff] }
 0x2f7   : > { %v1043_v32 = vld [vmem:[%s9826_s30 + $0x1628] sm:$0xff] }
 0x2f8   : > { %8096 = vmatpush1.bf16.msra.mxu0 %v8095_v52  ;;  %v8627_v52 = vpack.c.bf16 %v892_v44, %v884_v42  ;;  %v970_v44 = vld [vmem:[%s9826_s30 + $0x13e0] sm:$0xff]  ;;  %v1051_v33 = vld [vmem:[%s9826_s30 + $0x1668] sm:$0xff] }
 0x2f9   : > { %8608 = vmatpush1.bf16.msra.mxu1 %v8607_v53  ;;  %8098 = vmatprep.subr.bf16.mxu0 %v8097_v54  ;;  %v8117_v53 = vpack.c.bf16 %v907_v46, %v899_v45  ;;  %v898_v54 = vld [vmem:[%s9826_s30 + $0x11a0] sm:$0xff]  ;;  %v964_v45 = vld [vmem:[%s9826_s30 + $0x13b0] sm:$0xff] }
 0x2fa   : > { %8610 = vmatprep.subr.bf16.mxu1 %v8609_v58  ;;  %v908_v58 = vld [vmem:[%s9826_s30 + $0x11f0] sm:$0xff] }
 0x2fc   : > { %8100 = vmatpush1.bf16.msra.mxu0 %v8099_v0  ;;  %v9358_v0 = vld [vmem:[%s9940_s3 + $0x910] sm:$0xff] }
 0x2fd   : > { %8612 = vmatpush1.bf16.msra.mxu1 %v8611_v1  ;;  %8102 = vmatprep.subr.bf16.mxu0 %v8101_v2  ;;  %v8119_v1 = vpack.c.bf16 %v906_v55, %v898_v54  ;;  %v8631_v2 = vpack.c.bf16 %v908_v58, %v900_v56  ;;  %v8137_v54 = vpack.c.bf16 %v987_v49, %v979_v48  ;;  %v978_v55 = vld [vmem:[%s9826_s30 + $0x1420] sm:$0xff] }
 0x2fe   : > { %8614 = vmatprep.subr.bf16.mxu1 %v8613_v6  ;;  %v916_v6 = vld [vmem:[%s9826_s30 + $0x1230] sm:$0xff]  ;;  %v986_v56 = vld [vmem:[%s9826_s30 + $0x1460] sm:$0xff] }
 0x2ff   : > { %v8635_v16 = vpack.c.bf16 %v924_v8, %v916_v6  ;;  %v8653_v6 = vpack.c.bf16 %v1005_v63, %v997_v62  ;;  %v1011_v8 = vld [vmem:[%s9826_s30 + $0x1528] sm:$0xff]  ;;  %v1074_v63 = vld [vmem:[%s9826_s30 + $0x1720] sm:$0xff] }
 0x300   : > { %8104 = vmatpush1.bf16.msra.mxu0 %v8103_v12  ;;  %v933_v12 = vld [vmem:[%s9826_s30 + $0x12b8] sm:$0xff] }
 0x301   : > { %8616 = vmatpush1.bf16.msra.mxu1 %v8615_v13  ;;  %8106 = vmatprep.subr.bf16.mxu0 %v8105_v14  ;;  %v941_v13 = vld [vmem:[%s9826_s30 + $0x12f8] sm:$0xff]  ;;  %v9360_v14 = vld [vmem:[%s9940_s3 + $0xd90] sm:$0xff] }
 0x302   : > { %8618 = vmatprep.subr.bf16.mxu1 %v8617_v18  ;;  %v930_v18 = vld [vmem:[%s9826_s30 + $0x12a0] sm:$0xff]  ;;  %v8637_v21 = vpack.c.bf16 %v941_v13, %v933_v12 }
 0x303   : > { %3960 = vmatmul.mubr.f32.vlgmr.msra.gmra.mrb[8].mxu0 %v9354_v34  ;;  %v8127_v28 = vpack.c.bf16 %v938_v19, %v930_v18  ;;  %v1020_v19 = vld [vmem:[%s9826_s30 + $0x1570] sm:$0xff] }
 0x304   : > { %8108 = vmatpush1.bf16.msra.mxu0 %v8107_v24  ;;  %4672 = vmatmul.mubr.f32.vlgmr.msra.gmra.mrb[8].mxu1 %v9354_v34  ;;  %v955_v24 = vld [vmem:[%s9826_s30 + $0x1368] sm:$0xff] }
 0x305   : > { %8620 = vmatpush1.bf16.msra.mxu1 %v8619_v25  ;;  %8110 = vmatprep.subr.bf16.mxu0 %v8109_v26  ;;  %v9361_v25 = vld [vmem:[%s9940_s3 + $0x28] sm:$0xff]  ;;  %v949_v26 = vld [vmem:[%s9826_s30 + $0x1338] sm:$0xff] }
 0x306   : > { %8622 = vmatprep.subr.bf16.mxu1 %v8621_v30  ;;  %3965 = vmatprep.mubr.f32.mxu0 %v9355_v47  ;;  %v8129_v30 = vpack.c.bf16 %v955_v24, %v947_v23  ;;  %v8641_v34 = vpack.c.bf16 %v957_v27, %v949_v26  ;;  %v1037_v23 = vld [vmem:[%s9826_s30 + $0x15f8] sm:$0xff]  ;;  %v1026_v27 = vld [vmem:[%s9826_s30 + $0x15a0] sm:$0xff] }
 0x307   : > { %4677 = vmatprep.mubr.f32.mxu1 %v9355_v47  ;;  %3966 = vmatmul.mubr.f32.gmra.mrb[10].mxu0 %v9356_v50  ;;  %v972_v47 = vld [vmem:[%s9826_s30 + $0x13f0] sm:$0xff] }
 0x308   : > { %8112 = vmatpush1.bf16.msra.mxu0 %v8111_v37  ;;  %4678 = vmatmul.mubr.f32.gmra.mrb[10].mxu1 %v9356_v50  ;;  %v971_v37 = vld [vmem:[%s9826_s30 + $0x13e8] sm:$0xff]  ;;  %v981_v50 = vld [vmem:[%s9826_s30 + $0x1438] sm:$0xff] }
 0x309   : > { %8624 = vmatpush1.bf16.msra.mxu1 %v8623_v38  ;;  %8114 = vmatprep.subr.bf16.mxu0 %v8113_v39  ;;  %v965_v38 = vld [vmem:[%s9826_s30 + $0x13b8] sm:$0xff]  ;;  %v8133_v42 = vpack.c.bf16 %v971_v37, %v963_v36 }
 0x30a   : > { %8626 = vmatprep.subr.bf16.mxu1 %v8625_v43  ;;  %3971 = vmatprep.mubr.f32.mxu0 %v9357_v61  ;;  %v973_v39 = vld [vmem:[%s9826_s30 + $0x13f8] sm:$0xff]  ;;  %v962_v43 = vld [vmem:[%s9826_s30 + $0x13a0] sm:$0xff] }
 0x30b   : > { %4683 = vmatprep.mubr.f32.mxu1 %v9357_v61  ;;  %3972 = vmatmul.mubr.f32.gmra.mrb[12].mxu0 %v9358_v0  ;;  %v8645_v46 = vpack.c.bf16 %v973_v39, %v965_v38  ;;  %v1003_v61 = vld [vmem:[%s9826_s30 + $0x14e8] sm:$0xff]  ;;  %v8153_v38 = vpack.c.bf16 %v1051_v33, %v1043_v32  ;;  %v1042_v39 = vld [vmem:[%s9826_s30 + $0x1620] sm:$0xff] }
 0x30c   : > { %8116 = vmatpush1.bf16.msra.mxu0 %v8115_v51  ;;  %4684 = vmatmul.mubr.f32.gmra.mrb[12].mxu1 %v9358_v0  ;;  %v989_v51 = vld [vmem:[%s9826_s30 + $0x1478] sm:$0xff]  ;;  %v8139_v0 = vpack.c.bf16 %v986_v56, %v978_v55  ;;  %v1068_v55 = vld [vmem:[%s9826_s30 + $0x16f0] sm:$0xff]  ;;  %v1075_v56 = vld [vmem:[%s9826_s30 + $0x1728] sm:$0xff] }
 0x30d   : > { %8628 = vmatpush1.bf16.msra.mxu1 %v8627_v52  ;;  %8118 = vmatprep.subr.bf16.mxu0 %v8117_v53  ;;  %v8135_v52 = vpack.c.bf16 %v970_v44, %v962_v43  ;;  %v8647_v53 = vpack.c.bf16 %v972_v47, %v964_v45  ;;  %v8649_v58 = vpack.c.bf16 %v989_v51, %v981_v50  ;;  %v1052_v43 = vld [vmem:[%s9826_s30 + $0x1670] sm:$0xff]  ;;  %v1059_v44 = vld [vmem:[%s9826_s30 + $0x16a8] sm:$0xff]  ;;  %v1069_v47 = vld [vmem:[%s9826_s30 + $0x16f8] sm:$0xff] }
 0x30e   : > { %8630 = vmatprep.subr.bf16.mxu1 %v8629_v57  ;;  %3977 = vmatprep.mubr.f32.mxu0 %v9359_v11  ;;  %v980_v57 = vld [vmem:[%s9826_s30 + $0x1430] sm:$0xff]  ;;  %v1067_v45 = vld [vmem:[%s9826_s30 + $0x16e8] sm:$0xff]  ;;  %v1058_v51 = vld [vmem:[%s9826_s30 + $0x16a0] sm:$0xff] }
 0x30f   : > { %4689 = vmatprep.mubr.f32.mxu1 %v9359_v11  ;;  %3978 = vmatmul.mubr.f32.gmra.mrb[14].mxu0 %v9360_v14  ;;  %v1021_v11 = vld [vmem:[%s9826_s30 + $0x1578] sm:$0xff]  ;;  %v8157_v50 = vpack.c.bf16 %v1067_v45, %v1059_v44 }
 0x310   : > { %8120 = vmatpush1.bf16.msra.mxu0 %v8119_v1  ;;  %4690 = vmatmul.mubr.f32.gmra.mrb[14].mxu1 %v9360_v14  ;;  %v8651_v1 = vpack.c.bf16 %v988_v59, %v980_v57  ;;  %v8145_v14 = vpack.c.bf16 %v1019_v9, %v1011_v8  ;;  %v8657_v18 = vpack.c.bf16 %v1021_v11, %v1013_v10  ;;  %v1083_v57 = vld [vmem:[%s9826_s30 + $0x1768] sm:$0xff]  ;;  %v1085_v59 = vld [vmem:[%s9826_s30 + $0x1778] sm:$0xff]  ;;  %v1090_v11 = vld [vmem:[%s9826_s30 + $0x17a0] sm:$0xff] }
 0x311   : > { %8632 = vmatpush1.bf16.msra.mxu1 %v8631_v2  ;;  %8122 = vmatprep.subr.bf16.mxu0 %v8121_v3  ;;  %v8141_v2 = vpack.c.bf16 %v1003_v61, %v995_v60  ;;  %v994_v3 = vld [vmem:[%s9826_s30 + $0x14a0] sm:$0xff]  ;;  %v8161_v62 = vpack.c.bf16 %v1083_v57, %v1075_v56  ;;  %v1149_v44 = vld [vmem:[%s9826_s30 + $0x1978] sm:$0xff] }
 0x312   : > { %8634 = vmatprep.subr.bf16.mxu1 %v8633_v7  ;;  %4048 = vmatprep.mubr.f32.mxu0 %v9361_v25  ;;  %v1004_v7 = vld [vmem:[%s9826_s30 + $0x14f0] sm:$0xff]  ;;  %v8143_v12 = vpack.c.bf16 %v1002_v4, %v994_v3  ;;  %v1091_v4 = vld [vmem:[%s9826_s30 + $0x17a8] sm:$0xff]  ;;  %v1157_v56 = vld [vmem:[%s9826_s30 + $0x19b8] sm:$0xff] }
 0x313   : > { %4760 = vmatprep.mubr.f32.mxu1 %v9361_v25  ;;  %v8655_v13 = vpack.c.bf16 %v1004_v7, %v996_v5  ;;  %v1084_v3 = vld [vmem:[%s9826_s30 + $0x1770] sm:$0xff]  ;;  %v1099_v5 = vld [vmem:[%s9826_s30 + $0x17e8] sm:$0xff]  ;;  %v1101_v7 = vld [vmem:[%s9826_s30 + $0x17f8] sm:$0xff] }
 0x314   : > { %8124 = vmatpush1.bf16.msra.mxu0 %v8123_v15  ;;  %v1010_v15 = vld [vmem:[%s9826_s30 + $0x1520] sm:$0xff]  ;;  %v8165_v10 = vpack.c.bf16 %v1099_v5, %v1091_v4  ;;  %v1165_v57 = vld [vmem:[%s9826_s30 + $0x19f8] sm:$0xff]  ;;  %v1179_v4 = vld [vmem:[%s9826_s30 + $0x1a68] sm:$0xff] }
 0x315   : > { %8636 = vmatpush1.bf16.msra.mxu1 %v8635_v16  ;;  %8126 = vmatprep.subr.bf16.mxu0 %v8125_v17  ;;  %v1018_v16 = vld [vmem:[%s9826_s30 + $0x1560] sm:$0xff]  ;;  %v1012_v17 = vld [vmem:[%s9826_s30 + $0x1530] sm:$0xff]  ;;  %v9365_v5 = vld [vmem:[%s9940_s3 + $0x928] sm:$0xff] }
 0x316   : > { %8638 = vmatprep.subr.bf16.mxu1 %v8637_v21  ;;  %v1035_v21 = vld [vmem:[%s9826_s30 + $0x15e8] sm:$0xff]  ;;  %v8147_v24 = vpack.c.bf16 %v1018_v16, %v1010_v15  ;;  %v8659_v25 = vpack.c.bf16 %v1020_v19, %v1012_v17  ;;  %v1100_v15 = vld [vmem:[%s9826_s30 + $0x17f0] sm:$0xff]  ;;  %v1117_v19 = vld [vmem:[%s9826_s30 + $0x1878] sm:$0xff] }
 0x317   : > { %v8149_v26 = vpack.c.bf16 %v1035_v21, %v1027_v20  ;;  %v1107_v16 = vld [vmem:[%s9826_s30 + $0x1828] sm:$0xff] }
 0x318   : > { %8128 = vmatpush1.bf16.msra.mxu0 %v8127_v28  ;;  %v1034_v28 = vld [vmem:[%s9826_s30 + $0x15e0] sm:$0xff]  ;;  %v1115_v17 = vld [vmem:[%s9826_s30 + $0x1868] sm:$0xff] }
 0x319   : > { %8640 = vmatpush1.bf16.msra.mxu1 %v8639_v29  ;;  %8130 = vmatprep.subr.bf16.mxu0 %v8129_v30  ;;  %v1028_v29 = vld [vmem:[%s9826_s30 + $0x15b0] sm:$0xff]  ;;  %v8661_v30 = vpack.c.bf16 %v1037_v23, %v1029_v22  ;;  %v8151_v36 = vpack.c.bf16 %v1034_v28, %v1026_v27  ;;  %v8169_v22 = vpack.c.bf16 %v1115_v17, %v1107_v16  ;;  %v1106_v23 = vld [vmem:[%s9826_s30 + $0x1820] sm:$0xff]  ;;  %v1123_v28 = vld [vmem:[%s9826_s30 + $0x18a8] sm:$0xff] }
 0x31a   : > { %8642 = vmatprep.subr.bf16.mxu1 %v8641_v34  ;;  %v1045_v34 = vld [vmem:[%s9826_s30 + $0x1638] sm:$0xff]  ;;  %v8663_v37 = vpack.c.bf16 %v1036_v31, %v1028_v29  ;;  %v1116_v27 = vld [vmem:[%s9826_s30 + $0x1870] sm:$0xff]  ;;  %v1131_v29 = vld [vmem:[%s9826_s30 + $0x18e8] sm:$0xff] }
 0x31b   : > { %v1133_v31 = vld [vmem:[%s9826_s30 + $0x18f8] sm:$0xff]  ;;  %v1180_v16 = vld [vmem:[%s9826_s30 + $0x1a70] sm:$0xff]  ;;  %v1187_v17 = vld [vmem:[%s9826_s30 + $0x1aa8] sm:$0xff] }
 0x31c   : > { %8132 = vmatpush1.bf16.msra.mxu0 %v8131_v40  ;;  %v1050_v40 = vld [vmem:[%s9826_s30 + $0x1660] sm:$0xff] }
 0x31d   : > { %8644 = vmatpush1.bf16.msra.mxu1 %v8643_v41  ;;  %8134 = vmatprep.subr.bf16.mxu0 %v8133_v42  ;;  %v1044_v41 = vld [vmem:[%s9826_s30 + $0x1630] sm:$0xff]  ;;  %v8665_v42 = vpack.c.bf16 %v1053_v35, %v1045_v34  ;;  %v8155_v48 = vpack.c.bf16 %v1050_v40, %v1042_v39  ;;  %v8173_v34 = vpack.c.bf16 %v1131_v29, %v1123_v28  ;;  %v1122_v35 = vld [vmem:[%s9826_s30 + $0x18a0] sm:$0xff]  ;;  %v1139_v40 = vld [vmem:[%s9826_s30 + $0x1928] sm:$0xff] }
 0x31e   : > { %8646 = vmatprep.subr.bf16.mxu1 %v8645_v46  ;;  %v1061_v46 = vld [vmem:[%s9826_s30 + $0x16b8] sm:$0xff]  ;;  %v8667_v49 = vpack.c.bf16 %v1052_v43, %v1044_v41  ;;  %v1132_v39 = vld [vmem:[%s9826_s30 + $0x18f0] sm:$0xff]  ;;  %v1147_v41 = vld [vmem:[%s9826_s30 + $0x1968] sm:$0xff] }
 0x31f   : > { %v1141_v43 = vld [vmem:[%s9826_s30 + $0x1938] sm:$0xff]  ;;  %v1188_v28 = vld [vmem:[%s9826_s30 + $0x1ab0] sm:$0xff] }
 0x320   : > { %8136 = vmatpush1.bf16.msra.mxu0 %v8135_v52  ;;  %v1066_v52 = vld [vmem:[%s9826_s30 + $0x16e0] sm:$0xff] }
 0x321   : > { %8648 = vmatpush1.bf16.msra.mxu1 %v8647_v53  ;;  %8138 = vmatprep.subr.bf16.mxu0 %v8137_v54  ;;  %v1060_v53 = vld [vmem:[%s9826_s30 + $0x16b0] sm:$0xff]  ;;  %v8669_v54 = vpack.c.bf16 %v1069_v47, %v1061_v46  ;;  %v8159_v60 = vpack.c.bf16 %v1066_v52, %v1058_v51  ;;  %v8177_v47 = vpack.c.bf16 %v1147_v41, %v1139_v40 }
 0x322   : > { %8650 = vmatprep.subr.bf16.mxu1 %v8649_v58  ;;  %v1077_v58 = vld [vmem:[%s9826_s30 + $0x1738] sm:$0xff]  ;;  %v8671_v61 = vpack.c.bf16 %v1068_v55, %v1060_v53  ;;  %v8689_v51 = vpack.c.bf16 %v1149_v44, %v1141_v43  ;;  %v1148_v52 = vld [vmem:[%s9826_s30 + $0x1970] sm:$0xff]  ;;  %v1155_v53 = vld [vmem:[%s9826_s30 + $0x19a8] sm:$0xff] }
 0x323   : > { %v9363_v55 = vld [vmem:[%s9940_s3 + $0x4a8] sm:$0xff]  ;;  %v1202_v43 = vld [vmem:[%s9826_s30 + $0x1b20] sm:$0xff] }
 0x324   : > { %8140 = vmatpush1.bf16.msra.mxu0 %v8139_v0  ;;  %v1082_v0 = vld [vmem:[%s9826_s30 + $0x1760] sm:$0xff] }
 0x325   : > { %8652 = vmatpush1.bf16.msra.mxu1 %v8651_v1  ;;  %8142 = vmatprep.subr.bf16.mxu0 %v8141_v2  ;;  %v1076_v1 = vld [vmem:[%s9826_s30 + $0x1730] sm:$0xff]  ;;  %v8673_v2 = vpack.c.bf16 %v1085_v59, %v1077_v58  ;;  %v8163_v8 = vpack.c.bf16 %v1082_v0, %v1074_v63  ;;  %v9364_v58 = vld [vmem:[%s9940_s3 + $0x4a0] sm:$0xff] }
 0x326   : > { %8654 = vmatprep.subr.bf16.mxu1 %v8653_v6  ;;  %v1093_v6 = vld [vmem:[%s9826_s30 + $0x17b8] sm:$0xff]  ;;  %v8675_v9 = vpack.c.bf16 %v1084_v3, %v1076_v1  ;;  %v1162_v63 = vld [vmem:[%s9826_s30 + $0x19e0] sm:$0xff]  ;;  %v1156_v0 = vld [vmem:[%s9826_s30 + $0x19b0] sm:$0xff]  ;;  %v8693_v1 = vpack.c.bf16 %v1165_v57, %v1157_v56 }
 0x327   : > { %v1171_v3 = vld [vmem:[%s9826_s30 + $0x1a28] sm:$0xff]  ;;  %v1210_v44 = vld [vmem:[%s9826_s30 + $0x1b60] sm:$0xff]  ;;  %v1229_v56 = vld [vmem:[%s9826_s30 + $0x1bf8] sm:$0xff] }
 0x328   : > { %8144 = vmatpush1.bf16.msra.mxu0 %v8143_v12  ;;  %v1098_v12 = vld [vmem:[%s9826_s30 + $0x17e0] sm:$0xff] }
 0x329   : > { %8656 = vmatpush1.bf16.msra.mxu1 %v8655_v13  ;;  %8146 = vmatprep.subr.bf16.mxu0 %v8145_v14  ;;  %v1092_v13 = vld [vmem:[%s9826_s30 + $0x17b0] sm:$0xff]  ;;  %v8677_v14 = vpack.c.bf16 %v1101_v7, %v1093_v6  ;;  %v8167_v20 = vpack.c.bf16 %v1098_v12, %v1090_v11  ;;  %v1173_v6 = vld [vmem:[%s9826_s30 + $0x1a38] sm:$0xff]  ;;  %v8185_v11 = vpack.c.bf16 %v1179_v4, %v1171_v3  ;;  %v1170_v12 = vld [vmem:[%s9826_s30 + $0x1a20] sm:$0xff] }
 0x32a   : > { %8658 = vmatprep.subr.bf16.mxu1 %v8657_v18  ;;  %v1109_v18 = vld [vmem:[%s9826_s30 + $0x1838] sm:$0xff]  ;;  %v8679_v21 = vpack.c.bf16 %v1100_v15, %v1092_v13  ;;  %v1178_v13 = vld [vmem:[%s9826_s30 + $0x1a60] sm:$0xff] }
 0x32b   : > { %v1181_v7 = vld [vmem:[%s9826_s30 + $0x1a78] sm:$0xff]  ;;  %v1218_v3 = vld [vmem:[%s9826_s30 + $0x1ba0] sm:$0xff] }
 0x32c   : > { %8148 = vmatpush1.bf16.msra.mxu0 %v8147_v24  ;;  %v1114_v24 = vld [vmem:[%s9826_s30 + $0x1860] sm:$0xff]  ;;  %v8697_v15 = vpack.c.bf16 %v1181_v7, %v1173_v6 }
 0x32d   : > { %8660 = vmatpush1.bf16.msra.mxu1 %v8659_v25  ;;  %8150 = vmatprep.subr.bf16.mxu0 %v8149_v26  ;;  %v1108_v25 = vld [vmem:[%s9826_s30 + $0x1830] sm:$0xff]  ;;  %v8681_v26 = vpack.c.bf16 %v1117_v19, %v1109_v18  ;;  %v8171_v32 = vpack.c.bf16 %v1114_v24, %v1106_v23  ;;  %v1195_v18 = vld [vmem:[%s9826_s30 + $0x1ae8] sm:$0xff]  ;;  %v8187_v23 = vpack.c.bf16 %v1178_v13, %v1170_v12  ;;  %v1226_v4 = vld [vmem:[%s9826_s30 + $0x1be0] sm:$0xff] }
 0x32e   : > { %8662 = vmatprep.subr.bf16.mxu1 %v8661_v30  ;;  %v1125_v30 = vld [vmem:[%s9826_s30 + $0x18b8] sm:$0xff]  ;;  %v8683_v33 = vpack.c.bf16 %v1116_v27, %v1108_v25  ;;  %v9367_v19 = vld [vmem:[%s9940_s3 + $0xda8] sm:$0xff]  ;;  %v8189_v25 = vpack.c.bf16 %v1195_v18, %v1187_v17  ;;  %v1194_v27 = vld [vmem:[%s9826_s30 + $0x1ae0] sm:$0xff] }
 0x330   : > { %8152 = vmatpush1.bf16.msra.mxu0 %v8151_v36  ;;  %v1130_v36 = vld [vmem:[%s9826_s30 + $0x18e0] sm:$0xff] }
 0x331   : > { %8664 = vmatpush1.bf16.msra.mxu1 %v8663_v37  ;;  %8154 = vmatprep.subr.bf16.mxu0 %v8153_v38  ;;  %v1124_v37 = vld [vmem:[%s9826_s30 + $0x18b0] sm:$0xff]  ;;  %v8685_v38 = vpack.c.bf16 %v1133_v31, %v1125_v30  ;;  %v8175_v45 = vpack.c.bf16 %v1130_v36, %v1122_v35  ;;  %v1203_v31 = vld [vmem:[%s9826_s30 + $0x1b28] sm:$0xff]  ;;  %v1205_v35 = vld [vmem:[%s9826_s30 + $0x1b38] sm:$0xff] }
 0x332   : > { %8666 = vmatprep.subr.bf16.mxu1 %v8665_v42  ;;  %v9362_v42 = vld [vmem:[%s9940_s3 + $0x20] sm:$0xff]  ;;  %v8687_v46 = vpack.c.bf16 %v1132_v39, %v1124_v37  ;;  %v1196_v30 = vld [vmem:[%s9826_s30 + $0x1af0] sm:$0xff]  ;;  %v1213_v36 = vld [vmem:[%s9826_s30 + $0x1b78] sm:$0xff] }
 0x333   : > { %v304_v37 = vld [vmem:[#allocation2 + $0x10] sm:$0xff]  ;;  %v305_v39 = vld [vmem:[#allocation2 + $0x18] sm:$0xff]  ;;  %v8703_v41 = vpack.c.bf16 %v1196_v30, %v1188_v28  ;;  %v1242_v28 = vld [vmem:[%s9826_s30 + $0x1c60] sm:$0xff] }
 0x334   : > { %8156 = vmatpush1.bf16.msra.mxu0 %v8155_v48  ;;  %v1138_v48 = vld [vmem:[%s9826_s30 + $0x1920] sm:$0xff] }
 0x335   : > { %8668 = vmatpush1.bf16.msra.mxu1 %v8667_v49  ;;  %8158 = vmatprep.subr.bf16.mxu0 %v8157_v50  ;;  %v1146_v49 = vld [vmem:[%s9826_s30 + $0x1960] sm:$0xff]  ;;  %v1140_v50 = vld [vmem:[%s9826_s30 + $0x1930] sm:$0xff] }
 0x336   : > { %8670 = vmatprep.subr.bf16.mxu1 %v8669_v54  ;;  %v1163_v54 = vld [vmem:[%s9826_s30 + $0x19e8] sm:$0xff]  ;;  %v8179_v59 = vpack.c.bf16 %v1146_v49, %v1138_v48  ;;  %v1212_v48 = vld [vmem:[%s9826_s30 + $0x1b70] sm:$0xff] }
 0x337   : > { %v1219_v49 = vld [vmem:[%s9826_s30 + $0x1ba8] sm:$0xff] }
 0x338   : > { %8160 = vmatpush1.bf16.msra.mxu0 %v8159_v60  ;;  %v8691_v60 = vpack.c.bf16 %v1148_v52, %v1140_v50  ;;  %v1227_v50 = vld [vmem:[%s9826_s30 + $0x1be8] sm:$0xff] }
 0x339   : > { %8672 = vmatpush1.bf16.msra.mxu1 %v8671_v61  ;;  %8162 = vmatprep.subr.bf16.mxu0 %v8161_v62  ;;  %v8181_v61 = vpack.c.bf16 %v1163_v54, %v1155_v53  ;;  %v1154_v62 = vld [vmem:[%s9826_s30 + $0x19a0] sm:$0xff] }
 0x33a   : > { %8674 = vmatprep.subr.bf16.mxu1 %v8673_v2  ;;  %v1164_v2 = vld [vmem:[%s9826_s30 + $0x19f0] sm:$0xff]  ;;  %v310_v54 = vld [vmem:[#allocation2 + $0x40] sm:$0xff] }
 0x33c   : > { %8164 = vmatpush1.bf16.msra.mxu0 %v8163_v8  ;;  %v9366_v8 = vld [vmem:[%s9940_s3 + $0x920] sm:$0xff] }
 0x33d   : > { %8676 = vmatpush1.bf16.msra.mxu1 %v8675_v9  ;;  %8166 = vmatprep.subr.bf16.mxu0 %v8165_v10  ;;  %v8183_v9 = vpack.c.bf16 %v1162_v63, %v1154_v62  ;;  %v8695_v10 = vpack.c.bf16 %v1164_v2, %v1156_v0  ;;  %v313_v62 = vld [vmem:[#allocation2 + $0x58] sm:$0xff]  ;;  %v8195_v63 = vpack.c.bf16 %v1210_v44, %v1202_v43  ;;  %v328_v44 = vld [vmem:[#allocation2 + $0xd0] sm:$0xff] }
 0x33e   : > { %8678 = vmatprep.subr.bf16.mxu1 %v8677_v14  ;;  %v1172_v14 = vld [vmem:[%s9826_s30 + $0x1a30] sm:$0xff]  ;;  %v8197_v2 = vpack.c.bf16 %v1227_v50, %v1219_v49 }
 0x33f   : > { %v8699_v24 = vpack.c.bf16 %v1180_v16, %v1172_v14  ;;  %v318_v14 = vld [vmem:[#allocation2 + $0x80] sm:$0xff]  ;;  %v1245_v16 = vld [vmem:[%s9826_s30 + $0x1c78] sm:$0xff] }
 0x340   : > { %8168 = vmatpush1.bf16.msra.mxu0 %v8167_v20  ;;  %v1189_v20 = vld [vmem:[%s9826_s30 + $0x1ab8] sm:$0xff] }
 0x341   : > { %8680 = vmatpush1.bf16.msra.mxu1 %v8679_v21  ;;  %8170 = vmatprep.subr.bf16.mxu0 %v8169_v22  ;;  %v1197_v21 = vld [vmem:[%s9826_s30 + $0x1af8] sm:$0xff]  ;;  %v9368_v22 = vld [vmem:[%s9940_s3 + $0xda0] sm:$0xff] }
 0x342   : > { %8682 = vmatprep.subr.bf16.mxu1 %v8681_v26  ;;  %v1186_v26 = vld [vmem:[%s9826_s30 + $0x1aa0] sm:$0xff]  ;;  %v8701_v29 = vpack.c.bf16 %v1197_v21, %v1189_v20  ;;  %v320_v20 = vld [vmem:[#allocation2 + $0x90] sm:$0xff]  ;;  %v319_v21 = vld [vmem:[#allocation2 + $0x88] sm:$0xff] }
 0x343   : > { %4049 = vmatmul.mubr.f32.vlgmr.msra.gmra.mrb[8].mxu0 %v9362_v42  ;;  %v8191_v40 = vpack.c.bf16 %v1194_v27, %v1186_v26  ;;  %v1234_v27 = vld [vmem:[%s9826_s30 + $0x1c20] sm:$0xff] }
 0x344   : > { %8172 = vmatpush1.bf16.msra.mxu0 %v8171_v32  ;;  %4761 = vmatmul.mubr.f32.vlgmr.msra.gmra.mrb[8].mxu1 %v9362_v42  ;;  %v1211_v32 = vld [vmem:[%s9826_s30 + $0x1b68] sm:$0xff] }
 0x345   : > { %8684 = vmatpush1.bf16.msra.mxu1 %v8683_v33  ;;  %8174 = vmatprep.subr.bf16.mxu0 %v8173_v34  ;;  %v9369_v33 = vld [vmem:[%s9940_s3 + $0x38] sm:$0xff]  ;;  %v302_v34 = vld [vmem:[#allocation2] sm:$0xff]  ;;  %v8193_v42 = vpack.c.bf16 %v1211_v32, %v1203_v31  ;;  %v1244_v32 = vld [vmem:[%s9826_s30 + $0x1c70] sm:$0xff] }
 0x346   : > { %8686 = vmatprep.subr.bf16.mxu1 %v8685_v38  ;;  %4054 = vmatprep.mubr.f32.mxu0 %v9363_v55  ;;  %v303_v38 = vld [vmem:[#allocation2 + $0x8] sm:$0xff] }
 0x347   : > { %4766 = vmatprep.mubr.f32.mxu1 %v9363_v55  ;;  %4055 = vmatmul.mubr.f32.gmra.mrb[10].mxu0 %v9364_v58  ;;  %v1221_v55 = vld [vmem:[%s9826_s30 + $0x1bb8] sm:$0xff] }
 0x348   : > { %8176 = vmatpush1.bf16.msra.mxu0 %v8175_v45  ;;  %4767 = vmatmul.mubr.f32.gmra.mrb[10].mxu1 %v9364_v58  ;;  %v1204_v45 = vld [vmem:[%s9826_s30 + $0x1b30] sm:$0xff]  ;;  %v8709_v7 = vpack.c.bf16 %v1229_v56, %v1221_v55 }
 0x349   : > { %8688 = vmatpush1.bf16.msra.mxu1 %v8687_v46  ;;  %8178 = vmatprep.subr.bf16.mxu0 %v8177_v47  ;;  %v8705_v47 = vpack.c.bf16 %v1213_v36, %v1205_v35  ;;  %v1260_v56 = vld [vmem:[%s9826_s30 + $0x1cf0] sm:$0xff] }
 0x34a   : > { %8690 = vmatprep.subr.bf16.mxu1 %v8689_v51  ;;  %4060 = vmatprep.mubr.f32.mxu0 %v9365_v5 }
 0x34b   : > { %4772 = vmatprep.mubr.f32.mxu1 %v9365_v5  ;;  %4061 = vmatmul.mubr.f32.gmra.mrb[12].mxu0 %v9366_v8  ;;  %v1220_v5 = vld [vmem:[%s9826_s30 + $0x1bb0] sm:$0xff] }
 0x34c   : > { %8180 = vmatpush1.bf16.msra.mxu0 %v8179_v59  ;;  %4773 = vmatmul.mubr.f32.gmra.mrb[12].mxu1 %v9366_v8  ;;  %v1228_v8 = vld [vmem:[%s9826_s30 + $0x1bf0] sm:$0xff] }
 0x34d   : > { %8692 = vmatpush1.bf16.msra.mxu1 %v8691_v60  ;;  %8182 = vmatprep.subr.bf16.mxu0 %v8181_v61  ;;  %v312_v60 = vld [vmem:[#allocation2 + $0x50] sm:$0xff]  ;;  %v311_v61 = vld [vmem:[#allocation2 + $0x48] sm:$0xff] }
 0x34e   : > { %8694 = vmatprep.subr.bf16.mxu1 %v8693_v1  ;;  %4066 = vmatprep.mubr.f32.mxu0 %v9367_v19  ;;  %v8707_v1 = vpack.c.bf16 %v1212_v48, %v1204_v45  ;;  %v327_v45 = vld [vmem:[#allocation2 + $0xc8] sm:$0xff] }
 0x34f   : > { %4778 = vmatprep.mubr.f32.mxu1 %v9367_v19  ;;  %4067 = vmatmul.mubr.f32.gmra.mrb[14].mxu0 %v9368_v22 }
 0x350   : > { %8184 = vmatpush1.bf16.msra.mxu0 %v8183_v9  ;;  %4779 = vmatmul.mubr.f32.gmra.mrb[14].mxu1 %v9368_v22  ;;  %v1235_v9 = vld [vmem:[%s9826_s30 + $0x1c28] sm:$0xff]  ;;  %v321_v22 = vld [vmem:[#allocation2 + $0x98] sm:$0xff] }
 0x351   : > { %8696 = vmatpush1.bf16.msra.mxu1 %v8695_v10  ;;  %8186 = vmatprep.subr.bf16.mxu0 %v8185_v11  ;;  %v1243_v10 = vld [vmem:[%s9826_s30 + $0x1c68] sm:$0xff] }
 0x352   : > { %8698 = vmatprep.subr.bf16.mxu1 %v8697_v15  ;;  %4137 = vmatprep.mubr.f32.mxu0 %v9369_v33  ;;  %v1237_v15 = vld [vmem:[%s9826_s30 + $0x1c38] sm:$0xff]  ;;  %v8201_v26 = vpack.c.bf16 %v1243_v10, %v1235_v9  ;;  %v1268_v9 = vld [vmem:[%s9826_s30 + $0x1d30] sm:$0xff] }
 0x353   : > { %4849 = vmatprep.mubr.f32.mxu1 %v9369_v33  ;;  %v8713_v31 = vpack.c.bf16 %v1245_v16, %v1237_v15  ;;  %v1251_v33 = vld [vmem:[%s9826_s30 + $0x1ca8] sm:$0xff]  ;;  %v1293_v15 = vld [vmem:[%s9826_s30 + $0x1df8] sm:$0xff] }
 0x354   : > { %8188 = vmatpush1.bf16.msra.mxu0 %v8187_v23  ;;  %v8199_v23 = vpack.c.bf16 %v1226_v4, %v1218_v3 }
 0x355   : > { %8700 = vmatpush1.bf16.msra.mxu1 %v8699_v24  ;;  %8190 = vmatprep.subr.bf16.mxu0 %v8189_v25  ;;  %v8711_v25 = vpack.c.bf16 %v1228_v8, %v1220_v5  ;;  %v1274_v8 = vld [vmem:[%s9826_s30 + $0x1d60] sm:$0xff] }
 0x356   : > { %v3071_v46 = vpop.f32.mrb[0].mxu0  ;;  %8702 = vmatprep.subr.bf16.mxu1 %v8701_v29  ;;  %v1236_v29 = vld [vmem:[%s9826_s30 + $0x1c30] sm:$0xff] }
 0x357   : > { %v5230_v51 = vadd.f32 %v3071_v46, %v302_v34  ;;  %v3783_v52 = vpop.f32.mrb[0].mxu1  ;;  %v3073_v53 = vpop.f32.mrb[1].mxu0  ;;  %v1259_v34 = vld [vmem:[%s9826_s30 + $0x1ce8] sm:$0xff]  ;;  %v329_v46 = vld [vmem:[#allocation2 + $0xd8] sm:$0xff]  ;;  %v8715_v49 = vpack.c.bf16 %v1244_v32, %v1236_v29  ;;  %v1306_v32 = vld [vmem:[%s9826_s30 + $0x1e60] sm:$0xff] }
 0x358   : > { %v5232_v57 = vadd.f32 %v3783_v52, %v304_v37  ;;  %v5231_v58 = vadd.f32 %v3073_v53, %v303_v38  ;;  %v3785_v59 = vpop.f32.mrb[1].mxu1  ;;  %8192 = vmatpush1.bf16.msra.mxu0 %v8191_v40  ;;  %v326_v38 = vld [vmem:[#allocation2 + $0xc0] sm:$0xff]  ;;  %v1261_v40 = vld [vmem:[%s9826_s30 + $0x1cf8] sm:$0xff]  ;;  %v8205_v50 = vpack.c.bf16 %v1259_v34, %v1251_v33  ;;  %v1252_v53 = vld [vmem:[%s9826_s30 + $0x1cb0] sm:$0xff] }
 0x359   : > { %5262 = vst [vmem:[#allocation2] sm:$0xff] %v5230_v51  ;;  %v5233_v0 = vadd.f32 %v3785_v59, %v305_v39  ;;  %8704 = vmatpush1.bf16.msra.mxu1 %v8703_v41  ;;  %8194 = vmatprep.subr.bf16.mxu0 %v8193_v42  ;;  %v1253_v39 = vld [vmem:[%s9826_s30 + $0x1cb8] sm:$0xff]  ;;  %v1250_v51 = vld [vmem:[%s9826_s30 + $0x1ca0] sm:$0xff]  ;;  %v8719_v5 = vpack.c.bf16 %v1260_v56, %v1252_v53  ;;  %v1300_v33 = vld [vmem:[%s9826_s30 + $0x1e30] sm:$0xff] }
 0x35a   : > { %5264 = vst [vmem:[#allocation2 + $0x10] sm:$0xff] %v5232_v57  ;;  %5263 = vst [vmem:[#allocation2 + $0x8] sm:$0xff] %v5231_v58  ;;  %v3077_v6 = vpop.f32.mrb[2].mxu0  ;;  %8706 = vmatprep.subr.bf16.mxu1 %v8705_v47  ;;  %v8203_v47 = vpack.c.bf16 %v1242_v28, %v1234_v27  ;;  %v1258_v52 = vld [vmem:[%s9826_s30 + $0x1ce0] sm:$0xff]  ;;  %v8717_v55 = vpack.c.bf16 %v1261_v40, %v1253_v39  ;;  %v1267_v57 = vld [vmem:[%s9826_s30 + $0x1d28] sm:$0xff] }
 0x35b   : > { %5265 = vst [vmem:[#allocation2 + $0x18] sm:$0xff] %v5233_v0  ;;  %v5238_v11 = vadd.f32 %v3077_v6, %v310_v54  ;;  %v3789_v12 = vpop.f32.mrb[2].mxu1  ;;  %v3079_v13 = vpop.f32.mrb[3].mxu0  ;;  %v1275_v58 = vld [vmem:[%s9826_s30 + $0x1d68] sm:$0xff]  ;;  %v8207_v3 = vpack.c.bf16 %v1258_v52, %v1250_v51  ;;  %v1309_v27 = vld [vmem:[%s9826_s30 + $0x1e78] sm:$0xff]  ;;  %v1338_v56 = vld [vmem:[%s9826_s30 + $0x1f60] sm:$0xff] }
 0x35c   : > { %v5240_v17 = vadd.f32 %v3789_v12, %v312_v60  ;;  %v5239_v18 = vadd.f32 %v3079_v13, %v311_v61  ;;  %v3791_v19 = vpop.f32.mrb[3].mxu1  ;;  %8196 = vmatpush1.bf16.msra.mxu0 %v8195_v63  ;;  %v1277_v63 = vld [vmem:[%s9826_s30 + $0x1d78] sm:$0xff]  ;;  %v8209_v6 = vpack.c.bf16 %v1275_v58, %v1267_v57  ;;  %v1283_v12 = vld [vmem:[%s9826_s30 + $0x1da8] sm:$0xff]  ;;  %v1332_v57 = vld [vmem:[%s9826_s30 + $0x1f30] sm:$0xff] }
 0x35d   : > { %5270 = vst [vmem:[#allocation2 + $0x40] sm:$0xff] %v5238_v11  ;;  %v5241_v24 = vadd.f32 %v3791_v19, %v313_v62  ;;  %8708 = vmatpush1.bf16.msra.mxu1 %v8707_v1  ;;  %8198 = vmatprep.subr.bf16.mxu0 %v8197_v2  ;;  %v1269_v62 = vld [vmem:[%s9826_s30 + $0x1d38] sm:$0xff]  ;;  %v1276_v11 = vld [vmem:[%s9826_s30 + $0x1d70] sm:$0xff]  ;;  %v1291_v13 = vld [vmem:[%s9826_s30 + $0x1de8] sm:$0xff] }
 0x35e   : > { %5272 = vst [vmem:[#allocation2 + $0x50] sm:$0xff] %v5240_v17  ;;  %5271 = vst [vmem:[#allocation2 + $0x48] sm:$0xff] %v5239_v18  ;;  %v3083_v30 = vpop.f32.mrb[4].mxu0  ;;  %8710 = vmatprep.subr.bf16.mxu1 %v8709_v7  ;;  %v1266_v7 = vld [vmem:[%s9826_s30 + $0x1d20] sm:$0xff]  ;;  %v8721_v10 = vpack.c.bf16 %v1277_v63, %v1269_v62  ;;  %v8723_v17 = vpack.c.bf16 %v1276_v11, %v1268_v9  ;;  %v8213_v18 = vpack.c.bf16 %v1291_v13, %v1283_v12  ;;  %v1325_v39 = vld [vmem:[%s9826_s30 + $0x1ef8] sm:$0xff] }
 0x35f   : > { %5273 = vst [vmem:[#allocation2 + $0x58] sm:$0xff] %v5241_v24  ;;  %v5246_v35 = vadd.f32 %v3083_v30, %v318_v14  ;;  %v3795_v36 = vpop.f32.mrb[4].mxu1  ;;  %v3085_v37 = vpop.f32.mrb[5].mxu0  ;;  %v1285_v14 = vld [vmem:[%s9826_s30 + $0x1db8] sm:$0xff]  ;;  %v8211_v16 = vpack.c.bf16 %v1274_v8, %v1266_v7  ;;  %v1282_v19 = vld [vmem:[%s9826_s30 + $0x1da0] sm:$0xff]  ;;  %v1299_v24 = vld [vmem:[%s9826_s30 + $0x1e28] sm:$0xff] }
 0x360   : > { %v5248_v41 = vadd.f32 %v3795_v36, %v320_v20  ;;  %v5247_v42 = vadd.f32 %v3085_v37, %v319_v21  ;;  %v3797_v43 = vpop.f32.mrb[5].mxu1  ;;  %8200 = vmatpush1.bf16.msra.mxu0 %v8199_v23  ;;  %v1290_v20 = vld [vmem:[%s9826_s30 + $0x1de0] sm:$0xff]  ;;  %v1284_v21 = vld [vmem:[%s9826_s30 + $0x1db0] sm:$0xff]  ;;  %v1315_v36 = vld [vmem:[%s9826_s30 + $0x1ea8] sm:$0xff] }
 0x361   : > { %5278 = vst [vmem:[#allocation2 + $0x80] sm:$0xff] %v5246_v35  ;;  %v5249_v48 = vadd.f32 %v3797_v43, %v321_v22  ;;  %8712 = vmatpush1.bf16.msra.mxu1 %v8711_v25  ;;  %8202 = vmatprep.subr.bf16.mxu0 %v8201_v26  ;;  %v8725_v22 = vpack.c.bf16 %v1293_v15, %v1285_v14  ;;  %v1292_v23 = vld [vmem:[%s9826_s30 + $0x1df0] sm:$0xff]  ;;  %v1307_v25 = vld [vmem:[%s9826_s30 + $0x1e68] sm:$0xff]  ;;  %v1301_v26 = vld [vmem:[%s9826_s30 + $0x1e38] sm:$0xff] }
 0x362   : > { %5280 = vst [vmem:[#allocation2 + $0x90] sm:$0xff] %v5248_v41  ;;  %5279 = vst [vmem:[#allocation2 + $0x88] sm:$0xff] %v5247_v42  ;;  %v3089_v54 = vpop.f32.mrb[6].mxu0  ;;  %8714 = vmatprep.subr.bf16.mxu1 %v8713_v31  ;;  %v8215_v28 = vpack.c.bf16 %v1290_v20, %v1282_v19  ;;  %v8727_v29 = vpack.c.bf16 %v1292_v23, %v1284_v21  ;;  %v8217_v30 = vpack.c.bf16 %v1307_v25, %v1299_v24  ;;  %v1298_v31 = vld [vmem:[%s9826_s30 + $0x1e20] sm:$0xff]  ;;  %v1308_v35 = vld [vmem:[%s9826_s30 + $0x1e70] sm:$0xff] }
 0x363   : > { %5281 = vst [vmem:[#allocation2 + $0x98] sm:$0xff] %v5249_v48  ;;  %v5254_v59 = vadd.f32 %v3089_v54, %v326_v38  ;;  %v3801_v60 = vpop.f32.mrb[6].mxu1  ;;  %v3091_v61 = vpop.f32.mrb[7].mxu0  ;;  %v8729_v34 = vpack.c.bf16 %v1309_v27, %v1301_v26  ;;  %v1323_v37 = vld [vmem:[%s9826_s30 + $0x1ee8] sm:$0xff]  ;;  %v1317_v38 = vld [vmem:[%s9826_s30 + $0x1eb8] sm:$0xff]  ;;  %v8219_v40 = vpack.c.bf16 %v1306_v32, %v1298_v31  ;;  %v8731_v41 = vpack.c.bf16 %v1308_v35, %v1300_v33  ;;  %v1314_v43 = vld [vmem:[%s9826_s30 + $0x1ea0] sm:$0xff] }
 0x364   : > { %v5256_v0 = vadd.f32 %v3801_v60, %v328_v44  ;;  %v5255_v1 = vadd.f32 %v3091_v61, %v327_v45  ;;  %v3803_v2 = vpop.f32.mrb[7].mxu1  ;;  %8204 = vmatpush1.bf16.msra.mxu0 %v8203_v47  ;;  %v8221_v42 = vpack.c.bf16 %v1323_v37, %v1315_v36  ;;  %v1322_v44 = vld [vmem:[%s9826_s30 + $0x1ee0] sm:$0xff]  ;;  %v1316_v45 = vld [vmem:[%s9826_s30 + $0x1eb0] sm:$0xff]  ;;  %v1331_v48 = vld [vmem:[%s9826_s30 + $0x1f28] sm:$0xff] }
 0x365   : > { %5286 = vst [vmem:[#allocation2 + $0xc0] sm:$0xff] %v5254_v59  ;;  %v5257_v4 = vadd.f32 %v3803_v2, %v329_v46  ;;  %8716 = vmatpush1.bf16.msra.mxu1 %v8715_v49  ;;  %8206 = vmatprep.subr.bf16.mxu0 %v8205_v50  ;;  %v8733_v46 = vpack.c.bf16 %v1325_v39, %v1317_v38  ;;  %v1324_v47 = vld [vmem:[%s9826_s30 + $0x1ef0] sm:$0xff]  ;;  %v1339_v49 = vld [vmem:[%s9826_s30 + $0x1f68] sm:$0xff]  ;;  %v1333_v50 = vld [vmem:[%s9826_s30 + $0x1f38] sm:$0xff] }
 0x366   : > { %5288 = vst [vmem:[#allocation2 + $0xd0] sm:$0xff] %v5256_v0  ;;  %5287 = vst [vmem:[#allocation2 + $0xc8] sm:$0xff] %v5255_v1  ;;  %8718 = vmatprep.subr.bf16.mxu1 %v8717_v55  ;;  %v1341_v51 = vld [vmem:[%s9826_s30 + $0x1f78] sm:$0xff]  ;;  %v8223_v52 = vpack.c.bf16 %v1322_v44, %v1314_v43  ;;  %v8735_v53 = vpack.c.bf16 %v1324_v47, %v1316_v45  ;;  %v8225_v54 = vpack.c.bf16 %v1339_v49, %v1331_v48  ;;  %v1330_v55 = vld [vmem:[%s9826_s30 + $0x1f20] sm:$0xff] }
 0x367   : > { %5289 = vst [vmem:[#allocation2 + $0xd8] sm:$0xff] %v5257_v4  ;;  %v8737_v58 = vpack.c.bf16 %v1341_v51, %v1333_v50  ;;  %v1340_v59 = vld [vmem:[%s9826_s30 + $0x1f70] sm:$0xff]  ;;  %v1347_v60 = vld [vmem:[%s9826_s30 + $0x1fa8] sm:$0xff]  ;;  %v1349_v62 = vld [vmem:[%s9826_s30 + $0x1fb8] sm:$0xff]  ;;  %v8227_v0 = vpack.c.bf16 %v1338_v56, %v1330_v55 }
 0x368   : > { %8208 = vmatpush1.bf16.msra.mxu0 %v8207_v3  ;;  %v1355_v61 = vld [vmem:[%s9826_s30 + $0x1fe8] sm:$0xff]  ;;  %v1357_v63 = vld [vmem:[%s9826_s30 + $0x1ff8] sm:$0xff]  ;;  %v8739_v1 = vpack.c.bf16 %v1340_v59, %v1332_v57  ;;  %v1346_v3 = vld [vmem:[%s9826_s30 + $0x1fa0] sm:$0xff] }
 0x369   : > { %8720 = vmatpush1.bf16.msra.mxu1 %v8719_v5  ;;  %8210 = vmatprep.subr.bf16.mxu0 %v8209_v6  ;;  %v8229_v2 = vpack.c.bf16 %v1355_v61, %v1347_v60  ;;  %v1354_v4 = vld [vmem:[%s9826_s30 + $0x1fe0] sm:$0xff]  ;;  %v1348_v5 = vld [vmem:[%s9826_s30 + $0x1fb0] sm:$0xff]  ;;  %v8741_v6 = vpack.c.bf16 %v1357_v63, %v1349_v62  ;;  %v1363_v8 = vld [vmem:[%s9826_s30 + $0x2028] sm:$0xff] }
 0x36a   : > { %8722 = vmatprep.subr.bf16.mxu1 %v8721_v10  ;;  %v1356_v7 = vld [vmem:[%s9826_s30 + $0x1ff0] sm:$0xff]  ;;  %v1371_v9 = vld [vmem:[%s9826_s30 + $0x2068] sm:$0xff]  ;;  %v1365_v10 = vld [vmem:[%s9826_s30 + $0x2038] sm:$0xff]  ;;  %v8231_v12 = vpack.c.bf16 %v1354_v4, %v1346_v3 }
 0x36b   : > { %v1373_v11 = vld [vmem:[%s9826_s30 + $0x2078] sm:$0xff]  ;;  %v8743_v13 = vpack.c.bf16 %v1356_v7, %v1348_v5  ;;  %v8233_v14 = vpack.c.bf16 %v1371_v9, %v1363_v8  ;;  %v1362_v15 = vld [vmem:[%s9826_s30 + $0x2020] sm:$0xff]  ;;  %v1372_v19 = vld [vmem:[%s9826_s30 + $0x2070] sm:$0xff] }
 0x36c   : > { %8212 = vmatpush1.bf16.msra.mxu0 %v8211_v16  ;;  %v1370_v16 = vld [vmem:[%s9826_s30 + $0x2060] sm:$0xff]  ;;  %v1379_v20 = vld [vmem:[%s9826_s30 + $0x20a8] sm:$0xff]  ;;  %v1389_v23 = vld [vmem:[%s9826_s30 + $0x20f8] sm:$0xff] }
 0x36d   : > { %8724 = vmatpush1.bf16.msra.mxu1 %v8723_v17  ;;  %8214 = vmatprep.subr.bf16.mxu0 %v8213_v18  ;;  %v1364_v17 = vld [vmem:[%s9826_s30 + $0x2030] sm:$0xff]  ;;  %v8745_v18 = vpack.c.bf16 %v1373_v11, %v1365_v10  ;;  %v1387_v21 = vld [vmem:[%s9826_s30 + $0x20e8] sm:$0xff]  ;;  %v8235_v24 = vpack.c.bf16 %v1370_v16, %v1362_v15  ;;  %v1378_v27 = vld [vmem:[%s9826_s30 + $0x20a0] sm:$0xff] }
 0x36e   : > { %8726 = vmatprep.subr.bf16.mxu1 %v8725_v22  ;;  %v1381_v22 = vld [vmem:[%s9826_s30 + $0x20b8] sm:$0xff]  ;;  %v8747_v25 = vpack.c.bf16 %v1372_v19, %v1364_v17  ;;  %v8237_v26 = vpack.c.bf16 %v1387_v21, %v1379_v20  ;;  %v1388_v31 = vld [vmem:[%s9826_s30 + $0x20f0] sm:$0xff]  ;;  %v1395_v32 = vld [vmem:[%s9826_s30 + $0x2128] sm:$0xff] }
 0x36f   : > { %v1403_v33 = vld [vmem:[%s9826_s30 + $0x2168] sm:$0xff]  ;;  %v1397_v35 = vld [vmem:[%s9826_s30 + $0x2138] sm:$0xff]  ;;  %v1404_v44 = vld [vmem:[%s9826_s30 + $0x2170] sm:$0xff] }
 0x370   : > { %8216 = vmatpush1.bf16.msra.mxu0 %v8215_v28  ;;  %v1386_v28 = vld [vmem:[%s9826_s30 + $0x20e0] sm:$0xff]  ;;  %v1405_v36 = vld [vmem:[%s9826_s30 + $0x2178] sm:$0xff]  ;;  %v8241_v39 = vpack.c.bf16 %v1403_v33, %v1395_v32  ;;  %v1411_v45 = vld [vmem:[%s9826_s30 + $0x21a8] sm:$0xff] }
 0x371   : > { %8728 = vmatpush1.bf16.msra.mxu1 %v8727_v29  ;;  %8218 = vmatprep.subr.bf16.mxu0 %v8217_v30  ;;  %v1380_v29 = vld [vmem:[%s9826_s30 + $0x20b0] sm:$0xff]  ;;  %v8749_v30 = vpack.c.bf16 %v1389_v23, %v1381_v22  ;;  %v8239_v37 = vpack.c.bf16 %v1386_v28, %v1378_v27  ;;  %v8753_v43 = vpack.c.bf16 %v1405_v36, %v1397_v35  ;;  %v9371_v47 = vld [vmem:[%s9940_s3 + $0x4b8] sm:$0xff]  ;;  %v1418_v55 = vld [vmem:[%s9826_s30 + $0x21e0] sm:$0xff] }
 0x372   : > { %8730 = vmatprep.subr.bf16.mxu1 %v8729_v34  ;;  %v9370_v34 = vld [vmem:[%s9940_s3 + $0x30] sm:$0xff]  ;;  %v8751_v38 = vpack.c.bf16 %v1388_v31, %v1380_v29  ;;  %v1413_v48 = vld [vmem:[%s9826_s30 + $0x21b8] sm:$0xff]  ;;  %v1427_v59 = vld [vmem:[%s9826_s30 + $0x2228] sm:$0xff] }
 0x373   : > { %v1421_v49 = vld [vmem:[%s9826_s30 + $0x21f8] sm:$0xff]  ;;  %v9372_v50 = vld [vmem:[%s9940_s3 + $0x4b0] sm:$0xff]  ;;  %v1435_v60 = vld [vmem:[%s9826_s30 + $0x2268] sm:$0xff] }
 0x374   : > { %8220 = vmatpush1.bf16.msra.mxu0 %v8219_v40  ;;  %v1394_v40 = vld [vmem:[%s9826_s30 + $0x2120] sm:$0xff]  ;;  %v1412_v56 = vld [vmem:[%s9826_s30 + $0x21b0] sm:$0xff]  ;;  %v8757_v57 = vpack.c.bf16 %v1421_v49, %v1413_v48  ;;  %v9373_v61 = vld [vmem:[%s9940_s3 + $0x938] sm:$0xff]  ;;  %v8249_v3 = vpack.c.bf16 %v1435_v60, %v1427_v59 }
 0x375   : > { %8732 = vmatpush1.bf16.msra.mxu1 %v8731_v41  ;;  %8222 = vmatprep.subr.bf16.mxu0 %v8221_v42  ;;  %v1402_v41 = vld [vmem:[%s9826_s30 + $0x2160] sm:$0xff]  ;;  %v1396_v42 = vld [vmem:[%s9826_s30 + $0x2130] sm:$0xff]  ;;  %v1429_v62 = vld [vmem:[%s9826_s30 + $0x2238] sm:$0xff] }
 0x376   : > { %8734 = vmatprep.subr.bf16.mxu1 %v8733_v46  ;;  %v1419_v46 = vld [vmem:[%s9826_s30 + $0x21e8] sm:$0xff]  ;;  %v8243_v51 = vpack.c.bf16 %v1402_v41, %v1394_v40  ;;  %v1437_v63 = vld [vmem:[%s9826_s30 + $0x2278] sm:$0xff]  ;;  %v1426_v4 = vld [vmem:[%s9826_s30 + $0x2220] sm:$0xff] }
 0x377   : > { %v1434_v5 = vld [vmem:[%s9826_s30 + $0x2260] sm:$0xff]  ;;  %v8761_v7 = vpack.c.bf16 %v1437_v63, %v1429_v62  ;;  %v1436_v8 = vld [vmem:[%s9826_s30 + $0x2270] sm:$0xff]  ;;  %v1443_v9 = vld [vmem:[%s9826_s30 + $0x22a8] sm:$0xff] }
 0x378   : > { %8224 = vmatpush1.bf16.msra.mxu0 %v8223_v52  ;;  %v8755_v52 = vpack.c.bf16 %v1404_v44, %v1396_v42  ;;  %v1451_v10 = vld [vmem:[%s9826_s30 + $0x22e8] sm:$0xff]  ;;  %v9375_v11 = vld [vmem:[%s9940_s3 + $0xdb8] sm:$0xff]  ;;  %v8251_v15 = vpack.c.bf16 %v1434_v5, %v1426_v4  ;;  %v1450_v19 = vld [vmem:[%s9826_s30 + $0x22e0] sm:$0xff] }
 0x379   : > { %8736 = vmatpush1.bf16.msra.mxu1 %v8735_v53  ;;  %8226 = vmatprep.subr.bf16.mxu0 %v8225_v54  ;;  %v8245_v53 = vpack.c.bf16 %v1419_v46, %v1411_v45  ;;  %v1410_v54 = vld [vmem:[%s9826_s30 + $0x21a0] sm:$0xff]  ;;  %v8253_v17 = vpack.c.bf16 %v1451_v10, %v1443_v9  ;;  %v1444_v20 = vld [vmem:[%s9826_s30 + $0x22b0] sm:$0xff]  ;;  %v1459_v23 = vld [vmem:[%s9826_s30 + $0x2328] sm:$0xff] }
 0x37a   : > { %8738 = vmatprep.subr.bf16.mxu1 %v8737_v58  ;;  %v1420_v58 = vld [vmem:[%s9826_s30 + $0x21f0] sm:$0xff]  ;;  %v1469_v27 = vld [vmem:[%s9826_s30 + $0x2378] sm:$0xff]  ;;  %v1458_v31 = vld [vmem:[%s9826_s30 + $0x2320] sm:$0xff] }
 0x37b   : > { %v1452_v22 = vld [vmem:[%s9826_s30 + $0x22f0] sm:$0xff]  ;;  %v1466_v32 = vld [vmem:[%s9826_s30 + $0x2360] sm:$0xff]  ;;  %v1475_v36 = vld [vmem:[%s9826_s30 + $0x23a8] sm:$0xff] }
 0x37c   : > { %8228 = vmatpush1.bf16.msra.mxu0 %v8227_v0  ;;  %v9374_v0 = vld [vmem:[%s9940_s3 + $0x930] sm:$0xff]  ;;  %v8767_v29 = vpack.c.bf16 %v1452_v22, %v1444_v20  ;;  %v8259_v40 = vpack.c.bf16 %v1466_v32, %v1458_v31  ;;  %v1482_v44 = vld [vmem:[%s9826_s30 + $0x23e0] sm:$0xff]  ;;  %v1491_v48 = vld [vmem:[%s9826_s30 + $0x2428] sm:$0xff] }
 0x37d   : > { %8740 = vmatpush1.bf16.msra.mxu1 %v8739_v1  ;;  %8230 = vmatprep.subr.bf16.mxu0 %v8229_v2  ;;  %v8247_v1 = vpack.c.bf16 %v1418_v55, %v1410_v54  ;;  %v8759_v2 = vpack.c.bf16 %v1420_v58, %v1412_v56  ;;  %v1460_v33 = vld [vmem:[%s9826_s30 + $0x2330] sm:$0xff]  ;;  %v1499_v49 = vld [vmem:[%s9826_s30 + $0x2468] sm:$0xff]  ;;  %v1490_v55 = vld [vmem:[%s9826_s30 + $0x2420] sm:$0xff] }
 0x37e   : > { %8742 = vmatprep.subr.bf16.mxu1 %v8741_v6  ;;  %v1428_v6 = vld [vmem:[%s9826_s30 + $0x2230] sm:$0xff]  ;;  %v8265_v54 = vpack.c.bf16 %v1499_v49, %v1491_v48  ;;  %v1498_v56 = vld [vmem:[%s9826_s30 + $0x2460] sm:$0xff]  ;;  %v1507_v60 = vld [vmem:[%s9826_s30 + $0x24a8] sm:$0xff] }
 0x37f   : > { %v8763_v16 = vpack.c.bf16 %v1436_v8, %v1428_v6  ;;  %v1468_v35 = vld [vmem:[%s9826_s30 + $0x2370] sm:$0xff]  ;;  %v1509_v62 = vld [vmem:[%s9826_s30 + $0x24b8] sm:$0xff]  ;;  %v1514_v4 = vld [vmem:[%s9826_s30 + $0x24e0] sm:$0xff] }
 0x380   : > { %8232 = vmatpush1.bf16.msra.mxu0 %v8231_v12  ;;  %v1445_v12 = vld [vmem:[%s9826_s30 + $0x22b8] sm:$0xff]  ;;  %v8771_v41 = vpack.c.bf16 %v1468_v35, %v1460_v33  ;;  %v1476_v45 = vld [vmem:[%s9826_s30 + $0x23b0] sm:$0xff]  ;;  %v1523_v8 = vld [vmem:[%s9826_s30 + $0x2528] sm:$0xff] }
 0x381   : > { %8744 = vmatpush1.bf16.msra.mxu1 %v8743_v13  ;;  %8234 = vmatprep.subr.bf16.mxu0 %v8233_v14  ;;  %v1453_v13 = vld [vmem:[%s9826_s30 + $0x22f8] sm:$0xff]  ;;  %v9376_v14 = vld [vmem:[%s9940_s3 + $0xdb0] sm:$0xff]  ;;  %v1531_v9 = vld [vmem:[%s9826_s30 + $0x2568] sm:$0xff] }
 0x382   : > { %8746 = vmatprep.subr.bf16.mxu1 %v8745_v18  ;;  %v1442_v18 = vld [vmem:[%s9826_s30 + $0x22a0] sm:$0xff]  ;;  %v8765_v21 = vpack.c.bf16 %v1453_v13, %v1445_v12  ;;  %v1500_v59 = vld [vmem:[%s9826_s30 + $0x2470] sm:$0xff]  ;;  %v1517_v63 = vld [vmem:[%s9826_s30 + $0x24f8] sm:$0xff] }
 0x383   : > { %4138 = vmatmul.mubr.f32.vlgmr.msra.gmra.mrb[8].mxu0 %v9370_v34  ;;  %v8255_v28 = vpack.c.bf16 %v1450_v19, %v1442_v18  ;;  %v1508_v5 = vld [vmem:[%s9826_s30 + $0x24b0] sm:$0xff]  ;;  %v8781_v6 = vpack.c.bf16 %v1517_v63, %v1509_v62  ;;  %v1525_v10 = vld [vmem:[%s9826_s30 + $0x2538] sm:$0xff]  ;;  %v1539_v20 = vld [vmem:[%s9826_s30 + $0x25a8] sm:$0xff] }
 0x384   : > { %8236 = vmatpush1.bf16.msra.mxu0 %v8235_v24  ;;  %4850 = vmatmul.mubr.f32.vlgmr.msra.gmra.mrb[8].mxu1 %v9370_v34  ;;  %v1467_v24 = vld [vmem:[%s9826_s30 + $0x2368] sm:$0xff]  ;;  %v1532_v19 = vld [vmem:[%s9826_s30 + $0x2570] sm:$0xff]  ;;  %v1541_v22 = vld [vmem:[%s9826_s30 + $0x25b8] sm:$0xff] }
 0x385   : > { %8748 = vmatpush1.bf16.msra.mxu1 %v8747_v25  ;;  %8238 = vmatprep.subr.bf16.mxu0 %v8237_v26  ;;  %v9377_v25 = vld [vmem:[%s9940_s3 + $0x48] sm:$0xff]  ;;  %v1461_v26 = vld [vmem:[%s9826_s30 + $0x2338] sm:$0xff]  ;;  %v1548_v31 = vld [vmem:[%s9826_s30 + $0x25f0] sm:$0xff] }
 0x386   : > { %8750 = vmatprep.subr.bf16.mxu1 %v8749_v30  ;;  %4143 = vmatprep.mubr.f32.mxu0 %v9371_v47  ;;  %v8257_v30 = vpack.c.bf16 %v1467_v24, %v1459_v23  ;;  %v8769_v34 = vpack.c.bf16 %v1469_v27, %v1461_v26  ;;  %v1549_v23 = vld [vmem:[%s9826_s30 + $0x25f8] sm:$0xff]  ;;  %v1538_v27 = vld [vmem:[%s9826_s30 + $0x25a0] sm:$0xff]  ;;  %v1555_v32 = vld [vmem:[%s9826_s30 + $0x2628] sm:$0xff] }
 0x387   : > { %4855 = vmatprep.mubr.f32.mxu1 %v9371_v47  ;;  %4144 = vmatmul.mubr.f32.gmra.mrb[10].mxu0 %v9372_v50  ;;  %v1484_v47 = vld [vmem:[%s9826_s30 + $0x23f0] sm:$0xff]  ;;  %v1563_v33 = vld [vmem:[%s9826_s30 + $0x2668] sm:$0xff]  ;;  %v1565_v35 = vld [vmem:[%s9826_s30 + $0x2678] sm:$0xff] }
 0x388   : > { %8240 = vmatpush1.bf16.msra.mxu0 %v8239_v37  ;;  %4856 = vmatmul.mubr.f32.gmra.mrb[10].mxu1 %v9372_v50  ;;  %v1483_v37 = vld [vmem:[%s9826_s30 + $0x23e8] sm:$0xff]  ;;  %v1493_v50 = vld [vmem:[%s9826_s30 + $0x2438] sm:$0xff]  ;;  %v1586_v63 = vld [vmem:[%s9826_s30 + $0x2720] sm:$0xff] }
 0x389   : > { %8752 = vmatpush1.bf16.msra.mxu1 %v8751_v38  ;;  %8242 = vmatprep.subr.bf16.mxu0 %v8241_v39  ;;  %v1477_v38 = vld [vmem:[%s9826_s30 + $0x23b8] sm:$0xff]  ;;  %v8261_v42 = vpack.c.bf16 %v1483_v37, %v1475_v36 }
 0x38a   : > { %8754 = vmatprep.subr.bf16.mxu1 %v8753_v43  ;;  %4149 = vmatprep.mubr.f32.mxu0 %v9373_v61  ;;  %v1485_v39 = vld [vmem:[%s9826_s30 + $0x23f8] sm:$0xff]  ;;  %v1474_v43 = vld [vmem:[%s9826_s30 + $0x23a0] sm:$0xff] }
 0x38b   : > { %4861 = vmatprep.mubr.f32.mxu1 %v9373_v61  ;;  %4150 = vmatmul.mubr.f32.gmra.mrb[12].mxu0 %v9374_v0  ;;  %v8773_v46 = vpack.c.bf16 %v1485_v39, %v1477_v38  ;;  %v1515_v61 = vld [vmem:[%s9826_s30 + $0x24e8] sm:$0xff]  ;;  %v8281_v38 = vpack.c.bf16 %v1563_v33, %v1555_v32  ;;  %v1554_v39 = vld [vmem:[%s9826_s30 + $0x2620] sm:$0xff] }
 0x38c   : > { %8244 = vmatpush1.bf16.msra.mxu0 %v8243_v51  ;;  %4862 = vmatmul.mubr.f32.gmra.mrb[12].mxu1 %v9374_v0  ;;  %v1501_v51 = vld [vmem:[%s9826_s30 + $0x2478] sm:$0xff]  ;;  %v8267_v0 = vpack.c.bf16 %v1498_v56, %v1490_v55  ;;  %v1580_v55 = vld [vmem:[%s9826_s30 + $0x26f0] sm:$0xff]  ;;  %v1587_v56 = vld [vmem:[%s9826_s30 + $0x2728] sm:$0xff] }
 0x38d   : > { %8756 = vmatpush1.bf16.msra.mxu1 %v8755_v52  ;;  %8246 = vmatprep.subr.bf16.mxu0 %v8245_v53  ;;  %v8263_v52 = vpack.c.bf16 %v1482_v44, %v1474_v43  ;;  %v8775_v53 = vpack.c.bf16 %v1484_v47, %v1476_v45  ;;  %v8777_v58 = vpack.c.bf16 %v1501_v51, %v1493_v50  ;;  %v1564_v43 = vld [vmem:[%s9826_s30 + $0x2670] sm:$0xff]  ;;  %v1571_v44 = vld [vmem:[%s9826_s30 + $0x26a8] sm:$0xff]  ;;  %v1581_v47 = vld [vmem:[%s9826_s30 + $0x26f8] sm:$0xff] }
 0x38e   : > { %8758 = vmatprep.subr.bf16.mxu1 %v8757_v57  ;;  %4155 = vmatprep.mubr.f32.mxu0 %v9375_v11  ;;  %v1492_v57 = vld [vmem:[%s9826_s30 + $0x2430] sm:$0xff]  ;;  %v1579_v45 = vld [vmem:[%s9826_s30 + $0x26e8] sm:$0xff]  ;;  %v1570_v51 = vld [vmem:[%s9826_s30 + $0x26a0] sm:$0xff] }
 0x38f   : > { %4867 = vmatprep.mubr.f32.mxu1 %v9375_v11  ;;  %4156 = vmatmul.mubr.f32.gmra.mrb[14].mxu0 %v9376_v14  ;;  %v1533_v11 = vld [vmem:[%s9826_s30 + $0x2578] sm:$0xff]  ;;  %v8285_v50 = vpack.c.bf16 %v1579_v45, %v1571_v44 }
 0x390   : > { %8248 = vmatpush1.bf16.msra.mxu0 %v8247_v1  ;;  %4868 = vmatmul.mubr.f32.gmra.mrb[14].mxu1 %v9376_v14  ;;  %v8779_v1 = vpack.c.bf16 %v1500_v59, %v1492_v57  ;;  %v8273_v14 = vpack.c.bf16 %v1531_v9, %v1523_v8  ;;  %v8785_v18 = vpack.c.bf16 %v1533_v11, %v1525_v10  ;;  %v1595_v57 = vld [vmem:[%s9826_s30 + $0x2768] sm:$0xff]  ;;  %v1597_v59 = vld [vmem:[%s9826_s30 + $0x2778] sm:$0xff]  ;;  %v1602_v11 = vld [vmem:[%s9826_s30 + $0x27a0] sm:$0xff] }
 0x391   : > { %8760 = vmatpush1.bf16.msra.mxu1 %v8759_v2  ;;  %8250 = vmatprep.subr.bf16.mxu0 %v8249_v3  ;;  %v8269_v2 = vpack.c.bf16 %v1515_v61, %v1507_v60  ;;  %v1506_v3 = vld [vmem:[%s9826_s30 + $0x24a0] sm:$0xff]  ;;  %v8289_v62 = vpack.c.bf16 %v1595_v57, %v1587_v56  ;;  %v1661_v44 = vld [vmem:[%s9826_s30 + $0x2978] sm:$0xff] }
 0x392   : > { %8762 = vmatprep.subr.bf16.mxu1 %v8761_v7  ;;  %4226 = vmatprep.mubr.f32.mxu0 %v9377_v25  ;;  %v1516_v7 = vld [vmem:[%s9826_s30 + $0x24f0] sm:$0xff]  ;;  %v8271_v12 = vpack.c.bf16 %v1514_v4, %v1506_v3  ;;  %v1603_v4 = vld [vmem:[%s9826_s30 + $0x27a8] sm:$0xff]  ;;  %v1669_v56 = vld [vmem:[%s9826_s30 + $0x29b8] sm:$0xff] }
 0x393   : > { %4938 = vmatprep.mubr.f32.mxu1 %v9377_v25  ;;  %v8783_v13 = vpack.c.bf16 %v1516_v7, %v1508_v5  ;;  %v1596_v3 = vld [vmem:[%s9826_s30 + $0x2770] sm:$0xff]  ;;  %v1611_v5 = vld [vmem:[%s9826_s30 + $0x27e8] sm:$0xff]  ;;  %v1613_v7 = vld [vmem:[%s9826_s30 + $0x27f8] sm:$0xff] }
 0x394   : > { %8252 = vmatpush1.bf16.msra.mxu0 %v8251_v15  ;;  %v1522_v15 = vld [vmem:[%s9826_s30 + $0x2520] sm:$0xff]  ;;  %v8293_v10 = vpack.c.bf16 %v1611_v5, %v1603_v4  ;;  %v1677_v57 = vld [vmem:[%s9826_s30 + $0x29f8] sm:$0xff]  ;;  %v1691_v4 = vld [vmem:[%s9826_s30 + $0x2a68] sm:$0xff] }
 0x395   : > { %8764 = vmatpush1.bf16.msra.mxu1 %v8763_v16  ;;  %8254 = vmatprep.subr.bf16.mxu0 %v8253_v17  ;;  %v1530_v16 = vld [vmem:[%s9826_s30 + $0x2560] sm:$0xff]  ;;  %v1524_v17 = vld [vmem:[%s9826_s30 + $0x2530] sm:$0xff]  ;;  %v9381_v5 = vld [vmem:[%s9940_s3 + $0x948] sm:$0xff] }
 0x396   : > { %8766 = vmatprep.subr.bf16.mxu1 %v8765_v21  ;;  %v1547_v21 = vld [vmem:[%s9826_s30 + $0x25e8] sm:$0xff]  ;;  %v8275_v24 = vpack.c.bf16 %v1530_v16, %v1522_v15  ;;  %v8787_v25 = vpack.c.bf16 %v1532_v19, %v1524_v17  ;;  %v1612_v15 = vld [vmem:[%s9826_s30 + $0x27f0] sm:$0xff]  ;;  %v1629_v19 = vld [vmem:[%s9826_s30 + $0x2878] sm:$0xff] }
 0x397   : > { %v8277_v26 = vpack.c.bf16 %v1547_v21, %v1539_v20  ;;  %v1619_v16 = vld [vmem:[%s9826_s30 + $0x2828] sm:$0xff] }
 0x398   : > { %8256 = vmatpush1.bf16.msra.mxu0 %v8255_v28  ;;  %v1546_v28 = vld [vmem:[%s9826_s30 + $0x25e0] sm:$0xff]  ;;  %v1627_v17 = vld [vmem:[%s9826_s30 + $0x2868] sm:$0xff] }
 0x399   : > { %8768 = vmatpush1.bf16.msra.mxu1 %v8767_v29  ;;  %8258 = vmatprep.subr.bf16.mxu0 %v8257_v30  ;;  %v1540_v29 = vld [vmem:[%s9826_s30 + $0x25b0] sm:$0xff]  ;;  %v8789_v30 = vpack.c.bf16 %v1549_v23, %v1541_v22  ;;  %v8279_v36 = vpack.c.bf16 %v1546_v28, %v1538_v27  ;;  %v8297_v22 = vpack.c.bf16 %v1627_v17, %v1619_v16  ;;  %v1618_v23 = vld [vmem:[%s9826_s30 + $0x2820] sm:$0xff]  ;;  %v1635_v28 = vld [vmem:[%s9826_s30 + $0x28a8] sm:$0xff] }
 0x39a   : > { %8770 = vmatprep.subr.bf16.mxu1 %v8769_v34  ;;  %v1557_v34 = vld [vmem:[%s9826_s30 + $0x2638] sm:$0xff]  ;;  %v8791_v37 = vpack.c.bf16 %v1548_v31, %v1540_v29  ;;  %v1628_v27 = vld [vmem:[%s9826_s30 + $0x2870] sm:$0xff]  ;;  %v1643_v29 = vld [vmem:[%s9826_s30 + $0x28e8] sm:$0xff] }
 0x39b   : > { %v1645_v31 = vld [vmem:[%s9826_s30 + $0x28f8] sm:$0xff]  ;;  %v1692_v16 = vld [vmem:[%s9826_s30 + $0x2a70] sm:$0xff]  ;;  %v1699_v17 = vld [vmem:[%s9826_s30 + $0x2aa8] sm:$0xff] }
 0x39c   : > { %8260 = vmatpush1.bf16.msra.mxu0 %v8259_v40  ;;  %v1562_v40 = vld [vmem:[%s9826_s30 + $0x2660] sm:$0xff] }
 0x39d   : > { %8772 = vmatpush1.bf16.msra.mxu1 %v8771_v41  ;;  %8262 = vmatprep.subr.bf16.mxu0 %v8261_v42  ;;  %v1556_v41 = vld [vmem:[%s9826_s30 + $0x2630] sm:$0xff]  ;;  %v8793_v42 = vpack.c.bf16 %v1565_v35, %v1557_v34  ;;  %v8283_v48 = vpack.c.bf16 %v1562_v40, %v1554_v39  ;;  %v8301_v34 = vpack.c.bf16 %v1643_v29, %v1635_v28  ;;  %v1634_v35 = vld [vmem:[%s9826_s30 + $0x28a0] sm:$0xff]  ;;  %v1651_v40 = vld [vmem:[%s9826_s30 + $0x2928] sm:$0xff] }
 0x39e   : > { %8774 = vmatprep.subr.bf16.mxu1 %v8773_v46  ;;  %v1573_v46 = vld [vmem:[%s9826_s30 + $0x26b8] sm:$0xff]  ;;  %v8795_v49 = vpack.c.bf16 %v1564_v43, %v1556_v41  ;;  %v1644_v39 = vld [vmem:[%s9826_s30 + $0x28f0] sm:$0xff]  ;;  %v1659_v41 = vld [vmem:[%s9826_s30 + $0x2968] sm:$0xff] }
 0x39f   : > { %v1653_v43 = vld [vmem:[%s9826_s30 + $0x2938] sm:$0xff]  ;;  %v1700_v28 = vld [vmem:[%s9826_s30 + $0x2ab0] sm:$0xff] }
 0x3a0   : > { %8264 = vmatpush1.bf16.msra.mxu0 %v8263_v52  ;;  %v1578_v52 = vld [vmem:[%s9826_s30 + $0x26e0] sm:$0xff] }
 0x3a1   : > { %8776 = vmatpush1.bf16.msra.mxu1 %v8775_v53  ;;  %8266 = vmatprep.subr.bf16.mxu0 %v8265_v54  ;;  %v1572_v53 = vld [vmem:[%s9826_s30 + $0x26b0] sm:$0xff]  ;;  %v8797_v54 = vpack.c.bf16 %v1581_v47, %v1573_v46  ;;  %v8287_v60 = vpack.c.bf16 %v1578_v52, %v1570_v51  ;;  %v8305_v47 = vpack.c.bf16 %v1659_v41, %v1651_v40  ;;  %v1722_v40 = vld [vmem:[%s9826_s30 + $0x2b60] sm:$0xff] }
 0x3a2   : > { %8778 = vmatprep.subr.bf16.mxu1 %v8777_v58  ;;  %v1589_v58 = vld [vmem:[%s9826_s30 + $0x2738] sm:$0xff]  ;;  %v8799_v61 = vpack.c.bf16 %v1580_v55, %v1572_v53  ;;  %v8817_v51 = vpack.c.bf16 %v1661_v44, %v1653_v43  ;;  %v1660_v52 = vld [vmem:[%s9826_s30 + $0x2970] sm:$0xff]  ;;  %v1667_v53 = vld [vmem:[%s9826_s30 + $0x29a8] sm:$0xff] }
 0x3a3   : > { %v9379_v55 = vld [vmem:[%s9940_s3 + $0x4c8] sm:$0xff]  ;;  %v1716_v41 = vld [vmem:[%s9826_s30 + $0x2b30] sm:$0xff] }
 0x3a4   : > { %8268 = vmatpush1.bf16.msra.mxu0 %v8267_v0  ;;  %v1594_v0 = vld [vmem:[%s9826_s30 + $0x2760] sm:$0xff]  ;;  %v1724_v43 = vld [vmem:[%s9826_s30 + $0x2b70] sm:$0xff]  ;;  %v1731_v44 = vld [vmem:[%s9826_s30 + $0x2ba8] sm:$0xff] }
 0x3a5   : > { %8780 = vmatpush1.bf16.msra.mxu1 %v8779_v1  ;;  %8270 = vmatprep.subr.bf16.mxu0 %v8269_v2  ;;  %v1588_v1 = vld [vmem:[%s9826_s30 + $0x2730] sm:$0xff]  ;;  %v8801_v2 = vpack.c.bf16 %v1597_v59, %v1589_v58  ;;  %v8291_v8 = vpack.c.bf16 %v1594_v0, %v1586_v63  ;;  %v9380_v58 = vld [vmem:[%s9940_s3 + $0x4c0] sm:$0xff] }
 0x3a6   : > { %8782 = vmatprep.subr.bf16.mxu1 %v8781_v6  ;;  %v1605_v6 = vld [vmem:[%s9826_s30 + $0x27b8] sm:$0xff]  ;;  %v8803_v9 = vpack.c.bf16 %v1596_v3, %v1588_v1  ;;  %v1674_v63 = vld [vmem:[%s9826_s30 + $0x29e0] sm:$0xff]  ;;  %v1668_v0 = vld [vmem:[%s9826_s30 + $0x29b0] sm:$0xff]  ;;  %v8821_v1 = vpack.c.bf16 %v1677_v57, %v1669_v56 }
 0x3a7   : > { %v1683_v3 = vld [vmem:[%s9826_s30 + $0x2a28] sm:$0xff] }
 0x3a8   : > { %8272 = vmatpush1.bf16.msra.mxu0 %v8271_v12  ;;  %v1610_v12 = vld [vmem:[%s9826_s30 + $0x27e0] sm:$0xff]  ;;  %v1747_v56 = vld [vmem:[%s9826_s30 + $0x2c28] sm:$0xff] }
 0x3a9   : > { %8784 = vmatpush1.bf16.msra.mxu1 %v8783_v13  ;;  %8274 = vmatprep.subr.bf16.mxu0 %v8273_v14  ;;  %v1604_v13 = vld [vmem:[%s9826_s30 + $0x27b0] sm:$0xff]  ;;  %v8805_v14 = vpack.c.bf16 %v1613_v7, %v1605_v6  ;;  %v8295_v20 = vpack.c.bf16 %v1610_v12, %v1602_v11  ;;  %v1685_v6 = vld [vmem:[%s9826_s30 + $0x2a38] sm:$0xff]  ;;  %v8313_v11 = vpack.c.bf16 %v1691_v4, %v1683_v3  ;;  %v1682_v12 = vld [vmem:[%s9826_s30 + $0x2a20] sm:$0xff] }
 0x3aa   : > { %8786 = vmatprep.subr.bf16.mxu1 %v8785_v18  ;;  %v1621_v18 = vld [vmem:[%s9826_s30 + $0x2838] sm:$0xff]  ;;  %v8807_v21 = vpack.c.bf16 %v1612_v15, %v1604_v13  ;;  %v1690_v13 = vld [vmem:[%s9826_s30 + $0x2a60] sm:$0xff]  ;;  %v1755_v57 = vld [vmem:[%s9826_s30 + $0x2c68] sm:$0xff] }
 0x3ab   : > { %v1693_v7 = vld [vmem:[%s9826_s30 + $0x2a78] sm:$0xff]  ;;  %v1756_v3 = vld [vmem:[%s9826_s30 + $0x2c70] sm:$0xff]  ;;  %v1763_v4 = vld [vmem:[%s9826_s30 + $0x2ca8] sm:$0xff] }
 0x3ac   : > { %8276 = vmatpush1.bf16.msra.mxu0 %v8275_v24  ;;  %v1626_v24 = vld [vmem:[%s9826_s30 + $0x2860] sm:$0xff]  ;;  %v8825_v15 = vpack.c.bf16 %v1693_v7, %v1685_v6  ;;  %v1765_v6 = vld [vmem:[%s9826_s30 + $0x2cb8] sm:$0xff] }
 0x3ad   : > { %8788 = vmatpush1.bf16.msra.mxu1 %v8787_v25  ;;  %8278 = vmatprep.subr.bf16.mxu0 %v8277_v26  ;;  %v1620_v25 = vld [vmem:[%s9826_s30 + $0x2830] sm:$0xff]  ;;  %v8809_v26 = vpack.c.bf16 %v1629_v19, %v1621_v18  ;;  %v8299_v32 = vpack.c.bf16 %v1626_v24, %v1618_v23  ;;  %v1707_v18 = vld [vmem:[%s9826_s30 + $0x2ae8] sm:$0xff]  ;;  %v8315_v23 = vpack.c.bf16 %v1690_v13, %v1682_v12  ;;  %v1773_v7 = vld [vmem:[%s9826_s30 + $0x2cf8] sm:$0xff] }
 0x3ae   : > { %8790 = vmatprep.subr.bf16.mxu1 %v8789_v30  ;;  %v1637_v30 = vld [vmem:[%s9826_s30 + $0x28b8] sm:$0xff]  ;;  %v8811_v33 = vpack.c.bf16 %v1628_v27, %v1620_v25  ;;  %v9383_v19 = vld [vmem:[%s9940_s3 + $0xdc8] sm:$0xff]  ;;  %v8317_v25 = vpack.c.bf16 %v1707_v18, %v1699_v17  ;;  %v1706_v27 = vld [vmem:[%s9826_s30 + $0x2ae0] sm:$0xff] }
 0x3af   : > { %v1770_v12 = vld [vmem:[%s9826_s30 + $0x2ce0] sm:$0xff]  ;;  %v1764_v13 = vld [vmem:[%s9826_s30 + $0x2cb0] sm:$0xff]  ;;  %v1787_v17 = vld [vmem:[%s9826_s30 + $0x2d68] sm:$0xff] }
 0x3b0   : > { %8280 = vmatpush1.bf16.msra.mxu0 %v8279_v36  ;;  %v1642_v36 = vld [vmem:[%s9826_s30 + $0x28e0] sm:$0xff]  ;;  %v1781_v18 = vld [vmem:[%s9826_s30 + $0x2d38] sm:$0xff] }
 0x3b1   : > { %8792 = vmatpush1.bf16.msra.mxu1 %v8791_v37  ;;  %8282 = vmatprep.subr.bf16.mxu0 %v8281_v38  ;;  %v1636_v37 = vld [vmem:[%s9826_s30 + $0x28b0] sm:$0xff]  ;;  %v8813_v38 = vpack.c.bf16 %v1645_v31, %v1637_v30  ;;  %v8303_v45 = vpack.c.bf16 %v1642_v36, %v1634_v35  ;;  %v1715_v31 = vld [vmem:[%s9826_s30 + $0x2b28] sm:$0xff]  ;;  %v1725_v35 = vld [vmem:[%s9826_s30 + $0x2b78] sm:$0xff] }
 0x3b2   : > { %8794 = vmatprep.subr.bf16.mxu1 %v8793_v42  ;;  %v9378_v42 = vld [vmem:[%s9940_s3 + $0x40] sm:$0xff]  ;;  %v8815_v46 = vpack.c.bf16 %v1644_v39, %v1636_v37  ;;  %v1708_v30 = vld [vmem:[%s9826_s30 + $0x2af0] sm:$0xff] }
 0x3b3   : > { %v8831_v37 = vpack.c.bf16 %v1708_v30, %v1700_v28  ;;  %v1714_v39 = vld [vmem:[%s9826_s30 + $0x2b20] sm:$0xff]  ;;  %v1795_v28 = vld [vmem:[%s9826_s30 + $0x2da8] sm:$0xff]  ;;  %v1797_v30 = vld [vmem:[%s9826_s30 + $0x2db8] sm:$0xff] }
 0x3b4   : > { %8284 = vmatpush1.bf16.msra.mxu0 %v8283_v48  ;;  %v1650_v48 = vld [vmem:[%s9826_s30 + $0x2920] sm:$0xff] }
 0x3b5   : > { %8796 = vmatpush1.bf16.msra.mxu1 %v8795_v49  ;;  %8286 = vmatprep.subr.bf16.mxu0 %v8285_v50  ;;  %v1658_v49 = vld [vmem:[%s9826_s30 + $0x2960] sm:$0xff]  ;;  %v1652_v50 = vld [vmem:[%s9826_s30 + $0x2930] sm:$0xff] }
 0x3b6   : > { %8798 = vmatprep.subr.bf16.mxu1 %v8797_v54  ;;  %v1675_v54 = vld [vmem:[%s9826_s30 + $0x29e8] sm:$0xff]  ;;  %v8307_v59 = vpack.c.bf16 %v1658_v49, %v1650_v48  ;;  %v8323_v48 = vpack.c.bf16 %v1722_v40, %v1714_v39  ;;  %v8835_v49 = vpack.c.bf16 %v1724_v43, %v1716_v41  ;;  %v1804_v39 = vld [vmem:[%s9826_s30 + $0x2df0] sm:$0xff]  ;;  %v1821_v43 = vld [vmem:[%s9826_s30 + $0x2e78] sm:$0xff] }
 0x3b7   : > { %v1811_v40 = vld [vmem:[%s9826_s30 + $0x2e28] sm:$0xff] }
 0x3b8   : > { %8288 = vmatpush1.bf16.msra.mxu0 %v8287_v60  ;;  %v8819_v60 = vpack.c.bf16 %v1660_v52, %v1652_v50  ;;  %v1738_v52 = vld [vmem:[%s9826_s30 + $0x2be0] sm:$0xff]  ;;  %v1819_v41 = vld [vmem:[%s9826_s30 + $0x2e68] sm:$0xff] }
 0x3b9   : > { %8800 = vmatpush1.bf16.msra.mxu1 %v8799_v61  ;;  %8290 = vmatprep.subr.bf16.mxu0 %v8289_v62  ;;  %v8309_v61 = vpack.c.bf16 %v1675_v54, %v1667_v53  ;;  %v1666_v62 = vld [vmem:[%s9826_s30 + $0x29a0] sm:$0xff]  ;;  %v1732_v53 = vld [vmem:[%s9826_s30 + $0x2bb0] sm:$0xff] }
 0x3ba   : > { %8802 = vmatprep.subr.bf16.mxu1 %v8801_v2  ;;  %v1676_v2 = vld [vmem:[%s9826_s30 + $0x29f0] sm:$0xff] }
 0x3bc   : > { %8292 = vmatpush1.bf16.msra.mxu0 %v8291_v8  ;;  %v9382_v8 = vld [vmem:[%s9940_s3 + $0x940] sm:$0xff] }
 0x3bd   : > { %8804 = vmatpush1.bf16.msra.mxu1 %v8803_v9  ;;  %8294 = vmatprep.subr.bf16.mxu0 %v8293_v10  ;;  %v8311_v9 = vpack.c.bf16 %v1674_v63, %v1666_v62  ;;  %v8823_v10 = vpack.c.bf16 %v1676_v2, %v1668_v0  ;;  %v8329_v62 = vpack.c.bf16 %v1755_v57, %v1747_v56  ;;  %v1746_v63 = vld [vmem:[%s9826_s30 + $0x2c20] sm:$0xff] }
 0x3be   : > { %8806 = vmatprep.subr.bf16.mxu1 %v8805_v14  ;;  %v1684_v14 = vld [vmem:[%s9826_s30 + $0x2a30] sm:$0xff]  ;;  %v1754_v0 = vld [vmem:[%s9826_s30 + $0x2c60] sm:$0xff] }
 0x3bf   : > { %v8827_v24 = vpack.c.bf16 %v1692_v16, %v1684_v14  ;;  %v8845_v14 = vpack.c.bf16 %v1773_v7, %v1765_v6  ;;  %v1779_v16 = vld [vmem:[%s9826_s30 + $0x2d28] sm:$0xff]  ;;  %v1842_v7 = vld [vmem:[%s9826_s30 + $0x2f20] sm:$0xff] }
 0x3c0   : > { %8296 = vmatpush1.bf16.msra.mxu0 %v8295_v20  ;;  %v1701_v20 = vld [vmem:[%s9826_s30 + $0x2ab8] sm:$0xff] }
 0x3c1   : > { %8808 = vmatpush1.bf16.msra.mxu1 %v8807_v21  ;;  %8298 = vmatprep.subr.bf16.mxu0 %v8297_v22  ;;  %v1709_v21 = vld [vmem:[%s9826_s30 + $0x2af8] sm:$0xff]  ;;  %v9384_v22 = vld [vmem:[%s9940_s3 + $0xdc0] sm:$0xff] }
 0x3c2   : > { %8810 = vmatprep.subr.bf16.mxu1 %v8809_v26  ;;  %v1698_v26 = vld [vmem:[%s9826_s30 + $0x2aa0] sm:$0xff]  ;;  %v8829_v29 = vpack.c.bf16 %v1709_v21, %v1701_v20 }
 0x3c3   : > { %4227 = vmatmul.mubr.f32.vlgmr.msra.gmra.mrb[8].mxu0 %v9378_v42  ;;  %v8319_v36 = vpack.c.bf16 %v1706_v27, %v1698_v26  ;;  %v1788_v27 = vld [vmem:[%s9826_s30 + $0x2d70] sm:$0xff] }
 0x3c4   : > { %8300 = vmatpush1.bf16.msra.mxu0 %v8299_v32  ;;  %4939 = vmatmul.mubr.f32.vlgmr.msra.gmra.mrb[8].mxu1 %v9378_v42  ;;  %v1723_v32 = vld [vmem:[%s9826_s30 + $0x2b68] sm:$0xff] }
 0x3c5   : > { %8812 = vmatpush1.bf16.msra.mxu1 %v8811_v33  ;;  %8302 = vmatprep.subr.bf16.mxu0 %v8301_v34  ;;  %v9385_v33 = vld [vmem:[%s9940_s3 + $0x58] sm:$0xff] }
 0x3c6   : > { %8814 = vmatprep.subr.bf16.mxu1 %v8813_v38  ;;  %4232 = vmatprep.mubr.f32.mxu0 %v9379_v55  ;;  %v1717_v34 = vld [vmem:[%s9826_s30 + $0x2b38] sm:$0xff]  ;;  %v8321_v38 = vpack.c.bf16 %v1723_v32, %v1715_v31 }
 0x3c7   : > { %4944 = vmatprep.mubr.f32.mxu1 %v9379_v55  ;;  %4233 = vmatmul.mubr.f32.gmra.mrb[10].mxu0 %v9380_v58  ;;  %v8833_v42 = vpack.c.bf16 %v1725_v35, %v1717_v34  ;;  %v1740_v55 = vld [vmem:[%s9826_s30 + $0x2bf0] sm:$0xff]  ;;  %v1805_v31 = vld [vmem:[%s9826_s30 + $0x2df8] sm:$0xff]  ;;  %v1794_v35 = vld [vmem:[%s9826_s30 + $0x2da0] sm:$0xff] }
 0x3c8   : > { %8304 = vmatpush1.bf16.msra.mxu0 %v8303_v45  ;;  %4945 = vmatmul.mubr.f32.gmra.mrb[10].mxu1 %v9380_v58  ;;  %v1739_v45 = vld [vmem:[%s9826_s30 + $0x2be8] sm:$0xff]  ;;  %v1749_v58 = vld [vmem:[%s9826_s30 + $0x2c38] sm:$0xff] }
 0x3c9   : > { %8816 = vmatpush1.bf16.msra.mxu1 %v8815_v46  ;;  %8306 = vmatprep.subr.bf16.mxu0 %v8305_v47  ;;  %v1733_v46 = vld [vmem:[%s9826_s30 + $0x2bb8] sm:$0xff]  ;;  %v8325_v50 = vpack.c.bf16 %v1739_v45, %v1731_v44 }
 0x3ca   : > { %8818 = vmatprep.subr.bf16.mxu1 %v8817_v51  ;;  %4238 = vmatprep.mubr.f32.mxu0 %v9381_v5  ;;  %v1741_v47 = vld [vmem:[%s9826_s30 + $0x2bf8] sm:$0xff]  ;;  %v1730_v51 = vld [vmem:[%s9826_s30 + $0x2ba0] sm:$0xff] }
 0x3cb   : > { %4950 = vmatprep.mubr.f32.mxu1 %v9381_v5  ;;  %4239 = vmatmul.mubr.f32.gmra.mrb[12].mxu0 %v9382_v8  ;;  %v8837_v54 = vpack.c.bf16 %v1741_v47, %v1733_v46  ;;  %v1771_v5 = vld [vmem:[%s9826_s30 + $0x2ce8] sm:$0xff]  ;;  %v8345_v46 = vpack.c.bf16 %v1819_v41, %v1811_v40  ;;  %v1810_v47 = vld [vmem:[%s9826_s30 + $0x2e20] sm:$0xff] }
 0x3cc   : > { %8308 = vmatpush1.bf16.msra.mxu0 %v8307_v59  ;;  %4951 = vmatmul.mubr.f32.gmra.mrb[12].mxu1 %v9382_v8  ;;  %v1757_v59 = vld [vmem:[%s9826_s30 + $0x2c78] sm:$0xff]  ;;  %v8331_v8 = vpack.c.bf16 %v1754_v0, %v1746_v63  ;;  %v1836_v63 = vld [vmem:[%s9826_s30 + $0x2ef0] sm:$0xff]  ;;  %v1843_v0 = vld [vmem:[%s9826_s30 + $0x2f28] sm:$0xff] }
 0x3cd   : > { %8820 = vmatpush1.bf16.msra.mxu1 %v8819_v60  ;;  %8310 = vmatprep.subr.bf16.mxu0 %v8309_v61  ;;  %v8327_v60 = vpack.c.bf16 %v1738_v52, %v1730_v51  ;;  %v8839_v61 = vpack.c.bf16 %v1740_v55, %v1732_v53  ;;  %v8841_v2 = vpack.c.bf16 %v1757_v59, %v1749_v58  ;;  %v1820_v51 = vld [vmem:[%s9826_s30 + $0x2e70] sm:$0xff]  ;;  %v1827_v52 = vld [vmem:[%s9826_s30 + $0x2ea8] sm:$0xff]  ;;  %v1837_v55 = vld [vmem:[%s9826_s30 + $0x2ef8] sm:$0xff] }
 0x3ce   : > { %8822 = vmatprep.subr.bf16.mxu1 %v8821_v1  ;;  %4244 = vmatprep.mubr.f32.mxu0 %v9383_v19  ;;  %v1748_v1 = vld [vmem:[%s9826_s30 + $0x2c30] sm:$0xff]  ;;  %v1835_v53 = vld [vmem:[%s9826_s30 + $0x2ee8] sm:$0xff]  ;;  %v1826_v59 = vld [vmem:[%s9826_s30 + $0x2ea0] sm:$0xff] }
 0x3cf   : > { %4956 = vmatprep.mubr.f32.mxu1 %v9383_v19  ;;  %4245 = vmatmul.mubr.f32.gmra.mrb[14].mxu0 %v9384_v22  ;;  %v1789_v19 = vld [vmem:[%s9826_s30 + $0x2d78] sm:$0xff]  ;;  %v8349_v58 = vpack.c.bf16 %v1835_v53, %v1827_v52 }
 0x3d0   : > { %8312 = vmatpush1.bf16.msra.mxu0 %v8311_v9  ;;  %4957 = vmatmul.mubr.f32.gmra.mrb[14].mxu1 %v9384_v22  ;;  %v8843_v9 = vpack.c.bf16 %v1756_v3, %v1748_v1  ;;  %v8337_v22 = vpack.c.bf16 %v1787_v17, %v1779_v16  ;;  %v8849_v26 = vpack.c.bf16 %v1789_v19, %v1781_v18  ;;  %v1851_v1 = vld [vmem:[%s9826_s30 + $0x2f68] sm:$0xff]  ;;  %v1853_v3 = vld [vmem:[%s9826_s30 + $0x2f78] sm:$0xff]  ;;  %v1858_v19 = vld [vmem:[%s9826_s30 + $0x2fa0] sm:$0xff] }
 0x3d1   : > { %8824 = vmatpush1.bf16.msra.mxu1 %v8823_v10  ;;  %8314 = vmatprep.subr.bf16.mxu0 %v8313_v11  ;;  %v8333_v10 = vpack.c.bf16 %v1771_v5, %v1763_v4  ;;  %v1762_v11 = vld [vmem:[%s9826_s30 + $0x2ca0] sm:$0xff]  ;;  %v8353_v6 = vpack.c.bf16 %v1851_v1, %v1843_v0  ;;  %v1917_v52 = vld [vmem:[%s9826_s30 + $0x3178] sm:$0xff] }
 0x3d2   : > { %8826 = vmatprep.subr.bf16.mxu1 %v8825_v15  ;;  %4315 = vmatprep.mubr.f32.mxu0 %v9385_v33  ;;  %v1772_v15 = vld [vmem:[%s9826_s30 + $0x2cf0] sm:$0xff]  ;;  %v8335_v20 = vpack.c.bf16 %v1770_v12, %v1762_v11  ;;  %v1859_v12 = vld [vmem:[%s9826_s30 + $0x2fa8] sm:$0xff]  ;;  %v1925_v0 = vld [vmem:[%s9826_s30 + $0x31b8] sm:$0xff] }
 0x3d3   : > { %5027 = vmatprep.mubr.f32.mxu1 %v9385_v33  ;;  %v8847_v21 = vpack.c.bf16 %v1772_v15, %v1764_v13  ;;  %v1852_v11 = vld [vmem:[%s9826_s30 + $0x2f70] sm:$0xff]  ;;  %v1867_v13 = vld [vmem:[%s9826_s30 + $0x2fe8] sm:$0xff]  ;;  %v1869_v15 = vld [vmem:[%s9826_s30 + $0x2ff8] sm:$0xff] }
 0x3d4   : > { %8316 = vmatpush1.bf16.msra.mxu0 %v8315_v23  ;;  %v1778_v23 = vld [vmem:[%s9826_s30 + $0x2d20] sm:$0xff]  ;;  %v8357_v18 = vpack.c.bf16 %v1867_v13, %v1859_v12  ;;  %v1933_v1 = vld [vmem:[%s9826_s30 + $0x31f8] sm:$0xff]  ;;  %v1947_v12 = vld [vmem:[%s9826_s30 + $0x3268] sm:$0xff] }
 0x3d5   : > { %8828 = vmatpush1.bf16.msra.mxu1 %v8827_v24  ;;  %8318 = vmatprep.subr.bf16.mxu0 %v8317_v25  ;;  %v1786_v24 = vld [vmem:[%s9826_s30 + $0x2d60] sm:$0xff]  ;;  %v1780_v25 = vld [vmem:[%s9826_s30 + $0x2d30] sm:$0xff]  ;;  %v9389_v13 = vld [vmem:[%s9940_s3 + $0x958] sm:$0xff] }
 0x3d6   : > { %8830 = vmatprep.subr.bf16.mxu1 %v8829_v29  ;;  %v1803_v29 = vld [vmem:[%s9826_s30 + $0x2de8] sm:$0xff]  ;;  %v8339_v32 = vpack.c.bf16 %v1786_v24, %v1778_v23  ;;  %v8851_v33 = vpack.c.bf16 %v1788_v27, %v1780_v25  ;;  %v1868_v23 = vld [vmem:[%s9826_s30 + $0x2ff0] sm:$0xff]  ;;  %v1885_v27 = vld [vmem:[%s9826_s30 + $0x3078] sm:$0xff] }
 0x3d7   : > { %v8341_v34 = vpack.c.bf16 %v1803_v29, %v1795_v28  ;;  %v1875_v24 = vld [vmem:[%s9826_s30 + $0x3028] sm:$0xff] }
 0x3d8   : > { %8320 = vmatpush1.bf16.msra.mxu0 %v8319_v36  ;;  %v1802_v36 = vld [vmem:[%s9826_s30 + $0x2de0] sm:$0xff]  ;;  %v1883_v25 = vld [vmem:[%s9826_s30 + $0x3068] sm:$0xff] }
 0x3d9   : > { %8832 = vmatpush1.bf16.msra.mxu1 %v8831_v37  ;;  %8322 = vmatprep.subr.bf16.mxu0 %v8321_v38  ;;  %v1796_v37 = vld [vmem:[%s9826_s30 + $0x2db0] sm:$0xff]  ;;  %v8853_v38 = vpack.c.bf16 %v1805_v31, %v1797_v30  ;;  %v8343_v44 = vpack.c.bf16 %v1802_v36, %v1794_v35  ;;  %v8361_v30 = vpack.c.bf16 %v1883_v25, %v1875_v24  ;;  %v1874_v31 = vld [vmem:[%s9826_s30 + $0x3020] sm:$0xff]  ;;  %v1891_v36 = vld [vmem:[%s9826_s30 + $0x30a8] sm:$0xff] }
 0x3da   : > { %8834 = vmatprep.subr.bf16.mxu1 %v8833_v42  ;;  %v1813_v42 = vld [vmem:[%s9826_s30 + $0x2e38] sm:$0xff]  ;;  %v8855_v45 = vpack.c.bf16 %v1804_v39, %v1796_v37  ;;  %v1884_v35 = vld [vmem:[%s9826_s30 + $0x3070] sm:$0xff]  ;;  %v1899_v37 = vld [vmem:[%s9826_s30 + $0x30e8] sm:$0xff] }
 0x3db   : > { %v1901_v39 = vld [vmem:[%s9826_s30 + $0x30f8] sm:$0xff]  ;;  %v1948_v24 = vld [vmem:[%s9826_s30 + $0x3270] sm:$0xff]  ;;  %v1955_v25 = vld [vmem:[%s9826_s30 + $0x32a8] sm:$0xff] }
 0x3dc   : > { %8324 = vmatpush1.bf16.msra.mxu0 %v8323_v48  ;;  %v1818_v48 = vld [vmem:[%s9826_s30 + $0x2e60] sm:$0xff] }
 0x3dd   : > { %8836 = vmatpush1.bf16.msra.mxu1 %v8835_v49  ;;  %8326 = vmatprep.subr.bf16.mxu0 %v8325_v50  ;;  %v1812_v49 = vld [vmem:[%s9826_s30 + $0x2e30] sm:$0xff]  ;;  %v8857_v50 = vpack.c.bf16 %v1821_v43, %v1813_v42  ;;  %v8347_v56 = vpack.c.bf16 %v1818_v48, %v1810_v47  ;;  %v8365_v42 = vpack.c.bf16 %v1899_v37, %v1891_v36  ;;  %v1890_v43 = vld [vmem:[%s9826_s30 + $0x30a0] sm:$0xff]  ;;  %v1907_v48 = vld [vmem:[%s9826_s30 + $0x3128] sm:$0xff] }
 0x3de   : > { %8838 = vmatprep.subr.bf16.mxu1 %v8837_v54  ;;  %v1829_v54 = vld [vmem:[%s9826_s30 + $0x2eb8] sm:$0xff]  ;;  %v8859_v57 = vpack.c.bf16 %v1820_v51, %v1812_v49  ;;  %v1900_v47 = vld [vmem:[%s9826_s30 + $0x30f0] sm:$0xff]  ;;  %v1915_v49 = vld [vmem:[%s9826_s30 + $0x3168] sm:$0xff] }
 0x3df   : > { %v1909_v51 = vld [vmem:[%s9826_s30 + $0x3138] sm:$0xff]  ;;  %v1956_v36 = vld [vmem:[%s9826_s30 + $0x32b0] sm:$0xff] }
 0x3e0   : > { %8328 = vmatpush1.bf16.msra.mxu0 %v8327_v60  ;;  %v1834_v60 = vld [vmem:[%s9826_s30 + $0x2ee0] sm:$0xff] }
 0x3e1   : > { %8840 = vmatpush1.bf16.msra.mxu1 %v8839_v61  ;;  %8330 = vmatprep.subr.bf16.mxu0 %v8329_v62  ;;  %v1828_v61 = vld [vmem:[%s9826_s30 + $0x2eb0] sm:$0xff]  ;;  %v8861_v62 = vpack.c.bf16 %v1837_v55, %v1829_v54  ;;  %v8351_v4 = vpack.c.bf16 %v1834_v60, %v1826_v59  ;;  %v8369_v55 = vpack.c.bf16 %v1915_v49, %v1907_v48  ;;  %v1978_v48 = vld [vmem:[%s9826_s30 + $0x3360] sm:$0xff] }
 0x3e2   : > { %8842 = vmatprep.subr.bf16.mxu1 %v8841_v2  ;;  %v1845_v2 = vld [vmem:[%s9826_s30 + $0x2f38] sm:$0xff]  ;;  %v8863_v5 = vpack.c.bf16 %v1836_v63, %v1828_v61  ;;  %v8881_v59 = vpack.c.bf16 %v1917_v52, %v1909_v51  ;;  %v1916_v60 = vld [vmem:[%s9826_s30 + $0x3170] sm:$0xff]  ;;  %v1923_v61 = vld [vmem:[%s9826_s30 + $0x31a8] sm:$0xff] }
 0x3e3   : > { %v9387_v63 = vld [vmem:[%s9940_s3 + $0x4d8] sm:$0xff]  ;;  %v1972_v49 = vld [vmem:[%s9826_s30 + $0x3330] sm:$0xff]  ;;  %v1987_v52 = vld [vmem:[%s9826_s30 + $0x33a8] sm:$0xff] }
 0x3e4   : > { %8332 = vmatpush1.bf16.msra.mxu0 %v8331_v8  ;;  %v1850_v8 = vld [vmem:[%s9826_s30 + $0x2f60] sm:$0xff]  ;;  %v1980_v51 = vld [vmem:[%s9826_s30 + $0x3370] sm:$0xff] }
 0x3e5   : > { %8844 = vmatpush1.bf16.msra.mxu1 %v8843_v9  ;;  %8334 = vmatprep.subr.bf16.mxu0 %v8333_v10  ;;  %v1844_v9 = vld [vmem:[%s9826_s30 + $0x2f30] sm:$0xff]  ;;  %v8865_v10 = vpack.c.bf16 %v1853_v3, %v1845_v2  ;;  %v8355_v16 = vpack.c.bf16 %v1850_v8, %v1842_v7  ;;  %v1930_v7 = vld [vmem:[%s9826_s30 + $0x31e0] sm:$0xff] }
 0x3e6   : > { %8846 = vmatprep.subr.bf16.mxu1 %v8845_v14  ;;  %v1861_v14 = vld [vmem:[%s9826_s30 + $0x2fb8] sm:$0xff]  ;;  %v8867_v17 = vpack.c.bf16 %v1852_v11, %v1844_v9  ;;  %v9388_v2 = vld [vmem:[%s9940_s3 + $0x4d0] sm:$0xff]  ;;  %v8885_v9 = vpack.c.bf16 %v1933_v1, %v1925_v0  ;;  %v1939_v11 = vld [vmem:[%s9826_s30 + $0x3228] sm:$0xff] }
 0x3e7   : > { %v1924_v8 = vld [vmem:[%s9826_s30 + $0x31b0] sm:$0xff]  ;;  %v2003_v0 = vld [vmem:[%s9826_s30 + $0x3428] sm:$0xff] }
 0x3e8   : > { %8336 = vmatpush1.bf16.msra.mxu0 %v8335_v20  ;;  %v1866_v20 = vld [vmem:[%s9826_s30 + $0x2fe0] sm:$0xff]  ;;  %v2011_v1 = vld [vmem:[%s9826_s30 + $0x3468] sm:$0xff] }
 0x3e9   : > { %8848 = vmatpush1.bf16.msra.mxu1 %v8847_v21  ;;  %8338 = vmatprep.subr.bf16.mxu0 %v8337_v22  ;;  %v1860_v21 = vld [vmem:[%s9826_s30 + $0x2fb0] sm:$0xff]  ;;  %v8869_v22 = vpack.c.bf16 %v1869_v15, %v1861_v14  ;;  %v8359_v28 = vpack.c.bf16 %v1866_v20, %v1858_v19  ;;  %v1941_v14 = vld [vmem:[%s9826_s30 + $0x3238] sm:$0xff]  ;;  %v8377_v19 = vpack.c.bf16 %v1947_v12, %v1939_v11  ;;  %v1938_v20 = vld [vmem:[%s9826_s30 + $0x3220] sm:$0xff] }
 0x3ea   : > { %8850 = vmatprep.subr.bf16.mxu1 %v8849_v26  ;;  %v1877_v26 = vld [vmem:[%s9826_s30 + $0x3038] sm:$0xff]  ;;  %v8871_v29 = vpack.c.bf16 %v1868_v23, %v1860_v21  ;;  %v1946_v21 = vld [vmem:[%s9826_s30 + $0x3260] sm:$0xff]  ;;  %v2012_v11 = vld [vmem:[%s9826_s30 + $0x3470] sm:$0xff] }
 0x3eb   : > { %v1949_v15 = vld [vmem:[%s9826_s30 + $0x3278] sm:$0xff]  ;;  %v2019_v12 = vld [vmem:[%s9826_s30 + $0x34a8] sm:$0xff] }
 0x3ec   : > { %8340 = vmatpush1.bf16.msra.mxu0 %v8339_v32  ;;  %v1882_v32 = vld [vmem:[%s9826_s30 + $0x3060] sm:$0xff]  ;;  %v8889_v23 = vpack.c.bf16 %v1949_v15, %v1941_v14  ;;  %v2021_v14 = vld [vmem:[%s9826_s30 + $0x34b8] sm:$0xff] }
 0x3ed   : > { %8852 = vmatpush1.bf16.msra.mxu1 %v8851_v33  ;;  %8342 = vmatprep.subr.bf16.mxu0 %v8341_v34  ;;  %v1876_v33 = vld [vmem:[%s9826_s30 + $0x3030] sm:$0xff]  ;;  %v8873_v34 = vpack.c.bf16 %v1885_v27, %v1877_v26  ;;  %v8363_v40 = vpack.c.bf16 %v1882_v32, %v1874_v31  ;;  %v1963_v26 = vld [vmem:[%s9826_s30 + $0x32e8] sm:$0xff]  ;;  %v9391_v27 = vld [vmem:[%s9940_s3 + $0xdd8] sm:$0xff]  ;;  %v8379_v31 = vpack.c.bf16 %v1946_v21, %v1938_v20 }
 0x3ee   : > { %8854 = vmatprep.subr.bf16.mxu1 %v8853_v38  ;;  %v1893_v38 = vld [vmem:[%s9826_s30 + $0x30b8] sm:$0xff]  ;;  %v8875_v41 = vpack.c.bf16 %v1884_v35, %v1876_v33  ;;  %v8381_v33 = vpack.c.bf16 %v1963_v26, %v1955_v25  ;;  %v1962_v35 = vld [vmem:[%s9826_s30 + $0x32e0] sm:$0xff]  ;;  %v2020_v21 = vld [vmem:[%s9826_s30 + $0x34b0] sm:$0xff] }
 0x3ef   : > { %v2029_v15 = vld [vmem:[%s9826_s30 + $0x34f8] sm:$0xff]  ;;  %v2026_v20 = vld [vmem:[%s9826_s30 + $0x34e0] sm:$0xff]  ;;  %v2043_v25 = vld [vmem:[%s9826_s30 + $0x3568] sm:$0xff] }
 0x3f0   : > { %8344 = vmatpush1.bf16.msra.mxu0 %v8343_v44  ;;  %v1898_v44 = vld [vmem:[%s9826_s30 + $0x30e0] sm:$0xff]  ;;  %v2037_v26 = vld [vmem:[%s9826_s30 + $0x3538] sm:$0xff] }
 0x3f1   : > { %8856 = vmatpush1.bf16.msra.mxu1 %v8855_v45  ;;  %8346 = vmatprep.subr.bf16.mxu0 %v8345_v46  ;;  %v1892_v45 = vld [vmem:[%s9826_s30 + $0x30b0] sm:$0xff]  ;;  %v8877_v46 = vpack.c.bf16 %v1901_v39, %v1893_v38  ;;  %v8367_v53 = vpack.c.bf16 %v1898_v44, %v1890_v43  ;;  %v1971_v39 = vld [vmem:[%s9826_s30 + $0x3328] sm:$0xff]  ;;  %v1981_v43 = vld [vmem:[%s9826_s30 + $0x3378] sm:$0xff] }
 0x3f2   : > { %8858 = vmatprep.subr.bf16.mxu1 %v8857_v50  ;;  %v9386_v50 = vld [vmem:[%s9940_s3 + $0x50] sm:$0xff]  ;;  %v8879_v54 = vpack.c.bf16 %v1900_v47, %v1892_v45  ;;  %v1970_v47 = vld [vmem:[%s9826_s30 + $0x3320] sm:$0xff] }
 0x3f3   : > { %v1964_v38 = vld [vmem:[%s9826_s30 + $0x32f0] sm:$0xff] }
 0x3f4   : > { %8348 = vmatpush1.bf16.msra.mxu0 %v8347_v56  ;;  %v1906_v56 = vld [vmem:[%s9826_s30 + $0x3120] sm:$0xff]  ;;  %v8895_v45 = vpack.c.bf16 %v1964_v38, %v1956_v36  ;;  %v2051_v36 = vld [vmem:[%s9826_s30 + $0x35a8] sm:$0xff]  ;;  %v2053_v38 = vld [vmem:[%s9826_s30 + $0x35b8] sm:$0xff] }
 0x3f5   : > { %8860 = vmatpush1.bf16.msra.mxu1 %v8859_v57  ;;  %8350 = vmatprep.subr.bf16.mxu0 %v8349_v58  ;;  %v1914_v57 = vld [vmem:[%s9826_s30 + $0x3160] sm:$0xff]  ;;  %v1908_v58 = vld [vmem:[%s9826_s30 + $0x3130] sm:$0xff] }
 0x3f6   : > { %8862 = vmatprep.subr.bf16.mxu1 %v8861_v62  ;;  %v1931_v62 = vld [vmem:[%s9826_s30 + $0x31e8] sm:$0xff]  ;;  %v8371_v3 = vpack.c.bf16 %v1914_v57, %v1906_v56  ;;  %v8387_v56 = vpack.c.bf16 %v1978_v48, %v1970_v47  ;;  %v8899_v57 = vpack.c.bf16 %v1980_v51, %v1972_v49  ;;  %v2060_v47 = vld [vmem:[%s9826_s30 + $0x35f0] sm:$0xff]  ;;  %v2077_v51 = vld [vmem:[%s9826_s30 + $0x3678] sm:$0xff] }
 0x3f7   : > { %v2067_v48 = vld [vmem:[%s9826_s30 + $0x3628] sm:$0xff] }
 0x3f8   : > { %8352 = vmatpush1.bf16.msra.mxu0 %v8351_v4  ;;  %v8883_v4 = vpack.c.bf16 %v1916_v60, %v1908_v58  ;;  %v1994_v60 = vld [vmem:[%s9826_s30 + $0x33e0] sm:$0xff]  ;;  %v2075_v49 = vld [vmem:[%s9826_s30 + $0x3668] sm:$0xff] }
 0x3f9   : > { %8864 = vmatpush1.bf16.msra.mxu1 %v8863_v5  ;;  %8354 = vmatprep.subr.bf16.mxu0 %v8353_v6  ;;  %v8373_v5 = vpack.c.bf16 %v1931_v62, %v1923_v61  ;;  %v1922_v6 = vld [vmem:[%s9826_s30 + $0x31a0] sm:$0xff]  ;;  %v1988_v61 = vld [vmem:[%s9826_s30 + $0x33b0] sm:$0xff] }
 0x3fa   : > { %8866 = vmatprep.subr.bf16.mxu1 %v8865_v10  ;;  %v1932_v10 = vld [vmem:[%s9826_s30 + $0x31f0] sm:$0xff] }
 0x3fc   : > { %8356 = vmatpush1.bf16.msra.mxu0 %v8355_v16  ;;  %v9390_v16 = vld [vmem:[%s9940_s3 + $0x950] sm:$0xff] }
 0x3fd   : > { %8868 = vmatpush1.bf16.msra.mxu1 %v8867_v17  ;;  %8358 = vmatprep.subr.bf16.mxu0 %v8357_v18  ;;  %v8375_v17 = vpack.c.bf16 %v1930_v7, %v1922_v6  ;;  %v8887_v18 = vpack.c.bf16 %v1932_v10, %v1924_v8  ;;  %v8393_v6 = vpack.c.bf16 %v2011_v1, %v2003_v0  ;;  %v2002_v7 = vld [vmem:[%s9826_s30 + $0x3420] sm:$0xff] }
 0x3fe   : > { %8870 = vmatprep.subr.bf16.mxu1 %v8869_v22  ;;  %v1940_v22 = vld [vmem:[%s9826_s30 + $0x3230] sm:$0xff]  ;;  %v2010_v8 = vld [vmem:[%s9826_s30 + $0x3460] sm:$0xff] }
 0x3ff   : > { %v8891_v32 = vpack.c.bf16 %v1948_v24, %v1940_v22  ;;  %v8909_v22 = vpack.c.bf16 %v2029_v15, %v2021_v14  ;;  %v2035_v24 = vld [vmem:[%s9826_s30 + $0x3528] sm:$0xff]  ;;  %v2098_v15 = vld [vmem:[%s9826_s30 + $0x3720] sm:$0xff] }
 0x400   : > { %8360 = vmatpush1.bf16.msra.mxu0 %v8359_v28  ;;  %v1957_v28 = vld [vmem:[%s9826_s30 + $0x32b8] sm:$0xff] }
 0x401   : > { %8872 = vmatpush1.bf16.msra.mxu1 %v8871_v29  ;;  %8362 = vmatprep.subr.bf16.mxu0 %v8361_v30  ;;  %v1965_v29 = vld [vmem:[%s9826_s30 + $0x32f8] sm:$0xff]  ;;  %v9392_v30 = vld [vmem:[%s9940_s3 + $0xdd0] sm:$0xff] }
 0x402   : > { %8874 = vmatprep.subr.bf16.mxu1 %v8873_v34  ;;  %v1954_v34 = vld [vmem:[%s9826_s30 + $0x32a0] sm:$0xff]  ;;  %v8893_v37 = vpack.c.bf16 %v1965_v29, %v1957_v28 }
 0x403   : > { %4316 = vmatmul.mubr.f32.vlgmr.msra.gmra.mrb[8].mxu0 %v9386_v50  ;;  %v8383_v44 = vpack.c.bf16 %v1962_v35, %v1954_v34  ;;  %v2044_v35 = vld [vmem:[%s9826_s30 + $0x3570] sm:$0xff] }
 0x404   : > { %8364 = vmatpush1.bf16.msra.mxu0 %v8363_v40  ;;  %5028 = vmatmul.mubr.f32.vlgmr.msra.gmra.mrb[8].mxu1 %v9386_v50  ;;  %v1979_v40 = vld [vmem:[%s9826_s30 + $0x3368] sm:$0xff] }
 0x405   : > { %8876 = vmatpush1.bf16.msra.mxu1 %v8875_v41  ;;  %8366 = vmatprep.subr.bf16.mxu0 %v8365_v42  ;;  %v9393_v41 = vld [vmem:[%s9940_s3 + $0x68] sm:$0xff]  ;;  %v1973_v42 = vld [vmem:[%s9826_s30 + $0x3338] sm:$0xff] }
 0x406   : > { %8878 = vmatprep.subr.bf16.mxu1 %v8877_v46  ;;  %4321 = vmatprep.mubr.f32.mxu0 %v9387_v63  ;;  %v8385_v46 = vpack.c.bf16 %v1979_v40, %v1971_v39  ;;  %v8897_v50 = vpack.c.bf16 %v1981_v43, %v1973_v42  ;;  %v2061_v39 = vld [vmem:[%s9826_s30 + $0x35f8] sm:$0xff]  ;;  %v2050_v43 = vld [vmem:[%s9826_s30 + $0x35a0] sm:$0xff] }
 0x407   : > { %5033 = vmatprep.mubr.f32.mxu1 %v9387_v63  ;;  %4322 = vmatmul.mubr.f32.gmra.mrb[10].mxu0 %v9388_v2  ;;  %v1996_v63 = vld [vmem:[%s9826_s30 + $0x33f0] sm:$0xff] }
 0x408   : > { %8368 = vmatpush1.bf16.msra.mxu0 %v8367_v53  ;;  %5034 = vmatmul.mubr.f32.gmra.mrb[10].mxu1 %v9388_v2  ;;  %v1995_v53 = vld [vmem:[%s9826_s30 + $0x33e8] sm:$0xff]  ;;  %v2005_v2 = vld [vmem:[%s9826_s30 + $0x3438] sm:$0xff] }
 0x409   : > { %8880 = vmatpush1.bf16.msra.mxu1 %v8879_v54  ;;  %8370 = vmatprep.subr.bf16.mxu0 %v8369_v55  ;;  %v1989_v54 = vld [vmem:[%s9826_s30 + $0x33b8] sm:$0xff]  ;;  %v8389_v58 = vpack.c.bf16 %v1995_v53, %v1987_v52 }
 0x40a   : > { %8882 = vmatprep.subr.bf16.mxu1 %v8881_v59  ;;  %4327 = vmatprep.mubr.f32.mxu0 %v9389_v13  ;;  %v1997_v55 = vld [vmem:[%s9826_s30 + $0x33f8] sm:$0xff]  ;;  %v1986_v59 = vld [vmem:[%s9826_s30 + $0x33a0] sm:$0xff] }
 0x40b   : > { %5039 = vmatprep.mubr.f32.mxu1 %v9389_v13  ;;  %4328 = vmatmul.mubr.f32.gmra.mrb[12].mxu0 %v9390_v16  ;;  %v8901_v62 = vpack.c.bf16 %v1997_v55, %v1989_v54  ;;  %v2027_v13 = vld [vmem:[%s9826_s30 + $0x34e8] sm:$0xff]  ;;  %v8409_v54 = vpack.c.bf16 %v2075_v49, %v2067_v48  ;;  %v2066_v55 = vld [vmem:[%s9826_s30 + $0x3620] sm:$0xff] }
 0x40c   : > { %8372 = vmatpush1.bf16.msra.mxu0 %v8371_v3  ;;  %5040 = vmatmul.mubr.f32.gmra.mrb[12].mxu1 %v9390_v16  ;;  %v2013_v3 = vld [vmem:[%s9826_s30 + $0x3478] sm:$0xff]  ;;  %v8395_v16 = vpack.c.bf16 %v2010_v8, %v2002_v7  ;;  %v2092_v7 = vld [vmem:[%s9826_s30 + $0x36f0] sm:$0xff]  ;;  %v2099_v8 = vld [vmem:[%s9826_s30 + $0x3728] sm:$0xff] }
 0x40d   : > { %8884 = vmatpush1.bf16.msra.mxu1 %v8883_v4  ;;  %8374 = vmatprep.subr.bf16.mxu0 %v8373_v5  ;;  %v8391_v4 = vpack.c.bf16 %v1994_v60, %v1986_v59  ;;  %v8903_v5 = vpack.c.bf16 %v1996_v63, %v1988_v61  ;;  %v8905_v10 = vpack.c.bf16 %v2013_v3, %v2005_v2  ;;  %v2076_v59 = vld [vmem:[%s9826_s30 + $0x3670] sm:$0xff]  ;;  %v2083_v60 = vld [vmem:[%s9826_s30 + $0x36a8] sm:$0xff]  ;;  %v2093_v63 = vld [vmem:[%s9826_s30 + $0x36f8] sm:$0xff] }
 0x40e   : > { %8886 = vmatprep.subr.bf16.mxu1 %v8885_v9  ;;  %4333 = vmatprep.mubr.f32.mxu0 %v9391_v27  ;;  %v2004_v9 = vld [vmem:[%s9826_s30 + $0x3430] sm:$0xff]  ;;  %v2091_v61 = vld [vmem:[%s9826_s30 + $0x36e8] sm:$0xff]  ;;  %v2082_v3 = vld [vmem:[%s9826_s30 + $0x36a0] sm:$0xff] }
 0x40f   : > { %5045 = vmatprep.mubr.f32.mxu1 %v9391_v27  ;;  %4334 = vmatmul.mubr.f32.gmra.mrb[14].mxu0 %v9392_v30  ;;  %v2045_v27 = vld [vmem:[%s9826_s30 + $0x3578] sm:$0xff]  ;;  %v8413_v2 = vpack.c.bf16 %v2091_v61, %v2083_v60 }
 0x410   : > { %8376 = vmatpush1.bf16.msra.mxu0 %v8375_v17  ;;  %5046 = vmatmul.mubr.f32.gmra.mrb[14].mxu1 %v9392_v30  ;;  %v8907_v17 = vpack.c.bf16 %v2012_v11, %v2004_v9  ;;  %v8401_v30 = vpack.c.bf16 %v2043_v25, %v2035_v24  ;;  %v8913_v34 = vpack.c.bf16 %v2045_v27, %v2037_v26  ;;  %v2107_v9 = vld [vmem:[%s9826_s30 + $0x3768] sm:$0xff]  ;;  %v2109_v11 = vld [vmem:[%s9826_s30 + $0x3778] sm:$0xff]  ;;  %v2114_v27 = vld [vmem:[%s9826_s30 + $0x37a0] sm:$0xff] }
 0x411   : > { %8888 = vmatpush1.bf16.msra.mxu1 %v8887_v18  ;;  %8378 = vmatprep.subr.bf16.mxu0 %v8377_v19  ;;  %v8397_v18 = vpack.c.bf16 %v2027_v13, %v2019_v12  ;;  %v2018_v19 = vld [vmem:[%s9826_s30 + $0x34a0] sm:$0xff]  ;;  %v8417_v14 = vpack.c.bf16 %v2107_v9, %v2099_v8  ;;  %v2173_v60 = vld [vmem:[%s9826_s30 + $0x3978] sm:$0xff] }
 0x412   : > { %8890 = vmatprep.subr.bf16.mxu1 %v8889_v23  ;;  %4404 = vmatprep.mubr.f32.mxu0 %v9393_v41  ;;  %v2028_v23 = vld [vmem:[%s9826_s30 + $0x34f0] sm:$0xff]  ;;  %v8399_v28 = vpack.c.bf16 %v2026_v20, %v2018_v19  ;;  %v2115_v20 = vld [vmem:[%s9826_s30 + $0x37a8] sm:$0xff]  ;;  %v2181_v8 = vld [vmem:[%s9826_s30 + $0x39b8] sm:$0xff] }
 0x413   : > { %5116 = vmatprep.mubr.f32.mxu1 %v9393_v41  ;;  %v8911_v29 = vpack.c.bf16 %v2028_v23, %v2020_v21  ;;  %v2108_v19 = vld [vmem:[%s9826_s30 + $0x3770] sm:$0xff]  ;;  %v2123_v21 = vld [vmem:[%s9826_s30 + $0x37e8] sm:$0xff]  ;;  %v2125_v23 = vld [vmem:[%s9826_s30 + $0x37f8] sm:$0xff] }
 0x414   : > { %8380 = vmatpush1.bf16.msra.mxu0 %v8379_v31  ;;  %v2034_v31 = vld [vmem:[%s9826_s30 + $0x3520] sm:$0xff]  ;;  %v8421_v26 = vpack.c.bf16 %v2123_v21, %v2115_v20  ;;  %v2189_v9 = vld [vmem:[%s9826_s30 + $0x39f8] sm:$0xff]  ;;  %v2203_v20 = vld [vmem:[%s9826_s30 + $0x3a68] sm:$0xff] }
 0x415   : > { %8892 = vmatpush1.bf16.msra.mxu1 %v8891_v32  ;;  %8382 = vmatprep.subr.bf16.mxu0 %v8381_v33  ;;  %v2042_v32 = vld [vmem:[%s9826_s30 + $0x3560] sm:$0xff]  ;;  %v2036_v33 = vld [vmem:[%s9826_s30 + $0x3530] sm:$0xff]  ;;  %v9397_v21 = vld [vmem:[%s9940_s3 + $0x968] sm:$0xff] }
 0x416   : > { %8894 = vmatprep.subr.bf16.mxu1 %v8893_v37  ;;  %v2059_v37 = vld [vmem:[%s9826_s30 + $0x35e8] sm:$0xff]  ;;  %v8403_v40 = vpack.c.bf16 %v2042_v32, %v2034_v31  ;;  %v8915_v41 = vpack.c.bf16 %v2044_v35, %v2036_v33  ;;  %v2124_v31 = vld [vmem:[%s9826_s30 + $0x37f0] sm:$0xff]  ;;  %v2141_v35 = vld [vmem:[%s9826_s30 + $0x3878] sm:$0xff] }
 0x417   : > { %v8405_v42 = vpack.c.bf16 %v2059_v37, %v2051_v36  ;;  %v2131_v32 = vld [vmem:[%s9826_s30 + $0x3828] sm:$0xff] }
 0x418   : > { %8384 = vmatpush1.bf16.msra.mxu0 %v8383_v44  ;;  %v2058_v44 = vld [vmem:[%s9826_s30 + $0x35e0] sm:$0xff]  ;;  %v2139_v33 = vld [vmem:[%s9826_s30 + $0x3868] sm:$0xff] }
 0x419   : > { %8896 = vmatpush1.bf16.msra.mxu1 %v8895_v45  ;;  %8386 = vmatprep.subr.bf16.mxu0 %v8385_v46  ;;  %v2052_v45 = vld [vmem:[%s9826_s30 + $0x35b0] sm:$0xff]  ;;  %v8917_v46 = vpack.c.bf16 %v2061_v39, %v2053_v38  ;;  %v8407_v52 = vpack.c.bf16 %v2058_v44, %v2050_v43  ;;  %v8425_v38 = vpack.c.bf16 %v2139_v33, %v2131_v32  ;;  %v2130_v39 = vld [vmem:[%s9826_s30 + $0x3820] sm:$0xff]  ;;  %v2147_v44 = vld [vmem:[%s9826_s30 + $0x38a8] sm:$0xff] }
 0x41a   : > { %8898 = vmatprep.subr.bf16.mxu1 %v8897_v50  ;;  %v2069_v50 = vld [vmem:[%s9826_s30 + $0x3638] sm:$0xff]  ;;  %v8919_v53 = vpack.c.bf16 %v2060_v47, %v2052_v45  ;;  %v2140_v43 = vld [vmem:[%s9826_s30 + $0x3870] sm:$0xff]  ;;  %v2155_v45 = vld [vmem:[%s9826_s30 + $0x38e8] sm:$0xff] }
 0x41b   : > { %v2157_v47 = vld [vmem:[%s9826_s30 + $0x38f8] sm:$0xff]  ;;  %v2204_v32 = vld [vmem:[%s9826_s30 + $0x3a70] sm:$0xff]  ;;  %v2211_v33 = vld [vmem:[%s9826_s30 + $0x3aa8] sm:$0xff] }
 0x41c   : > { %8388 = vmatpush1.bf16.msra.mxu0 %v8387_v56  ;;  %v2074_v56 = vld [vmem:[%s9826_s30 + $0x3660] sm:$0xff] }
 0x41d   : > { %8900 = vmatpush1.bf16.msra.mxu1 %v8899_v57  ;;  %8390 = vmatprep.subr.bf16.mxu0 %v8389_v58  ;;  %v2068_v57 = vld [vmem:[%s9826_s30 + $0x3630] sm:$0xff]  ;;  %v8921_v58 = vpack.c.bf16 %v2077_v51, %v2069_v50  ;;  %v8411_v0 = vpack.c.bf16 %v2074_v56, %v2066_v55  ;;  %v8429_v50 = vpack.c.bf16 %v2155_v45, %v2147_v44  ;;  %v2146_v51 = vld [vmem:[%s9826_s30 + $0x38a0] sm:$0xff]  ;;  %v2163_v56 = vld [vmem:[%s9826_s30 + $0x3928] sm:$0xff] }
 0x41e   : > { %8902 = vmatprep.subr.bf16.mxu1 %v8901_v62  ;;  %v2085_v62 = vld [vmem:[%s9826_s30 + $0x36b8] sm:$0xff]  ;;  %v8923_v1 = vpack.c.bf16 %v2076_v59, %v2068_v57  ;;  %v2156_v55 = vld [vmem:[%s9826_s30 + $0x38f0] sm:$0xff]  ;;  %v2171_v57 = vld [vmem:[%s9826_s30 + $0x3968] sm:$0xff] }
 0x41f   : > { %v2165_v59 = vld [vmem:[%s9826_s30 + $0x3938] sm:$0xff]  ;;  %v2212_v44 = vld [vmem:[%s9826_s30 + $0x3ab0] sm:$0xff] }
 0x420   : > { %8392 = vmatpush1.bf16.msra.mxu0 %v8391_v4  ;;  %v2090_v4 = vld [vmem:[%s9826_s30 + $0x36e0] sm:$0xff] }
 0x421   : > { %8904 = vmatpush1.bf16.msra.mxu1 %v8903_v5  ;;  %8394 = vmatprep.subr.bf16.mxu0 %v8393_v6  ;;  %v2084_v5 = vld [vmem:[%s9826_s30 + $0x36b0] sm:$0xff]  ;;  %v8925_v6 = vpack.c.bf16 %v2093_v63, %v2085_v62  ;;  %v8415_v12 = vpack.c.bf16 %v2090_v4, %v2082_v3  ;;  %v8433_v63 = vpack.c.bf16 %v2171_v57, %v2163_v56  ;;  %v2234_v56 = vld [vmem:[%s9826_s30 + $0x3b60] sm:$0xff] }
 0x422   : > { %8906 = vmatprep.subr.bf16.mxu1 %v8905_v10  ;;  %v2101_v10 = vld [vmem:[%s9826_s30 + $0x3738] sm:$0xff]  ;;  %v8927_v13 = vpack.c.bf16 %v2092_v7, %v2084_v5  ;;  %v8945_v3 = vpack.c.bf16 %v2173_v60, %v2165_v59  ;;  %v2172_v4 = vld [vmem:[%s9826_s30 + $0x3970] sm:$0xff]  ;;  %v2179_v5 = vld [vmem:[%s9826_s30 + $0x39a8] sm:$0xff] }
 0x423   : > { %v9395_v7 = vld [vmem:[%s9940_s3 + $0x4e8] sm:$0xff]  ;;  %v2228_v57 = vld [vmem:[%s9826_s30 + $0x3b30] sm:$0xff] }
 0x424   : > { %8396 = vmatpush1.bf16.msra.mxu0 %v8395_v16  ;;  %v2106_v16 = vld [vmem:[%s9826_s30 + $0x3760] sm:$0xff]  ;;  %v2236_v59 = vld [vmem:[%s9826_s30 + $0x3b70] sm:$0xff]  ;;  %v2243_v60 = vld [vmem:[%s9826_s30 + $0x3ba8] sm:$0xff] }
 0x425   : > { %8908 = vmatpush1.bf16.msra.mxu1 %v8907_v17  ;;  %8398 = vmatprep.subr.bf16.mxu0 %v8397_v18  ;;  %v2100_v17 = vld [vmem:[%s9826_s30 + $0x3730] sm:$0xff]  ;;  %v8929_v18 = vpack.c.bf16 %v2109_v11, %v2101_v10  ;;  %v8419_v24 = vpack.c.bf16 %v2106_v16, %v2098_v15  ;;  %v9396_v10 = vld [vmem:[%s9940_s3 + $0x4e0] sm:$0xff] }
 0x426   : > { %8910 = vmatprep.subr.bf16.mxu1 %v8909_v22  ;;  %v2117_v22 = vld [vmem:[%s9826_s30 + $0x37b8] sm:$0xff]  ;;  %v8931_v25 = vpack.c.bf16 %v2108_v19, %v2100_v17  ;;  %v2186_v15 = vld [vmem:[%s9826_s30 + $0x39e0] sm:$0xff]  ;;  %v2180_v16 = vld [vmem:[%s9826_s30 + $0x39b0] sm:$0xff]  ;;  %v8949_v17 = vpack.c.bf16 %v2189_v9, %v2181_v8 }
 0x427   : > { %v2195_v19 = vld [vmem:[%s9826_s30 + $0x3a28] sm:$0xff] }
 0x428   : > { %8400 = vmatpush1.bf16.msra.mxu0 %v8399_v28  ;;  %v2122_v28 = vld [vmem:[%s9826_s30 + $0x37e0] sm:$0xff]  ;;  %v2259_v8 = vld [vmem:[%s9826_s30 + $0x3c28] sm:$0xff] }
 0x429   : > { %8912 = vmatpush1.bf16.msra.mxu1 %v8911_v29  ;;  %8402 = vmatprep.subr.bf16.mxu0 %v8401_v30  ;;  %v2116_v29 = vld [vmem:[%s9826_s30 + $0x37b0] sm:$0xff]  ;;  %v8933_v30 = vpack.c.bf16 %v2125_v23, %v2117_v22  ;;  %v8423_v36 = vpack.c.bf16 %v2122_v28, %v2114_v27  ;;  %v2197_v22 = vld [vmem:[%s9826_s30 + $0x3a38] sm:$0xff]  ;;  %v8441_v27 = vpack.c.bf16 %v2203_v20, %v2195_v19  ;;  %v2194_v28 = vld [vmem:[%s9826_s30 + $0x3a20] sm:$0xff] }
 0x42a   : > { %8914 = vmatprep.subr.bf16.mxu1 %v8913_v34  ;;  %v2133_v34 = vld [vmem:[%s9826_s30 + $0x3838] sm:$0xff]  ;;  %v8935_v37 = vpack.c.bf16 %v2124_v31, %v2116_v29  ;;  %v2202_v29 = vld [vmem:[%s9826_s30 + $0x3a60] sm:$0xff]  ;;  %v2267_v9 = vld [vmem:[%s9826_s30 + $0x3c68] sm:$0xff] }
 0x42b   : > { %v2205_v23 = vld [vmem:[%s9826_s30 + $0x3a78] sm:$0xff]  ;;  %v2268_v19 = vld [vmem:[%s9826_s30 + $0x3c70] sm:$0xff]  ;;  %v2275_v20 = vld [vmem:[%s9826_s30 + $0x3ca8] sm:$0xff] }
 0x42c   : > { %8404 = vmatpush1.bf16.msra.mxu0 %v8403_v40  ;;  %v2138_v40 = vld [vmem:[%s9826_s30 + $0x3860] sm:$0xff]  ;;  %v8953_v31 = vpack.c.bf16 %v2205_v23, %v2197_v22  ;;  %v2277_v22 = vld [vmem:[%s9826_s30 + $0x3cb8] sm:$0xff] }
 0x42d   : > { %8916 = vmatpush1.bf16.msra.mxu1 %v8915_v41  ;;  %8406 = vmatprep.subr.bf16.mxu0 %v8405_v42  ;;  %v2132_v41 = vld [vmem:[%s9826_s30 + $0x3830] sm:$0xff]  ;;  %v8937_v42 = vpack.c.bf16 %v2141_v35, %v2133_v34  ;;  %v8427_v48 = vpack.c.bf16 %v2138_v40, %v2130_v39  ;;  %v2219_v34 = vld [vmem:[%s9826_s30 + $0x3ae8] sm:$0xff]  ;;  %v8443_v39 = vpack.c.bf16 %v2202_v29, %v2194_v28  ;;  %v2285_v23 = vld [vmem:[%s9826_s30 + $0x3cf8] sm:$0xff] }
 0x42e   : > { %8918 = vmatprep.subr.bf16.mxu1 %v8917_v46  ;;  %v2149_v46 = vld [vmem:[%s9826_s30 + $0x38b8] sm:$0xff]  ;;  %v8939_v49 = vpack.c.bf16 %v2140_v43, %v2132_v41  ;;  %v9399_v35 = vld [vmem:[%s9940_s3 + $0xde8] sm:$0xff]  ;;  %v8445_v41 = vpack.c.bf16 %v2219_v34, %v2211_v33  ;;  %v2218_v43 = vld [vmem:[%s9826_s30 + $0x3ae0] sm:$0xff] }
 0x42f   : > { %v2282_v28 = vld [vmem:[%s9826_s30 + $0x3ce0] sm:$0xff]  ;;  %v2276_v29 = vld [vmem:[%s9826_s30 + $0x3cb0] sm:$0xff]  ;;  %v2299_v33 = vld [vmem:[%s9826_s30 + $0x3d68] sm:$0xff] }
 0x430   : > { %8408 = vmatpush1.bf16.msra.mxu0 %v8407_v52  ;;  %v2154_v52 = vld [vmem:[%s9826_s30 + $0x38e0] sm:$0xff]  ;;  %v2293_v34 = vld [vmem:[%s9826_s30 + $0x3d38] sm:$0xff] }
 0x431   : > { %8920 = vmatpush1.bf16.msra.mxu1 %v8919_v53  ;;  %8410 = vmatprep.subr.bf16.mxu0 %v8409_v54  ;;  %v2148_v53 = vld [vmem:[%s9826_s30 + $0x38b0] sm:$0xff]  ;;  %v8941_v54 = vpack.c.bf16 %v2157_v47, %v2149_v46  ;;  %v8431_v61 = vpack.c.bf16 %v2154_v52, %v2146_v51  ;;  %v2227_v47 = vld [vmem:[%s9826_s30 + $0x3b28] sm:$0xff]  ;;  %v2237_v51 = vld [vmem:[%s9826_s30 + $0x3b78] sm:$0xff] }
 0x432   : > { %8922 = vmatprep.subr.bf16.mxu1 %v8921_v58  ;;  %v9394_v58 = vld [vmem:[%s9940_s3 + $0x60] sm:$0xff]  ;;  %v8943_v62 = vpack.c.bf16 %v2156_v55, %v2148_v53  ;;  %v2220_v46 = vld [vmem:[%s9826_s30 + $0x3af0] sm:$0xff] }
 0x433   : > { %v8959_v53 = vpack.c.bf16 %v2220_v46, %v2212_v44  ;;  %v2226_v55 = vld [vmem:[%s9826_s30 + $0x3b20] sm:$0xff]  ;;  %v2307_v44 = vld [vmem:[%s9826_s30 + $0x3da8] sm:$0xff]  ;;  %v2309_v46 = vld [vmem:[%s9826_s30 + $0x3db8] sm:$0xff] }
 0x434   : > { %8412 = vmatpush1.bf16.msra.mxu0 %v8411_v0  ;;  %v2162_v0 = vld [vmem:[%s9826_s30 + $0x3920] sm:$0xff] }
 0x435   : > { %8924 = vmatpush1.bf16.msra.mxu1 %v8923_v1  ;;  %8414 = vmatprep.subr.bf16.mxu0 %v8413_v2  ;;  %v2170_v1 = vld [vmem:[%s9826_s30 + $0x3960] sm:$0xff]  ;;  %v2164_v2 = vld [vmem:[%s9826_s30 + $0x3930] sm:$0xff] }
 0x436   : > { %8926 = vmatprep.subr.bf16.mxu1 %v8925_v6  ;;  %v2187_v6 = vld [vmem:[%s9826_s30 + $0x39e8] sm:$0xff]  ;;  %v8435_v11 = vpack.c.bf16 %v2170_v1, %v2162_v0  ;;  %v8451_v0 = vpack.c.bf16 %v2234_v56, %v2226_v55  ;;  %v8963_v1 = vpack.c.bf16 %v2236_v59, %v2228_v57  ;;  %v2316_v55 = vld [vmem:[%s9826_s30 + $0x3df0] sm:$0xff]  ;;  %v2333_v59 = vld [vmem:[%s9826_s30 + $0x3e78] sm:$0xff] }
 0x437   : > { %v2323_v56 = vld [vmem:[%s9826_s30 + $0x3e28] sm:$0xff] }
 0x438   : > { %8416 = vmatpush1.bf16.msra.mxu0 %v8415_v12  ;;  %v8947_v12 = vpack.c.bf16 %v2172_v4, %v2164_v2  ;;  %v2250_v4 = vld [vmem:[%s9826_s30 + $0x3be0] sm:$0xff]  ;;  %v2331_v57 = vld [vmem:[%s9826_s30 + $0x3e68] sm:$0xff] }
 0x439   : > { %8928 = vmatpush1.bf16.msra.mxu1 %v8927_v13  ;;  %8418 = vmatprep.subr.bf16.mxu0 %v8417_v14  ;;  %v8437_v13 = vpack.c.bf16 %v2187_v6, %v2179_v5  ;;  %v2178_v14 = vld [vmem:[%s9826_s30 + $0x39a0] sm:$0xff]  ;;  %v2244_v5 = vld [vmem:[%s9826_s30 + $0x3bb0] sm:$0xff] }
 0x43a   : > { %8930 = vmatprep.subr.bf16.mxu1 %v8929_v18  ;;  %v2188_v18 = vld [vmem:[%s9826_s30 + $0x39f0] sm:$0xff] }
 0x43c   : > { %8420 = vmatpush1.bf16.msra.mxu0 %v8419_v24  ;;  %v9398_v24 = vld [vmem:[%s9940_s3 + $0x960] sm:$0xff] }
 0x43d   : > { %8932 = vmatpush1.bf16.msra.mxu1 %v8931_v25  ;;  %8422 = vmatprep.subr.bf16.mxu0 %v8421_v26  ;;  %v8439_v25 = vpack.c.bf16 %v2186_v15, %v2178_v14  ;;  %v8951_v26 = vpack.c.bf16 %v2188_v18, %v2180_v16  ;;  %v8457_v14 = vpack.c.bf16 %v2267_v9, %v2259_v8  ;;  %v2258_v15 = vld [vmem:[%s9826_s30 + $0x3c20] sm:$0xff] }
 0x43e   : > { %8934 = vmatprep.subr.bf16.mxu1 %v8933_v30  ;;  %v2196_v30 = vld [vmem:[%s9826_s30 + $0x3a30] sm:$0xff]  ;;  %v2266_v16 = vld [vmem:[%s9826_s30 + $0x3c60] sm:$0xff] }
 0x43f   : > { %v8955_v40 = vpack.c.bf16 %v2204_v32, %v2196_v30  ;;  %v8973_v30 = vpack.c.bf16 %v2285_v23, %v2277_v22  ;;  %v2291_v32 = vld [vmem:[%s9826_s30 + $0x3d28] sm:$0xff]  ;;  %v2354_v23 = vld [vmem:[%s9826_s30 + $0x3f20] sm:$0xff] }
 0x440   : > { %8424 = vmatpush1.bf16.msra.mxu0 %v8423_v36  ;;  %v2213_v36 = vld [vmem:[%s9826_s30 + $0x3ab8] sm:$0xff] }
 0x441   : > { %8936 = vmatpush1.bf16.msra.mxu1 %v8935_v37  ;;  %8426 = vmatprep.subr.bf16.mxu0 %v8425_v38  ;;  %v2221_v37 = vld [vmem:[%s9826_s30 + $0x3af8] sm:$0xff]  ;;  %v9400_v38 = vld [vmem:[%s9940_s3 + $0xde0] sm:$0xff] }
 0x442   : > { %8938 = vmatprep.subr.bf16.mxu1 %v8937_v42  ;;  %v2210_v42 = vld [vmem:[%s9826_s30 + $0x3aa0] sm:$0xff]  ;;  %v8957_v45 = vpack.c.bf16 %v2221_v37, %v2213_v36 }
 0x443   : > { %4405 = vmatmul.mubr.f32.vlgmr.msra.gmra.mrb[8].mxu0 %v9394_v58  ;;  %v8447_v52 = vpack.c.bf16 %v2218_v43, %v2210_v42  ;;  %v2300_v43 = vld [vmem:[%s9826_s30 + $0x3d70] sm:$0xff] }
 0x444   : > { %8428 = vmatpush1.bf16.msra.mxu0 %v8427_v48  ;;  %5117 = vmatmul.mubr.f32.vlgmr.msra.gmra.mrb[8].mxu1 %v9394_v58  ;;  %v2235_v48 = vld [vmem:[%s9826_s30 + $0x3b68] sm:$0xff] }
 0x445   : > { %8940 = vmatpush1.bf16.msra.mxu1 %v8939_v49  ;;  %8430 = vmatprep.subr.bf16.mxu0 %v8429_v50  ;;  %v9401_v49 = vld [vmem:[%s9940_s3 + $0x78] sm:$0xff] }
 0x446   : > { %8942 = vmatprep.subr.bf16.mxu1 %v8941_v54  ;;  %4410 = vmatprep.mubr.f32.mxu0 %v9395_v7  ;;  %v2229_v50 = vld [vmem:[%s9826_s30 + $0x3b38] sm:$0xff]  ;;  %v8449_v54 = vpack.c.bf16 %v2235_v48, %v2227_v47 }
 0x447   : > { %5122 = vmatprep.mubr.f32.mxu1 %v9395_v7  ;;  %4411 = vmatmul.mubr.f32.gmra.mrb[10].mxu0 %v9396_v10  ;;  %v8961_v58 = vpack.c.bf16 %v2237_v51, %v2229_v50  ;;  %v2252_v7 = vld [vmem:[%s9826_s30 + $0x3bf0] sm:$0xff]  ;;  %v2317_v47 = vld [vmem:[%s9826_s30 + $0x3df8] sm:$0xff]  ;;  %v2306_v51 = vld [vmem:[%s9826_s30 + $0x3da0] sm:$0xff] }
 0x448   : > { %8432 = vmatpush1.bf16.msra.mxu0 %v8431_v61  ;;  %5123 = vmatmul.mubr.f32.gmra.mrb[10].mxu1 %v9396_v10  ;;  %v2251_v61 = vld [vmem:[%s9826_s30 + $0x3be8] sm:$0xff]  ;;  %v2261_v10 = vld [vmem:[%s9826_s30 + $0x3c38] sm:$0xff] }
 0x449   : > { %8944 = vmatpush1.bf16.msra.mxu1 %v8943_v62  ;;  %8434 = vmatprep.subr.bf16.mxu0 %v8433_v63  ;;  %v2245_v62 = vld [vmem:[%s9826_s30 + $0x3bb8] sm:$0xff]  ;;  %v8453_v2 = vpack.c.bf16 %v2251_v61, %v2243_v60 }
 0x44a   : > { %8946 = vmatprep.subr.bf16.mxu1 %v8945_v3  ;;  %4416 = vmatprep.mubr.f32.mxu0 %v9397_v21  ;;  %v2253_v63 = vld [vmem:[%s9826_s30 + $0x3bf8] sm:$0xff]  ;;  %v2242_v3 = vld [vmem:[%s9826_s30 + $0x3ba0] sm:$0xff] }
 0x44b   : > { %5128 = vmatprep.mubr.f32.mxu1 %v9397_v21  ;;  %4417 = vmatmul.mubr.f32.gmra.mrb[12].mxu0 %v9398_v24  ;;  %v8965_v6 = vpack.c.bf16 %v2253_v63, %v2245_v62  ;;  %v2283_v21 = vld [vmem:[%s9826_s30 + $0x3ce8] sm:$0xff]  ;;  %v8473_v62 = vpack.c.bf16 %v2331_v57, %v2323_v56  ;;  %v2322_v63 = vld [vmem:[%s9826_s30 + $0x3e20] sm:$0xff] }
 0x44c   : > { %8436 = vmatpush1.bf16.msra.mxu0 %v8435_v11  ;;  %5129 = vmatmul.mubr.f32.gmra.mrb[12].mxu1 %v9398_v24  ;;  %v2269_v11 = vld [vmem:[%s9826_s30 + $0x3c78] sm:$0xff]  ;;  %v8459_v24 = vpack.c.bf16 %v2266_v16, %v2258_v15  ;;  %v2348_v15 = vld [vmem:[%s9826_s30 + $0x3ef0] sm:$0xff]  ;;  %v2355_v16 = vld [vmem:[%s9826_s30 + $0x3f28] sm:$0xff] }
 0x44d   : > { %8948 = vmatpush1.bf16.msra.mxu1 %v8947_v12  ;;  %8438 = vmatprep.subr.bf16.mxu0 %v8437_v13  ;;  %v8455_v12 = vpack.c.bf16 %v2250_v4, %v2242_v3  ;;  %v8967_v13 = vpack.c.bf16 %v2252_v7, %v2244_v5  ;;  %v8969_v18 = vpack.c.bf16 %v2269_v11, %v2261_v10  ;;  %v2332_v3 = vld [vmem:[%s9826_s30 + $0x3e70] sm:$0xff]  ;;  %v2339_v4 = vld [vmem:[%s9826_s30 + $0x3ea8] sm:$0xff]  ;;  %v2349_v7 = vld [vmem:[%s9826_s30 + $0x3ef8] sm:$0xff] }
 0x44e   : > { %8950 = vmatprep.subr.bf16.mxu1 %v8949_v17  ;;  %4422 = vmatprep.mubr.f32.mxu0 %v9399_v35  ;;  %v2260_v17 = vld [vmem:[%s9826_s30 + $0x3c30] sm:$0xff]  ;;  %v2347_v5 = vld [vmem:[%s9826_s30 + $0x3ee8] sm:$0xff]  ;;  %v2338_v11 = vld [vmem:[%s9826_s30 + $0x3ea0] sm:$0xff] }
 0x44f   : > { %5134 = vmatprep.mubr.f32.mxu1 %v9399_v35  ;;  %4423 = vmatmul.mubr.f32.gmra.mrb[14].mxu0 %v9400_v38  ;;  %v2301_v35 = vld [vmem:[%s9826_s30 + $0x3d78] sm:$0xff]  ;;  %v8477_v10 = vpack.c.bf16 %v2347_v5, %v2339_v4 }
 0x450   : > { %8440 = vmatpush1.bf16.msra.mxu0 %v8439_v25  ;;  %5135 = vmatmul.mubr.f32.gmra.mrb[14].mxu1 %v9400_v38  ;;  %v8971_v25 = vpack.c.bf16 %v2268_v19, %v2260_v17  ;;  %v8465_v38 = vpack.c.bf16 %v2299_v33, %v2291_v32  ;;  %v8977_v42 = vpack.c.bf16 %v2301_v35, %v2293_v34  ;;  %v2363_v17 = vld [vmem:[%s9826_s30 + $0x3f68] sm:$0xff]  ;;  %v2365_v19 = vld [vmem:[%s9826_s30 + $0x3f78] sm:$0xff]  ;;  %v2370_v35 = vld [vmem:[%s9826_s30 + $0x3fa0] sm:$0xff] }
 0x451   : > { %8952 = vmatpush1.bf16.msra.mxu1 %v8951_v26  ;;  %8442 = vmatprep.subr.bf16.mxu0 %v8441_v27  ;;  %v8461_v26 = vpack.c.bf16 %v2283_v21, %v2275_v20  ;;  %v2274_v27 = vld [vmem:[%s9826_s30 + $0x3ca0] sm:$0xff]  ;;  %v8481_v22 = vpack.c.bf16 %v2363_v17, %v2355_v16 }
 0x452   : > { %8954 = vmatprep.subr.bf16.mxu1 %v8953_v31  ;;  %4493 = vmatprep.mubr.f32.mxu0 %v9401_v49  ;;  %v2284_v31 = vld [vmem:[%s9826_s30 + $0x3cf0] sm:$0xff]  ;;  %v8463_v36 = vpack.c.bf16 %v2282_v28, %v2274_v27  ;;  %v2371_v28 = vld [vmem:[%s9826_s30 + $0x3fa8] sm:$0xff] }
 0x453   : > { %5205 = vmatprep.mubr.f32.mxu1 %v9401_v49  ;;  %v8975_v37 = vpack.c.bf16 %v2284_v31, %v2276_v29  ;;  %v2364_v27 = vld [vmem:[%s9826_s30 + $0x3f70] sm:$0xff]  ;;  %v2379_v29 = vld [vmem:[%s9826_s30 + $0x3fe8] sm:$0xff]  ;;  %v2381_v31 = vld [vmem:[%s9826_s30 + $0x3ff8] sm:$0xff] }
 0x454   : > { %8444 = vmatpush1.bf16.msra.mxu0 %v8443_v39  ;;  %v2290_v39 = vld [vmem:[%s9826_s30 + $0x3d20] sm:$0xff]  ;;  %v8485_v34 = vpack.c.bf16 %v2379_v29, %v2371_v28 }
 0x455   : > { %8956 = vmatpush1.bf16.msra.mxu1 %v8955_v40  ;;  %8446 = vmatprep.subr.bf16.mxu0 %v8445_v41  ;;  %v2298_v40 = vld [vmem:[%s9826_s30 + $0x3d60] sm:$0xff]  ;;  %v2292_v41 = vld [vmem:[%s9826_s30 + $0x3d30] sm:$0xff] }
 0x456   : > { %8958 = vmatprep.subr.bf16.mxu1 %v8957_v45  ;;  %v2315_v45 = vld [vmem:[%s9826_s30 + $0x3de8] sm:$0xff]  ;;  %v8467_v48 = vpack.c.bf16 %v2298_v40, %v2290_v39  ;;  %v8979_v49 = vpack.c.bf16 %v2300_v43, %v2292_v41  ;;  %v2380_v39 = vld [vmem:[%s9826_s30 + $0x3ff0] sm:$0xff]  ;;  %v9403_v43 = vld [vmem:[%s9940_s3 + $0x4f8] sm:$0xff] }
 0x457   : > { %v8469_v50 = vpack.c.bf16 %v2315_v45, %v2307_v44  ;;  %v9404_v44 = vld [vmem:[%s9940_s3 + $0x4f0] sm:$0xff]  ;;  %v9405_v45 = vld [vmem:[%s9940_s3 + $0x978] sm:$0xff] }
 0x458   : > { %8448 = vmatpush1.bf16.msra.mxu0 %v8447_v52  ;;  %v2314_v52 = vld [vmem:[%s9826_s30 + $0x3de0] sm:$0xff] }
 0x459   : > { %8960 = vmatpush1.bf16.msra.mxu1 %v8959_v53  ;;  %8450 = vmatprep.subr.bf16.mxu0 %v8449_v54  ;;  %v2308_v53 = vld [vmem:[%s9826_s30 + $0x3db0] sm:$0xff]  ;;  %v8981_v54 = vpack.c.bf16 %v2317_v47, %v2309_v46  ;;  %v8471_v60 = vpack.c.bf16 %v2314_v52, %v2306_v51  ;;  %v9407_v47 = vld [vmem:[%s9940_s3 + $0xdf8] sm:$0xff]  ;;  %v307_v51 = vld [vmem:[#allocation2 + $0x28] sm:$0xff] }
 0x45a   : > { %8962 = vmatprep.subr.bf16.mxu1 %v8961_v58  ;;  %v2325_v58 = vld [vmem:[%s9826_s30 + $0x3e38] sm:$0xff]  ;;  %v8983_v61 = vpack.c.bf16 %v2316_v55, %v2308_v53  ;;  %v9406_v46 = vld [vmem:[%s9940_s3 + $0x970] sm:$0xff] }
 0x45b   : > { %v309_v53 = vld [vmem:[#allocation2 + $0x38] sm:$0xff] }
 0x45c   : > { %8452 = vmatpush1.bf16.msra.mxu0 %v8451_v0  ;;  %v2330_v0 = vld [vmem:[%s9826_s30 + $0x3e60] sm:$0xff] }
 0x45d   : > { %8964 = vmatpush1.bf16.msra.mxu1 %v8963_v1  ;;  %8454 = vmatprep.subr.bf16.mxu0 %v8453_v2  ;;  %v2324_v1 = vld [vmem:[%s9826_s30 + $0x3e30] sm:$0xff]  ;;  %v8985_v2 = vpack.c.bf16 %v2333_v59, %v2325_v58  ;;  %v8475_v8 = vpack.c.bf16 %v2330_v0, %v2322_v63  ;;  %v315_v63 = vld [vmem:[#allocation2 + $0x68] sm:$0xff] }
 0x45e   : > { %8966 = vmatprep.subr.bf16.mxu1 %v8965_v6  ;;  %v2341_v6 = vld [vmem:[%s9826_s30 + $0x3eb8] sm:$0xff]  ;;  %v8987_v9 = vpack.c.bf16 %v2332_v3, %v2324_v1 }
 0x45f   : > { %v317_v1 = vld [vmem:[#allocation2 + $0x78] sm:$0xff] }
 0x460   : > { %8456 = vmatpush1.bf16.msra.mxu0 %v8455_v12  ;;  %v2346_v12 = vld [vmem:[%s9826_s30 + $0x3ee0] sm:$0xff] }
 0x461   : > { %8968 = vmatpush1.bf16.msra.mxu1 %v8967_v13  ;;  %8458 = vmatprep.subr.bf16.mxu0 %v8457_v14  ;;  %v2340_v13 = vld [vmem:[%s9826_s30 + $0x3eb0] sm:$0xff]  ;;  %v8989_v14 = vpack.c.bf16 %v2349_v7, %v2341_v6  ;;  %v8479_v20 = vpack.c.bf16 %v2346_v12, %v2338_v11  ;;  %v323_v11 = vld [vmem:[#allocation2 + $0xa8] sm:$0xff] }
 0x462   : > { %8970 = vmatprep.subr.bf16.mxu1 %v8969_v18  ;;  %v2357_v18 = vld [vmem:[%s9826_s30 + $0x3f38] sm:$0xff]  ;;  %v8991_v21 = vpack.c.bf16 %v2348_v15, %v2340_v13 }
 0x463   : > { %v325_v13 = vld [vmem:[#allocation2 + $0xb8] sm:$0xff] }
 0x464   : > { %8460 = vmatpush1.bf16.msra.mxu0 %v8459_v24  ;;  %v2362_v24 = vld [vmem:[%s9826_s30 + $0x3f60] sm:$0xff] }
 0x465   : > { %8972 = vmatpush1.bf16.msra.mxu1 %v8971_v25  ;;  %8462 = vmatprep.subr.bf16.mxu0 %v8461_v26  ;;  %v2356_v25 = vld [vmem:[%s9826_s30 + $0x3f30] sm:$0xff]  ;;  %v8993_v26 = vpack.c.bf16 %v2365_v19, %v2357_v18  ;;  %v8483_v32 = vpack.c.bf16 %v2362_v24, %v2354_v23  ;;  %v331_v23 = vld [vmem:[#allocation2 + $0xe8] sm:$0xff] }
 0x466   : > { %8974 = vmatprep.subr.bf16.mxu1 %v8973_v30  ;;  %v2373_v30 = vld [vmem:[%s9826_s30 + $0x3fb8] sm:$0xff]  ;;  %v8995_v33 = vpack.c.bf16 %v2364_v27, %v2356_v25 }
 0x467   : > { %v333_v25 = vld [vmem:[#allocation2 + $0xf8] sm:$0xff] }
 0x468   : > { %8464 = vmatpush1.bf16.msra.mxu0 %v8463_v36  ;;  %v2378_v36 = vld [vmem:[%s9826_s30 + $0x3fe0] sm:$0xff] }
 0x469   : > { %8976 = vmatpush1.bf16.msra.mxu1 %v8975_v37  ;;  %8466 = vmatprep.subr.bf16.mxu0 %v8465_v38  ;;  %v8997_v37 = vpack.c.bf16 %v2381_v31, %v2373_v30  ;;  %v2372_v38 = vld [vmem:[%s9826_s30 + $0x3fb0] sm:$0xff]  ;;  %v8487_v40 = vpack.c.bf16 %v2378_v36, %v2370_v35 }
 0x46a   : > { %8978 = vmatprep.subr.bf16.mxu1 %v8977_v42  ;;  %v8999_v41 = vpack.c.bf16 %v2380_v39, %v2372_v38  ;;  %v9402_v42 = vld [vmem:[%s9940_s3 + $0x70] sm:$0xff] }
 0x46c   : > { %8468 = vmatpush1.bf16.msra.mxu0 %v8467_v48  ;;  %v9408_v48 = vld [vmem:[%s9940_s3 + $0xdf0] sm:$0xff] }
 0x46d   : > { %8980 = vmatpush1.bf16.msra.mxu1 %v8979_v49  ;;  %8470 = vmatprep.subr.bf16.mxu0 %v8469_v50  ;;  %v306_v49 = vld [vmem:[#allocation2 + $0x20] sm:$0xff]  ;;  %v308_v50 = vld [vmem:[#allocation2 + $0x30] sm:$0xff] }
 0x46e   : > { %8982 = vmatprep.subr.bf16.mxu1 %v8981_v54 }
 0x470   : > { %8472 = vmatpush1.bf16.msra.mxu0 %v8471_v60  ;;  %v314_v60 = vld [vmem:[#allocation2 + $0x60] sm:$0xff] }
 0x471   : > { %8984 = vmatpush1.bf16.msra.mxu1 %v8983_v61  ;;  %8474 = vmatprep.subr.bf16.mxu0 %v8473_v62  ;;  %v316_v62 = vld [vmem:[#allocation2 + $0x70] sm:$0xff] }
 0x472   : > { %8986 = vmatprep.subr.bf16.mxu1 %v8985_v2 }
 0x474   : > { %8476 = vmatpush1.bf16.msra.mxu0 %v8475_v8  ;;  %v322_v8 = vld [vmem:[#allocation2 + $0xa0] sm:$0xff] }
 0x475   : > { %8988 = vmatpush1.bf16.msra.mxu1 %v8987_v9  ;;  %8478 = vmatprep.subr.bf16.mxu0 %v8477_v10  ;;  %v324_v10 = vld [vmem:[#allocation2 + $0xb0] sm:$0xff] }
 0x476   : > { %8990 = vmatprep.subr.bf16.mxu1 %v8989_v14 }
 0x478   : > { %8480 = vmatpush1.bf16.msra.mxu0 %v8479_v20  ;;  %v330_v20 = vld [vmem:[#allocation2 + $0xe0] sm:$0xff] }
 0x479   : > { %8992 = vmatpush1.bf16.msra.mxu1 %v8991_v21  ;;  %8482 = vmatprep.subr.bf16.mxu0 %v8481_v22  ;;  %v332_v22 = vld [vmem:[#allocation2 + $0xf0] sm:$0xff] }
 0x47a   : > { %8994 = vmatprep.subr.bf16.mxu1 %v8993_v26 }
 0x47c   : > { %8484 = vmatpush1.bf16.msra.mxu0 %v8483_v32 }
 0x47d   : > { %8996 = vmatpush1.bf16.msra.mxu1 %v8995_v33  ;;  %8486 = vmatprep.subr.bf16.mxu0 %v8485_v34 }
 0x47e   : > { %8998 = vmatprep.subr.bf16.mxu1 %v8997_v37 }
 0x480   : > { %8488 = vmatpush1.bf16.msra.mxu0 %v8487_v40 }
 0x481   : > { %9000 = vmatpush1.bf16.msra.mxu1 %v8999_v41 }
 0x483   : > { %4494 = vmatmul.mubr.f32.vlgmr.msra.gmra.mrb[8].mxu0 %v9402_v42 }
 0x484   : > { %5206 = vmatmul.mubr.f32.vlgmr.msra.gmra.mrb[8].mxu1 %v9402_v42  ;;  %4499 = vmatprep.mubr.f32.mxu0 %v9403_v43 }
 0x485   : > { %5211 = vmatprep.mubr.f32.mxu1 %v9403_v43 }
 0x487   : > { %4500 = vmatmul.mubr.f32.gmra.mrb[10].mxu0 %v9404_v44 }
 0x488   : > { %5212 = vmatmul.mubr.f32.gmra.mrb[10].mxu1 %v9404_v44  ;;  %4505 = vmatprep.mubr.f32.mxu0 %v9405_v45 }
 0x489   : > { %5217 = vmatprep.mubr.f32.mxu1 %v9405_v45 }
 0x48b   : > { %4506 = vmatmul.mubr.f32.gmra.mrb[12].mxu0 %v9406_v46 }
 0x48c   : > { %5218 = vmatmul.mubr.f32.gmra.mrb[12].mxu1 %v9406_v46  ;;  %4511 = vmatprep.mubr.f32.mxu0 %v9407_v47 }
 0x48d   : > { %5223 = vmatprep.mubr.f32.mxu1 %v9407_v47 }
 0x48f   : > { %4512 = vmatmul.mubr.f32.gmra.mrb[14].mxu0 %v9408_v48 }
 0x490   : > { %5224 = vmatmul.mubr.f32.gmra.mrb[14].mxu1 %v9408_v48 }
 0x556   : > { %v4495_v52 = vpop.f32.mrb[8].mxu0 }
 0x557   : > { %v5234_v54 = vadd.f32 %v4495_v52, %v306_v49  ;;  %v5207_v55 = vpop.f32.mrb[8].mxu1  ;;  %v4497_v56 = vpop.f32.mrb[9].mxu0 }
 0x558   : > { %v5236_v57 = vadd.f32 %v5207_v55, %v308_v50  ;;  %v5235_v58 = vadd.f32 %v4497_v56, %v307_v51  ;;  %v5209_v59 = vpop.f32.mrb[9].mxu1 }
 0x559   : > { %5266 = vst [vmem:[#allocation2 + $0x20] sm:$0xff] %v5234_v54  ;;  %v5237_v61 = vadd.f32 %v5209_v59, %v309_v53 }
 0x55a   : > { %5268 = vst [vmem:[#allocation2 + $0x30] sm:$0xff] %v5236_v57  ;;  %5267 = vst [vmem:[#allocation2 + $0x28] sm:$0xff] %v5235_v58  ;;  %v4501_v0 = vpop.f32.mrb[10].mxu0 }
 0x55b   : > { %5269 = vst [vmem:[#allocation2 + $0x38] sm:$0xff] %v5237_v61  ;;  %v5242_v2 = vadd.f32 %v4501_v0, %v314_v60  ;;  %v5213_v3 = vpop.f32.mrb[10].mxu1  ;;  %v4503_v4 = vpop.f32.mrb[11].mxu0 }
 0x55c   : > { %v5244_v5 = vadd.f32 %v5213_v3, %v316_v62  ;;  %v5243_v6 = vadd.f32 %v4503_v4, %v315_v63  ;;  %v5215_v7 = vpop.f32.mrb[11].mxu1 }
 0x55d   : > { %5274 = vst [vmem:[#allocation2 + $0x60] sm:$0xff] %v5242_v2  ;;  %v5245_v9 = vadd.f32 %v5215_v7, %v317_v1 }
 0x55e   : > { %5276 = vst [vmem:[#allocation2 + $0x70] sm:$0xff] %v5244_v5  ;;  %5275 = vst [vmem:[#allocation2 + $0x68] sm:$0xff] %v5243_v6  ;;  %v4507_v12 = vpop.f32.mrb[12].mxu0 }
 0x55f   : > { %5277 = vst [vmem:[#allocation2 + $0x78] sm:$0xff] %v5245_v9  ;;  %v5250_v14 = vadd.f32 %v4507_v12, %v322_v8  ;;  %v5219_v15 = vpop.f32.mrb[12].mxu1  ;;  %v4509_v16 = vpop.f32.mrb[13].mxu0 }
 0x560   : > { %v5252_v17 = vadd.f32 %v5219_v15, %v324_v10  ;;  %v5251_v18 = vadd.f32 %v4509_v16, %v323_v11  ;;  %v5221_v19 = vpop.f32.mrb[13].mxu1 }
 0x561   : > { %5282 = vst [vmem:[#allocation2 + $0xa0] sm:$0xff] %v5250_v14  ;;  %v5253_v21 = vadd.f32 %v5221_v19, %v325_v13  ;;  %5297 = sbr.rel (%p6944_p4) target bundleno = 1764 (0x6e4), region = 44 }
 0x562   : > { %5284 = vst [vmem:[#allocation2 + $0xb0] sm:$0xff] %v5252_v17  ;;  %5283 = vst [vmem:[#allocation2 + $0xa8] sm:$0xff] %v5251_v18  ;;  %v4513_v24 = vpop.f32.mrb[14].mxu0 }
 0x563   : > { %5285 = vst [vmem:[#allocation2 + $0xb8] sm:$0xff] %v5253_v21  ;;  %v5258_v26 = vadd.f32 %v4513_v24, %v330_v20  ;;  %v5225_v27 = vpop.f32.mrb[14].mxu1  ;;  %v4515_v28 = vpop.f32.mrb[15].mxu0 }
 0x564   : > { %v5260_v29 = vadd.f32 %v5225_v27, %v332_v22  ;;  %v5259_v30 = vadd.f32 %v4515_v28, %v331_v23  ;;  %v5227_v31 = vpop.f32.mrb[15].mxu1 }
 0x565   : > { %5290 = vst [vmem:[#allocation2 + $0xe0] sm:$0xff] %v5258_v26  ;;  %v5261_v32 = vadd.f32 %v5227_v31, %v333_v25 }
 0x566   : > { %5292 = vst [vmem:[#allocation2 + $0xf0] sm:$0xff] %v5260_v29  ;;  %5291 = vst [vmem:[#allocation2 + $0xe8] sm:$0xff] %v5259_v30 }
 0x567   : > { %5293 = vst [vmem:[#allocation2 + $0xf8] sm:$0xff] %v5261_v32 }
 0x568   : > { %v12021_v33 = vld [vmem:[#allocation2] sm:$0xff]  ;;  %v12023_v34 = vld [vmem:[#allocation2 + $0x8] sm:$0xff]  ;;  %v12025_v35 = vld [vmem:[#allocation2 + $0x10] sm:$0xff]  ;;  %vm5635_vm0 = vcmask 1041408   ;;  %vm5692_vm1 = vcmask 1045508   ;;  %vm5757_vm2 = vcmask 1043457  }
 0x569   : > { %v12027_v36 = vld [vmem:[#allocation2 + $0x18] sm:$0xff]  ;;  %v12029_v37 = vld [vmem:[#allocation2 + $0x20] sm:$0xff]  ;;  %v12031_v38 = vld [vmem:[#allocation2 + $0x28] sm:$0xff]  ;;  %vm5814_vm3 = vcmask 1047557  }
 0x56a   : > { %v12033_v39 = vld [vmem:[#allocation2 + $0x30] sm:$0xff]  ;;  %v12035_v40 = vld [vmem:[#allocation2 + $0x38] sm:$0xff]  ;;  %v12037_v41 = vld [vmem:[#allocation2 + $0x40] sm:$0xff] }
 0x56b   : > { %v12039_v42 = vld [vmem:[#allocation2 + $0x48] sm:$0xff]  ;;  %v12041_v43 = vld [vmem:[#allocation2 + $0x50] sm:$0xff]  ;;  %v12043_v44 = vld [vmem:[#allocation2 + $0x58] sm:$0xff]  ;;  %v5330_v45 = vadd.f32 %v12037_v41, %v12021_v33 }
 0x56c   : > { %v12047_v46 = vld [vmem:[#allocation2 + $0x60] sm:$0xff]  ;;  %v12049_v47 = vld [vmem:[#allocation2 + $0x68] sm:$0xff]  ;;  %v12051_v48 = vld [vmem:[#allocation2 + $0x70] sm:$0xff]  ;;  %v5339_v49 = vadd.f32 %v12039_v42, %v12023_v34  ;;  %v5348_v50 = vadd.f32 %v12041_v43, %v12025_v35  ;;  %v5357_v51 = vadd.f32 %v12043_v44, %v12027_v36 }
 0x56d   : > { %v12059_v52 = vld [vmem:[#allocation2 + $0x78] sm:$0xff]  ;;  %v12061_v53 = vld [vmem:[#allocation2 + $0x80] sm:$0xff]  ;;  %v12063_v54 = vld [vmem:[#allocation2 + $0x88] sm:$0xff]  ;;  %v5366_v55 = vadd.f32 %v12047_v46, %v12029_v37  ;;  %v5375_v56 = vadd.f32 %v12049_v47, %v12031_v38  ;;  %v5384_v57 = vadd.f32 %v12051_v48, %v12033_v39 }
 0x56e   : > { %v12071_v58 = vld [vmem:[#allocation2 + $0x90] sm:$0xff]  ;;  %v12073_v59 = vld [vmem:[#allocation2 + $0x98] sm:$0xff]  ;;  %v12075_v60 = vld [vmem:[#allocation2 + $0xa0] sm:$0xff]  ;;  %v5331_v61 = vadd.f32 %v5330_v45, %v12061_v53  ;;  %v5340_v62 = vadd.f32 %v5339_v49, %v12063_v54  ;;  %v5393_v63 = vadd.f32 %v12059_v52, %v12035_v40 }
 0x56f   : > { %v12081_v0 = vld [vmem:[#allocation2 + $0xa8] sm:$0xff]  ;;  %v12083_v1 = vld [vmem:[#allocation2 + $0xb0] sm:$0xff]  ;;  %v12085_v2 = vld [vmem:[#allocation2 + $0xb8] sm:$0xff]  ;;  %v5349_v3 = vadd.f32 %v5348_v50, %v12071_v58  ;;  %v5358_v4 = vadd.f32 %v5357_v51, %v12073_v59  ;;  %v5367_v5 = vadd.f32 %v5366_v55, %v12075_v60 }
 0x570   : > { %v12090_v6 = vld [vmem:[#allocation2 + $0xc0] sm:$0xff]  ;;  %v12092_v7 = vld [vmem:[#allocation2 + $0xc8] sm:$0xff]  ;;  %v12094_v8 = vld [vmem:[#allocation2 + $0xd0] sm:$0xff]  ;;  %v5376_v9 = vadd.f32 %v5375_v56, %v12081_v0  ;;  %v5385_v10 = vadd.f32 %v5384_v57, %v12083_v1  ;;  %v5394_v11 = vadd.f32 %v5393_v63, %v12085_v2 }
 0x571   : > { %v12099_v12 = vld [vmem:[#allocation2 + $0xd8] sm:$0xff]  ;;  %v12101_v13 = vld [vmem:[#allocation2 + $0xe0] sm:$0xff]  ;;  %v12103_v14 = vld [vmem:[#allocation2 + $0xe8] sm:$0xff]  ;;  %v5332_v15 = vadd.f32 %v5331_v61, %v12090_v6  ;;  %v5341_v16 = vadd.f32 %v5340_v62, %v12092_v7  ;;  %v5350_v17 = vadd.f32 %v5349_v3, %v12094_v8 }
 0x572   : > { %13363 = vst [vmem:[#allocation16_spill] sm:$0xff] %v12103_v14  ;;  %v12108_v18 = vld [vmem:[#allocation2 + $0xf0] sm:$0xff]  ;;  %v12110_v19 = vld [vmem:[#allocation2 + $0xf8] sm:$0xff]  ;;  %v5359_v20 = vadd.f32 %v5358_v4, %v12099_v12  ;;  %v5368_v21 = vadd.f32 %v5367_v5, %v12101_v13  ;;  %v5377_v22 = vadd.f32 %v5376_v9, %v12103_v14 }
 0x573   : > { %13364 = vst [vmem:[#allocation17_spill] sm:$0xff] %v12108_v18  ;;  %13365 = vst [vmem:[#allocation18_spill] sm:$0xff] %v12110_v19  ;;  %v5333_v23 = vrot.slane %v5332_v15, 4  ;;  %v5342_v24 = vrot.slane %v5341_v16, 4  ;;  %v5351_v25 = vrot.slane %v5350_v17, 4  ;;  %v5386_v26 = vadd.f32 %v5385_v10, %v12108_v18 }
 0x574   : > { %v5360_v27 = vrot.slane %v5359_v20, 4  ;;  %v5369_v28 = vrot.slane %v5368_v21, 4  ;;  %v5378_v29 = vrot.slane %v5377_v22, 4  ;;  %v5395_v30 = vadd.f32 %v5394_v11, %v12110_v19 }
 0x575   : > { %v5334_v31 = vadd.f32 %v5333_v23, %v5332_v15  ;;  %v5343_v32 = vadd.f32 %v5342_v24, %v5341_v16  ;;  %v5352_v45 = vadd.f32 %v5351_v25, %v5350_v17  ;;  %v5387_v49 = vrot.slane %v5386_v26, 4 }
 0x576   : > { %v5361_v50 = vadd.f32 %v5360_v27, %v5359_v20  ;;  %v5370_v51 = vadd.f32 %v5369_v28, %v5368_v21  ;;  %v5379_v55 = vadd.f32 %v5378_v29, %v5377_v22  ;;  %v5396_v56 = vrot.slane %v5395_v30, 4 }
 0x577   : > { %v5335_v57 = vrot.slane %v5334_v31, 2  ;;  %v5344_v61 = vrot.slane %v5343_v32, 2  ;;  %v5353_v62 = vrot.slane %v5352_v45, 2  ;;  %v5388_v63 = vadd.f32 %v5387_v49, %v5386_v26 }
 0x578   : > { %v5362_v3 = vrot.slane %v5361_v50, 2  ;;  %v5371_v4 = vrot.slane %v5370_v51, 2  ;;  %v5380_v5 = vrot.slane %v5379_v55, 2  ;;  %v5397_v9 = vadd.f32 %v5396_v56, %v5395_v30 }
 0x579   : > { %v5336_v10 = vadd.f32 %v5335_v57, %v5334_v31  ;;  %v5345_v18 = vadd.f32 %v5344_v61, %v5343_v32  ;;  %v5354_v14 = vadd.f32 %v5353_v62, %v5352_v45  ;;  %v5389_v11 = vrot.slane %v5388_v63, 2 }
 0x57a   : > { %v5363_v15 = vadd.f32 %v5362_v3, %v5361_v50  ;;  %v5372_v16 = vadd.f32 %v5371_v4, %v5370_v51  ;;  %v5381_v17 = vadd.f32 %v5380_v5, %v5379_v55  ;;  %v5398_v23 = vrot.slane %v5397_v9, 2 }
 0x57b   : > { %v5337_v20 = vrot.slane %v5336_v10, 1  ;;  %v5346_v21 = vrot.slane %v5345_v18, 1  ;;  %v5355_v22 = vrot.slane %v5354_v14, 1  ;;  %v5390_v24 = vadd.f32 %v5389_v11, %v5388_v63 }
 0x57c   : > { %v5364_v25 = vrot.slane %v5363_v15, 1  ;;  %v5373_v27 = vrot.slane %v5372_v16, 1  ;;  %v5382_v28 = vrot.slane %v5381_v17, 1  ;;  %v5399_v26 = vadd.f32 %v5398_v23, %v5397_v9 }
 0x57d   : > { %v5338_v29 = vadd.f32 %v5337_v20, %v5336_v10  ;;  %v5347_v49 = vadd.f32 %v5346_v21, %v5345_v18  ;;  %v5356_v19 = vadd.f32 %v5355_v22, %v5354_v14  ;;  %v5391_v30 = vrot.slane %v5390_v24, 1 }
 0x57e   : > { %v5365_v31 = vadd.f32 %v5364_v25, %v5363_v15  ;;  %v5374_v32 = vadd.f32 %v5373_v27, %v5372_v16  ;;  %v5383_v45 = vadd.f32 %v5382_v28, %v5381_v17  ;;  %v5400_v56 = vrot.slane %v5399_v26, 1 }
 0x57f   : > { %v5392_v50 = vadd.f32 %v5391_v30, %v5390_v24  ;;  %v5403_v51 = vmul.f32 0.03125, %v5338_v29  ;;  %v5404_v55 = vmul.f32 0.03125, %v5347_v49  ;;  %v5405_v57 = vmul.f32 0.03125, %v5356_v19 }
 0x580   : > { %v5401_v61 = vadd.f32 %v5400_v56, %v5399_v26  ;;  %v5406_v62 = vmul.f32 0.03125, %v5365_v31  ;;  %v5407_v3 = vmul.f32 0.03125, %v5374_v32  ;;  %v5408_v63 = vmul.f32 0.03125, %v5383_v45 }
 0x581   : > { %v5409_v4 = vmul.f32 0.03125, %v5392_v50  ;;  %v12118_v5 = vsub.f32 %v12021_v33, %v5403_v51  ;;  %v12121_v18 = vsub.f32 %v12023_v34, %v5404_v55  ;;  %v12124_v14 = vsub.f32 %v12025_v35, %v5405_v57 }
 0x582   : > { %v5410_v9 = vmul.f32 0.03125, %v5401_v61  ;;  %v12127_v10 = vsub.f32 %v12027_v36, %v5406_v62  ;;  %v12130_v19 = vsub.f32 %v12029_v37, %v5407_v3  ;;  %v12133_v11 = vsub.f32 %v12031_v38, %v5408_v63 }
 0x583   : > { %v12136_v15 = vsub.f32 %v12033_v39, %v5409_v4  ;;  %v12139_v33 = vsub.f32 %v12037_v41, %v5403_v51  ;;  %v12142_v34 = vsub.f32 %v12039_v42, %v5404_v55  ;;  %v12145_v35 = vsub.f32 %v12041_v43, %v5405_v57 }
 0x584   : > { %13366 = vst [vmem:[#allocation19_spill] sm:$0xff] %v12127_v10  ;;  %13367 = vst [vmem:[#allocation20_spill] sm:$0xff] %v12130_v19  ;;  %v12148_v36 = vsub.f32 %v12035_v40, %v5410_v9  ;;  %v12151_v37 = vsub.f32 %v12043_v44, %v5406_v62  ;;  %v12154_v38 = vsub.f32 %v12047_v46, %v5407_v3 }
 0x585   : > { %13368 = vst [vmem:[#allocation21_spill] sm:$0xff] %v12133_v11  ;;  %13369 = vst [vmem:[#allocation22_spill] sm:$0xff] %v12136_v15  ;;  %v12157_v39 = vsub.f32 %v12049_v47, %v5408_v63  ;;  %v12160_v41 = vsub.f32 %v12051_v48, %v5409_v4  ;;  %v12163_v42 = vsub.f32 %v12059_v52, %v5410_v9 }
 0x586   : > { %13370 = vst [vmem:[#allocation23_spill] sm:$0xff] %v12148_v36  ;;  %13371 = vst [vmem:[#allocation24_spill] sm:$0xff] %v12151_v37  ;;  %v12166_v43 = vsub.f32 %v12061_v53, %v5403_v51  ;;  %v12169_v40 = vsub.f32 %v12063_v54, %v5404_v55  ;;  %v12172_v44 = vsub.f32 %v12071_v58, %v5405_v57 }
 0x587   : > { %13372 = vst [vmem:[#allocation25_spill] sm:$0xff] %v12154_v38  ;;  %13373 = vst [vmem:[#allocation26_spill] sm:$0xff] %v12157_v39  ;;  %v12175_v46 = vsub.f32 %v12073_v59, %v5406_v62  ;;  %v12178_v47 = vsub.f32 %v12075_v60, %v5407_v3  ;;  %v12181_v48 = vsub.f32 %v12081_v0, %v5408_v63 }
 0x588   : > { %13374 = vst [vmem:[#allocation27_spill] sm:$0xff] %v12160_v41  ;;  %13375 = vst [vmem:[#allocation28_spill] sm:$0xff] %v12163_v42  ;;  %v12184_v52 = vsub.f32 %v12083_v1, %v5409_v4  ;;  %v12187_v53 = vsub.f32 %v12085_v2, %v5410_v9  ;;  %v12190_v54 = vsub.f32 %v12090_v6, %v5403_v51  ;;  %v13383_v1 = vld [vmem:[#allocation16_spill] sm:$0xff]  ;;  %v13385_v2 = vld [vmem:[#allocation17_spill] sm:$0xff] }
 0x589   : > { %13376 = vst [vmem:[#allocation29_spill] sm:$0xff] %v12175_v46  ;;  %13377 = vst [vmem:[#allocation30_spill] sm:$0xff] %v12178_v47  ;;  %v12193_v58 = vsub.f32 %v12092_v7, %v5404_v55  ;;  %v12196_v59 = vsub.f32 %v12094_v8, %v5405_v57  ;;  %v12199_v60 = vsub.f32 %v12099_v12, %v5406_v62  ;;  %v13387_v6 = vld [vmem:[#allocation18_spill] sm:$0xff] }
 0x58a   : > { %13378 = vst [vmem:[#allocation31_spill] sm:$0xff] %v12181_v48  ;;  %13379 = vst [vmem:[#allocation32_spill] sm:$0xff] %v12184_v52  ;;  %v12202_v0 = vsub.f32 %v12101_v13, %v5407_v3  ;;  %v12205_v16 = vsub.f32 %v13383_v1, %v5408_v63  ;;  %v12208_v17 = vsub.f32 %v13385_v2, %v5409_v4 }
 0x58b   : > { %13380 = vst [vmem:[#allocation33_spill] sm:$0xff] %v12187_v53  ;;  %13381 = vst [vmem:[#allocation34_spill] sm:$0xff] %v12199_v60  ;;  %v12211_v23 = vsub.f32 %v13387_v6, %v5410_v9  ;;  %v5443_v7 = vmul.f32 %v12118_v5, %v12118_v5  ;;  %v5444_v8 = vmul.f32 %v12121_v18, %v12121_v18 }
 0x58c   : > { %13382 = vst [vmem:[#allocation35_spill] sm:$0xff] %v12202_v0  ;;  %13384 = vst [vmem:[#allocation16_spill] sm:$0xff] %v12205_v16  ;;  %v5445_v12 = vmul.f32 %v12124_v14, %v12124_v14  ;;  %v5446_v13 = vmul.f32 %v12127_v10, %v12127_v10  ;;  %v5447_v20 = vmul.f32 %v12130_v19, %v12130_v19 }
 0x58d   : > { %13386 = vst [vmem:[#allocation17_spill] sm:$0xff] %v12208_v17  ;;  %13388 = vst [vmem:[#allocation18_spill] sm:$0xff] %v12211_v23  ;;  %v5448_v21 = vmul.f32 %v12133_v11, %v12133_v11  ;;  %v5449_v22 = vmul.f32 %v12136_v15, %v12136_v15  ;;  %v5450_v24 = vmul.f32 %v12148_v36, %v12148_v36 }
 0x58e   : > { %v5451_v25 = vmul.f32 %v12139_v33, %v12139_v33  ;;  %v5452_v27 = vmul.f32 %v12142_v34, %v12142_v34  ;;  %v5453_v28 = vmul.f32 %v12145_v35, %v12145_v35  ;;  %v5454_v26 = vmul.f32 %v12151_v37, %v12151_v37 }
 0x58f   : > { %v5455_v29 = vmul.f32 %v12154_v38, %v12154_v38  ;;  %v5456_v49 = vmul.f32 %v12157_v39, %v12157_v39  ;;  %v5457_v30 = vmul.f32 %v12160_v41, %v12160_v41  ;;  %v5458_v31 = vmul.f32 %v12163_v42, %v12163_v42 }
 0x590   : > { %v5459_v32 = vmul.f32 %v12166_v43, %v12166_v43  ;;  %v5460_v45 = vmul.f32 %v12169_v40, %v12169_v40  ;;  %v5461_v56 = vmul.f32 %v12172_v44, %v12172_v44  ;;  %v5462_v50 = vmul.f32 %v12175_v46, %v12175_v46 }
 0x591   : > { %v5463_v51 = vmul.f32 %v12178_v47, %v12178_v47  ;;  %v5464_v55 = vmul.f32 %v12181_v48, %v12181_v48  ;;  %v5465_v57 = vmul.f32 %v12184_v52, %v12184_v52  ;;  %v5466_v61 = vmul.f32 %v12187_v53, %v12187_v53 }
 0x592   : > { %v5467_v62 = vmul.f32 %v12190_v54, %v12190_v54  ;;  %v5468_v3 = vmul.f32 %v12193_v58, %v12193_v58  ;;  %v5469_v63 = vmul.f32 %v12196_v59, %v12196_v59  ;;  %v5470_v4 = vmul.f32 %v12199_v60, %v12199_v60 }
 0x593   : > { %v5471_v9 = vmul.f32 %v12202_v0, %v12202_v0  ;;  %v5472_v1 = vmul.f32 %v12205_v16, %v12205_v16  ;;  %v5473_v2 = vmul.f32 %v12208_v17, %v12208_v17  ;;  %v5474_v6 = vmul.f32 %v12211_v23, %v12211_v23 }
 0x594   : > { %v5475_v53 = vadd.f32 %v5451_v25, %v5443_v7  ;;  %v5484_v42 = vadd.f32 %v5452_v27, %v5444_v8  ;;  %v5493_v36 = vadd.f32 %v5453_v28, %v5445_v12  ;;  %v5502_v52 = vadd.f32 %v5454_v26, %v5446_v13 }
 0x595   : > { %v5511_v41 = vadd.f32 %v5455_v29, %v5447_v20  ;;  %v5520_v15 = vadd.f32 %v5456_v49, %v5448_v21  ;;  %v5529_v11 = vadd.f32 %v5457_v30, %v5449_v22  ;;  %v5538_v47 = vadd.f32 %v5458_v31, %v5450_v24 }
 0x596   : > { %v5476_v48 = vadd.f32 %v5475_v53, %v5459_v32  ;;  %v5485_v39 = vadd.f32 %v5484_v42, %v5460_v45  ;;  %v5494_v0 = vadd.f32 %v5493_v36, %v5461_v56  ;;  %v5503_v38 = vadd.f32 %v5502_v52, %v5462_v50 }
 0x597   : > { %v5512_v19 = vadd.f32 %v5511_v41, %v5463_v51  ;;  %v5521_v16 = vadd.f32 %v5520_v15, %v5464_v55  ;;  %v5530_v17 = vadd.f32 %v5529_v11, %v5465_v57  ;;  %v5539_v37 = vadd.f32 %v5538_v47, %v5466_v61 }
 0x598   : > { %v5477_v60 = vadd.f32 %v5476_v48, %v5467_v62  ;;  %v5486_v46 = vadd.f32 %v5485_v39, %v5468_v3  ;;  %v5495_v10 = vadd.f32 %v5494_v0, %v5469_v63  ;;  %v5504_v23 = vadd.f32 %v5503_v38, %v5470_v4 }
 0x599   : > { %v5513_v7 = vadd.f32 %v5512_v19, %v5471_v9  ;;  %v5522_v8 = vadd.f32 %v5521_v16, %v5472_v1  ;;  %v5531_v20 = vadd.f32 %v5530_v17, %v5473_v2  ;;  %v5540_v21 = vadd.f32 %v5539_v37, %v5474_v6 }
 0x59a   : > { %v5478_v12 = vrot.slane %v5477_v60, 4  ;;  %v5487_v13 = vrot.slane %v5486_v46, 4  ;;  %v5496_v53 = vrot.slane %v5495_v10, 4  ;;  %v5505_v42 = vrot.slane %v5504_v23, 4 }
 0x59b   : > { %v5514_v22 = vrot.slane %v5513_v7, 4  ;;  %v5523_v24 = vrot.slane %v5522_v8, 4  ;;  %v5532_v41 = vrot.slane %v5531_v20, 4  ;;  %v5541_v15 = vrot.slane %v5540_v21, 4 }
 0x59c   : > { %v5479_v36 = vadd.f32 %v5478_v12, %v5477_v60  ;;  %v5488_v52 = vadd.f32 %v5487_v13, %v5486_v46  ;;  %v5497_v48 = vadd.f32 %v5496_v53, %v5495_v10  ;;  %v5506_v39 = vadd.f32 %v5505_v42, %v5504_v23 }
 0x59d   : > { %v5515_v11 = vadd.f32 %v5514_v22, %v5513_v7  ;;  %v5524_v47 = vadd.f32 %v5523_v24, %v5522_v8  ;;  %v5533_v19 = vadd.f32 %v5532_v41, %v5531_v20  ;;  %v5542_v16 = vadd.f32 %v5541_v15, %v5540_v21 }
 0x59e   : > { %v5480_v0 = vrot.slane %v5479_v36, 2  ;;  %v5489_v38 = vrot.slane %v5488_v52, 2  ;;  %v5498_v25 = vrot.slane %v5497_v48, 2  ;;  %v5507_v27 = vrot.slane %v5506_v39, 2 }
 0x59f   : > { %v5516_v17 = vrot.slane %v5515_v11, 2  ;;  %v5525_v37 = vrot.slane %v5524_v47, 2  ;;  %v5534_v29 = vrot.slane %v5533_v19, 2  ;;  %v5543_v49 = vrot.slane %v5542_v16, 2 }
 0x5a0   : > { %v5481_v28 = vadd.f32 %v5480_v0, %v5479_v36  ;;  %v5490_v26 = vadd.f32 %v5489_v38, %v5488_v52  ;;  %v5499_v60 = vadd.f32 %v5498_v25, %v5497_v48  ;;  %v5508_v46 = vadd.f32 %v5507_v27, %v5506_v39 }
 0x5a1   : > { %v5517_v30 = vadd.f32 %v5516_v17, %v5515_v11  ;;  %v5526_v31 = vadd.f32 %v5525_v37, %v5524_v47  ;;  %v5535_v32 = vadd.f32 %v5534_v29, %v5533_v19  ;;  %v5544_v45 = vadd.f32 %v5543_v49, %v5542_v16 }
 0x5a2   : > { %v5482_v10 = vrot.slane %v5481_v28, 1  ;;  %v5491_v23 = vrot.slane %v5490_v26, 1  ;;  %v5500_v56 = vrot.slane %v5499_v60, 1  ;;  %v5509_v50 = vrot.slane %v5508_v46, 1 }
 0x5a3   : > { %v5518_v51 = vrot.slane %v5517_v30, 1  ;;  %v5527_v55 = vrot.slane %v5526_v31, 1  ;;  %v5536_v62 = vrot.slane %v5535_v32, 1  ;;  %v5545_v3 = vrot.slane %v5544_v45, 1 }
 0x5a4   : > { %v5483_v57 = vadd.f32 %v5482_v10, %v5481_v28  ;;  %v5492_v61 = vadd.f32 %v5491_v23, %v5490_v26  ;;  %v5501_v63 = vadd.f32 %v5500_v56, %v5499_v60  ;;  %v5510_v4 = vadd.f32 %v5509_v50, %v5508_v46  ;;  %v13390_v46 = vld [vmem:[#allocation24_spill] sm:$0xff]  ;;  %v13396_v56 = vld [vmem:[#allocation35_spill] sm:$0xff] }
 0x5a5   : > { %v5519_v9 = vadd.f32 %v5518_v51, %v5517_v30  ;;  %v5528_v1 = vadd.f32 %v5527_v55, %v5526_v31  ;;  %v5537_v2 = vadd.f32 %v5536_v62, %v5535_v32  ;;  %v5546_v6 = vadd.f32 %v5545_v3, %v5544_v45  ;;  %v13391_v30 = vld [vmem:[#allocation29_spill] sm:$0xff]  ;;  %v13392_v31 = vld [vmem:[#allocation34_spill] sm:$0xff]  ;;  %v13400_v3 = vld [vmem:[#allocation16_spill] sm:$0xff] }
 0x5a6   : > { %v5547_v7 = vmul.f32 0.03125, %v5483_v57  ;;  %v5548_v8 = vmul.f32 0.03125, %v5492_v61  ;;  %v5549_v12 = vmul.f32 0.03125, %v5501_v63  ;;  %v5550_v13 = vmul.f32 0.03125, %v5510_v4  ;;  %v13394_v32 = vld [vmem:[#allocation25_spill] sm:$0xff]  ;;  %v13395_v45 = vld [vmem:[#allocation30_spill] sm:$0xff] }
 0x5a7   : > { %v5551_v20 = vmul.f32 0.03125, %v5519_v9  ;;  %v5552_v21 = vmul.f32 0.03125, %v5528_v1  ;;  %v5553_v53 = vmul.f32 0.03125, %v5537_v2  ;;  %v5554_v24 = vmul.f32 0.03125, %v5546_v6  ;;  %v13398_v55 = vld [vmem:[#allocation26_spill] sm:$0xff]  ;;  %v13399_v61 = vld [vmem:[#allocation31_spill] sm:$0xff] }
 0x5a8   : > { %v5555_v42 = vadd.f32 1e-05, %v5547_v7  ;;  %v5556_v22 = vadd.f32 1e-05, %v5548_v8  ;;  %v5557_v36 = vadd.f32 1e-05, %v5549_v12 }
 0x5a9   : > { %v5558_v52 = vadd.f32 1e-05, %v5550_v13  ;;  %v5559_v41 = vadd.f32 1e-05, %v5551_v20  ;;  %v5560_v15 = vadd.f32 1e-05, %v5552_v21 }
 0x5aa   : > { %9409 = vrsqrt.f32 %v5555_v42  ;;  %v5561_v48 = vadd.f32 1e-05, %v5553_v53  ;;  %v5562_v39 = vadd.f32 1e-05, %v5554_v24  ;;  %v13401_v9 = vld [vmem:[#allocation22_spill] sm:$0xff]  ;;  %v13402_v2 = vld [vmem:[#allocation27_spill] sm:$0xff] }
 0x5ab   : > { %9411 = vrsqrt.f32 %v5556_v22  ;;  %v13403_v7 = vld [vmem:[#allocation32_spill] sm:$0xff]  ;;  %v13404_v12 = vld [vmem:[#allocation17_spill] sm:$0xff]  ;;  %v13405_v20 = vld [vmem:[#allocation23_spill] sm:$0xff] }
 0x5ac   : > { %9413 = vrsqrt.f32 %v5557_v36  ;;  %v13406_v53 = vld [vmem:[#allocation28_spill] sm:$0xff]  ;;  %v13407_v22 = vld [vmem:[#allocation33_spill] sm:$0xff]  ;;  %v13408_v36 = vld [vmem:[#allocation18_spill] sm:$0xff] }
 0x5ad   : > { %9415 = vrsqrt.f32 %v5558_v52 }
 0x5ae   : > { %9417 = vrsqrt.f32 %v5559_v41 }
 0x5af   : > { %9419 = vrsqrt.f32 %v5560_v15 }
 0x5b0   : > { %9421 = vrsqrt.f32 %v5561_v48 }
 0x5b1   : > { %9423 = vrsqrt.f32 %v5562_v39 }
 0x5b4   : > { %v9410_v11 = vpop.eup %9409 }
 0x5b5   : > { %v9412_v47 = vpop.eup %9411  ;;  %v5571_v0 = vmul.f32 %v9410_v11, %v12118_v5  ;;  %v5579_v38 = vmul.f32 %v9410_v11, %v12139_v33  ;;  %v5587_v19 = vmul.f32 %v9410_v11, %v12166_v43  ;;  %v5595_v16 = vmul.f32 %v9410_v11, %v12190_v54  ;;  %v13389_v54 = vld [vmem:[#allocation19_spill] sm:$0xff] }
 0x5b6   : > { %v9414_v25 = vpop.eup %9413  ;;  %v5572_v27 = vmul.f32 %v9412_v47, %v12121_v18  ;;  %v5580_v17 = vmul.f32 %v9412_v47, %v12142_v34  ;;  %v5588_v37 = vmul.f32 %v9412_v47, %v12169_v40  ;;  %v5596_v28 = vmul.f32 %v9412_v47, %v12193_v58  ;;  %v13393_v58 = vld [vmem:[#allocation20_spill] sm:$0xff] }
 0x5b7   : > { %v9416_v26 = vpop.eup %9415  ;;  %v5573_v29 = vmul.f32 %v9414_v25, %v12124_v14  ;;  %v5581_v5 = vmul.f32 %v9414_v25, %v12145_v35  ;;  %v5589_v33 = vmul.f32 %v9414_v25, %v12172_v44  ;;  %v5597_v43 = vmul.f32 %v9414_v25, %v12196_v59  ;;  %v13397_v59 = vld [vmem:[#allocation21_spill] sm:$0xff] }
 0x5b8   : > { %v9418_v49 = vpop.eup %9417  ;;  %v5574_v60 = vmul.f32 %v9416_v26, %v13389_v54  ;;  %v5582_v18 = vmul.f32 %v9416_v26, %v13390_v46  ;;  %v5590_v34 = vmul.f32 %v9416_v26, %v13391_v30  ;;  %v5598_v40 = vmul.f32 %v9416_v26, %v13392_v31 }
 0x5b9   : > { %v9420_v10 = vpop.eup %9419  ;;  %v5575_v23 = vmul.f32 %v9418_v49, %v13393_v58  ;;  %v5583_v14 = vmul.f32 %v9418_v49, %v13394_v32  ;;  %v5591_v35 = vmul.f32 %v9418_v49, %v13395_v45  ;;  %v5599_v44 = vmul.f32 %v9418_v49, %v13396_v56 }
 0x5ba   : > { %v9422_v50 = vpop.eup %9421  ;;  %v5576_v51 = vmul.f32 %v9420_v10, %v13397_v59  ;;  %v5584_v57 = vmul.f32 %v9420_v10, %v13398_v55  ;;  %v5592_v62 = vmul.f32 %v9420_v10, %v13399_v61  ;;  %v5600_v63 = vmul.f32 %v9420_v10, %v13400_v3 }
 0x5bb   : > { %v9424_v4 = vpop.eup %9423  ;;  %v5577_v1 = vmul.f32 %v9422_v50, %v13401_v9  ;;  %v5585_v6 = vmul.f32 %v9422_v50, %v13402_v2  ;;  %v5593_v8 = vmul.f32 %v9422_v50, %v13403_v7  ;;  %v5601_v13 = vmul.f32 %v9422_v50, %v13404_v12 }
 0x5bc   : > { %v5578_v21 = vmul.f32 %v9424_v4, %v13405_v20  ;;  %v5586_v42 = vmul.f32 %v9424_v4, %v13406_v53  ;;  %v5594_v24 = vmul.f32 %v9424_v4, %v13407_v22  ;;  %v5602_v52 = vmul.f32 %v9424_v4, %v13408_v36 }
 0x5bd   : > { %v12309_v41 = vmax.f32 %v5571_v0, 0.0  ;;  %v12311_v15 = vmax.f32 %v5572_v27, 0.0  ;;  %v12313_v48 = vmax.f32 %v5573_v29, 0.0  ;;  %v12315_v39 = vmax.f32 %v5574_v60, 0.0 }
 0x5be   : > { %v12317_v11 = vmax.f32 %v5575_v23, 0.0  ;;  %v12319_v47 = vmax.f32 %v5576_v51, 0.0  ;;  %v12321_v25 = vmax.f32 %v5577_v1, 0.0  ;;  %v12323_v26 = vmax.f32 %v5578_v21, 0.0 }
 0x5bf   : > { %v12325_v49 = vmax.f32 %v5579_v38, 0.0  ;;  %v12327_v54 = vmax.f32 %v5580_v17, 0.0  ;;  %v12329_v0 = vmax.f32 %v5581_v5, 0.0  ;;  %v12331_v27 = vmax.f32 %v5582_v18, 0.0 }
 0x5c0   : > { %v12333_v29 = vmax.f32 %v5583_v14, 0.0  ;;  %v12335_v60 = vmax.f32 %v5584_v57, 0.0  ;;  %v12337_v46 = vmax.f32 %v5585_v6, 0.0  ;;  %v12339_v30 = vmax.f32 %v5586_v42, 0.0 }
 0x5c1   : > { %v12341_v31 = vmax.f32 %v5587_v19, 0.0  ;;  %v12343_v10 = vmax.f32 %v5588_v37, 0.0  ;;  %v12345_v38 = vmax.f32 %v5589_v33, 0.0  ;;  %v12347_v17 = vmax.f32 %v5590_v34, 0.0 }
 0x5c2   : > { %13409 = vst [vmem:[#allocation19_spill] sm:$0xff] %v12333_v29  ;;  %13410 = vst [vmem:[#allocation24_spill] sm:$0xff] %v12335_v60  ;;  %v12349_v5 = vmax.f32 %v5591_v35, 0.0  ;;  %v12351_v18 = vmax.f32 %v5592_v62, 0.0  ;;  %v12353_v58 = vmax.f32 %v5593_v8, 0.0  ;;  %v12355_v23 = vmax.f32 %v5594_v24, 0.0 }
 0x5c3   : > { %13411 = vst [vmem:[#allocation29_spill] sm:$0xff] %v12337_v46  ;;  %13412 = vst [vmem:[#allocation34_spill] sm:$0xff] %v12339_v30  ;;  %v12357_v32 = vmax.f32 %v5595_v16, 0.0  ;;  %v12359_v14 = vmax.f32 %v5596_v28, 0.0  ;;  %v12361_v19 = vmax.f32 %v5597_v43, 0.0  ;;  %v12363_v37 = vmax.f32 %v5598_v40, 0.0 }
 0x5c4   : > { %13413 = vst [vmem:[#allocation20_spill] sm:$0xff] %v12341_v31  ;;  %13414 = vst [vmem:[#allocation25_spill] sm:$0xff] %v12343_v10  ;;  %v12365_v33 = vmax.f32 %v5599_v44, 0.0  ;;  %v12367_v34 = vmax.f32 %v5600_v63, 0.0  ;;  %v12369_v45 = vmax.f32 %v5601_v13, 0.0  ;;  %v12371_v35 = vmax.f32 %v5602_v52, 0.0 }
 0x5c5   : > { %13415 = vst [vmem:[#allocation30_spill] sm:$0xff] %v12345_v38  ;;  %13416 = vst [vmem:[#allocation35_spill] sm:$0xff] %v12347_v17  ;;  %v5636_v56 = vsel %vm5635_vm0, %v12309_v41, -inf  ;;  %v5643_v16 = vsel %vm5635_vm0, %v12311_v15, -inf  ;;  %v5650_v28 = vsel %vm5635_vm0, %v12313_v48, -inf  ;;  %v5657_v43 = vsel %vm5635_vm0, %v12315_v39, -inf }
 0x5c6   : > { %13417 = vst [vmem:[#allocation21_spill] sm:$0xff] %v12349_v5  ;;  %13418 = vst [vmem:[#allocation26_spill] sm:$0xff] %v12351_v18  ;;  %v5637_v40 = vrot.slane %v5636_v56, 4  ;;  %v5644_v44 = vrot.slane %v5643_v16, 4  ;;  %v5651_v50 = vrot.slane %v5650_v28, 4  ;;  %v5658_v59 = vrot.slane %v5657_v43, 4 }
 0x5c7   : > { %13419 = vst [vmem:[#allocation31_spill] sm:$0xff] %v12353_v58  ;;  %13420 = vst [vmem:[#allocation16_spill] sm:$0xff] %v12355_v23  ;;  %v5664_v51 = vsel %vm5635_vm0, %v12317_v11, -inf  ;;  %v5671_v55 = vsel %vm5635_vm0, %v12319_v47, -inf  ;;  %v5678_v57 = vsel %vm5635_vm0, %v12321_v25, -inf  ;;  %v5685_v61 = vsel %vm5635_vm0, %v12323_v26, -inf }
 0x5c8   : > { %13421 = vst [vmem:[#allocation22_spill] sm:$0xff] %v12357_v32  ;;  %13422 = vst [vmem:[#allocation27_spill] sm:$0xff] %v12359_v14  ;;  %v5638_v62 = vmax.f32 %v5636_v56, %v5637_v40  ;;  %v5645_v3 = vmax.f32 %v5643_v16, %v5644_v44  ;;  %v5652_v63 = vmax.f32 %v5650_v28, %v5651_v50  ;;  %v5665_v9 = vrot.slane %v5664_v51, 4 }
 0x5c9   : > { %13423 = vst [vmem:[#allocation32_spill] sm:$0xff] %v12361_v19  ;;  %13424 = vst [vmem:[#allocation17_spill] sm:$0xff] %v12363_v37  ;;  %v5659_v4 = vmax.f32 %v5657_v43, %v5658_v59  ;;  %v5672_v1 = vrot.slane %v5671_v55, 4  ;;  %v5679_v2 = vrot.slane %v5678_v57, 4  ;;  %v5686_v6 = vrot.slane %v5685_v61, 4 }
 0x5ca   : > { %13425 = vst [vmem:[#allocation23_spill] sm:$0xff] %v12365_v33  ;;  %13426 = vst [vmem:[#allocation28_spill] sm:$0xff] %v12367_v34  ;;  %v5639_v7 = vrot.slane %v5638_v62, 2  ;;  %v5646_v8 = vrot.slane %v5645_v3, 2  ;;  %v5653_v12 = vrot.slane %v5652_v63, 2  ;;  %v5666_v20 = vmax.f32 %v5664_v51, %v5665_v9 }
 0x5cb   : > { %13427 = vst [vmem:[#allocation33_spill] sm:$0xff] %v12369_v45  ;;  %13428 = vst [vmem:[#allocation18_spill] sm:$0xff] %v12371_v35  ;;  %v5660_v13 = vrot.slane %v5659_v4, 2  ;;  %v5673_v21 = vmax.f32 %v5671_v55, %v5672_v1  ;;  %v5680_v53 = vmax.f32 %v5678_v57, %v5679_v2  ;;  %v5687_v42 = vmax.f32 %v5685_v61, %v5686_v6 }
 0x5cc   : > { %v5640_v22 = vmax.f32 %v5638_v62, %v5639_v7  ;;  %v5647_v24 = vmax.f32 %v5645_v3, %v5646_v8  ;;  %v5654_v36 = vmax.f32 %v5652_v63, %v5653_v12  ;;  %v5667_v56 = vrot.slane %v5666_v20, 2 }
 0x5cd   : > { %v5661_v52 = vmax.f32 %v5659_v4, %v5660_v13  ;;  %v5674_v16 = vrot.slane %v5673_v21, 2  ;;  %v5681_v28 = vrot.slane %v5680_v53, 2  ;;  %v5688_v43 = vrot.slane %v5687_v42, 2 }
 0x5ce   : > { %v5641_v40 = vrot.slane %v5640_v22, 1  ;;  %v5648_v44 = vrot.slane %v5647_v24, 1  ;;  %v5655_v50 = vrot.slane %v5654_v36, 1  ;;  %v5668_v35 = vmax.f32 %v5666_v20, %v5667_v56 }
 0x5cf   : > { %v5662_v59 = vrot.slane %v5661_v52, 1  ;;  %v5675_v45 = vmax.f32 %v5673_v21, %v5674_v16  ;;  %v5682_v34 = vmax.f32 %v5680_v53, %v5681_v28  ;;  %v5689_v33 = vmax.f32 %v5687_v42, %v5688_v43 }
 0x5d0   : > { %v12389_v51 = vmax.f32 %v5640_v22, %v5641_v40  ;;  %v12391_v55 = vmax.f32 %v5647_v24, %v5648_v44  ;;  %v12393_v57 = vmax.f32 %v5654_v36, %v5655_v50  ;;  %v5669_v62 = vrot.slane %v5668_v35, 1 }
 0x5d1   : > { %v12395_v61 = vmax.f32 %v5661_v52, %v5662_v59  ;;  %v5676_v3 = vrot.slane %v5675_v45, 1  ;;  %v5683_v63 = vrot.slane %v5682_v34, 1  ;;  %v5690_v4 = vrot.slane %v5689_v33, 1 }
 0x5d2   : > { %v5693_v9 = vsel %vm5692_vm1, %v12309_v41, -inf  ;;  %v5700_v1 = vsel %vm5692_vm1, %v12311_v15, -inf  ;;  %v5707_v2 = vsel %vm5692_vm1, %v12313_v48, -inf  ;;  %v5714_v6 = vsel %vm5692_vm1, %v12315_v39, -inf }
 0x5d3   : > { %v12405_v7 = vmax.f32 %v5668_v35, %v5669_v62  ;;  %v12407_v8 = vmax.f32 %v5675_v45, %v5676_v3  ;;  %v12409_v12 = vmax.f32 %v5682_v34, %v5683_v63  ;;  %v12411_v13 = vmax.f32 %v5689_v33, %v5690_v4 }
 0x5d4   : > { %v5694_v20 = vrot.slane %v5693_v9, 4  ;;  %v5701_v21 = vrot.slane %v5700_v1, 4  ;;  %v5708_v53 = vrot.slane %v5707_v2, 4  ;;  %v5715_v42 = vrot.slane %v5714_v6, 4 }
 0x5d5   : > { %v5721_v22 = vsel %vm5692_vm1, %v12317_v11, -inf  ;;  %v5728_v24 = vsel %vm5692_vm1, %v12319_v47, -inf  ;;  %v5735_v35 = vsel %vm5692_vm1, %v12321_v25, -inf  ;;  %v5742_v45 = vsel %vm5692_vm1, %v12323_v26, -inf }
 0x5d6   : > { %v5695_v34 = vmax.f32 %v5693_v9, %v5694_v20  ;;  %v5702_v36 = vmax.f32 %v5700_v1, %v5701_v21  ;;  %v5709_v33 = vmax.f32 %v5707_v2, %v5708_v53  ;;  %v5716_v52 = vmax.f32 %v5714_v6, %v5715_v42 }
 0x5d7   : > { %v5722_v56 = vrot.slane %v5721_v22, 4  ;;  %v5729_v16 = vrot.slane %v5728_v24, 4  ;;  %v5736_v28 = vrot.slane %v5735_v35, 4  ;;  %v5743_v43 = vrot.slane %v5742_v45, 4 }
 0x5d8   : > { %v5696_v40 = vrot.slane %v5695_v34, 2  ;;  %v5703_v44 = vrot.slane %v5702_v36, 2  ;;  %v5710_v50 = vrot.slane %v5709_v33, 2  ;;  %v5717_v59 = vrot.slane %v5716_v52, 2 }
 0x5d9   : > { %v5723_v62 = vmax.f32 %v5721_v22, %v5722_v56  ;;  %v5730_v3 = vmax.f32 %v5728_v24, %v5729_v16  ;;  %v5737_v63 = vmax.f32 %v5735_v35, %v5736_v28  ;;  %v5744_v4 = vmax.f32 %v5742_v45, %v5743_v43 }
 0x5da   : > { %v5697_v37 = vmax.f32 %v5695_v34, %v5696_v40  ;;  %v5704_v19 = vmax.f32 %v5702_v36, %v5703_v44  ;;  %v5711_v14 = vmax.f32 %v5709_v33, %v5710_v50  ;;  %v5718_v9 = vmax.f32 %v5716_v52, %v5717_v59 }
 0x5db   : > { %v5724_v1 = vrot.slane %v5723_v62, 2  ;;  %v5731_v2 = vrot.slane %v5730_v3, 2  ;;  %v5738_v6 = vrot.slane %v5737_v63, 2  ;;  %v5745_v20 = vrot.slane %v5744_v4, 2 }
 0x5dc   : > { %v5698_v21 = vrot.slane %v5697_v37, 1  ;;  %v5705_v53 = vrot.slane %v5704_v19, 1  ;;  %v5712_v42 = vrot.slane %v5711_v14, 1  ;;  %v5719_v32 = vrot.slane %v5718_v9, 1 }
 0x5dd   : > { %v5725_v23 = vmax.f32 %v5723_v62, %v5724_v1  ;;  %v5732_v58 = vmax.f32 %v5730_v3, %v5731_v2  ;;  %v5739_v18 = vmax.f32 %v5737_v63, %v5738_v6  ;;  %v5746_v5 = vmax.f32 %v5744_v4, %v5745_v20 }
 0x5de   : > { %v12421_v22 = vmax.f32 %v5697_v37, %v5698_v21  ;;  %v12423_v24 = vmax.f32 %v5704_v19, %v5705_v53  ;;  %v12425_v35 = vmax.f32 %v5711_v14, %v5712_v42  ;;  %v12427_v45 = vmax.f32 %v5718_v9, %v5719_v32 }
 0x5df   : > { %v5726_v34 = vrot.slane %v5725_v23, 1  ;;  %v5733_v36 = vrot.slane %v5732_v58, 1  ;;  %v5740_v33 = vrot.slane %v5739_v18, 1  ;;  %v5747_v52 = vrot.slane %v5746_v5, 1 }
 0x5e0   : > { %v5758_v40 = vsel %vm5757_vm2, %v12309_v41, -inf  ;;  %v5765_v44 = vsel %vm5757_vm2, %v12311_v15, -inf  ;;  %v5772_v50 = vsel %vm5757_vm2, %v12313_v48, -inf  ;;  %v5779_v59 = vsel %vm5757_vm2, %v12315_v39, -inf }
 0x5e1   : > { %v12437_v14 = vmax.f32 %v5725_v23, %v5726_v34  ;;  %v12439_v32 = vmax.f32 %v5732_v58, %v5733_v36  ;;  %v12441_v28 = vmax.f32 %v5739_v18, %v5740_v33  ;;  %v12443_v43 = vmax.f32 %v5746_v5, %v5747_v52 }
 0x5e2   : > { %v5759_v62 = vrot.slane %v5758_v40, 4  ;;  %v5766_v3 = vrot.slane %v5765_v44, 4  ;;  %v5773_v63 = vrot.slane %v5772_v50, 4  ;;  %v5780_v4 = vrot.slane %v5779_v59, 4 }
 0x5e3   : > { %v5786_v9 = vsel %vm5757_vm2, %v12317_v11, -inf  ;;  %v5793_v1 = vsel %vm5757_vm2, %v12319_v47, -inf  ;;  %v5800_v2 = vsel %vm5757_vm2, %v12321_v25, -inf  ;;  %v5807_v6 = vsel %vm5757_vm2, %v12323_v26, -inf }
 0x5e4   : > { %v5760_v20 = vmax.f32 %v5758_v40, %v5759_v62  ;;  %v5767_v21 = vmax.f32 %v5765_v44, %v5766_v3  ;;  %v5774_v53 = vmax.f32 %v5772_v50, %v5773_v63  ;;  %v5781_v42 = vmax.f32 %v5779_v59, %v5780_v4 }
 0x5e5   : > { %v5787_v34 = vrot.slane %v5786_v9, 4  ;;  %v5794_v36 = vrot.slane %v5793_v1, 4  ;;  %v5801_v33 = vrot.slane %v5800_v2, 4  ;;  %v5808_v52 = vrot.slane %v5807_v6, 4 }
 0x5e6   : > { %v5761_v23 = vrot.slane %v5760_v20, 2  ;;  %v5768_v5 = vrot.slane %v5767_v21, 2  ;;  %v5775_v18 = vrot.slane %v5774_v53, 2  ;;  %v5782_v58 = vrot.slane %v5781_v42, 2 }
 0x5e7   : > { %v5788_v19 = vmax.f32 %v5786_v9, %v5787_v34  ;;  %v5795_v37 = vmax.f32 %v5793_v1, %v5794_v36  ;;  %v5802_v16 = vmax.f32 %v5800_v2, %v5801_v33  ;;  %v5809_v56 = vmax.f32 %v5807_v6, %v5808_v52 }
 0x5e8   : > { %v5762_v17 = vmax.f32 %v5760_v20, %v5761_v23  ;;  %v5769_v38 = vmax.f32 %v5767_v21, %v5768_v5  ;;  %v5776_v10 = vmax.f32 %v5774_v53, %v5775_v18  ;;  %v5783_v31 = vmax.f32 %v5781_v42, %v5782_v58 }
 0x5e9   : > { %v5789_v40 = vrot.slane %v5788_v19, 2  ;;  %v5796_v44 = vrot.slane %v5795_v37, 2  ;;  %v5803_v50 = vrot.slane %v5802_v16, 2  ;;  %v5810_v59 = vrot.slane %v5809_v56, 2 }
 0x5ea   : > { %v5763_v62 = vrot.slane %v5762_v17, 1  ;;  %v5770_v3 = vrot.slane %v5769_v38, 1  ;;  %v5777_v63 = vrot.slane %v5776_v10, 1  ;;  %v5784_v4 = vrot.slane %v5783_v31, 1 }
 0x5eb   : > { %v5790_v30 = vmax.f32 %v5788_v19, %v5789_v40  ;;  %v5797_v46 = vmax.f32 %v5795_v37, %v5796_v44  ;;  %v5804_v60 = vmax.f32 %v5802_v16, %v5803_v50  ;;  %v5811_v29 = vmax.f32 %v5809_v56, %v5810_v59 }
 0x5ec   : > { %v12469_v9 = vmax.f32 %v5762_v17, %v5763_v62  ;;  %v12471_v1 = vmax.f32 %v5769_v38, %v5770_v3  ;;  %v12473_v23 = vmax.f32 %v5776_v10, %v5777_v63  ;;  %v12475_v18 = vmax.f32 %v5783_v31, %v5784_v4 }
 0x5ed   : > { %v5791_v58 = vrot.slane %v5790_v30, 1  ;;  %v5798_v5 = vrot.slane %v5797_v46, 1  ;;  %v5805_v2 = vrot.slane %v5804_v60, 1  ;;  %v5812_v6 = vrot.slane %v5811_v29, 1 }
 0x5ee   : > { %v5815_v20 = vsel %vm5814_vm3, %v12309_v41, -inf  ;;  %v5822_v37 = vsel %vm5814_vm3, %v12311_v15, -inf  ;;  %v5829_v17 = vsel %vm5814_vm3, %v12313_v48, -inf  ;;  %v5836_v38 = vsel %vm5814_vm3, %v12315_v39, -inf }
 0x5ef   : > { %v12485_v10 = vmax.f32 %v5790_v30, %v5791_v58  ;;  %v12487_v31 = vmax.f32 %v5797_v46, %v5798_v5  ;;  %v12489_v56 = vmax.f32 %v5804_v60, %v5805_v2  ;;  %v12491_v16 = vmax.f32 %v5811_v29, %v5812_v6 }
 0x5f0   : > { %v5816_v19 = vrot.slane %v5815_v20, 4  ;;  %v5823_v21 = vrot.slane %v5822_v37, 4  ;;  %v5830_v41 = vrot.slane %v5829_v17, 4  ;;  %v5837_v53 = vrot.slane %v5836_v38, 4 }
 0x5f1   : > { %v5843_v15 = vsel %vm5814_vm3, %v12317_v11, -inf  ;;  %v5850_v48 = vsel %vm5814_vm3, %v12319_v47, -inf  ;;  %v5857_v39 = vsel %vm5814_vm3, %v12321_v25, -inf  ;;  %v5864_v46 = vsel %vm5814_vm3, %v12323_v26, -inf }
 0x5f2   : > { %v5817_v60 = vmax.f32 %v5815_v20, %v5816_v19  ;;  %v5824_v30 = vmax.f32 %v5822_v37, %v5823_v21  ;;  %v5831_v29 = vmax.f32 %v5829_v17, %v5830_v41  ;;  %v5838_v42 = vmax.f32 %v5836_v38, %v5837_v53 }
 0x5f3   : > { %v5844_v34 = vrot.slane %v5843_v15, 4  ;;  %v5851_v36 = vrot.slane %v5850_v48, 4  ;;  %v5858_v33 = vrot.slane %v5857_v39, 4  ;;  %v5865_v52 = vrot.slane %v5864_v46, 4 }
 0x5f4   : > { %v5818_v40 = vrot.slane %v5817_v60, 2  ;;  %v5825_v44 = vrot.slane %v5824_v30, 2  ;;  %v5832_v11 = vrot.slane %v5831_v29, 2  ;;  %v5839_v50 = vrot.slane %v5838_v42, 2 }
 0x5f5   : > { %v5845_v59 = vmax.f32 %v5843_v15, %v5844_v34  ;;  %v5852_v47 = vmax.f32 %v5850_v48, %v5851_v36  ;;  %v5859_v62 = vmax.f32 %v5857_v39, %v5858_v33  ;;  %v5866_v3 = vmax.f32 %v5864_v46, %v5865_v52 }
 0x5f6   : > { %v5819_v25 = vmax.f32 %v5817_v60, %v5818_v40  ;;  %v5826_v63 = vmax.f32 %v5824_v30, %v5825_v44  ;;  %v5833_v4 = vmax.f32 %v5831_v29, %v5832_v11  ;;  %v5840_v26 = vmax.f32 %v5838_v42, %v5839_v50 }
 0x5f7   : > { %v5846_v58 = vrot.slane %v5845_v59, 2  ;;  %v5853_v5 = vrot.slane %v5852_v47, 2  ;;  %v5860_v2 = vrot.slane %v5859_v62, 2  ;;  %v5867_v6 = vrot.slane %v5866_v3, 2 }
 0x5f8   : > { %v5820_v20 = vrot.slane %v5819_v25, 1  ;;  %v5827_v37 = vrot.slane %v5826_v63, 1  ;;  %v5834_v17 = vrot.slane %v5833_v4, 1  ;;  %v5841_v38 = vrot.slane %v5840_v26, 1 }
 0x5f9   : > { %v5847_v19 = vmax.f32 %v5845_v59, %v5846_v58  ;;  %v5854_v21 = vmax.f32 %v5852_v47, %v5853_v5  ;;  %v5861_v41 = vmax.f32 %v5859_v62, %v5860_v2  ;;  %v5868_v53 = vmax.f32 %v5866_v3, %v5867_v6 }
 0x5fa   : > { %v12501_v15 = vmax.f32 %v5819_v25, %v5820_v20  ;;  %v12503_v48 = vmax.f32 %v5826_v63, %v5827_v37  ;;  %v12505_v39 = vmax.f32 %v5833_v4, %v5834_v17  ;;  %v12507_v46 = vmax.f32 %v5840_v26, %v5841_v38  ;;  %v13445_v38 = vld [vmem:[#allocation19_spill] sm:$0xff] }
 0x5fb   : > { %v5848_v60 = vrot.slane %v5847_v19, 1  ;;  %v5855_v30 = vrot.slane %v5854_v21, 1  ;;  %v5862_v29 = vrot.slane %v5861_v41, 1  ;;  %v5869_v42 = vrot.slane %v5868_v53, 1 }
 0x5fc   : > { %13429 = vst [vmem:[#allocation36_spill] sm:$0xff] %v12501_v15  ;;  %13430 = vst [vmem:[#allocation37_spill] sm:$0xff] %v12503_v48  ;;  %v5871_v34 = vmax.f32 %v12469_v9, %v12501_v15  ;;  %v5872_v36 = vmax.f32 %v12471_v1, %v12503_v48  ;;  %v5873_v33 = vmax.f32 %v12473_v23, %v12505_v39  ;;  %v5901_v4 = vsel %vm5635_vm0, %v12329_v0, -inf }
 0x5fd   : > { %13431 = vst [vmem:[#allocation38_spill] sm:$0xff] %v12505_v39  ;;  %13432 = vst [vmem:[#allocation39_spill] sm:$0xff] %v12507_v46  ;;  %v5874_v52 = vmax.f32 %v12475_v18, %v12507_v46  ;;  %v12517_v40 = vmax.f32 %v5847_v19, %v5848_v60  ;;  %v12519_v44 = vmax.f32 %v5854_v21, %v5855_v30  ;;  %v5915_v19 = vsel %vm5635_vm0, %v13445_v38, -inf }
 0x5fe   : > { %v12521_v11 = vmax.f32 %v5861_v41, %v5862_v29  ;;  %v12523_v50 = vmax.f32 %v5868_v53, %v5869_v42  ;;  %v13437_v9 = vmax.f32 %v12389_v51, %v12421_v22  ;;  %v13438_v1 = vmax.f32 %v12391_v55, %v12423_v24  ;;  %v13447_v41 = vld [vmem:[#allocation29_spill] sm:$0xff]  ;;  %v13448_v53 = vld [vmem:[#allocation34_spill] sm:$0xff] }
 0x5ff   : > { %13433 = vst [vmem:[#allocation40_spill] sm:$0xff] %v12517_v40  ;;  %13434 = vst [vmem:[#allocation41_spill] sm:$0xff] %v12519_v44  ;;  %v13439_v18 = vmax.f32 %v12393_v57, %v12425_v35  ;;  %v13440_v62 = vmax.f32 %v12395_v61, %v12427_v45  ;;  %v5875_v51 = vmax.f32 %v12485_v10, %v12517_v40  ;;  %v5887_v57 = vsel %vm5635_vm0, %v12325_v49, -inf }
 0x600   : > { %13435 = vst [vmem:[#allocation42_spill] sm:$0xff] %v12521_v11  ;;  %13436 = vst [vmem:[#allocation43_spill] sm:$0xff] %v12523_v50  ;;  %v12528_v59 = vadd.f32 %v5871_v34, %v13437_v9  ;;  %v12533_v23 = vadd.f32 %v5872_v36, %v13438_v1  ;;  %v5876_v25 = vmax.f32 %v12487_v31, %v12519_v44  ;;  %v5894_v61 = vsel %vm5635_vm0, %v12327_v54, -inf }
 0x601   : > { %v12538_v47 = vadd.f32 %v5873_v33, %v13439_v18  ;;  %v12543_v3 = vadd.f32 %v5874_v52, %v13440_v62  ;;  %v5877_v55 = vmax.f32 %v12489_v56, %v12521_v11  ;;  %v5878_v63 = vmax.f32 %v12491_v16, %v12523_v50 }
 0x602   : > { %v5908_v10 = vsel %vm5635_vm0, %v12331_v27, -inf  ;;  %v13441_v31 = vmax.f32 %v12405_v7, %v12437_v14  ;;  %v13442_v56 = vmax.f32 %v12407_v8, %v12439_v32  ;;  %v13443_v58 = vmax.f32 %v12409_v12, %v12441_v28  ;;  %v13446_v8 = vld [vmem:[#allocation24_spill] sm:$0xff] }
 0x603   : > { %v13444_v2 = vmax.f32 %v12411_v13, %v12443_v43  ;;  %v5888_v20 = vrot.slane %v5887_v57, 4  ;;  %v5895_v37 = vrot.slane %v5894_v61, 4  ;;  %v5902_v7 = vrot.slane %v5901_v4, 4 }
 0x604   : > { %v12564_v26 = vadd.f32 %v5875_v51, %v13441_v31  ;;  %v12569_v16 = vadd.f32 %v5876_v25, %v13442_v56  ;;  %v12574_v5 = vadd.f32 %v5877_v55, %v13443_v58  ;;  %v5909_v17 = vrot.slane %v5908_v10, 4 }
 0x605   : > { %v12579_v6 = vadd.f32 %v5878_v63, %v13444_v2  ;;  %v5922_v21 = vsel %vm5635_vm0, %v13446_v8, -inf  ;;  %v5929_v12 = vsel %vm5635_vm0, %v13447_v41, -inf  ;;  %v5936_v60 = vsel %vm5635_vm0, %v13448_v53, -inf }
 0x606   : > { %v5889_v30 = vmax.f32 %v5887_v57, %v5888_v20  ;;  %v5896_v13 = vmax.f32 %v5894_v61, %v5895_v37  ;;  %v5903_v29 = vmax.f32 %v5901_v4, %v5902_v7  ;;  %v5910_v42 = vmax.f32 %v5908_v10, %v5909_v17 }
 0x607   : > { %v5916_v34 = vrot.slane %v5915_v19, 4  ;;  %v5923_v36 = vrot.slane %v5922_v21, 4  ;;  %v5930_v33 = vrot.slane %v5929_v12, 4  ;;  %v5937_v52 = vrot.slane %v5936_v60, 4 }
 0x608   : > { %v5890_v9 = vrot.slane %v5889_v30, 2  ;;  %v5897_v1 = vrot.slane %v5896_v13, 2  ;;  %v5904_v18 = vrot.slane %v5903_v29, 2  ;;  %v5911_v62 = vrot.slane %v5910_v42, 2 }
 0x609   : > { %v5917_v51 = vmax.f32 %v5915_v19, %v5916_v34  ;;  %v5924_v25 = vmax.f32 %v5922_v21, %v5923_v36  ;;  %v5931_v55 = vmax.f32 %v5929_v12, %v5930_v33  ;;  %v5938_v63 = vmax.f32 %v5936_v60, %v5937_v52 }
 0x60a   : > { %v5891_v31 = vmax.f32 %v5889_v30, %v5890_v9  ;;  %v5898_v56 = vmax.f32 %v5896_v13, %v5897_v1  ;;  %v5905_v58 = vmax.f32 %v5903_v29, %v5904_v18  ;;  %v5912_v2 = vmax.f32 %v5910_v42, %v5911_v62 }
 0x60b   : > { %v5918_v57 = vrot.slane %v5917_v51, 2  ;;  %v5925_v61 = vrot.slane %v5924_v25, 2  ;;  %v5932_v4 = vrot.slane %v5931_v55, 2  ;;  %v5939_v10 = vrot.slane %v5938_v63, 2 }
 0x60c   : > { %v5892_v20 = vrot.slane %v5891_v31, 1  ;;  %v5899_v37 = vrot.slane %v5898_v56, 1  ;;  %v5906_v7 = vrot.slane %v5905_v58, 1  ;;  %v5913_v17 = vrot.slane %v5912_v2, 1 }
 0x60d   : > { %v5919_v50 = vmax.f32 %v5917_v51, %v5918_v57  ;;  %v5926_v11 = vmax.f32 %v5924_v25, %v5925_v61  ;;  %v5933_v44 = vmax.f32 %v5931_v55, %v5932_v4  ;;  %v5940_v40 = vmax.f32 %v5938_v63, %v5939_v10 }
 0x60e   : > { %v12589_v19 = vmax.f32 %v5891_v31, %v5892_v20  ;;  %v12591_v21 = vmax.f32 %v5898_v56, %v5899_v37  ;;  %v12593_v12 = vmax.f32 %v5905_v58, %v5906_v7  ;;  %v12595_v60 = vmax.f32 %v5912_v2, %v5913_v17 }
 0x60f   : > { %v5920_v30 = vrot.slane %v5919_v50, 1  ;;  %v5927_v13 = vrot.slane %v5926_v11, 1  ;;  %v5934_v29 = vrot.slane %v5933_v44, 1  ;;  %v5941_v42 = vrot.slane %v5940_v40, 1 }
 0x610   : > { %v5951_v51 = vsel %vm5692_vm1, %v12325_v49, -inf  ;;  %v5958_v25 = vsel %vm5692_vm1, %v12327_v54, -inf  ;;  %v5965_v55 = vsel %vm5692_vm1, %v12329_v0, -inf  ;;  %v5972_v63 = vsel %vm5692_vm1, %v12331_v27, -inf }
 0x611   : > { %v12605_v9 = vmax.f32 %v5919_v50, %v5920_v30  ;;  %v12607_v1 = vmax.f32 %v5926_v11, %v5927_v13  ;;  %v12609_v18 = vmax.f32 %v5933_v44, %v5934_v29  ;;  %v12611_v62 = vmax.f32 %v5940_v40, %v5941_v42 }
 0x612   : > { %v5952_v31 = vrot.slane %v5951_v51, 4  ;;  %v5959_v56 = vrot.slane %v5958_v25, 4  ;;  %v5966_v58 = vrot.slane %v5965_v55, 4  ;;  %v5973_v2 = vrot.slane %v5972_v63, 4 }
 0x613   : > { %v5979_v57 = vsel %vm5692_vm1, %v13445_v38, -inf  ;;  %v5986_v61 = vsel %vm5692_vm1, %v13446_v8, -inf  ;;  %v5993_v4 = vsel %vm5692_vm1, %v13447_v41, -inf  ;;  %v6000_v10 = vsel %vm5692_vm1, %v13448_v53, -inf }
 0x614   : > { %v5953_v20 = vmax.f32 %v5951_v51, %v5952_v31  ;;  %v5960_v37 = vmax.f32 %v5958_v25, %v5959_v56  ;;  %v5967_v7 = vmax.f32 %v5965_v55, %v5966_v58  ;;  %v5974_v17 = vmax.f32 %v5972_v63, %v5973_v2 }
 0x615   : > { %v5980_v30 = vrot.slane %v5979_v57, 4  ;;  %v5987_v13 = vrot.slane %v5986_v61, 4  ;;  %v5994_v29 = vrot.slane %v5993_v4, 4  ;;  %v6001_v42 = vrot.slane %v6000_v10, 4 }
 0x616   : > { %v5954_v50 = vrot.slane %v5953_v20, 2  ;;  %v5961_v40 = vrot.slane %v5960_v37, 2  ;;  %v5968_v44 = vrot.slane %v5967_v7, 2  ;;  %v5975_v11 = vrot.slane %v5974_v17, 2 }
 0x617   : > { %v5981_v52 = vmax.f32 %v5979_v57, %v5980_v30  ;;  %v5988_v33 = vmax.f32 %v5986_v61, %v5987_v13  ;;  %v5995_v36 = vmax.f32 %v5993_v4, %v5994_v29  ;;  %v6002_v34 = vmax.f32 %v6000_v10, %v6001_v42  ;;  %v13458_v29 = vld [vmem:[#allocation24_spill] sm:$0xff]  ;;  %v13459_v42 = vld [vmem:[#allocation29_spill] sm:$0xff] }
 0x618   : > { %v5955_v46 = vmax.f32 %v5953_v20, %v5954_v50  ;;  %v5962_v39 = vmax.f32 %v5960_v37, %v5961_v40  ;;  %v5969_v48 = vmax.f32 %v5967_v7, %v5968_v44  ;;  %v5976_v15 = vmax.f32 %v5974_v17, %v5975_v11 }
 0x619   : > { %v5982_v51 = vrot.slane %v5981_v52, 2  ;;  %v5989_v25 = vrot.slane %v5988_v33, 2  ;;  %v5996_v55 = vrot.slane %v5995_v36, 2  ;;  %v6003_v63 = vrot.slane %v6002_v34, 2 }
 0x61a   : > { %v5956_v31 = vrot.slane %v5955_v46, 1  ;;  %v5963_v56 = vrot.slane %v5962_v39, 1  ;;  %v5970_v58 = vrot.slane %v5969_v48, 1  ;;  %v5977_v2 = vrot.slane %v5976_v15, 1 }
 0x61b   : > { %v5983_v53 = vmax.f32 %v5981_v52, %v5982_v51  ;;  %v5990_v41 = vmax.f32 %v5988_v33, %v5989_v25  ;;  %v5997_v8 = vmax.f32 %v5995_v36, %v5996_v55  ;;  %v6004_v38 = vmax.f32 %v6002_v34, %v6003_v63  ;;  %v13460_v51 = vld [vmem:[#allocation34_spill] sm:$0xff] }
 0x61c   : > { %v5957_v57 = vmax.f32 %v5955_v46, %v5956_v31  ;;  %v5964_v61 = vmax.f32 %v5962_v39, %v5963_v56  ;;  %v5971_v4 = vmax.f32 %v5969_v48, %v5970_v58  ;;  %v5978_v10 = vmax.f32 %v5976_v15, %v5977_v2 }
 0x61d   : > { %v5984_v50 = vrot.slane %v5983_v53, 1  ;;  %v5991_v40 = vrot.slane %v5990_v41, 1  ;;  %v5998_v44 = vrot.slane %v5997_v8, 1  ;;  %v6005_v11 = vrot.slane %v6004_v38, 1 }
 0x61e   : > { %v13449_v20 = vmax.f32 %v12421_v22, %v12589_v19  ;;  %v13450_v7 = vmax.f32 %v12423_v24, %v12591_v21  ;;  %v13451_v36 = vmax.f32 %v12425_v35, %v12593_v12  ;;  %v13452_v48 = vmax.f32 %v12427_v45, %v12595_v60 }
 0x61f   : > { %v5985_v39 = vmax.f32 %v5983_v53, %v5984_v50  ;;  %v5992_v46 = vmax.f32 %v5990_v41, %v5991_v40  ;;  %v5999_v33 = vmax.f32 %v5997_v8, %v5998_v44  ;;  %v6006_v52 = vmax.f32 %v6004_v38, %v6005_v11 }
 0x620   : > { %v6007_v37 = vmax.f32 %v13449_v20, %v5957_v57  ;;  %v6008_v17 = vmax.f32 %v13450_v7, %v5964_v61  ;;  %v6009_v34 = vmax.f32 %v13451_v36, %v5971_v4  ;;  %v6010_v15 = vmax.f32 %v13452_v48, %v5978_v10 }
 0x621   : > { %v13453_v45 = vmax.f32 %v12437_v14, %v12605_v9  ;;  %v13454_v8 = vmax.f32 %v12439_v32, %v12607_v1  ;;  %v6030_v53 = vsel %vm5757_vm2, %v12327_v54, -inf  ;;  %v6037_v14 = vsel %vm5757_vm2, %v12329_v0, -inf }
 0x622   : > { %v12650_v30 = vadd.f32 %v6007_v37, %v12528_v59  ;;  %v12653_v22 = vadd.f32 %v6008_v17, %v12533_v23  ;;  %v12656_v24 = vadd.f32 %v6009_v34, %v12538_v47  ;;  %v12659_v35 = vadd.f32 %v6010_v15, %v12543_v3 }
 0x623   : > { %v6011_v19 = vmax.f32 %v13453_v45, %v5985_v39  ;;  %v6012_v38 = vmax.f32 %v13454_v8, %v5992_v46  ;;  %v13455_v59 = vmax.f32 %v12441_v28, %v12609_v18  ;;  %v13456_v23 = vmax.f32 %v12443_v43, %v12611_v62  ;;  %v13457_v62 = vld [vmem:[#allocation19_spill] sm:$0xff] }
 0x624   : > { %v6023_v3 = vsel %vm5757_vm2, %v12325_v49, -inf  ;;  %v6044_v32 = vsel %vm5757_vm2, %v12331_v27, -inf  ;;  %v6031_v9 = vrot.slane %v6030_v53, 4  ;;  %v6038_v1 = vrot.slane %v6037_v14, 4 }
 0x625   : > { %v6013_v41 = vmax.f32 %v13455_v59, %v5999_v33  ;;  %v6014_v47 = vmax.f32 %v13456_v23, %v6006_v52  ;;  %v12682_v21 = vadd.f32 %v6011_v19, %v12564_v26  ;;  %v12685_v28 = vadd.f32 %v6012_v38, %v12569_v16 }
 0x626   : > { %v6024_v60 = vrot.slane %v6023_v3, 4  ;;  %v6045_v18 = vrot.slane %v6044_v32, 4  ;;  %v6051_v13 = vsel %vm5757_vm2, %v13457_v62, -inf  ;;  %v6058_v26 = vsel %vm5757_vm2, %v13458_v29, -inf }
 0x627   : > { %v12688_v43 = vadd.f32 %v6013_v41, %v12574_v5  ;;  %v12691_v12 = vadd.f32 %v6014_v47, %v12579_v6  ;;  %v6065_v16 = vsel %vm5757_vm2, %v13459_v42, -inf  ;;  %v6072_v5 = vsel %vm5757_vm2, %v13460_v51, -inf }
 0x628   : > { %v6025_v25 = vmax.f32 %v6023_v3, %v6024_v60  ;;  %v6032_v55 = vmax.f32 %v6030_v53, %v6031_v9  ;;  %v6039_v6 = vmax.f32 %v6037_v14, %v6038_v1  ;;  %v6046_v63 = vmax.f32 %v6044_v32, %v6045_v18  ;;  %v13461_v60 = vld [vmem:[#allocation36_spill] sm:$0xff]  ;;  %v13462_v1 = vld [vmem:[#allocation37_spill] sm:$0xff] }
 0x629   : > { %v6052_v31 = vrot.slane %v6051_v13, 4  ;;  %v6059_v56 = vrot.slane %v6058_v26, 4  ;;  %v6066_v58 = vrot.slane %v6065_v16, 4  ;;  %v6073_v2 = vrot.slane %v6072_v5, 4 }
 0x62a   : > { %v6026_v57 = vrot.slane %v6025_v25, 2  ;;  %v6033_v61 = vrot.slane %v6032_v55, 2  ;;  %v6040_v4 = vrot.slane %v6039_v6, 2  ;;  %v6047_v10 = vrot.slane %v6046_v63, 2 }
 0x62b   : > { %v6053_v50 = vmax.f32 %v6051_v13, %v6052_v31  ;;  %v6060_v40 = vmax.f32 %v6058_v26, %v6059_v56  ;;  %v6067_v44 = vmax.f32 %v6065_v16, %v6066_v58  ;;  %v6074_v11 = vmax.f32 %v6072_v5, %v6073_v2  ;;  %v13463_v13 = vld [vmem:[#allocation38_spill] sm:$0xff]  ;;  %v13464_v16 = vld [vmem:[#allocation39_spill] sm:$0xff] }
 0x62c   : > { %v6027_v20 = vmax.f32 %v6025_v25, %v6026_v57  ;;  %v6034_v37 = vmax.f32 %v6032_v55, %v6033_v61  ;;  %v6041_v7 = vmax.f32 %v6039_v6, %v6040_v4  ;;  %v6048_v17 = vmax.f32 %v6046_v63, %v6047_v10  ;;  %v13465_v57 = vld [vmem:[#allocation40_spill] sm:$0xff]  ;;  %v13466_v4 = vld [vmem:[#allocation41_spill] sm:$0xff] }
 0x62d   : > { %v6054_v36 = vrot.slane %v6053_v50, 2  ;;  %v6061_v34 = vrot.slane %v6060_v40, 2  ;;  %v6068_v48 = vrot.slane %v6067_v44, 2  ;;  %v6075_v15 = vrot.slane %v6074_v11, 2 }
 0x62e   : > { %v6028_v39 = vrot.slane %v6027_v20, 1  ;;  %v6035_v46 = vrot.slane %v6034_v37, 1  ;;  %v6042_v33 = vrot.slane %v6041_v7, 1  ;;  %v6049_v52 = vrot.slane %v6048_v17, 1 }
 0x62f   : > { %v6055_v45 = vmax.f32 %v6053_v50, %v6054_v36  ;;  %v6062_v19 = vmax.f32 %v6060_v40, %v6061_v34  ;;  %v6069_v8 = vmax.f32 %v6067_v44, %v6068_v48  ;;  %v6076_v38 = vmax.f32 %v6074_v11, %v6075_v15  ;;  %v13467_v50 = vld [vmem:[#allocation42_spill] sm:$0xff] }
 0x630   : > { %v12701_v59 = vmax.f32 %v6027_v20, %v6028_v39  ;;  %v12703_v41 = vmax.f32 %v6034_v37, %v6035_v46  ;;  %v12705_v23 = vmax.f32 %v6041_v7, %v6042_v33  ;;  %v12707_v47 = vmax.f32 %v6048_v17, %v6049_v52 }
 0x631   : > { %v6056_v3 = vrot.slane %v6055_v45, 1  ;;  %v6063_v53 = vrot.slane %v6062_v19, 1  ;;  %v6070_v14 = vrot.slane %v6069_v8, 1  ;;  %v6077_v32 = vrot.slane %v6076_v38, 1 }
 0x632   : > { %v6079_v9 = vmax.f32 %v13461_v60, %v12701_v59  ;;  %v6080_v18 = vmax.f32 %v13462_v1, %v12703_v41  ;;  %v6081_v26 = vmax.f32 %v13463_v13, %v12705_v23  ;;  %v6082_v5 = vmax.f32 %v13464_v16, %v12707_v47 }
 0x633   : > { %v12717_v25 = vmax.f32 %v6055_v45, %v6056_v3  ;;  %v12719_v55 = vmax.f32 %v6062_v19, %v6063_v53  ;;  %v12721_v6 = vmax.f32 %v6069_v8, %v6070_v14  ;;  %v12723_v63 = vmax.f32 %v6076_v38, %v6077_v32 }
 0x634   : > { %v6087_v31 = vsel %vm5814_vm3, %v12325_v49, -inf  ;;  %v6094_v56 = vsel %vm5814_vm3, %v12327_v54, -inf  ;;  %v6101_v58 = vsel %vm5814_vm3, %v12329_v0, -inf  ;;  %v6108_v2 = vsel %vm5814_vm3, %v12331_v27, -inf  ;;  %v13468_v49 = vld [vmem:[#allocation43_spill] sm:$0xff] }
 0x635   : > { %v6088_v11 = vrot.slane %v6087_v31, 4  ;;  %v6095_v54 = vrot.slane %v6094_v56, 4  ;;  %v6102_v20 = vrot.slane %v6101_v58, 4  ;;  %v6109_v37 = vrot.slane %v6108_v2, 4 }
 0x636   : > { %v6115_v0 = vsel %vm5814_vm3, %v13457_v62, -inf  ;;  %v6122_v27 = vsel %vm5814_vm3, %v13458_v29, -inf  ;;  %v6129_v7 = vsel %vm5814_vm3, %v13459_v42, -inf  ;;  %v6136_v17 = vsel %vm5814_vm3, %v13460_v51, -inf }
 0x637   : > { %v6089_v36 = vmax.f32 %v6087_v31, %v6088_v11  ;;  %v6096_v34 = vmax.f32 %v6094_v56, %v6095_v54  ;;  %v6103_v48 = vmax.f32 %v6101_v58, %v6102_v20  ;;  %v6110_v15 = vmax.f32 %v6108_v2, %v6109_v37 }
 0x638   : > { %v6116_v39 = vrot.slane %v6115_v0, 4  ;;  %v6123_v46 = vrot.slane %v6122_v27, 4  ;;  %v6130_v33 = vrot.slane %v6129_v7, 4  ;;  %v6137_v52 = vrot.slane %v6136_v17, 4 }
 0x639   : > { %v6090_v45 = vrot.slane %v6089_v36, 2  ;;  %v6097_v19 = vrot.slane %v6096_v34, 2  ;;  %v6104_v62 = vrot.slane %v6103_v48, 2  ;;  %v6111_v8 = vrot.slane %v6110_v15, 2 }
 0x63a   : > { %v6117_v38 = vmax.f32 %v6115_v0, %v6116_v39  ;;  %v6124_v29 = vmax.f32 %v6122_v27, %v6123_v46  ;;  %v6131_v3 = vmax.f32 %v6129_v7, %v6130_v33  ;;  %v6138_v53 = vmax.f32 %v6136_v17, %v6137_v52 }
 0x63b   : > { %v6091_v42 = vmax.f32 %v6089_v36, %v6090_v45  ;;  %v6098_v14 = vmax.f32 %v6096_v34, %v6097_v19  ;;  %v6105_v32 = vmax.f32 %v6103_v48, %v6104_v62  ;;  %v6112_v51 = vmax.f32 %v6110_v15, %v6111_v8 }
 0x63c   : > { %v6118_v31 = vrot.slane %v6117_v38, 2  ;;  %v6125_v56 = vrot.slane %v6124_v29, 2  ;;  %v6132_v58 = vrot.slane %v6131_v3, 2  ;;  %v6139_v2 = vrot.slane %v6138_v53, 2 }
 0x63d   : > { %v6092_v11 = vrot.slane %v6091_v42, 1  ;;  %v6099_v54 = vrot.slane %v6098_v14, 1  ;;  %v6106_v20 = vrot.slane %v6105_v32, 1  ;;  %v6113_v37 = vrot.slane %v6112_v51, 1 }
 0x63e   : > { %v6119_v44 = vmax.f32 %v6117_v38, %v6118_v31  ;;  %v6126_v40 = vmax.f32 %v6124_v29, %v6125_v56  ;;  %v6133_v10 = vmax.f32 %v6131_v3, %v6132_v58  ;;  %v6140_v61 = vmax.f32 %v6138_v53, %v6139_v2  ;;  %v13473_v3 = vld [vmem:[#allocation20_spill] sm:$0xff]  ;;  %v13476_v56 = vld [vmem:[#allocation35_spill] sm:$0xff]  ;;  %v13477_v2 = vld [vmem:[#allocation21_spill] sm:$0xff] }
 0x63f   : > { %v6093_v0 = vmax.f32 %v6091_v42, %v6092_v11  ;;  %v6100_v27 = vmax.f32 %v6098_v14, %v6099_v54  ;;  %v6107_v7 = vmax.f32 %v6105_v32, %v6106_v20  ;;  %v6114_v17 = vmax.f32 %v6112_v51, %v6113_v37  ;;  %v13475_v51 = vld [vmem:[#allocation30_spill] sm:$0xff] }
 0x640   : > { %v6120_v36 = vrot.slane %v6119_v44, 1  ;;  %v6127_v34 = vrot.slane %v6126_v40, 1  ;;  %v6134_v48 = vrot.slane %v6133_v10, 1  ;;  %v6141_v15 = vrot.slane %v6140_v61, 1 }
 0x641   : > { %v6143_v39 = vmax.f32 %v6079_v9, %v6093_v0  ;;  %v6144_v46 = vmax.f32 %v6080_v18, %v6100_v27  ;;  %v6145_v33 = vmax.f32 %v6081_v26, %v6107_v7  ;;  %v6146_v52 = vmax.f32 %v6082_v5, %v6114_v17  ;;  %v13479_v17 = vld [vmem:[#allocation26_spill] sm:$0xff] }
 0x642   : > { %v6121_v45 = vmax.f32 %v6119_v44, %v6120_v36  ;;  %v6128_v19 = vmax.f32 %v6126_v40, %v6127_v34  ;;  %v6135_v62 = vmax.f32 %v6133_v10, %v6134_v48  ;;  %v6142_v8 = vmax.f32 %v6140_v61, %v6141_v15  ;;  %v13480_v34 = vld [vmem:[#allocation31_spill] sm:$0xff] }
 0x643   : > { %v6151_v38 = vadd.f32 %v6143_v39, %v12650_v30  ;;  %v6152_v59 = vadd.f32 %v6144_v46, %v12653_v22  ;;  %v6153_v60 = vadd.f32 %v6145_v33, %v12656_v24  ;;  %v6154_v41 = vadd.f32 %v6146_v52, %v12659_v35 }
 0x644   : > { %v13469_v23 = vmax.f32 %v13465_v57, %v12717_v25  ;;  %v13470_v47 = vmax.f32 %v13466_v4, %v12719_v55  ;;  %v13471_v18 = vmax.f32 %v13467_v50, %v12721_v6  ;;  %v13472_v30 = vmax.f32 %v13468_v49, %v12723_v63 }
 0x645   : > { %v6159_v26 = vmul.f32 0.25, %v6151_v38  ;;  %v6160_v24 = vmul.f32 0.25, %v6152_v59  ;;  %v6161_v16 = vmul.f32 0.25, %v6153_v60  ;;  %v6162_v35 = vmul.f32 0.25, %v6154_v41 }
 0x646   : > { %v6147_v9 = vmax.f32 %v13469_v23, %v6121_v45  ;;  %v6148_v1 = vmax.f32 %v13470_v47, %v6128_v19  ;;  %v6149_v13 = vmax.f32 %v13471_v18, %v6135_v62  ;;  %v6150_v22 = vmax.f32 %v13472_v30, %v6142_v8 }
 0x647   : > { %v6175_v61 = vcombine.low %v6159_v26, %v6160_v24  ;;  %v6176_v4 = vcombine.low %v6161_v16, %v6162_v35  ;;  %v6182_v6 = vlaneseq  ;;  %v9619_v49 = vmov 1966171168  }
 0x648   : > { %v6155_v5 = vadd.f32 %v6147_v9, %v12682_v21  ;;  %v6156_v25 = vadd.f32 %v6148_v1, %v12685_v28  ;;  %v6157_v57 = vadd.f32 %v6149_v13, %v12688_v43  ;;  %v6158_v55 = vadd.f32 %v6150_v22, %v12691_v12  ;;  %v13474_v21 = vld [vmem:[#allocation25_spill] sm:$0xff] }
 0x649   : > { %v6180_v44 = vunpack.c.l.s4 %v9619_v49  ;;  %v6183_v29 = vshrl.u32 %v6182_v6, 7  ;;  %v6226_v53 = vsel %vm5635_vm0, %v13473_v3, -inf  ;;  %v6233_v28 = vsel %vm5635_vm0, %v13474_v21, -inf }
 0x64a   : > { %v6163_v10 = vmul.f32 0.25, %v6155_v5  ;;  %v6164_v50 = vmul.f32 0.25, %v6156_v25  ;;  %v6165_v40 = vmul.f32 0.25, %v6157_v57  ;;  %v6166_v63 = vmul.f32 0.25, %v6158_v55 }
 0x64b   : > { %v6227_v14 = vrot.slane %v6226_v53, 4  ;;  %v6234_v12 = vrot.slane %v6233_v28, 4  ;;  %v6181_v32 = vunpack.c.0.s8 %v6180_v44  ;;  %v6240_v31 = vsel %vm5635_vm0, %v13475_v51, -inf }
 0x64c   : > { %v6177_v42 = vcombine.low %v6163_v10, %v6164_v50  ;;  %v6178_v43 = vcombine.low %v6165_v40, %v6166_v63  ;;  %v6247_v58 = vsel %vm5635_vm0, %v13476_v56, -inf  ;;  %v6254_v11 = vsel %vm5635_vm0, %v13477_v2, -inf  ;;  %v13481_v40 = vld [vmem:[#allocation16_spill] sm:$0xff] }
 0x64d   : > { %v6228_v54 = vmax.f32 %v6226_v53, %v6227_v14  ;;  %v6235_v20 = vmax.f32 %v6233_v28, %v6234_v12  ;;  %v6241_v37 = vrot.slane %v6240_v31, 4  ;;  %v6248_v0 = vrot.slane %v6247_v58, 4 }
 0x64e   : > { %v12791_v27 = vsub.s32 %v6181_v32, %v6183_v29  ;;  %v6255_v7 = vrot.slane %v6254_v11, 4  ;;  %v6261_v36 = vsel %vm5635_vm0, %v13479_v17, -inf  ;;  %v6268_v48 = vsel %vm5635_vm0, %v13480_v34, -inf }
 0x64f   : > { %v6229_v15 = vrot.slane %v6228_v54, 2  ;;  %v6236_v39 = vrot.slane %v6235_v20, 2  ;;  %v6242_v46 = vmax.f32 %v6240_v31, %v6241_v37  ;;  %v6249_v33 = vmax.f32 %v6247_v58, %v6248_v0 }
 0x650   : > { %13478 = vst [vmem:[#allocation19_spill] sm:$0xff] %v12791_v27  ;;  %v6185_v52 = vrot.slane %v6175_v61, %v12791_v27  ;;  %v6192_v45 = vrot.slane %v6176_v4, %v12791_v27  ;;  %v6199_v19 = vrot.slane %v6177_v42, %v12791_v27  ;;  %v6206_v62 = vrot.slane %v6178_v43, %v12791_v27 }
 0x651   : > { %v6230_v8 = vmax.f32 %v6228_v54, %v6229_v15  ;;  %v6237_v38 = vmax.f32 %v6235_v20, %v6236_v39  ;;  %v6243_v59 = vrot.slane %v6242_v46, 2  ;;  %v6250_v60 = vrot.slane %v6249_v33, 2 }
 0x652   : > { %v6207_v41 = vcombine.low %v6185_v52, %v6192_v45  ;;  %v6208_v23 = vcombine.low %v6199_v19, %v6206_v62  ;;  %v6256_v9 = vmax.f32 %v6254_v11, %v6255_v7  ;;  %v6262_v47 = vrot.slane %v6261_v36, 4 }
 0x653   : > { %v6231_v1 = vrot.slane %v6230_v8, 1  ;;  %v6238_v18 = vrot.slane %v6237_v38, 1  ;;  %v6244_v13 = vmax.f32 %v6242_v46, %v6243_v59  ;;  %v6251_v30 = vmax.f32 %v6249_v33, %v6250_v60 }
 0x654   : > { %v6215_v22 = vrot.slane %v6207_v41, %v12791_v27  ;;  %v6222_v26 = vrot.slane %v6208_v23, %v12791_v27  ;;  %v6257_v24 = vrot.slane %v6256_v9, 2  ;;  %v6263_v16 = vmax.f32 %v6261_v36, %v6262_v47 }
 0x655   : > { %v12803_v35 = vmax.f32 %v6230_v8, %v6231_v1  ;;  %v12805_v5 = vmax.f32 %v6237_v38, %v6238_v18  ;;  %v6245_v25 = vrot.slane %v6244_v13, 1  ;;  %v6252_v57 = vrot.slane %v6251_v30, 1 }
 0x656   : > { %v6223_v55 = vcombine.low %v6215_v22, %v6222_v26  ;;  %v6258_v61 = vmax.f32 %v6256_v9, %v6257_v24  ;;  %v6264_v4 = vrot.slane %v6263_v16, 2  ;;  %v6269_v6 = vrot.slane %v6268_v48, 4 }
 0x657   : > { %v12807_v10 = vmax.f32 %v6244_v13, %v6245_v25  ;;  %v12809_v50 = vmax.f32 %v6251_v30, %v6252_v57  ;;  %v6275_v63 = vsel %vm5635_vm0, %v13481_v40, -inf  ;;  %v6282_v49 = vsel %vm5692_vm1, %v13473_v3, -inf }
 0x658   : > { %6225 = vst [vmem:[%s9835_s5] ss:$2 sm:$0xff] %v6223_v55  ;;  %v6259_v44 = vrot.slane %v6258_v61, 1  ;;  %v6265_v29 = vmax.f32 %v6263_v16, %v6264_v4  ;;  %v6270_v53 = vmax.f32 %v6268_v48, %v6269_v6  ;;  %v6276_v28 = vrot.slane %v6275_v63, 4 }
 0x659   : > { %v6283_v42 = vrot.slane %v6282_v49, 4  ;;  %v6289_v43 = vsel %vm5692_vm1, %v13474_v21, -inf  ;;  %v6296_v14 = vsel %vm5692_vm1, %v13475_v51, -inf  ;;  %v6303_v12 = vsel %vm5692_vm1, %v13476_v56, -inf }
 0x65a   : > { %v12822_v32 = vmax.f32 %v6258_v61, %v6259_v44  ;;  %v6266_v31 = vrot.slane %v6265_v29, 1  ;;  %v6271_v58 = vrot.slane %v6270_v53, 2  ;;  %v6277_v11 = vmax.f32 %v6275_v63, %v6276_v28 }
 0x65b   : > { %v6284_v54 = vmax.f32 %v6282_v49, %v6283_v42  ;;  %v6290_v20 = vrot.slane %v6289_v43, 4  ;;  %v6297_v37 = vrot.slane %v6296_v14, 4  ;;  %v6304_v0 = vrot.slane %v6303_v12, 4 }
 0x65c   : > { %v12824_v7 = vmax.f32 %v6265_v29, %v6266_v31  ;;  %v6272_v36 = vmax.f32 %v6270_v53, %v6271_v58  ;;  %v6278_v48 = vrot.slane %v6277_v11, 2  ;;  %v6310_v15 = vsel %vm5692_vm1, %v13477_v2, -inf }
 0x65d   : > { %v6285_v39 = vrot.slane %v6284_v54, 2  ;;  %v6291_v46 = vmax.f32 %v6289_v43, %v6290_v20  ;;  %v6298_v33 = vmax.f32 %v6296_v14, %v6297_v37  ;;  %v6305_v52 = vmax.f32 %v6303_v12, %v6304_v0 }
 0x65e   : > { %v6273_v45 = vrot.slane %v6272_v36, 1  ;;  %v6279_v19 = vmax.f32 %v6277_v11, %v6278_v48  ;;  %v6311_v62 = vrot.slane %v6310_v15, 4  ;;  %v6317_v8 = vsel %vm5692_vm1, %v13479_v17, -inf }
 0x65f   : > { %v6286_v38 = vmax.f32 %v6284_v54, %v6285_v39  ;;  %v6292_v59 = vrot.slane %v6291_v46, 2  ;;  %v6299_v60 = vrot.slane %v6298_v33, 2  ;;  %v6306_v41 = vrot.slane %v6305_v52, 2 }
 0x660   : > { %v12830_v23 = vmax.f32 %v6272_v36, %v6273_v45  ;;  %v6280_v9 = vrot.slane %v6279_v19, 1  ;;  %v6312_v47 = vmax.f32 %v6310_v15, %v6311_v62  ;;  %v6318_v1 = vrot.slane %v6317_v8, 4 }
 0x661   : > { %v6287_v18 = vrot.slane %v6286_v38, 1  ;;  %v6293_v13 = vmax.f32 %v6291_v46, %v6292_v59  ;;  %v6300_v30 = vmax.f32 %v6298_v33, %v6299_v60  ;;  %v6307_v22 = vmax.f32 %v6305_v52, %v6306_v41 }
 0x662   : > { %v12832_v26 = vmax.f32 %v6279_v19, %v6280_v9  ;;  %v6313_v24 = vrot.slane %v6312_v47, 2  ;;  %v6319_v16 = vmax.f32 %v6317_v8, %v6318_v1  ;;  %v6324_v25 = vsel %vm5692_vm1, %v13480_v34, -inf }
 0x663   : > { %v12836_v57 = vmax.f32 %v6286_v38, %v6287_v18  ;;  %v6294_v55 = vrot.slane %v6293_v13, 1  ;;  %v6301_v61 = vrot.slane %v6300_v30, 1  ;;  %v6308_v4 = vrot.slane %v6307_v22, 1 }
 0x664   : > { %v6314_v6 = vmax.f32 %v6312_v47, %v6313_v24  ;;  %v6320_v63 = vrot.slane %v6319_v16, 2  ;;  %v6325_v49 = vrot.slane %v6324_v25, 4  ;;  %v6331_v44 = vsel %vm5692_vm1, %v13481_v40, -inf }
 0x665   : > { %v12840_v29 = vmax.f32 %v6293_v13, %v6294_v55  ;;  %v12842_v53 = vmax.f32 %v6300_v30, %v6301_v61  ;;  %v12844_v28 = vmax.f32 %v6307_v22, %v6308_v4  ;;  %v6332_v42 = vrot.slane %v6331_v44, 4 }
 0x666   : > { %v6315_v43 = vrot.slane %v6314_v6, 1  ;;  %v6321_v14 = vmax.f32 %v6319_v16, %v6320_v63  ;;  %v6326_v12 = vmax.f32 %v6324_v25, %v6325_v49  ;;  %v6338_v31 = vmax.f32 %v12803_v35, %v12836_v57 }
 0x667   : > { %v6333_v58 = vmax.f32 %v6331_v44, %v6332_v42  ;;  %v6339_v11 = vmax.f32 %v12805_v5, %v12840_v29  ;;  %v6340_v54 = vmax.f32 %v12807_v10, %v12842_v53  ;;  %v6341_v20 = vmax.f32 %v12809_v50, %v12844_v28 }
 0x668   : > { %v12854_v37 = vmax.f32 %v6314_v6, %v6315_v43  ;;  %v6322_v0 = vrot.slane %v6321_v14, 1  ;;  %v6327_v36 = vrot.slane %v6326_v12, 2  ;;  %v6346_v48 = vsel %vm5757_vm2, %v13473_v3, -inf }
 0x669   : > { %v6334_v15 = vrot.slane %v6333_v58, 2  ;;  %v6347_v39 = vrot.slane %v6346_v48, 4  ;;  %v6353_v46 = vsel %vm5757_vm2, %v13474_v21, -inf  ;;  %v6360_v33 = vsel %vm5757_vm2, %v13475_v51, -inf }
 0x66a   : > { %v12862_v52 = vmax.f32 %v6321_v14, %v6322_v0  ;;  %v6328_v45 = vmax.f32 %v6326_v12, %v6327_v36  ;;  %v6342_v19 = vmax.f32 %v12822_v32, %v12854_v37  ;;  %v6354_v62 = vrot.slane %v6353_v46, 4  ;;  %v13489_v32 = vld [vmem:[#allocation23_spill] sm:$0xff] }
 0x66b   : > { %v6335_v8 = vmax.f32 %v6333_v58, %v6334_v15  ;;  %v6348_v38 = vmax.f32 %v6346_v48, %v6347_v39  ;;  %v6361_v59 = vrot.slane %v6360_v33, 4  ;;  %v6367_v60 = vsel %vm5757_vm2, %v13476_v56, -inf }
 0x66c   : > { %v6329_v41 = vrot.slane %v6328_v45, 1  ;;  %v6343_v9 = vmax.f32 %v12824_v7, %v12862_v52  ;;  %v6355_v47 = vmax.f32 %v6353_v46, %v6354_v62  ;;  %v6368_v1 = vrot.slane %v6367_v60, 4 }
 0x66d   : > { %v6336_v18 = vrot.slane %v6335_v8, 1  ;;  %v6349_v13 = vrot.slane %v6348_v38, 2  ;;  %v6362_v30 = vmax.f32 %v6360_v33, %v6361_v59  ;;  %v6374_v22 = vsel %vm5757_vm2, %v13477_v2, -inf }
 0x66e   : > { %v12872_v24 = vmax.f32 %v6328_v45, %v6329_v41  ;;  %v6356_v16 = vrot.slane %v6355_v47, 2  ;;  %v6369_v25 = vmax.f32 %v6367_v60, %v6368_v1  ;;  %v6375_v55 = vrot.slane %v6374_v22, 4 }
 0x66f   : > { %v12874_v61 = vmax.f32 %v6335_v8, %v6336_v18  ;;  %v6350_v4 = vmax.f32 %v6348_v38, %v6349_v13  ;;  %v6363_v6 = vrot.slane %v6362_v30, 2  ;;  %v6381_v63 = vsel %vm5757_vm2, %v13479_v17, -inf }
 0x670   : > { %v6344_v49 = vmax.f32 %v12830_v23, %v12872_v24  ;;  %v6357_v44 = vmax.f32 %v6355_v47, %v6356_v16  ;;  %v6370_v42 = vrot.slane %v6369_v25, 2  ;;  %v6376_v43 = vmax.f32 %v6374_v22, %v6375_v55 }
 0x671   : > { %v6345_v14 = vmax.f32 %v12832_v26, %v12874_v61  ;;  %v6351_v12 = vrot.slane %v6350_v4, 1  ;;  %v6364_v58 = vmax.f32 %v6362_v30, %v6363_v6  ;;  %v6382_v0 = vrot.slane %v6381_v63, 4 }
 0x672   : > { %v6358_v36 = vrot.slane %v6357_v44, 1  ;;  %v6371_v48 = vmax.f32 %v6369_v25, %v6370_v42  ;;  %v6377_v15 = vrot.slane %v6376_v43, 2  ;;  %v6388_v39 = vsel %vm5757_vm2, %v13480_v34, -inf }
 0x673   : > { %v12884_v46 = vmax.f32 %v6350_v4, %v6351_v12  ;;  %v6365_v33 = vrot.slane %v6364_v58, 1  ;;  %v6383_v45 = vmax.f32 %v6381_v63, %v6382_v0  ;;  %v6389_v62 = vrot.slane %v6388_v39, 4 }
 0x674   : > { %v12886_v8 = vmax.f32 %v6357_v44, %v6358_v36  ;;  %v6372_v38 = vrot.slane %v6371_v48, 1  ;;  %v6378_v59 = vmax.f32 %v6376_v43, %v6377_v15  ;;  %v6395_v60 = vsel %vm5757_vm2, %v13481_v40, -inf }
 0x675   : > { %v12890_v41 = vmax.f32 %v6364_v58, %v6365_v33  ;;  %v6384_v47 = vrot.slane %v6383_v45, 2  ;;  %v6390_v1 = vmax.f32 %v6388_v39, %v6389_v62  ;;  %v6396_v18 = vrot.slane %v6395_v60, 4 }
 0x676   : > { %v12892_v13 = vmax.f32 %v6371_v48, %v6372_v38  ;;  %v6379_v30 = vrot.slane %v6378_v59, 1  ;;  %v6402_v22 = vsel %vm5814_vm3, %v13473_v3, -inf  ;;  %v6409_v16 = vsel %vm5814_vm3, %v13474_v21, -inf }
 0x677   : > { %v6385_v25 = vmax.f32 %v6383_v45, %v6384_v47  ;;  %v6391_v55 = vrot.slane %v6390_v1, 2  ;;  %v6397_v4 = vmax.f32 %v6395_v60, %v6396_v18  ;;  %v6403_v6 = vrot.slane %v6402_v22, 4 }
 0x678   : > { %v12898_v63 = vmax.f32 %v6378_v59, %v6379_v30  ;;  %v6410_v44 = vrot.slane %v6409_v16, 4  ;;  %v6416_v42 = vsel %vm5814_vm3, %v13475_v51, -inf  ;;  %v6423_v43 = vsel %vm5814_vm3, %v13476_v56, -inf }
 0x679   : > { %v6386_v12 = vrot.slane %v6385_v25, 1  ;;  %v6392_v58 = vmax.f32 %v6390_v1, %v6391_v55  ;;  %v6398_v0 = vrot.slane %v6397_v4, 2  ;;  %v6404_v3 = vmax.f32 %v6402_v22, %v6403_v6 }
 0x67a   : > { %v6411_v36 = vmax.f32 %v6409_v16, %v6410_v44  ;;  %v6417_v48 = vrot.slane %v6416_v42, 4  ;;  %v6424_v21 = vrot.slane %v6423_v43, 4  ;;  %v6430_v15 = vsel %vm5814_vm3, %v13477_v2, -inf }
 0x67b   : > { %v12906_v39 = vmax.f32 %v6385_v25, %v6386_v12  ;;  %v6393_v33 = vrot.slane %v6392_v58, 1  ;;  %v6399_v45 = vmax.f32 %v6397_v4, %v6398_v0  ;;  %v6405_v62 = vrot.slane %v6404_v3, 2 }
 0x67c   : > { %v6412_v38 = vrot.slane %v6411_v36, 2  ;;  %v6418_v51 = vmax.f32 %v6416_v42, %v6417_v48  ;;  %v6425_v59 = vmax.f32 %v6423_v43, %v6424_v21  ;;  %v6431_v60 = vrot.slane %v6430_v15, 4 }
 0x67d   : > { %v12908_v56 = vmax.f32 %v6392_v58, %v6393_v33  ;;  %v6400_v47 = vrot.slane %v6399_v45, 1  ;;  %v6406_v1 = vmax.f32 %v6404_v3, %v6405_v62  ;;  %v6437_v18 = vsel %vm5814_vm3, %v13479_v17, -inf }
 0x67e   : > { %v6413_v30 = vmax.f32 %v6411_v36, %v6412_v38  ;;  %v6419_v22 = vrot.slane %v6418_v51, 2  ;;  %v6426_v16 = vrot.slane %v6425_v59, 2  ;;  %v6432_v2 = vmax.f32 %v6430_v15, %v6431_v60 }
 0x67f   : > { %v12912_v25 = vmax.f32 %v6399_v45, %v6400_v47  ;;  %v6407_v55 = vrot.slane %v6406_v1, 1  ;;  %v6438_v4 = vrot.slane %v6437_v18, 4  ;;  %v6444_v6 = vsel %vm5814_vm3, %v13480_v34, -inf }
 0x680   : > { %v6414_v44 = vrot.slane %v6413_v30, 1  ;;  %v6420_v42 = vmax.f32 %v6418_v51, %v6419_v22  ;;  %v6427_v43 = vmax.f32 %v6425_v59, %v6426_v16  ;;  %v6433_v12 = vrot.slane %v6432_v2, 2 }
 0x681   : > { %v12916_v58 = vmax.f32 %v6406_v1, %v6407_v55  ;;  %v6439_v0 = vmax.f32 %v6437_v18, %v6438_v4  ;;  %v6445_v3 = vrot.slane %v6444_v6, 4  ;;  %v6451_v17 = vsel %vm5814_vm3, %v13481_v40, -inf  ;;  %v13483_v4 = vld [vmem:[#allocation22_spill] sm:$0xff] }
 0x682   : > { %v12920_v36 = vmax.f32 %v6413_v30, %v6414_v44  ;;  %v6421_v48 = vrot.slane %v6420_v42, 1  ;;  %v6428_v21 = vrot.slane %v6427_v43, 1  ;;  %v6434_v15 = vmax.f32 %v6432_v2, %v6433_v12  ;;  %v13486_v12 = vld [vmem:[#allocation32_spill] sm:$0xff] }
 0x683   : > { %v6440_v33 = vrot.slane %v6439_v0, 2  ;;  %v6446_v45 = vmax.f32 %v6444_v6, %v6445_v3  ;;  %v6452_v62 = vrot.slane %v6451_v17, 4  ;;  %v6458_v34 = vmax.f32 %v12884_v46, %v12916_v58 }
 0x684   : > { %v12924_v38 = vmax.f32 %v6420_v42, %v6421_v48  ;;  %v12926_v51 = vmax.f32 %v6427_v43, %v6428_v21  ;;  %v6435_v59 = vrot.slane %v6434_v15, 1  ;;  %v6459_v60 = vmax.f32 %v12886_v8, %v12920_v36  ;;  %v13485_v42 = vld [vmem:[#allocation27_spill] sm:$0xff] }
 0x685   : > { %v6441_v40 = vmax.f32 %v6439_v0, %v6440_v33  ;;  %v6447_v47 = vrot.slane %v6446_v45, 2  ;;  %v6453_v1 = vmax.f32 %v6451_v17, %v6452_v62  ;;  %v12933_v18 = vadd.f32 %v6458_v34, %v6338_v31 }
 0x686   : > { %v12935_v30 = vmax.f32 %v6434_v15, %v6435_v59  ;;  %v6460_v46 = vmax.f32 %v12890_v41, %v12924_v38  ;;  %v6461_v22 = vmax.f32 %v12892_v13, %v12926_v51  ;;  %v12944_v8 = vadd.f32 %v6459_v60, %v6339_v11  ;;  %v13488_v15 = vld [vmem:[#allocation17_spill] sm:$0xff] }
 0x687   : > { %v6442_v16 = vrot.slane %v6441_v40, 1  ;;  %v6448_v2 = vmax.f32 %v6446_v45, %v6447_v47  ;;  %v6454_v55 = vrot.slane %v6453_v1, 2  ;;  %v6474_v35 = vsel %vm5635_vm0, %v13483_v4, -inf }
 0x688   : > { %13482 = vst [vmem:[#allocation24_spill] sm:$0xff] %v12935_v30  ;;  %v6462_v31 = vmax.f32 %v12898_v63, %v12935_v30  ;;  %v12953_v41 = vadd.f32 %v6460_v46, %v6340_v54  ;;  %v12958_v5 = vadd.f32 %v6461_v22, %v6341_v20  ;;  %v6475_v11 = vrot.slane %v6474_v35, 4 }
 0x689   : > { %v12960_v13 = vmax.f32 %v6441_v40, %v6442_v16  ;;  %v6449_v6 = vrot.slane %v6448_v2, 1  ;;  %v6455_v44 = vmax.f32 %v6453_v1, %v6454_v55  ;;  %v6481_v43 = vsel %vm5635_vm0, %v13485_v42, -inf }
 0x68a   : > { %v12967_v63 = vadd.f32 %v6462_v31, %v6342_v19  ;;  %v6476_v10 = vmax.f32 %v6474_v35, %v6475_v11  ;;  %v6482_v54 = vrot.slane %v6481_v43, 4  ;;  %v6488_v50 = vsel %vm5635_vm0, %v13486_v12, -inf  ;;  %v13492_v11 = vld [vmem:[#allocation33_spill] sm:$0xff] }
 0x68b   : > { %13484 = vst [vmem:[#allocation29_spill] sm:$0xff] %v12960_v13  ;;  %v12971_v20 = vmax.f32 %v6448_v2, %v6449_v6  ;;  %v6456_v0 = vrot.slane %v6455_v44, 1  ;;  %v6463_v3 = vmax.f32 %v12906_v39, %v12960_v13  ;;  %v6489_v17 = vrot.slane %v6488_v50, 4 }
 0x68c   : > { %v6477_v48 = vrot.slane %v6476_v10, 2  ;;  %v6483_v21 = vmax.f32 %v6481_v43, %v6482_v54  ;;  %v6495_v33 = vsel %vm5635_vm0, %v13488_v15, -inf  ;;  %v6502_v19 = vsel %vm5635_vm0, %v13489_v32, -inf }
 0x68d   : > { %13487 = vst [vmem:[#allocation34_spill] sm:$0xff] %v12971_v20  ;;  %v12979_v45 = vmax.f32 %v6455_v44, %v6456_v0  ;;  %v6464_v62 = vmax.f32 %v12908_v56, %v12971_v20  ;;  %v12986_v34 = vadd.f32 %v6463_v3, %v6343_v9  ;;  %v6490_v39 = vmax.f32 %v6488_v50, %v6489_v17  ;;  %v13491_v56 = vld [vmem:[#allocation28_spill] sm:$0xff]  ;;  %v13493_v0 = vld [vmem:[#allocation18_spill] sm:$0xff] }
 0x68e   : > { %v6478_v59 = vmax.f32 %v6476_v10, %v6477_v48  ;;  %v6484_v60 = vrot.slane %v6483_v21, 2  ;;  %v6496_v40 = vrot.slane %v6495_v33, 4  ;;  %v6503_v47 = vrot.slane %v6502_v19, 4 }
 0x68f   : > { %13490 = vst [vmem:[#allocation36_spill] sm:$0xff] %v12979_v45  ;;  %v6465_v1 = vmax.f32 %v12912_v25, %v12979_v45  ;;  %v12993_v46 = vadd.f32 %v6464_v62, %v6344_v49  ;;  %v6491_v22 = vrot.slane %v6490_v39, 2  ;;  %v6509_v16 = vsel %vm5635_vm0, %v13491_v56, -inf }
 0x690   : > { %v6479_v7 = vrot.slane %v6478_v59, 1  ;;  %v6485_v9 = vmax.f32 %v6483_v21, %v6484_v60  ;;  %v6497_v2 = vmax.f32 %v6495_v33, %v6496_v40  ;;  %v6504_v55 = vmax.f32 %v6502_v19, %v6503_v47 }
 0x691   : > { %v13000_v35 = vadd.f32 %v6465_v1, %v6345_v14  ;;  %v6492_v31 = vmax.f32 %v6490_v39, %v6491_v22  ;;  %v6510_v25 = vrot.slane %v6509_v16, 4  ;;  %v6516_v23 = vsel %vm5635_vm0, %v13492_v11, -inf }
 0x692   : > { %v13004_v49 = vmax.f32 %v6478_v59, %v6479_v7  ;;  %v6486_v6 = vrot.slane %v6485_v9, 1  ;;  %v6498_v44 = vrot.slane %v6497_v2, 2  ;;  %v6505_v43 = vrot.slane %v6504_v55, 2 }
 0x693   : > { %v6493_v10 = vrot.slane %v6492_v31, 1  ;;  %v6511_v54 = vmax.f32 %v6509_v16, %v6510_v25  ;;  %v6517_v50 = vrot.slane %v6516_v23, 4  ;;  %v6523_v3 = vsel %vm5635_vm0, %v13493_v0, -inf }
 0x694   : > { %v13008_v17 = vmax.f32 %v6485_v9, %v6486_v6  ;;  %v6499_v26 = vmax.f32 %v6497_v2, %v6498_v44  ;;  %v6506_v14 = vmax.f32 %v6504_v55, %v6505_v43  ;;  %v6524_v48 = vrot.slane %v6523_v3, 4 }
 0x695   : > { %v13010_v21 = vmax.f32 %v6492_v31, %v6493_v10  ;;  %v6512_v33 = vrot.slane %v6511_v54, 2  ;;  %v6518_v19 = vmax.f32 %v6516_v23, %v6517_v50  ;;  %v6538_v16 = vsel %vm5692_vm1, %v13483_v4, -inf }
 0x696   : > { %v6500_v39 = vrot.slane %v6499_v26, 1  ;;  %v6507_v59 = vrot.slane %v6506_v14, 1  ;;  %v6525_v60 = vmax.f32 %v6523_v3, %v6524_v48  ;;  %v6539_v55 = vrot.slane %v6538_v16, 4 }
 0x697   : > { %v6513_v47 = vmax.f32 %v6511_v54, %v6512_v33  ;;  %v6519_v1 = vrot.slane %v6518_v19, 2  ;;  %v6545_v23 = vsel %vm5692_vm1, %v13485_v42, -inf  ;;  %v6552_v6 = vsel %vm5692_vm1, %v13486_v12, -inf }
 0x698   : > { %v13020_v7 = vmax.f32 %v6499_v26, %v6500_v39  ;;  %v13022_v9 = vmax.f32 %v6506_v14, %v6507_v59  ;;  %v6526_v2 = vrot.slane %v6525_v60, 2  ;;  %v6540_v54 = vmax.f32 %v6538_v16, %v6539_v55 }
 0x699   : > { %v6514_v31 = vrot.slane %v6513_v47, 1  ;;  %v6520_v25 = vmax.f32 %v6518_v19, %v6519_v1  ;;  %v6546_v26 = vrot.slane %v6545_v23, 4  ;;  %v6553_v14 = vrot.slane %v6552_v6, 4 }
 0x69a   : > { %v6527_v44 = vmax.f32 %v6525_v60, %v6526_v2  ;;  %v6541_v33 = vrot.slane %v6540_v54, 2  ;;  %v6559_v19 = vsel %vm5692_vm1, %v13488_v15, -inf  ;;  %v6566_v39 = vsel %vm5692_vm1, %v13489_v32, -inf }
 0x69b   : > { %v13032_v50 = vmax.f32 %v6513_v47, %v6514_v31  ;;  %v6521_v3 = vrot.slane %v6520_v25, 1  ;;  %v6547_v1 = vmax.f32 %v6545_v23, %v6546_v26  ;;  %v6554_v16 = vmax.f32 %v6552_v6, %v6553_v14 }
 0x69c   : > { %v6528_v48 = vrot.slane %v6527_v44, 1  ;;  %v6542_v2 = vmax.f32 %v6540_v54, %v6541_v33  ;;  %v6560_v55 = vrot.slane %v6559_v19, 4  ;;  %v6567_v31 = vrot.slane %v6566_v39, 4 }
 0x69d   : > { %v13038_v59 = vmax.f32 %v6520_v25, %v6521_v3  ;;  %v6548_v43 = vrot.slane %v6547_v1, 2  ;;  %v6555_v22 = vrot.slane %v6554_v16, 2  ;;  %v6573_v40 = vsel %vm5692_vm1, %v13491_v56, -inf }
 0x69e   : > { %v13042_v47 = vmax.f32 %v6527_v44, %v6528_v48  ;;  %v6543_v3 = vrot.slane %v6542_v2, 1  ;;  %v6561_v60 = vmax.f32 %v6559_v19, %v6560_v55  ;;  %v6568_v23 = vmax.f32 %v6566_v39, %v6567_v31 }
 0x69f   : > { %v6536_v10 = vmax.f32 %v12872_v24, %v13038_v59  ;;  %v6549_v6 = vmax.f32 %v6547_v1, %v6548_v43  ;;  %v6556_v44 = vmax.f32 %v6554_v16, %v6555_v22  ;;  %v6574_v26 = vrot.slane %v6573_v40, 4 }
 0x6a0   : > { %v6580_v54 = vsel %vm5692_vm1, %v13492_v11, -inf  ;;  %v6544_v14 = vmax.f32 %v6542_v2, %v6543_v3  ;;  %v6562_v48 = vrot.slane %v6561_v60, 2  ;;  %v6569_v24 = vrot.slane %v6568_v23, 2 }
 0x6a1   : > { %v6581_v33 = vrot.slane %v6580_v54, 4  ;;  %v6550_v59 = vrot.slane %v6549_v6, 1  ;;  %v6557_v62 = vrot.slane %v6556_v44, 1  ;;  %v6575_v27 = vmax.f32 %v6573_v40, %v6574_v26 }
 0x6a2   : > { %v6587_v45 = vsel %vm5692_vm1, %v13493_v0, -inf  ;;  %v6563_v25 = vmax.f32 %v6561_v60, %v6562_v48  ;;  %v6570_v20 = vmax.f32 %v6568_v23, %v6569_v24  ;;  %v13494_v16 = vmax.f32 %v12836_v57, %v13004_v49 }
 0x6a3   : > { %v6582_v19 = vmax.f32 %v6580_v54, %v6581_v33  ;;  %v6588_v39 = vrot.slane %v6587_v45, 4  ;;  %v6551_v43 = vmax.f32 %v6549_v6, %v6550_v59  ;;  %v6558_v22 = vmax.f32 %v6556_v44, %v6557_v62 }
 0x6a4   : > { %v6576_v1 = vrot.slane %v6575_v27, 2  ;;  %v6594_v2 = vmax.f32 %v13494_v16, %v6544_v14  ;;  %v6564_v55 = vrot.slane %v6563_v25, 1  ;;  %v6571_v31 = vrot.slane %v6570_v20, 1 }
 0x6a5   : > { %v6583_v3 = vrot.slane %v6582_v19, 2  ;;  %v6589_v13 = vmax.f32 %v6587_v45, %v6588_v39  ;;  %v13495_v40 = vmax.f32 %v12840_v29, %v13008_v17  ;;  %v13496_v60 = vmax.f32 %v12842_v53, %v13010_v21 }
 0x6a6   : > { %v6577_v30 = vmax.f32 %v6575_v27, %v6576_v1  ;;  %v13064_v62 = vadd.f32 %v6594_v2, %v12933_v18  ;;  %v6565_v6 = vmax.f32 %v6563_v25, %v6564_v55  ;;  %v6572_v44 = vmax.f32 %v6570_v20, %v6571_v31 }
 0x6a7   : > { %v6595_v26 = vmax.f32 %v13495_v40, %v6551_v43  ;;  %v6596_v23 = vmax.f32 %v13496_v60, %v6558_v22  ;;  %v6584_v57 = vmax.f32 %v6582_v19, %v6583_v3  ;;  %v6590_v49 = vrot.slane %v6589_v13, 2 }
 0x6a8   : > { %v6578_v54 = vrot.slane %v6577_v30, 1  ;;  %v6610_v29 = vsel %vm5757_vm2, %v13483_v4, -inf  ;;  %v13497_v18 = vmax.f32 %v12844_v28, %v13020_v7  ;;  %v13498_v20 = vmax.f32 %v12854_v37, %v13022_v9 }
 0x6a9   : > { %v13067_v14 = vadd.f32 %v6595_v26, %v12944_v8  ;;  %v13070_v27 = vadd.f32 %v6596_v23, %v12953_v41  ;;  %v6585_v45 = vrot.slane %v6584_v57, 1  ;;  %v6591_v53 = vmax.f32 %v6589_v13, %v6590_v49 }
 0x6aa   : > { %v6597_v17 = vmax.f32 %v13497_v18, %v6565_v6  ;;  %v6598_v21 = vmax.f32 %v13498_v20, %v6572_v44  ;;  %v6579_v25 = vmax.f32 %v6577_v30, %v6578_v54  ;;  %v6611_v48 = vrot.slane %v6610_v29, 4 }
 0x6ab   : > { %v6617_v8 = vsel %vm5757_vm2, %v13485_v42, -inf  ;;  %v6624_v41 = vsel %vm5757_vm2, %v13486_v12, -inf  ;;  %v6586_v24 = vmax.f32 %v6584_v57, %v6585_v45  ;;  %v6592_v33 = vrot.slane %v6591_v53, 1 }
 0x6ac   : > { %v13085_v13 = vadd.f32 %v6597_v17, %v12958_v5  ;;  %v13088_v28 = vadd.f32 %v6598_v21, %v12967_v63  ;;  %v13499_v37 = vmax.f32 %v12862_v52, %v13032_v50  ;;  %v6612_v30 = vmax.f32 %v6610_v29, %v6611_v48 }
 0x6ad   : > { %v6618_v9 = vrot.slane %v6617_v8, 4  ;;  %v6625_v59 = vrot.slane %v6624_v41, 4  ;;  %v6593_v19 = vmax.f32 %v6591_v53, %v6592_v33  ;;  %v6600_v39 = vmax.f32 %v6536_v10, %v6586_v24 }
 0x6ae   : > { %v6599_v7 = vmax.f32 %v13499_v37, %v6579_v25  ;;  %v6631_v43 = vsel %vm5757_vm2, %v13488_v15, -inf  ;;  %v6638_v22 = vsel %vm5757_vm2, %v13489_v32, -inf  ;;  %v6613_v63 = vrot.slane %v6612_v30, 2 }
 0x6af   : > { %v6619_v1 = vmax.f32 %v6617_v8, %v6618_v9  ;;  %v6626_v16 = vmax.f32 %v6624_v41, %v6625_v59  ;;  %v13500_v52 = vmax.f32 %v12874_v61, %v13042_v47  ;;  %v13104_v2 = vadd.f32 %v6600_v39, %v12993_v46 }
 0x6b0   : > { %v13098_v5 = vadd.f32 %v6599_v7, %v12986_v34  ;;  %v6632_v10 = vrot.slane %v6631_v43, 4  ;;  %v6639_v55 = vrot.slane %v6638_v22, 4  ;;  %v6614_v31 = vmax.f32 %v6612_v30, %v6613_v63 }
 0x6b1   : > { %v6601_v50 = vmax.f32 %v13500_v52, %v6593_v19  ;;  %v6620_v3 = vrot.slane %v6619_v1, 2  ;;  %v6627_v40 = vrot.slane %v6626_v16, 2  ;;  %v6645_v26 = vsel %vm5757_vm2, %v13491_v56, -inf }
 0x6b2   : > { %v6633_v60 = vmax.f32 %v6631_v43, %v6632_v10  ;;  %v6640_v23 = vmax.f32 %v6638_v22, %v6639_v55  ;;  %v6646_v6 = vrot.slane %v6645_v26, 4  ;;  %v6615_v44 = vrot.slane %v6614_v31, 1 }
 0x6b3   : > { %v13109_v34 = vadd.f32 %v6601_v50, %v13000_v35  ;;  %v6621_v61 = vmax.f32 %v6619_v1, %v6620_v3  ;;  %v6628_v47 = vmax.f32 %v6626_v16, %v6627_v40  ;;  %v6652_v46 = vsel %vm5757_vm2, %v13492_v11, -inf  ;;  %v13501_v3 = vld [vmem:[#allocation24_spill] sm:$0xff] }
 0x6b4   : > { %v6634_v57 = vrot.slane %v6633_v60, 2  ;;  %v6641_v49 = vrot.slane %v6640_v23, 2  ;;  %v6647_v54 = vmax.f32 %v6645_v26, %v6646_v6  ;;  %v6653_v29 = vrot.slane %v6652_v46, 4 }
 0x6b5   : > { %v13113_v45 = vmax.f32 %v6614_v31, %v6615_v44  ;;  %v6622_v53 = vrot.slane %v6621_v61, 1  ;;  %v6629_v18 = vrot.slane %v6628_v47, 1  ;;  %v6659_v35 = vsel %vm5757_vm2, %v13493_v0, -inf }
 0x6b6   : > { %v6635_v17 = vmax.f32 %v6633_v60, %v6634_v57  ;;  %v6642_v20 = vmax.f32 %v6640_v23, %v6641_v49  ;;  %v6648_v21 = vrot.slane %v6647_v54, 2  ;;  %v6654_v25 = vmax.f32 %v6652_v46, %v6653_v29  ;;  %v13503_v29 = vld [vmem:[#allocation34_spill] sm:$0xff] }
 0x6b7   : > { %v13117_v48 = vmax.f32 %v6621_v61, %v6622_v53  ;;  %v13119_v8 = vmax.f32 %v6628_v47, %v6629_v18  ;;  %v6660_v41 = vrot.slane %v6659_v35, 4  ;;  %v6666_v24 = vmax.f32 %v12916_v58, %v13113_v45 }
 0x6b8   : > { %v6636_v33 = vrot.slane %v6635_v17, 1  ;;  %v6643_v37 = vrot.slane %v6642_v20, 1  ;;  %v6649_v7 = vmax.f32 %v6647_v54, %v6648_v21  ;;  %v6655_v30 = vrot.slane %v6654_v25, 2 }
 0x6b9   : > { %v6661_v9 = vmax.f32 %v6659_v35, %v6660_v41  ;;  %v6667_v59 = vmax.f32 %v12920_v36, %v13117_v48  ;;  %v6668_v19 = vmax.f32 %v12924_v38, %v13119_v8  ;;  %v6674_v39 = vsel %vm5814_vm3, %v13483_v4, -inf }
 0x6ba   : > { %v13129_v43 = vmax.f32 %v6635_v17, %v6636_v33  ;;  %v13131_v22 = vmax.f32 %v6642_v20, %v6643_v37  ;;  %v6650_v63 = vrot.slane %v6649_v7, 1  ;;  %v6656_v1 = vmax.f32 %v6654_v25, %v6655_v30 }
 0x6bb   : > { %v6662_v16 = vrot.slane %v6661_v9, 2  ;;  %v6675_v52 = vrot.slane %v6674_v39, 4  ;;  %v6681_v50 = vsel %vm5814_vm3, %v13485_v42, -inf  ;;  %v6688_v10 = vsel %vm5814_vm3, %v13486_v12, -inf  ;;  %v13502_v42 = vld [vmem:[#allocation29_spill] sm:$0xff] }
 0x6bc   : > { %v13137_v55 = vmax.f32 %v6649_v7, %v6650_v63  ;;  %v6657_v31 = vrot.slane %v6656_v1, 1  ;;  %v6669_v4 = vmax.f32 %v12926_v51, %v13129_v43  ;;  %v6670_v40 = vmax.f32 %v13501_v3, %v13131_v22  ;;  %v13504_v7 = vld [vmem:[#allocation36_spill] sm:$0xff] }
 0x6bd   : > { %v6663_v26 = vmax.f32 %v6661_v9, %v6662_v16  ;;  %v6676_v60 = vmax.f32 %v6674_v39, %v6675_v52  ;;  %v6682_v23 = vrot.slane %v6681_v50, 4  ;;  %v6689_v6 = vrot.slane %v6688_v10, 4 }
 0x6be   : > { %v13143_v44 = vmax.f32 %v6656_v1, %v6657_v31  ;;  %v6671_v61 = vmax.f32 %v13502_v42, %v13137_v55  ;;  %v6695_v12 = vsel %vm5814_vm3, %v13488_v15, -inf  ;;  %v6702_v47 = vsel %vm5814_vm3, %v13489_v32, -inf }
 0x6bf   : > { %v6664_v46 = vrot.slane %v6663_v26, 1  ;;  %v6677_v57 = vrot.slane %v6676_v60, 2  ;;  %v6683_v49 = vmax.f32 %v6681_v50, %v6682_v23  ;;  %v6690_v54 = vmax.f32 %v6688_v10, %v6689_v6 }
 0x6c0   : > { %v6672_v53 = vmax.f32 %v13503_v29, %v13143_v44  ;;  %v6696_v18 = vrot.slane %v6695_v12, 4  ;;  %v6703_v35 = vrot.slane %v6702_v47, 4  ;;  %v6709_v17 = vsel %vm5814_vm3, %v13491_v56, -inf }
 0x6c1   : > { %v13155_v20 = vmax.f32 %v6663_v26, %v6664_v46  ;;  %v6678_v21 = vmax.f32 %v6676_v60, %v6677_v57  ;;  %v6684_v25 = vrot.slane %v6683_v49, 2  ;;  %v6691_v15 = vrot.slane %v6690_v54, 2 }
 0x6c2   : > { %v6697_v41 = vmax.f32 %v6695_v12, %v6696_v18  ;;  %v6704_v33 = vmax.f32 %v6702_v47, %v6703_v35  ;;  %v6710_v32 = vrot.slane %v6709_v17, 4  ;;  %v6716_v37 = vsel %vm5814_vm3, %v13492_v11, -inf }
 0x6c3   : > { %v6673_v30 = vmax.f32 %v13504_v7, %v13155_v20  ;;  %v6679_v9 = vrot.slane %v6678_v21, 1  ;;  %v6685_v39 = vmax.f32 %v6683_v49, %v6684_v25  ;;  %v6692_v63 = vmax.f32 %v6690_v54, %v6691_v15 }
 0x6c4   : > { %v6698_v1 = vrot.slane %v6697_v41, 2  ;;  %v6705_v16 = vrot.slane %v6704_v33, 2  ;;  %v6711_v56 = vmax.f32 %v6709_v17, %v6710_v32  ;;  %v6717_v52 = vrot.slane %v6716_v37, 4 }
 0x6c5   : > { %v6680_v50 = vmax.f32 %v6678_v21, %v6679_v9  ;;  %v6686_v10 = vrot.slane %v6685_v39, 1  ;;  %v6693_v31 = vrot.slane %v6692_v63, 1  ;;  %v6723_v26 = vsel %vm5814_vm3, %v13493_v0, -inf }
 0x6c6   : > { %v6699_v60 = vmax.f32 %v6697_v41, %v6698_v1  ;;  %v6706_v23 = vmax.f32 %v6704_v33, %v6705_v16  ;;  %v6712_v6 = vrot.slane %v6711_v56, 2  ;;  %v6718_v11 = vmax.f32 %v6716_v37, %v6717_v52 }
 0x6c7   : > { %v6687_v44 = vmax.f32 %v6685_v39, %v6686_v10  ;;  %v6694_v12 = vmax.f32 %v6692_v63, %v6693_v31  ;;  %v6724_v47 = vrot.slane %v6723_v26, 4  ;;  %v6730_v46 = vmax.f32 %v6666_v24, %v6680_v50  ;;  %v13505_v63 = vld [vmem:[#allocation19_spill] sm:$0xff] }
 0x6c8   : > { %v6700_v57 = vrot.slane %v6699_v60, 1  ;;  %v6707_v49 = vrot.slane %v6706_v23, 1  ;;  %v6713_v54 = vmax.f32 %v6711_v56, %v6712_v6  ;;  %v6719_v29 = vrot.slane %v6718_v11, 2 }
 0x6c9   : > { %v6725_v18 = vmax.f32 %v6723_v26, %v6724_v47  ;;  %v6731_v0 = vmax.f32 %v6667_v59, %v6687_v44  ;;  %v6732_v35 = vmax.f32 %v6668_v19, %v6694_v12  ;;  %v6738_v17 = vadd.f32 %v6730_v46, %v13064_v62 }
 0x6ca   : > { %v6701_v20 = vmax.f32 %v6699_v60, %v6700_v57  ;;  %v6708_v21 = vmax.f32 %v6706_v23, %v6707_v49  ;;  %v6714_v25 = vrot.slane %v6713_v54, 1  ;;  %v6720_v58 = vmax.f32 %v6718_v11, %v6719_v29 }
 0x6cb   : > { %v6726_v45 = vrot.slane %v6725_v18, 2  ;;  %v6739_v24 = vadd.f32 %v6731_v0, %v13067_v14  ;;  %v6740_v15 = vadd.f32 %v6732_v35, %v13070_v27  ;;  %v6746_v41 = vmul.f32 0.25, %v6738_v17 }
 0x6cc   : > { %v6715_v33 = vmax.f32 %v6713_v54, %v6714_v25  ;;  %v6721_v32 = vrot.slane %v6720_v58, 1  ;;  %v6733_v36 = vmax.f32 %v6669_v4, %v6701_v20  ;;  %v6734_v38 = vmax.f32 %v6670_v40, %v6708_v21 }
 0x6cd   : > { %v6727_v62 = vmax.f32 %v6725_v18, %v6726_v45  ;;  %v6747_v48 = vmul.f32 0.25, %v6739_v24  ;;  %v6748_v8 = vmul.f32 0.25, %v6740_v15 }
 0x6ce   : > { %v6722_v59 = vmax.f32 %v6720_v58, %v6721_v32  ;;  %v6735_v14 = vmax.f32 %v6671_v61, %v6715_v33  ;;  %v6741_v27 = vadd.f32 %v6733_v36, %v13085_v13  ;;  %v6742_v19 = vadd.f32 %v6734_v38, %v13088_v28 }
 0x6cf   : > { %v6728_v37 = vrot.slane %v6727_v62, 1  ;;  %v6762_v7 = vcombine.low %v6746_v41, %v6747_v48 }
 0x6d0   : > { %v6736_v51 = vmax.f32 %v6672_v53, %v6722_v59  ;;  %v6743_v43 = vadd.f32 %v6735_v14, %v13098_v5  ;;  %v6749_v4 = vmul.f32 0.25, %v6741_v27  ;;  %v6750_v22 = vmul.f32 0.25, %v6742_v19 }
 0x6d1   : > { %v6729_v3 = vmax.f32 %v6727_v62, %v6728_v37  ;;  %v6772_v55 = vrot.slane %v6762_v7, %v13505_v63 }
 0x6d2   : > { %v6744_v40 = vadd.f32 %v6736_v51, %v13104_v2  ;;  %v6751_v9 = vmul.f32 0.25, %v6743_v43  ;;  %v6763_v39 = vcombine.low %v6748_v8, %v6749_v4 }
 0x6d3   : > { %v6737_v42 = vmax.f32 %v6673_v30, %v6729_v3 }
 0x6d4   : > { %v6764_v61 = vcombine.low %v6750_v22, %v6751_v9  ;;  %v6779_v13 = vrot.slane %v6763_v39, %v13505_v63  ;;  %v6752_v1 = vmul.f32 0.25, %v6744_v40 }
 0x6d5   : > { %v6745_v28 = vadd.f32 %v6737_v42, %v13109_v34 }
 0x6d6   : > { %v6794_v53 = vcombine.low %v6772_v55, %v6779_v13  ;;  %v6786_v56 = vrot.slane %v6764_v61, %v13505_v63 }
 0x6d7   : > { %v6753_v16 = vmul.f32 0.25, %v6745_v28 }
 0x6d8   : > { %v6802_v50 = vrot.slane %v6794_v53, %v13505_v63 }
 0x6d9   : > { %v6765_v5 = vcombine.low %v6752_v1, %v6753_v16 }
 0x6db   : > { %v6793_v52 = vrot.slane %v6765_v5, %v13505_v63 }
 0x6dd   : > { %v6795_v2 = vcombine.low %v6786_v56, %v6793_v52 }
 0x6df   : > { %v6809_v10 = vrot.slane %v6795_v2, %v13505_v63 }
 0x6e1   : > { %v6810_v31 = vcombine.low %v6802_v50, %v6809_v10 }
 0x6e3   : > { %6945 = vst [vmem:[%s9835_s5 + $0x1] ss:$2 sm:$0xff] %v6810_v31 }
 0x6e4 PF: > { %s6952_s15 = sshll.u32 %s9597_s16, 8  ;;  %s6829_s22 = sshll.u32 %s9835_s5, 4  ;;  %s6830_s22 = int_to_ptr.vmem [resolvable:$true] %s6829_s22 }
 0x6e5   : > { %s13200_s24 = scalar_lea.hbm %s13261_s2, %s6952_s15  ;;  %s6815_s0 = scalar_lea.sflag [#allocation5], %s191_s9 }
 0x6e6   : > { %s9483_s28 = scalar_lea.vmem %s6830_s22, 256  ;;  %p13506_p3 = scmp.ne.s32.totalorder %s13348_s27, 0 }
 0x6e7   : > { %p9484_p2 = scmp.ne.s32.totalorder %s6830_s22, %s9483_s28  ;;  %s9620_s20 = smov [#allocation8]  }
 0x6e8   : > { %s9487_s6 = sshll.u32 %s9620_s20, 4  ;;  %s9488_s6 = int_to_ptr.vmem [resolvable:$false] %s9487_s6 }
 0x6e9   : > { %p9485_p6 = pnand %p9484_p2, %p13506_p3  ;;  %s9489_s7 = scalar_lea.vmem %s9488_s6, 512 }
 0x6ea   : > { %p9490_p12 = scmp.lt.s32.totalorder %s6830_s22, %s9488_s6  ;;  %p9491_p0 = scmp.lt.s32.totalorder %s9489_s7, %s9483_s28 }
 0x6eb   : > { %p9486_p10 = pneg %p9485_p6 }
 0x6ec   : > { %p9492_p8 = por %p9491_p0, %p9490_p12 }
 0x6ee   : > { %p9493_p11 = pnand %p9492_p8, %p9486_p10 }
 0x6f0   : > { %9496 = shalt.err (!%p9493_p11)
}
 0x6f1   : > { %s9497_s16 = scalar_lea.hbm %s13200_s24, 256  ;;  %s9501_s29 = scalar_lea.hbm %s13261_s2, 1024 }
 0x6f2   : > { %p9498_p13 = scmp.ne.s32.totalorder %s13200_s24, %s9497_s16  ;;  %p9502_p1 = scmp.lt.u32.totalorder %s13200_s24, %s13261_s2 }
 0x6f3   : > { %p9503_p5 = scmp.lt.u32.totalorder %s9501_s29, %s9497_s16  ;;  %p9505_p2 = scmp.lt.u32.totalorder %s9497_s16, %s13200_s24 }
 0x6f4   : > { %p9499_p7 = pnand %p9498_p13, %p13506_p3 }
 0x6f5   : > { %p9504_p4 = por %p9503_p5, %p9502_p1 }
 0x6f6   : > { %p9500_p9 = pneg %p9499_p7 }
 0x6f7   : > { %p9506_p6 = por %p9505_p2, %p9504_p4 }
 0x6f9   : > { %p9507_p10 = pnand %p9506_p6, %p9500_p9 }
 0x6fb   : > { %9510 = shalt.err (!%p9507_p10)
}
 0x6fc   : > { %9231 = dma.vmem_to_hbm [thread:$0]  (%p13506_p3), %s6830_s22, 256, %s13200_s24, %s6815_s0  }
 0x6fd PF: > { %s13507_s26 = sld [smem:[#allocation12_spill]]  ;;  %s13508_s21 = sld [smem:[#allocation13_spill]] }
 0x6fe   : > { %p9248_p12 = scmp.ge.s32.totalorder %s9609_s19, 2 }
 0x703   : > { %s6841_s3 = sand.u32 1, %s13507_s26   ;;  %p13509_p0 = scmp.ne.s32.totalorder %s13508_s21, 0 }
 0x704   : > { %s6842_s15 = scalar_lea.sflag [#allocation5], %s6841_s3 }
 0x705   : > { %p9242_p8 = pnand %p9248_p12, %p13509_p0 }
 0x707   : > { %9564 = dma.done.wait (!%p9242_p8), %s6842_s15, 256  }
 0x708   : > { %9566 = vsyncadd (!%p9242_p8), %s6842_s15, 4294967040  ;;  %s19_s19 = sadd.s32 1, %s9609_s19   ;;  %s13510_s27 = sld [smem:[#allocation14_spill]] }
 0x709   : > { %p16_p11 = scmp.ge.s32.totalorder %s19_s19, 38   ;;  %s13511_s25 = sld [smem:[#allocation15_spill]] }
 0x70a   : > { %s13512_s9 = smov %s9573_s10  ;;  %s13513_s10 = smov %s9577_s11 }
 0x70b   : > { %s13514_s11 = smov %s9784_s8  ;;  %s13515_s12 = smov %s9585_s13 }
 0x70c   : > { %s13516_s13 = smov %s9589_s14  ;;  %s13517_s14 = smov %s9789_s4 }
 0x70d   : > { %s13518_s15 = smov %s9601_s17  ;;  %s13519_s16 = smov %s9605_s18 }
 0x70e   : > { %s13520_s17 = smov %s13510_s27  ;;  %18 = sbr.rel (!%p16_p11) target bundleno = 12 (0xc), region = 88 }
 0x70f   : > { %s13521_s18 = smov %s13511_s25 }
 0x715   :  { %6847 = vsyncpa [#allocation4], 1 }
 0x716   :  { %6849 = vsyncpa [#allocation4 + $0x1], 1 }
 0x717   :  { %6850 = vsyncpa [#allocation7], 1 }
 0x718   :  { %6852 = vsyncpa [#allocation7 + $0x1], 1 }
 0x719   :  { %6853 = vsyncpa [#allocation5], 1 }
 0x71a   :  { %6855 = vsyncpa [#allocation5 + $0x1], 1 }

</bundles_post_ra>
